<compile_context>
chip_gen: v7x
topology: tpu7x:2x2x1
jax: 0.10.0
libtpu: 0.0.40
codegen_flags: <defaults>
</compile_context>

<pallas_src>
import functools

import jax
import jax.numpy as jnp
from jax.experimental import pallas as pl
from jax.experimental.pallas import tpu as pltpu

# ---- model dims ----
D_IN = 64          # dim_dnn[0]  (encoder input / decoder output)
D_LAT = 32         # dim_dnn[-1] == QuantArgs.dim (quantized latent)
K = 64             # codebook_size
NQ = 3             # num_quantizers

# ---- kernel config ----
MAX_TB = 512       # max batch rows per grid step (sweep 512-1024 on v6e/v7x)
LOSS_LANES = 128   # lane-dense width of the per-tile commit-loss row
MXU_DTYPE = jnp.bfloat16   # MXU operand dtype; accumulation stays float32


def rq_autoencoder_kernel(x_ref, w_enc_ref, cb_ref, cb_t_ref, w_dec_ref, consts_ref,
                          y_ref, idx_ref, loss_ref, *, batch, tb):
    x = x_ref[...]                                               # (TB, D_IN) f32
    consts = consts_ref[...]                                     # (8, 128)   f32
    b_enc = consts[0:1, :D_LAT]                                  # (1, D_LAT)
    b_dec = consts[1:2, :D_IN]                                   # (1, D_IN)

    # Valid-row mask (only needed when the last batch tile is padded).
    if batch % tb:
        row = jax.lax.broadcasted_iota(jnp.int32, (tb, 1), 0) + pl.program_id(0) * tb
        valid = (row < batch).astype(jnp.float32)                # (TB, 1)
    else:
        valid = None

    # ---- encoder: single Linear (trailing ReLU is popped in __init__) ----
    h = jnp.dot(x.astype(MXU_DTYPE), w_enc_ref[...],
                preferred_element_type=jnp.float32) + b_enc      # (TB, D_LAT) f32

    # ---- ResidualVQ: NQ sequential nearest-codebook quantizers ----
    residual = h
    k_iota = jax.lax.broadcasted_iota(jnp.int32, (tb, K), 1)     # (TB, K)
    idx_cols = []
    loss_vals = []
    for q in range(NQ):                                          # static unrolled loop
        cb = cb_ref[q]                                           # (K, D_LAT) f32 (exact codewords)
        cb_t = cb_t_ref[q]                                       # (D_LAT, K) bf16, pre-scaled by -2
        c_sq = consts[2 + q:3 + q, :K]                           # (1, K) f32 (precomputed ||c||^2)

        # argmin_k ||r - c_k||^2 == argmin_k (||c_k||^2 - 2 r.c_k); ||r||^2 dropped,
        # -2 folded into cb_t at prepare time (exact power-of-two scale).
        cross = jnp.dot(residual.astype(MXU_DTYPE), cb_t,
                        preferred_element_type=jnp.float32)      # (TB, K) = -2 r.c
        dist = c_sq + cross                                      # (TB, K)

        # argmin with lowest-index tie-break (== torch.argmin)
        min_d = jnp.min(dist, axis=-1, keepdims=True)
        idx = jnp.min(jnp.where(dist == min_d, k_iota, K),
                      axis=-1, keepdims=True)                    # (TB, 1) int32
        idx_cols.append(idx)

        # gather the selected codewords via one-hot matmul, kept in f32 for exactness
        # TODO(synk): f32 one-hot gather lowers to multiple bf16 MXU passes; acceptable
        # while the kernel stays memory-bound (bf16 hi/lo split is the follow-up).
        one_hot = (k_iota == idx).astype(jnp.float32)            # (TB, K)
        quantized = jnp.dot(one_hot, cb,
                            preferred_element_type=jnp.float32)  # (TB, D_LAT)

        # commitment-loss partial sum for this tile (divide by B*D_LAT in wrapper)
        diff = quantized - residual
        if valid is not None:
            diff = diff * valid
        loss_vals.append(jnp.sum(diff * diff, axis=(0, 1), keepdims=True))  # (1, 1)

        residual = residual - quantized

    # ---- packed indices: one int32 per row (idx0 | idx1<<8 | idx2<<16) ----
    packed = idx_cols[0]
    for q in range(1, NQ):
        packed = packed | (idx_cols[q] << (8 * q))
    idx_ref[...] = packed                                        # (TB, 1) int32, 4 B/row

    # ---- lane-dense per-tile loss partials (lanes 0..NQ-1, rest zero) ----
    loss_lanes = jax.lax.broadcasted_iota(jnp.int32, (1, LOSS_LANES), 1)
    loss_row = jnp.zeros((1, LOSS_LANES), jnp.float32)
    for q in range(NQ):
        loss_row = jnp.where(loss_lanes == q, loss_vals[q], loss_row)
    loss_ref[0] = loss_row                                       # (1, LOSS_LANES)

    # ---- decoder: single Linear; input = sum of quantized codes = h - residual ----
    quant_out = h - residual
    y_ref[...] = jnp.dot(quant_out.astype(MXU_DTYPE), w_dec_ref[...],
                         preferred_element_type=jnp.float32) + b_dec


def prepare_params(w_enc, b_enc, codebooks, w_dec, b_dec):
    """One-time (load-time) conversion of torch-layout params to kernel layout."""
    cb = codebooks.astype(jnp.float32)                                  # (NQ, K, D_LAT)
    consts = jnp.zeros((8, 128), jnp.float32)
    consts = consts.at[0, :D_LAT].set(b_enc.astype(jnp.float32))
    consts = consts.at[1, :D_IN].set(b_dec.astype(jnp.float32))
    consts = consts.at[2:2 + NQ, :K].set(jnp.sum(cb * cb, axis=-1))     # ||c||^2
    return dict(
        w_enc_t=jnp.transpose(w_enc).astype(MXU_DTYPE),                 # (D_IN, D_LAT)
        cb=cb,                                                          # exact codewords
        cb_t=(-2.0 * jnp.transpose(cb, (0, 2, 1))).astype(MXU_DTYPE),   # (NQ, D_LAT, K), -2 folded
        w_dec_t=jnp.transpose(w_dec).astype(MXU_DTYPE),                 # (D_LAT, D_IN)
        consts=consts,                                                  # b_enc / b_dec / ||c||^2
    )


def _full_spec(shape):
    return pl.BlockSpec(shape, lambda i, _s=shape: (0,) * len(_s))


def _pick_tb(batch):
    # Biggest tile up to MAX_TB that still leaves >= 2 tiles (v7x has 2 TensorCores
    # sharing the "parallel" grid axis); tiny batches fall back to 128.
    for tb in (MAX_TB, 256, 128):
        if batch >= 2 * tb:
            return tb
    return 128


@jax.jit
def rq_autoencoder_fwd(x, params):
    """Matches RQAutoEncoder.forward: returns (x_rec, indices, commit_loss)."""
    batch = x.shape[0]
    tb = _pick_tb(batch)
    num_tiles = pl.cdiv(batch, tb)
    b_pad = num_tiles * tb
    x_pad = jnp.pad(x, ((0, b_pad - batch), (0, 0))) if b_pad != batch else x

    kernel = functools.partial(rq_autoencoder_kernel, batch=batch, tb=tb)

    y_pad, idx_packed, loss_part = pl.pallas_call(
        kernel,
        grid=(num_tiles,),
        out_shape=(
            jax.ShapeDtypeStruct((b_pad, D_IN), jnp.float32),           # reconstruction
            jax.ShapeDtypeStruct((b_pad, 1), jnp.int32),                # packed indices (4 B/row)
            jax.ShapeDtypeStruct((num_tiles, 1, LOSS_LANES), jnp.float32),  # loss partials
        ),
        in_specs=[
            pl.BlockSpec((tb, D_IN), lambda i: (i, 0)),                 # x: tiled over batch
            _full_spec((D_IN, D_LAT)),                                  # w_enc_t (bf16)
            _full_spec((NQ, K, D_LAT)),                                 # codebooks (f32)
            _full_spec((NQ, D_LAT, K)),                                 # -2 * codebooks^T (bf16)
            _full_spec((D_LAT, D_IN)),                                  # w_dec_t (bf16)
            _full_spec((8, 128)),                                       # consts: b_enc/b_dec/||c||^2
        ],
        out_specs=(
            pl.BlockSpec((tb, D_IN), lambda i: (i, 0)),
            pl.BlockSpec((tb, 1), lambda i: (i, 0)),
            pl.BlockSpec((1, 1, LOSS_LANES), lambda i: (i, 0, 0)),
        ),
        compiler_params=pltpu.CompilerParams(
            dimension_semantics=("parallel",)),                         # megacore-friendly on v7x
    )(x_pad, params["w_enc_t"], params["cb"], params["cb_t"], params["w_dec_t"],
      params["consts"])

    y = y_pad[:batch]
    packed = idx_packed[:batch, 0]
    shifts = 8 * jnp.arange(NQ, dtype=jnp.int32)
    idx = ((packed[:, None] >> shifts) & 0xFF).astype(jnp.int32)        # (batch, NQ)
    commit_loss = jnp.sum(loss_part[:, 0, :NQ], axis=0) / (batch * D_LAT)  # (NQ,)
    return y, idx, commit_loss


def reference_fwd(x, w_enc, b_enc, codebooks, w_dec, b_dec):
    """Pure-JAX reference mirroring the kernel math (bf16 MXU operands, f32 accum)."""
    w_enc_t = jnp.transpose(w_enc).astype(MXU_DTYPE)
    w_dec_t = jnp.transpose(w_dec).astype(MXU_DTYPE)
    h = jnp.dot(x.astype(MXU_DTYPE), w_enc_t,
                preferred_element_type=jnp.float32) + b_enc
    residual = h
    idxs, losses = [], []
    for q in range(NQ):
        cb = codebooks[q]
        cb_t_scaled = (-2.0 * jnp.transpose(cb)).astype(MXU_DTYPE)
        c_sq = jnp.sum(cb * cb, axis=-1)[None, :]
        cross = jnp.dot(residual.astype(MXU_DTYPE), cb_t_scaled,
                        preferred_element_type=jnp.float32)
        dist = c_sq + cross
        i = jnp.argmin(dist, axis=-1)
        quant = cb[i]
        losses.append(jnp.mean((quant - residual) ** 2))
        residual = residual - quant
        idxs.append(i)
    qout = h - residual
    y = jnp.dot(qout.astype(MXU_DTYPE), w_dec_t,
                preferred_element_type=jnp.float32) + b_dec
    return y, jnp.stack(idxs, axis=-1).astype(jnp.int32), jnp.stack(losses)


if __name__ == "__main__":
    key = jax.random.PRNGKey(0)
    ks = jax.random.split(key, 6)
    B = 640   # spans multiple batch tiles AND exercises the padded-tail path
    x = jax.random.normal(ks[0], (B, D_IN), jnp.float32)

    # deterministic synthetic parameters (torch Linear layout: weight (out, in))
    w_enc = jax.random.normal(ks[1], (D_LAT, D_IN), jnp.float32) / jnp.sqrt(D_IN)
    b_enc = jax.random.normal(ks[2], (D_LAT,), jnp.float32) * 0.01
    w_dec = jax.random.normal(ks[3], (D_IN, D_LAT), jnp.float32) / jnp.sqrt(D_LAT)
    b_dec = jax.random.normal(ks[4], (D_IN,), jnp.float32) * 0.01
    # TODO(synk): kmeans_init / stochastic code sampling of the codebooks are
    # training/init-time behaviors; deterministic random codebooks are used here.
    codebooks = jax.random.normal(ks[5], (NQ, K, D_LAT), jnp.float32)

    params = prepare_params(w_enc, b_enc, codebooks, w_dec, b_dec)
    y, idx, loss = rq_autoencoder_fwd(x, params)
    jax.block_until_ready((y, idx, loss))

    y_ref, idx_ref, loss_ref = reference_fwd(x, w_enc, b_enc, codebooks, w_dec, b_dec)
    assert y.shape == (B, D_IN) and idx.shape == (B, NQ) and loss.shape == (NQ,)
    assert jnp.allclose(y, y_ref, atol=1e-3, rtol=1e-3), "reconstruction mismatch"
    assert jnp.array_equal(idx, idx_ref), "indices mismatch"
    assert jnp.allclose(loss, loss_ref, atol=1e-4, rtol=1e-3), "commit loss mismatch"

    print("KERNEL_OK")
</pallas_src>

<mosaic_0001>
module attributes {stable_mosaic.version = 11 : i64} {
  func.func @rq_autoencoder_kernel(%arg0: i32, %arg1: memref<256x64xf32, #tpu.memory_space<vmem>>, %arg2: memref<64x32xbf16, #tpu.memory_space<vmem>>, %arg3: memref<3x64x32xf32, #tpu.memory_space<vmem>>, %arg4: memref<3x32x64xbf16, #tpu.memory_space<vmem>>, %arg5: memref<32x64xbf16, #tpu.memory_space<vmem>>, %arg6: memref<8x128xf32, #tpu.memory_space<vmem>>, %arg7: memref<256x64xf32, #tpu.memory_space<vmem>>, %arg8: memref<256x1xi32, #tpu.memory_space<vmem>>, %arg9: memref<1x1x128xf32, #tpu.memory_space<vmem>>) attributes {dimension_semantics = [#tpu.dimension_semantics<parallel>], iteration_bounds = array<i64: 3>, scalar_prefetch = 0 : i64, scratch_operands = 0 : i64, tpu.core_type = #tpu.core_type<tc>, window_params = [{transform_indices = @transform_0, window_bounds = array<i64: 256, 64>}, {pipeline_mode = #tpu.pipeline_mode<synchronous>, transform_indices = @transform_1, window_bounds = array<i64: 64, 32>}, {pipeline_mode = #tpu.pipeline_mode<synchronous>, transform_indices = @transform_2, window_bounds = array<i64: 3, 64, 32>}, {pipeline_mode = #tpu.pipeline_mode<synchronous>, transform_indices = @transform_3, window_bounds = array<i64: 3, 32, 64>}, {pipeline_mode = #tpu.pipeline_mode<synchronous>, transform_indices = @transform_4, window_bounds = array<i64: 32, 64>}, {pipeline_mode = #tpu.pipeline_mode<synchronous>, transform_indices = @transform_5, window_bounds = array<i64: 8, 128>}, {transform_indices = @transform_6, window_bounds = array<i64: 256, 64>}, {transform_indices = @transform_7, window_bounds = array<i64: 256, 1>}, {transform_indices = @transform_8, window_bounds = array<i64: 1, 1, 128>}]} {
    %c0 = arith.constant 0 : index
    %c0_0 = arith.constant 0 : index
    %0 = vector.load %arg1[%c0, %c0_0] : memref<256x64xf32, #tpu.memory_space<vmem>>, vector<256x64xf32>
    %c0_1 = arith.constant 0 : index
    %c0_2 = arith.constant 0 : index
    %1 = vector.load %arg6[%c0_1, %c0_2] : memref<8x128xf32, #tpu.memory_space<vmem>>, vector<8x128xf32>
    %2 = vector.extract_strided_slice %1 {offsets = [0, 0], sizes = [1, 32], strides = [1, 1]} : vector<8x128xf32> to vector<1x32xf32>
    %3 = vector.extract_strided_slice %1 {offsets = [1, 0], sizes = [1, 64], strides = [1, 1]} : vector<8x128xf32> to vector<1x64xf32>
    %4 = tpu.iota {dimensions = array<i32: 0>} : vector<256x1xi32>
    %c256_i32 = arith.constant 256 : i32
    %5 = arith.muli %arg0, %c256_i32 : i32
    %6 = vector.broadcast %5 : i32 to vector<256x1xi32>
    %7 = arith.addi %4, %6 : vector<256x1xi32>
    %c640_i32 = arith.constant 640 : i32
    %8 = vector.broadcast %c640_i32 : i32 to vector<256x1xi32>
    %9 = arith.cmpi slt, %7, %8 : vector<256x1xi32>
    %10 = arith.extui %9 : vector<256x1xi1> to vector<256x1xi32>
    %11 = arith.sitofp %10 : vector<256x1xi32> to vector<256x1xf32>
    %12 = arith.truncf %0 : vector<256x64xf32> to vector<256x64xbf16>
    %c0_3 = arith.constant 0 : index
    %c0_4 = arith.constant 0 : index
    %13 = vector.load %arg2[%c0_3, %c0_4] : memref<64x32xbf16, #tpu.memory_space<vmem>>, vector<64x32xbf16>
    %cst = arith.constant dense<0.000000e+00> : vector<256x32xf32>
    %14 = tpu.matmul %12, %13, %cst {dimension_numbers = #tpu.dot_dimension_numbers<[1], [0], [0], [1], [0, 0, 1, 1], [], []>} : vector<256x64xbf16>, vector<64x32xbf16>, vector<256x32xf32> -> vector<256x32xf32>
    %15 = vector.broadcast %2 : vector<1x32xf32> to vector<256x32xf32>
    %16 = arith.addf %14, %15 : vector<256x32xf32>
    %17 = tpu.iota {dimensions = array<i32: 1>} : vector<256x64xi32>
    %c0_5 = arith.constant 0 : index
    %c0_6 = arith.constant 0 : index
    %c0_7 = arith.constant 0 : index
    %18 = vector.load %arg3[%c0_5, %c0_6, %c0_7] : memref<3x64x32xf32, #tpu.memory_space<vmem>>, vector<1x64x32xf32>
    %19 = vector.shape_cast %18 : vector<1x64x32xf32> to vector<64x32xf32>
    %c0_8 = arith.constant 0 : index
    %c0_9 = arith.constant 0 : index
    %c0_10 = arith.constant 0 : index
    %20 = vector.load %arg4[%c0_8, %c0_9, %c0_10] : memref<3x32x64xbf16, #tpu.memory_space<vmem>>, vector<1x32x64xbf16>
    %21 = vector.shape_cast %20 : vector<1x32x64xbf16> to vector<32x64xbf16>
    %22 = vector.extract_strided_slice %1 {offsets = [2, 0], sizes = [1, 64], strides = [1, 1]} : vector<8x128xf32> to vector<1x64xf32>
    %23 = arith.truncf %16 : vector<256x32xf32> to vector<256x32xbf16>
    %cst_11 = arith.constant dense<0.000000e+00> : vector<256x64xf32>
    %24 = tpu.matmul %23, %21, %cst_11 {dimension_numbers = #tpu.dot_dimension_numbers<[1], [0], [0], [1], [0, 0, 1, 1], [], []>} : vector<256x32xbf16>, vector<32x64xbf16>, vector<256x64xf32> -> vector<256x64xf32>
    %25 = vector.broadcast %22 : vector<1x64xf32> to vector<256x64xf32>
    %26 = arith.addf %25, %24 : vector<256x64xf32>
    %cst_12 = arith.constant dense<0x7F800000> : vector<256xf32>
    %27 = vector.multi_reduction <minimumf>, %26, %cst_12 [1] : vector<256x64xf32> to vector<256xf32>
    %28 = vector.shape_cast %27 : vector<256xf32> to vector<256x1xf32>
    %29 = vector.broadcast %28 : vector<256x1xf32> to vector<256x64xf32>
    %30 = arith.cmpf oeq, %26, %29 : vector<256x64xf32>
    %c64_i32 = arith.constant 64 : i32
    %31 = vector.broadcast %c64_i32 : i32 to vector<256x64xi32>
    %32 = arith.select %30, %17, %31 : vector<256x64xi1>, vector<256x64xi32>
    %cst_13 = arith.constant dense<2147483647> : vector<256xi32>
    %33 = vector.multi_reduction <minsi>, %32, %cst_13 [1] : vector<256x64xi32> to vector<256xi32>
    %34 = vector.shape_cast %33 : vector<256xi32> to vector<256x1xi32>
    %35 = vector.broadcast %34 : vector<256x1xi32> to vector<256x64xi32>
    %36 = arith.cmpi eq, %17, %35 : vector<256x64xi32>
    %37 = arith.extui %36 : vector<256x64xi1> to vector<256x64xi32>
    %38 = arith.sitofp %37 : vector<256x64xi32> to vector<256x64xf32>
    %cst_14 = arith.constant dense<0.000000e+00> : vector<256x32xf32>
    %39 = tpu.matmul %38, %19, %cst_14 {dimension_numbers = #tpu.dot_dimension_numbers<[1], [0], [0], [1], [0, 0, 1, 1], [], []>} : vector<256x64xf32>, vector<64x32xf32>, vector<256x32xf32> -> vector<256x32xf32>
    %40 = arith.subf %39, %16 : vector<256x32xf32>
    %41 = vector.broadcast %11 : vector<256x1xf32> to vector<256x32xf32>
    %42 = arith.mulf %40, %41 : vector<256x32xf32>
    %43 = arith.mulf %42, %42 : vector<256x32xf32>
    %44 = vector.shape_cast %43 : vector<256x32xf32> to vector<1x256x32xf32>
    %cst_15 = arith.constant dense<0.000000e+00> : vector<1xf32>
    %45 = vector.multi_reduction <add>, %44, %cst_15 [1, 2] : vector<1x256x32xf32> to vector<1xf32>
    %46 = vector.shape_cast %45 : vector<1xf32> to vector<1x1x1xf32>
    %47 = vector.extract %46[0, 0, 0] : f32 from vector<1x1x1xf32>
    %48 = vector.broadcast %47 : f32 to vector<1x1xf32>
    %49 = arith.subf %16, %39 : vector<256x32xf32>
    %c1 = arith.constant 1 : index
    %c0_16 = arith.constant 0 : index
    %c0_17 = arith.constant 0 : index
    %50 = vector.load %arg3[%c1, %c0_16, %c0_17] : memref<3x64x32xf32, #tpu.memory_space<vmem>>, vector<1x64x32xf32>
    %51 = vector.shape_cast %50 : vector<1x64x32xf32> to vector<64x32xf32>
    %c1_18 = arith.constant 1 : index
    %c0_19 = arith.constant 0 : index
    %c0_20 = arith.constant 0 : index
    %52 = vector.load %arg4[%c1_18, %c0_19, %c0_20] : memref<3x32x64xbf16, #tpu.memory_space<vmem>>, vector<1x32x64xbf16>
    %53 = vector.shape_cast %52 : vector<1x32x64xbf16> to vector<32x64xbf16>
    %54 = vector.extract_strided_slice %1 {offsets = [3, 0], sizes = [1, 64], strides = [1, 1]} : vector<8x128xf32> to vector<1x64xf32>
    %55 = arith.truncf %49 : vector<256x32xf32> to vector<256x32xbf16>
    %cst_21 = arith.constant dense<0.000000e+00> : vector<256x64xf32>
    %56 = tpu.matmul %55, %53, %cst_21 {dimension_numbers = #tpu.dot_dimension_numbers<[1], [0], [0], [1], [0, 0, 1, 1], [], []>} : vector<256x32xbf16>, vector<32x64xbf16>, vector<256x64xf32> -> vector<256x64xf32>
    %57 = vector.broadcast %54 : vector<1x64xf32> to vector<256x64xf32>
    %58 = arith.addf %57, %56 : vector<256x64xf32>
    %cst_22 = arith.constant dense<0x7F800000> : vector<256xf32>
    %59 = vector.multi_reduction <minimumf>, %58, %cst_22 [1] : vector<256x64xf32> to vector<256xf32>
    %60 = vector.shape_cast %59 : vector<256xf32> to vector<256x1xf32>
    %61 = vector.broadcast %60 : vector<256x1xf32> to vector<256x64xf32>
    %62 = arith.cmpf oeq, %58, %61 : vector<256x64xf32>
    %c64_i32_23 = arith.constant 64 : i32
    %63 = vector.broadcast %c64_i32_23 : i32 to vector<256x64xi32>
    %64 = arith.select %62, %17, %63 : vector<256x64xi1>, vector<256x64xi32>
    %cst_24 = arith.constant dense<2147483647> : vector<256xi32>
    %65 = vector.multi_reduction <minsi>, %64, %cst_24 [1] : vector<256x64xi32> to vector<256xi32>
    %66 = vector.shape_cast %65 : vector<256xi32> to vector<256x1xi32>
    %67 = vector.broadcast %66 : vector<256x1xi32> to vector<256x64xi32>
    %68 = arith.cmpi eq, %17, %67 : vector<256x64xi32>
    %69 = arith.extui %68 : vector<256x64xi1> to vector<256x64xi32>
    %70 = arith.sitofp %69 : vector<256x64xi32> to vector<256x64xf32>
    %cst_25 = arith.constant dense<0.000000e+00> : vector<256x32xf32>
    %71 = tpu.matmul %70, %51, %cst_25 {dimension_numbers = #tpu.dot_dimension_numbers<[1], [0], [0], [1], [0, 0, 1, 1], [], []>} : vector<256x64xf32>, vector<64x32xf32>, vector<256x32xf32> -> vector<256x32xf32>
    %72 = arith.subf %71, %49 : vector<256x32xf32>
    %73 = vector.broadcast %11 : vector<256x1xf32> to vector<256x32xf32>
    %74 = arith.mulf %72, %73 : vector<256x32xf32>
    %75 = arith.mulf %74, %74 : vector<256x32xf32>
    %76 = vector.shape_cast %75 : vector<256x32xf32> to vector<1x256x32xf32>
    %cst_26 = arith.constant dense<0.000000e+00> : vector<1xf32>
    %77 = vector.multi_reduction <add>, %76, %cst_26 [1, 2] : vector<1x256x32xf32> to vector<1xf32>
    %78 = vector.shape_cast %77 : vector<1xf32> to vector<1x1x1xf32>
    %79 = vector.extract %78[0, 0, 0] : f32 from vector<1x1x1xf32>
    %80 = vector.broadcast %79 : f32 to vector<1x1xf32>
    %81 = arith.subf %49, %71 : vector<256x32xf32>
    %c2 = arith.constant 2 : index
    %c0_27 = arith.constant 0 : index
    %c0_28 = arith.constant 0 : index
    %82 = vector.load %arg3[%c2, %c0_27, %c0_28] : memref<3x64x32xf32, #tpu.memory_space<vmem>>, vector<1x64x32xf32>
    %83 = vector.shape_cast %82 : vector<1x64x32xf32> to vector<64x32xf32>
    %c2_29 = arith.constant 2 : index
    %c0_30 = arith.constant 0 : index
    %c0_31 = arith.constant 0 : index
    %84 = vector.load %arg4[%c2_29, %c0_30, %c0_31] : memref<3x32x64xbf16, #tpu.memory_space<vmem>>, vector<1x32x64xbf16>
    %85 = vector.shape_cast %84 : vector<1x32x64xbf16> to vector<32x64xbf16>
    %86 = vector.extract_strided_slice %1 {offsets = [4, 0], sizes = [1, 64], strides = [1, 1]} : vector<8x128xf32> to vector<1x64xf32>
    %87 = arith.truncf %81 : vector<256x32xf32> to vector<256x32xbf16>
    %cst_32 = arith.constant dense<0.000000e+00> : vector<256x64xf32>
    %88 = tpu.matmul %87, %85, %cst_32 {dimension_numbers = #tpu.dot_dimension_numbers<[1], [0], [0], [1], [0, 0, 1, 1], [], []>} : vector<256x32xbf16>, vector<32x64xbf16>, vector<256x64xf32> -> vector<256x64xf32>
    %89 = vector.broadcast %86 : vector<1x64xf32> to vector<256x64xf32>
    %90 = arith.addf %89, %88 : vector<256x64xf32>
    %cst_33 = arith.constant dense<0x7F800000> : vector<256xf32>
    %91 = vector.multi_reduction <minimumf>, %90, %cst_33 [1] : vector<256x64xf32> to vector<256xf32>
    %92 = vector.shape_cast %91 : vector<256xf32> to vector<256x1xf32>
    %93 = vector.broadcast %92 : vector<256x1xf32> to vector<256x64xf32>
    %94 = arith.cmpf oeq, %90, %93 : vector<256x64xf32>
    %c64_i32_34 = arith.constant 64 : i32
    %95 = vector.broadcast %c64_i32_34 : i32 to vector<256x64xi32>
    %96 = arith.select %94, %17, %95 : vector<256x64xi1>, vector<256x64xi32>
    %cst_35 = arith.constant dense<2147483647> : vector<256xi32>
    %97 = vector.multi_reduction <minsi>, %96, %cst_35 [1] : vector<256x64xi32> to vector<256xi32>
    %98 = vector.shape_cast %97 : vector<256xi32> to vector<256x1xi32>
    %99 = vector.broadcast %98 : vector<256x1xi32> to vector<256x64xi32>
    %100 = arith.cmpi eq, %17, %99 : vector<256x64xi32>
    %101 = arith.extui %100 : vector<256x64xi1> to vector<256x64xi32>
    %102 = arith.sitofp %101 : vector<256x64xi32> to vector<256x64xf32>
    %cst_36 = arith.constant dense<0.000000e+00> : vector<256x32xf32>
    %103 = tpu.matmul %102, %83, %cst_36 {dimension_numbers = #tpu.dot_dimension_numbers<[1], [0], [0], [1], [0, 0, 1, 1], [], []>} : vector<256x64xf32>, vector<64x32xf32>, vector<256x32xf32> -> vector<256x32xf32>
    %104 = arith.subf %103, %81 : vector<256x32xf32>
    %105 = vector.broadcast %11 : vector<256x1xf32> to vector<256x32xf32>
    %106 = arith.mulf %104, %105 : vector<256x32xf32>
    %107 = arith.mulf %106, %106 : vector<256x32xf32>
    %108 = vector.shape_cast %107 : vector<256x32xf32> to vector<1x256x32xf32>
    %cst_37 = arith.constant dense<0.000000e+00> : vector<1xf32>
    %109 = vector.multi_reduction <add>, %108, %cst_37 [1, 2] : vector<1x256x32xf32> to vector<1xf32>
    %110 = vector.shape_cast %109 : vector<1xf32> to vector<1x1x1xf32>
    %111 = vector.extract %110[0, 0, 0] : f32 from vector<1x1x1xf32>
    %112 = vector.broadcast %111 : f32 to vector<1x1xf32>
    %113 = arith.subf %81, %103 : vector<256x32xf32>
    %c8_i32 = arith.constant 8 : i32
    %114 = vector.broadcast %c8_i32 : i32 to vector<256x1xi32>
    %115 = arith.shli %66, %114 : vector<256x1xi32>
    %116 = arith.ori %34, %115 : vector<256x1xi32>
    %c16_i32 = arith.constant 16 : i32
    %117 = vector.broadcast %c16_i32 : i32 to vector<256x1xi32>
    %118 = arith.shli %98, %117 : vector<256x1xi32>
    %119 = arith.ori %116, %118 : vector<256x1xi32>
    %c0_38 = arith.constant 0 : index
    %c0_39 = arith.constant 0 : index
    %120 = vector.load %arg8[%c0_38, %c0_39] : memref<256x1xi32, #tpu.memory_space<vmem>>, vector<256x1xi32>
    tpu.vector_store %arg8[%c0_38, %c0_39], %119 {strides = array<i32>} : memref<256x1xi32, #tpu.memory_space<vmem>>, vector<256x1xi32>,
    %121 = tpu.iota {dimensions = array<i32: 1>} : vector<1x128xi32>
    %cst_40 = arith.constant 0.000000e+00 : f32
    %122 = vector.broadcast %cst_40 : f32 to vector<1x128xf32>
    %c0_i32 = arith.constant 0 : i32
    %123 = vector.broadcast %c0_i32 : i32 to vector<1x128xi32>
    %124 = arith.cmpi eq, %121, %123 : vector<1x128xi32>
    %125 = vector.shape_cast %48 : vector<1x1xf32> to vector<1x1xf32>
    %126 = vector.broadcast %125 : vector<1x1xf32> to vector<1x128xf32>
    %127 = arith.select %124, %126, %122 : vector<1x128xi1>, vector<1x128xf32>
    %c1_i32 = arith.constant 1 : i32
    %128 = vector.broadcast %c1_i32 : i32 to vector<1x128xi32>
    %129 = arith.cmpi eq, %121, %128 : vector<1x128xi32>
    %130 = vector.shape_cast %80 : vector<1x1xf32> to vector<1x1xf32>
    %131 = vector.broadcast %130 : vector<1x1xf32> to vector<1x128xf32>
    %132 = arith.select %129, %131, %127 : vector<1x128xi1>, vector<1x128xf32>
    %c2_i32 = arith.constant 2 : i32
    %133 = vector.broadcast %c2_i32 : i32 to vector<1x128xi32>
    %134 = arith.cmpi eq, %121, %133 : vector<1x128xi32>
    %135 = vector.shape_cast %112 : vector<1x1xf32> to vector<1x1xf32>
    %136 = vector.broadcast %135 : vector<1x1xf32> to vector<1x128xf32>
    %137 = arith.select %134, %136, %132 : vector<1x128xi1>, vector<1x128xf32>
    %c0_41 = arith.constant 0 : index
    %c0_42 = arith.constant 0 : index
    %c0_43 = arith.constant 0 : index
    %138 = vector.load %arg9[%c0_41, %c0_42, %c0_43] : memref<1x1x128xf32, #tpu.memory_space<vmem>>, vector<1x1x128xf32>
    %139 = vector.shape_cast %138 : vector<1x1x128xf32> to vector<1x128xf32>
    %140 = vector.shape_cast %137 : vector<1x128xf32> to vector<1x1x128xf32>
    tpu.vector_store %arg9[%c0_41, %c0_42, %c0_43], %140 {strides = array<i32>} : memref<1x1x128xf32, #tpu.memory_space<vmem>>, vector<1x1x128xf32>,
    %141 = arith.subf %16, %113 : vector<256x32xf32>
    %142 = arith.truncf %141 : vector<256x32xf32> to vector<256x32xbf16>
    %c0_44 = arith.constant 0 : index
    %c0_45 = arith.constant 0 : index
    %143 = vector.load %arg5[%c0_44, %c0_45] : memref<32x64xbf16, #tpu.memory_space<vmem>>, vector<32x64xbf16>
    %cst_46 = arith.constant dense<0.000000e+00> : vector<256x64xf32>
    %144 = tpu.matmul %142, %143, %cst_46 {dimension_numbers = #tpu.dot_dimension_numbers<[1], [0], [0], [1], [0, 0, 1, 1], [], []>} : vector<256x32xbf16>, vector<32x64xbf16>, vector<256x64xf32> -> vector<256x64xf32>
    %145 = vector.broadcast %3 : vector<1x64xf32> to vector<256x64xf32>
    %146 = arith.addf %144, %145 : vector<256x64xf32>
    %c0_47 = arith.constant 0 : index
    %c0_48 = arith.constant 0 : index
    %147 = vector.load %arg7[%c0_47, %c0_48] : memref<256x64xf32, #tpu.memory_space<vmem>>, vector<256x64xf32>
    tpu.vector_store %arg7[%c0_47, %c0_48], %146 {strides = array<i32>} : memref<256x64xf32, #tpu.memory_space<vmem>>, vector<256x64xf32>,
    return
  }
  func.func @transform_0(%arg0: i32) -> (i32, i32) {
    %c0_i32 = arith.constant 0 : i32
    %c0_i32_0 = arith.constant 0 : i32
    return %arg0, %c0_i32 : i32, i32
  }
  func.func @transform_1(%arg0: i32) -> (i32, i32) {
    %c0_i32 = arith.constant 0 : i32
    %c0_i32_0 = arith.constant 0 : i32
    %c0_i32_1 = arith.constant 0 : i32
    return %c0_i32, %c0_i32_0 : i32, i32
  }
  func.func @transform_2(%arg0: i32) -> (i32, i32, i32) {
    %c0_i32 = arith.constant 0 : i32
    %c0_i32_0 = arith.constant 0 : i32
    %c0_i32_1 = arith.constant 0 : i32
    %c0_i32_2 = arith.constant 0 : i32
    return %c0_i32, %c0_i32_0, %c0_i32_1 : i32, i32, i32
  }
  func.func @transform_3(%arg0: i32) -> (i32, i32, i32) {
    %c0_i32 = arith.constant 0 : i32
    %c0_i32_0 = arith.constant 0 : i32
    %c0_i32_1 = arith.constant 0 : i32
    %c0_i32_2 = arith.constant 0 : i32
    return %c0_i32, %c0_i32_0, %c0_i32_1 : i32, i32, i32
  }
  func.func @transform_4(%arg0: i32) -> (i32, i32) {
    %c0_i32 = arith.constant 0 : i32
    %c0_i32_0 = arith.constant 0 : i32
    %c0_i32_1 = arith.constant 0 : i32
    return %c0_i32, %c0_i32_0 : i32, i32
  }
  func.func @transform_5(%arg0: i32) -> (i32, i32) {
    %c0_i32 = arith.constant 0 : i32
    %c0_i32_0 = arith.constant 0 : i32
    %c0_i32_1 = arith.constant 0 : i32
    return %c0_i32, %c0_i32_0 : i32, i32
  }
  func.func @transform_6(%arg0: i32) -> (i32, i32) {
    %c0_i32 = arith.constant 0 : i32
    %c0_i32_0 = arith.constant 0 : i32
    return %arg0, %c0_i32 : i32, i32
  }
  func.func @transform_7(%arg0: i32) -> (i32, i32) {
    %c0_i32 = arith.constant 0 : i32
    %c0_i32_0 = arith.constant 0 : i32
    return %arg0, %c0_i32 : i32, i32
  }
  func.func @transform_8(%arg0: i32) -> (i32, i32, i32) {
    %c0_i32 = arith.constant 0 : i32
    %c0_i32_0 = arith.constant 0 : i32
    %c0_i32_1 = arith.constant 0 : i32
    return %arg0, %c0_i32, %c0_i32_0 : i32, i32, i32
  }
}

</mosaic_0001>

<bundles_post_ra>
// kernel: rq_autoencoder_fwd.1
= control target key start
LH: loop header
LB: loop body
LE: loop exit
PB: predicated region body
PF: predicated region fallthrough
CT: control target
= control target key end

     0   :  { %s7092_s27 = smov 0   ;;  %s11025_s0 = inlined_call_operand.vmem [shape: f32[768,64], index: 0, kind: input, shape index: {}]   ;;  %s11026_s1 = inlined_call_operand.vmem [shape: bf16[64,32], index: 1, kind: input, shape index: {}]   ;;  %s11027_s2 = inlined_call_operand.vmem [shape: f32[3,64,32], index: 2, kind: input, shape index: {}]   ;;  %s11028_s3 = inlined_call_operand.vmem [shape: bf16[3,32,64], index: 3, kind: input, shape index: {}]   ;;  %s11029_s4 = inlined_call_operand.vmem [shape: bf16[32,64], index: 4, kind: input, shape index: {}]   ;;  %s11030_s5 = inlined_call_operand.vmem [shape: f32[8,128], index: 5, kind: input, shape index: {}]   ;;  %s11031_s6 = inlined_call_operand.vmem [shape: f32[768,64], index: 6, kind: output, shape index: {0}]   ;;  %s11032_s7 = inlined_call_operand.vmem [shape: s32[768,1], index: 7, kind: output, shape index: {1}]   ;;  %s11033_s8 = inlined_call_operand.vmem [shape: f32[3,1,128], index: 8, kind: output, shape index: {2}]  }
   0x1 LB: > { %s7098_s28 = sadd.s32 4294967295, %s7044_s27   ;;  %p6022_p0 = scmp.ge.s32.totalorder %s7044_s27, 1  ;;  %s7044_s27 = sphi %s7092_s27, %s19_s27  }
   0x2   : > { %p268_p1 = scmp.lt.s32.totalorder %s7044_s27, 4 }
   0x4   : > { %p269_p2 = pnand %p6022_p0, %p268_p1 }
   0x6   : > { %272 = sbr.rel (%p269_p2) target bundleno = 3171 (0xc63), region = 44 }
   0xd   : > { %v7023_v0 = vld [vmem:[%s11026_s1] sm:$0xff]   ;;  %s6023_s9 = sshll.u32 %s7098_s28, 5  ;;  %v7024_v1 = vld [vmem:[%s11026_s1 + $0x8] sm:$0xff]   ;;  %v7025_v2 = vld [vmem:[%s11026_s1 + $0x10] sm:$0xff]   ;;  %vm580_vm0 = vcmask 523264   ;;  %v11034_v54 = vlaneseq  ;;  %vm832_vm1 = vcmask 261120  }
   0xe   : > { %p311_p3 = scmp.lt.s32.totalorder %s6023_s9, 95  ;;  %6584 = vmatprep.subr.bf16.mxu0 %v7023_v0  ;;  %v7026_v5 = vld [vmem:[%s11026_s1 + $0x18] sm:$0xff]   ;;  %v7027_v52 = vld [vmem:[%s11028_s3] sm:$0xff]   ;;  %v7028_v53 = vld [vmem:[%s11028_s3 + $0x8] sm:$0xff]   ;;  %s6029_s29 = sshll.u32 %s7098_s28, 8 }
   0xf   : > { %6585 = vmatpush3.bf16.msra.mxu0 %v7023_v0  ;;  %6624 = vmatprep.subr.bf16.mxu1 %v7027_v52  ;;  %v7178_v55 = vshrl.u32 %v11034_v54, 7  ;;  %v7184_v57 = vld [vmem:[%s11030_s5] sm:$0xff]  ;;  %p328_p4 = scmp.lt.s32.totalorder %s7098_s28, 2 }
  0x10   : > { %s11999_s9 = smov (!%p311_p3, %s6023_s9), 95  ;;  %6586 = vmatprep.subr.bf16.mxu0 %v7024_v1  ;;  %6625 = vmatpush3.bf16.msra.mxu1 %v7027_v52 }
  0x11   : > { %s7112_s14 = sshll.u32 %s11999_s9, 3  ;;  %6626 = vmatprep.subr.bf16.mxu1 %v7028_v53  ;;  %11442 = vst [vmem:[#allocation2_spill] sm:$0xff] %v7178_v55  ;;  %v554_v56 = vsub.s32 0, %v7178_v55  ;;  %s12001_s28 = smov (!%p328_p4, %s7098_s28), 2 }
  0x12   : > { %s7118_s17 = scalar_lea.vmem %s11025_s0, %s7112_s14  ;;  %s10916_s22 = scalar_lea.vmem %s11031_s6, %s7112_s14 }
  0x13   : > { %6587 = vmatpush3.bf16.msra.mxu0 %v7024_v1  ;;  %v332_v3 = vld [vmem:[%s7118_s17] sm:$0xff]  ;;  %v333_v4 = vld [vmem:[%s7118_s17 + $0x8] sm:$0xff]  ;;  %v334_v7 = vld [vmem:[%s7118_s17 + $0x10] sm:$0xff]  ;;  %v7187_v58 = vrot.slane %v7184_v57, %v554_v56  ;;  %s330_s26 = scalar_lea.vmem %s11033_s8, %s12001_s28 }
  0x14   : > { %6588 = vmatprep.subr.bf16.mxu0 %v7025_v2  ;;  %v528_v6 = vpack.c.bf16 %v333_v4, %v332_v3  ;;  %v335_v8 = vld [vmem:[%s7118_s17 + $0x18] sm:$0xff]  ;;  %v336_v9 = vld [vmem:[%s7118_s17 + $0x20] sm:$0xff]  ;;  %v337_v10 = vld [vmem:[%s7118_s17 + $0x28] sm:$0xff]  ;;  %6627 = vmatpush3.bf16.msra.mxu1 %v7028_v53 }
  0x15   : > { %v529_v11 = vpack.c.bf16 %v335_v8, %v334_v7  ;;  %v530_v12 = vpack.c.bf16 %v337_v10, %v336_v9  ;;  %v338_v13 = vld [vmem:[%s7118_s17 + $0x30] sm:$0xff]  ;;  %v339_v14 = vld [vmem:[%s7118_s17 + $0x38] sm:$0xff]  ;;  %v340_v15 = vld [vmem:[%s7118_s17 + $0x40] sm:$0xff] }
  0x16   : > { %6592 = vmatprep.mubr.msk.bf16.mxu0 %vm580_vm0, %v528_v6  ;;  %v341_v16 = vld [vmem:[%s7118_s17 + $0x48] sm:$0xff]  ;;  %v531_v17 = vpack.c.bf16 %v339_v14, %v338_v13  ;;  %v342_v19 = vld [vmem:[%s7118_s17 + $0x50] sm:$0xff]  ;;  %v343_v20 = vld [vmem:[%s7118_s17 + $0x58] sm:$0xff] }
  0x17   : > { %6589 = vmatpush3.bf16.msra.mxu0 %v7025_v2  ;;  %v532_v18 = vpack.c.bf16 %v341_v16, %v340_v15  ;;  %v344_v21 = vld [vmem:[%s7118_s17 + $0x60] sm:$0xff]  ;;  %v345_v22 = vld [vmem:[%s7118_s17 + $0x68] sm:$0xff]  ;;  %v533_v23 = vpack.c.bf16 %v343_v20, %v342_v19  ;;  %v346_v25 = vld [vmem:[%s7118_s17 + $0x70] sm:$0xff] }
  0x18   : > { %6590 = vmatprep.subr.bf16.mxu0 %v7026_v5  ;;  %v534_v24 = vpack.c.bf16 %v345_v22, %v344_v21  ;;  %v347_v26 = vld [vmem:[%s7118_s17 + $0x78] sm:$0xff]  ;;  %v348_v27 = vld [vmem:[%s7118_s17 + $0x80] sm:$0xff]  ;;  %v349_v28 = vld [vmem:[%s7118_s17 + $0x88] sm:$0xff] }
  0x19   : > { %v535_v29 = vpack.c.bf16 %v347_v26, %v346_v25  ;;  %v536_v30 = vpack.c.bf16 %v349_v28, %v348_v27  ;;  %v350_v31 = vld [vmem:[%s7118_s17 + $0x90] sm:$0xff]  ;;  %v351_v32 = vld [vmem:[%s7118_s17 + $0x98] sm:$0xff]  ;;  %v352_v33 = vld [vmem:[%s7118_s17 + $0xa0] sm:$0xff] }
  0x1a   : > { %v353_v34 = vld [vmem:[%s7118_s17 + $0xa8] sm:$0xff]  ;;  %v537_v35 = vpack.c.bf16 %v351_v32, %v350_v31  ;;  %v354_v37 = vld [vmem:[%s7118_s17 + $0xb0] sm:$0xff]  ;;  %v355_v38 = vld [vmem:[%s7118_s17 + $0xb8] sm:$0xff] }
  0x1b   : > { %6591 = vmatpush3.bf16.msra.mxu0 %v7026_v5  ;;  %v538_v36 = vpack.c.bf16 %v353_v34, %v352_v33  ;;  %v356_v39 = vld [vmem:[%s7118_s17 + $0xc0] sm:$0xff]  ;;  %v357_v40 = vld [vmem:[%s7118_s17 + $0xc8] sm:$0xff]  ;;  %v539_v41 = vpack.c.bf16 %v355_v38, %v354_v37  ;;  %v358_v43 = vld [vmem:[%s7118_s17 + $0xd0] sm:$0xff] }
  0x1c   : > { %v540_v42 = vpack.c.bf16 %v357_v40, %v356_v39  ;;  %v359_v44 = vld [vmem:[%s7118_s17 + $0xd8] sm:$0xff]  ;;  %v360_v45 = vld [vmem:[%s7118_s17 + $0xe0] sm:$0xff]  ;;  %v361_v46 = vld [vmem:[%s7118_s17 + $0xe8] sm:$0xff] }
  0x1d   : > { %v541_v47 = vpack.c.bf16 %v359_v44, %v358_v43  ;;  %v542_v48 = vpack.c.bf16 %v361_v46, %v360_v45  ;;  %v362_v49 = vld [vmem:[%s7118_s17 + $0xf0] sm:$0xff]  ;;  %v363_v50 = vld [vmem:[%s7118_s17 + $0xf8] sm:$0xff]  ;;  %s10501_s17 = scalar_lea.vmem %s11032_s7, %s7112_s14 }
  0x1e   : > { %6593 = vmatmul.mubr.msk.bf16.vlgmr.msra.gmra.mrb[0].mxu0 %vm580_vm0, %v529_v11  ;;  %v543_v51 = vpack.c.bf16 %v363_v50, %v362_v49 }
  0x1f   : > { %6596 = vmatprep.mubr.msk.bf16.mxu0 %vm580_vm0, %v530_v12 }
  0x26   : > { %6597 = vmatmul.mubr.msk.bf16.gmra.mrb[4].mxu0 %vm580_vm0, %v531_v17 }
  0x27   : > { %6600 = vmatprep.mubr.msk.bf16.mxu0 %vm580_vm0, %v532_v18 }
  0x2e   : > { %6601 = vmatmul.mubr.msk.bf16.gmra.mrb[8].mxu0 %vm580_vm0, %v533_v23 }
  0x2f   : > { %6604 = vmatprep.mubr.msk.bf16.mxu0 %vm580_vm0, %v534_v24 }
  0x36   : > { %6605 = vmatmul.mubr.msk.bf16.gmra.mrb[12].mxu0 %vm580_vm0, %v535_v29 }
  0x37   : > { %6608 = vmatprep.mubr.msk.bf16.mxu0 %vm580_vm0, %v536_v30 }
  0x3e   : > { %6609 = vmatmul.mubr.msk.bf16.gmra.mrb[16].mxu0 %vm580_vm0, %v537_v35 }
  0x3f   : > { %6612 = vmatprep.mubr.msk.bf16.mxu0 %vm580_vm0, %v538_v36 }
  0x46   : > { %6613 = vmatmul.mubr.msk.bf16.gmra.mrb[20].mxu0 %vm580_vm0, %v539_v41 }
  0x47   : > { %6616 = vmatprep.mubr.msk.bf16.mxu0 %vm580_vm0, %v540_v42 }
  0x4e   : > { %6617 = vmatmul.mubr.msk.bf16.gmra.mrb[24].mxu0 %vm580_vm0, %v541_v47 }
  0x4f   : > { %6620 = vmatprep.mubr.msk.bf16.mxu0 %vm580_vm0, %v542_v48 }
  0x56   : > { %6621 = vmatmul.mubr.msk.bf16.gmra.mrb[28].mxu0 %vm580_vm0, %v543_v51 }
  0xf1   : > { %v6594_v59 = vpop.f32.mrb[0].mxu0 }
  0xf2   : > { %v663_v60 = vpop.f32.mrb[1].mxu0  ;;  %v7199_v2 = vadd.f32 %v6594_v59, %v7187_v58 }
  0xf3   : > { %v6595_v61 = vpop.f32.mrb[2].mxu0  ;;  %v7193_v0 = vadd.f32 %v663_v60, %v7187_v58 }
  0xf4   : > { %v7190_v62 = vadd.f32 %v6595_v61, %v7187_v58  ;;  %v666_v63 = vpop.f32.mrb[3].mxu0  ;;  %11446 = vst [vmem:[#allocation6_spill] sm:$0xff] %v7199_v2 }
  0xf5   : > { %11444 = vst [vmem:[#allocation4_spill] sm:$0xff] %v7193_v0  ;;  %v7196_v1 = vadd.f32 %v666_v63, %v7187_v58 }
  0xf6   : > { %11443 = vst [vmem:[#allocation3_spill] sm:$0xff] %v7190_v62  ;;  %v805_v4 = vpack.c.bf16 %v7190_v62, %v7199_v2 }
  0xf7   : > { %11445 = vst [vmem:[#allocation5_spill] sm:$0xff] %v7196_v1  ;;  %v804_v3 = vpack.c.bf16 %v7196_v1, %v7193_v0 }
  0xf9   : > { %v6598_v5 = vpop.f32.mrb[4].mxu0  ;;  %6628 = vmatprep.mubr.msk.bf16.mxu1 %vm832_vm1, %v804_v3 }
  0xfa   : > { %v679_v6 = vpop.f32.mrb[5].mxu0  ;;  %6629 = vmatmul.mubr.msk.bf16.vlgmr.msra.gmra.mrb[0].mxu1 %vm832_vm1, %v805_v4  ;;  %v7211_v9 = vadd.f32 %v6598_v5, %v7187_v58 }
  0xfb   : > { %v7208_v7 = vadd.f32 %v679_v6, %v7187_v58  ;;  %v6599_v8 = vpop.f32.mrb[6].mxu0 }
  0xfc   : > { %11448 = vst [vmem:[#allocation8_spill] sm:$0xff] %v7211_v9  ;;  %v7214_v10 = vadd.f32 %v6599_v8, %v7187_v58  ;;  %v682_v11 = vpop.f32.mrb[7].mxu0 }
  0xfd   : > { %11447 = vst [vmem:[#allocation7_spill] sm:$0xff] %v7208_v7  ;;  %v7217_v12 = vadd.f32 %v682_v11, %v7187_v58 }
  0xfe   : > { %11449 = vst [vmem:[#allocation9_spill] sm:$0xff] %v7214_v10  ;;  %v807_v14 = vpack.c.bf16 %v7214_v10, %v7211_v9 }
  0xff   : > { %11450 = vst [vmem:[#allocation10_spill] sm:$0xff] %v7217_v12  ;;  %v806_v13 = vpack.c.bf16 %v7217_v12, %v7208_v7 }
 0x101   : > { %v6602_v15 = vpop.f32.mrb[8].mxu0  ;;  %6632 = vmatprep.mubr.msk.bf16.mxu1 %vm832_vm1, %v806_v13 }
 0x102   : > { %v695_v16 = vpop.f32.mrb[9].mxu0  ;;  %6633 = vmatmul.mubr.msk.bf16.gmra.mrb[4].mxu1 %vm832_vm1, %v807_v14  ;;  %v7229_v19 = vadd.f32 %v6602_v15, %v7187_v58 }
 0x103   : > { %v7226_v17 = vadd.f32 %v695_v16, %v7187_v58  ;;  %v6603_v18 = vpop.f32.mrb[10].mxu0 }
 0x104   : > { %11452 = vst [vmem:[#allocation12_spill] sm:$0xff] %v7229_v19  ;;  %v7232_v20 = vadd.f32 %v6603_v18, %v7187_v58  ;;  %v698_v21 = vpop.f32.mrb[11].mxu0 }
 0x105   : > { %11451 = vst [vmem:[#allocation11_spill] sm:$0xff] %v7226_v17  ;;  %v7235_v22 = vadd.f32 %v698_v21, %v7187_v58 }
 0x106   : > { %11453 = vst [vmem:[#allocation13_spill] sm:$0xff] %v7232_v20  ;;  %v809_v24 = vpack.c.bf16 %v7232_v20, %v7229_v19 }
 0x107   : > { %11454 = vst [vmem:[#allocation14_spill] sm:$0xff] %v7235_v22  ;;  %v808_v23 = vpack.c.bf16 %v7235_v22, %v7226_v17 }
 0x109   : > { %v6606_v25 = vpop.f32.mrb[12].mxu0  ;;  %6636 = vmatprep.mubr.msk.bf16.mxu1 %vm832_vm1, %v808_v23 }
 0x10a   : > { %v711_v26 = vpop.f32.mrb[13].mxu0  ;;  %6637 = vmatmul.mubr.msk.bf16.gmra.mrb[8].mxu1 %vm832_vm1, %v809_v24  ;;  %v7247_v29 = vadd.f32 %v6606_v25, %v7187_v58 }
 0x10b   : > { %v7244_v27 = vadd.f32 %v711_v26, %v7187_v58  ;;  %v6607_v28 = vpop.f32.mrb[14].mxu0 }
 0x10c   : > { %11456 = vst [vmem:[#allocation16_spill] sm:$0xff] %v7247_v29  ;;  %v7250_v30 = vadd.f32 %v6607_v28, %v7187_v58  ;;  %v714_v31 = vpop.f32.mrb[15].mxu0  ;;  %v1044_v28 = vsub.s32 2, %v7178_v55 }
 0x10d   : > { %11455 = vst [vmem:[#allocation15_spill] sm:$0xff] %v7244_v27  ;;  %v7253_v32 = vadd.f32 %v714_v31, %v7187_v58 }
 0x10e   : > { %11457 = vst [vmem:[#allocation17_spill] sm:$0xff] %v7250_v30  ;;  %v811_v34 = vpack.c.bf16 %v7250_v30, %v7247_v29  ;;  %v7335_v31 = vrot.slane %v7184_v57, %v1044_v28 }
 0x10f   : > { %11458 = vst [vmem:[#allocation18_spill] sm:$0xff] %v7253_v32  ;;  %v810_v33 = vpack.c.bf16 %v7253_v32, %v7244_v27 }
 0x111   : > { %v6610_v35 = vpop.f32.mrb[16].mxu0  ;;  %6640 = vmatprep.mubr.msk.bf16.mxu1 %vm832_vm1, %v810_v33 }
 0x112   : > { %v727_v36 = vpop.f32.mrb[17].mxu0  ;;  %6641 = vmatmul.mubr.msk.bf16.gmra.mrb[12].mxu1 %vm832_vm1, %v811_v34  ;;  %v7265_v39 = vadd.f32 %v6610_v35, %v7187_v58 }
 0x113   : > { %v7262_v37 = vadd.f32 %v727_v36, %v7187_v58  ;;  %v6611_v38 = vpop.f32.mrb[18].mxu0 }
 0x114   : > { %11460 = vst [vmem:[#allocation20_spill] sm:$0xff] %v7265_v39  ;;  %v7268_v40 = vadd.f32 %v6611_v38, %v7187_v58  ;;  %v730_v41 = vpop.f32.mrb[19].mxu0 }
 0x115   : > { %11459 = vst [vmem:[#allocation19_spill] sm:$0xff] %v7262_v37  ;;  %v7271_v42 = vadd.f32 %v730_v41, %v7187_v58 }
 0x116   : > { %11461 = vst [vmem:[#allocation21_spill] sm:$0xff] %v7268_v40  ;;  %v813_v44 = vpack.c.bf16 %v7268_v40, %v7265_v39 }
 0x117   : > { %11462 = vst [vmem:[#allocation22_spill] sm:$0xff] %v7271_v42  ;;  %v812_v43 = vpack.c.bf16 %v7271_v42, %v7262_v37 }
 0x119   : > { %v6614_v45 = vpop.f32.mrb[20].mxu0  ;;  %6644 = vmatprep.mubr.msk.bf16.mxu1 %vm832_vm1, %v812_v43 }
 0x11a   : > { %v743_v46 = vpop.f32.mrb[21].mxu0  ;;  %6645 = vmatmul.mubr.msk.bf16.gmra.mrb[16].mxu1 %vm832_vm1, %v813_v44  ;;  %v7283_v49 = vadd.f32 %v6614_v45, %v7187_v58 }
 0x11b   : > { %v7280_v47 = vadd.f32 %v743_v46, %v7187_v58  ;;  %v6615_v48 = vpop.f32.mrb[22].mxu0 }
 0x11c   : > { %11464 = vst [vmem:[#allocation24_spill] sm:$0xff] %v7283_v49  ;;  %v7286_v50 = vadd.f32 %v6615_v48, %v7187_v58  ;;  %v746_v51 = vpop.f32.mrb[23].mxu0 }
 0x11d   : > { %11463 = vst [vmem:[#allocation23_spill] sm:$0xff] %v7280_v47  ;;  %v7289_v52 = vadd.f32 %v746_v51, %v7187_v58 }
 0x11e   : > { %11465 = vst [vmem:[#allocation25_spill] sm:$0xff] %v7286_v50  ;;  %v815_v56 = vpack.c.bf16 %v7286_v50, %v7283_v49 }
 0x11f   : > { %11466 = vst [vmem:[#allocation26_spill] sm:$0xff] %v7289_v52  ;;  %v814_v53 = vpack.c.bf16 %v7289_v52, %v7280_v47 }
 0x121   : > { %v6618_v59 = vpop.f32.mrb[24].mxu0  ;;  %6648 = vmatprep.mubr.msk.bf16.mxu1 %vm832_vm1, %v814_v53 }
 0x122   : > { %v759_v60 = vpop.f32.mrb[25].mxu0  ;;  %6649 = vmatmul.mubr.msk.bf16.gmra.mrb[20].mxu1 %vm832_vm1, %v815_v56  ;;  %v7301_v3 = vadd.f32 %v6618_v59, %v7187_v58 }
 0x123   : > { %v7298_v61 = vadd.f32 %v759_v60, %v7187_v58  ;;  %v6619_v63 = vpop.f32.mrb[26].mxu0 }
 0x124   : > { %11468 = vst [vmem:[#allocation28_spill] sm:$0xff] %v7301_v3  ;;  %v7304_v4 = vadd.f32 %v6619_v63, %v7187_v58  ;;  %v762_v5 = vpop.f32.mrb[27].mxu0 }
 0x125   : > { %11467 = vst [vmem:[#allocation27_spill] sm:$0xff] %v7298_v61  ;;  %v7307_v6 = vadd.f32 %v762_v5, %v7187_v58 }
 0x126   : > { %11469 = vst [vmem:[#allocation29_spill] sm:$0xff] %v7304_v4  ;;  %v817_v11 = vpack.c.bf16 %v7304_v4, %v7301_v3 }
 0x127   : > { %11470 = vst [vmem:[#allocation30_spill] sm:$0xff] %v7307_v6  ;;  %v816_v8 = vpack.c.bf16 %v7307_v6, %v7298_v61 }
 0x129   : > { %v6622_v13 = vpop.f32.mrb[28].mxu0  ;;  %6652 = vmatprep.mubr.msk.bf16.mxu1 %vm832_vm1, %v816_v8 }
 0x12a   : > { %v775_v14 = vpop.f32.mrb[29].mxu0  ;;  %6653 = vmatmul.mubr.msk.bf16.gmra.mrb[24].mxu1 %vm832_vm1, %v817_v11  ;;  %v7319_v18 = vadd.f32 %v6622_v13, %v7187_v58 }
 0x12b   : > { %v7316_v15 = vadd.f32 %v775_v14, %v7187_v58  ;;  %v6623_v16 = vpop.f32.mrb[30].mxu0 }
 0x12c   : > { %11472 = vst [vmem:[#allocation32_spill] sm:$0xff] %v7319_v18  ;;  %v7322_v21 = vadd.f32 %v6623_v16, %v7187_v58  ;;  %v778_v23 = vpop.f32.mrb[31].mxu0 }
 0x12d   : > { %11471 = vst [vmem:[#allocation31_spill] sm:$0xff] %v7316_v15  ;;  %v7325_v24 = vadd.f32 %v778_v23, %v7187_v58 }
 0x12e   : > { %11473 = vst [vmem:[#allocation33_spill] sm:$0xff] %v7322_v21  ;;  %v819_v26 = vpack.c.bf16 %v7322_v21, %v7319_v18 }
 0x12f   : > { %11474 = vst [vmem:[#allocation34_spill] sm:$0xff] %v7325_v24  ;;  %v818_v25 = vpack.c.bf16 %v7325_v24, %v7316_v15 }
 0x131   : > { %6656 = vmatprep.mubr.msk.bf16.mxu1 %vm832_vm1, %v818_v25 }
 0x132   : > { %6657 = vmatmul.mubr.msk.bf16.gmra.mrb[28].mxu1 %vm832_vm1, %v819_v26 }
 0x1cd   : > { %v6630_v33 = vpop.f32.mrb[0].mxu1 }
 0x1ce   : > { %v7338_v34 = vadd.f32 %v6630_v33, %v7335_v31  ;;  %v915_v58 = vpop.f32.mrb[1].mxu1 }
 0x1cf   : > { %v7341_v35 = vadd.f32 %v7335_v31, %v915_v58  ;;  %v6631_v36 = vpop.f32.mrb[2].mxu1 }
 0x1d0   : > { %v7344_v38 = vadd.f32 %v6631_v36, %v7335_v31  ;;  %v918_v41 = vpop.f32.mrb[3].mxu1  ;;  %v1084_v43 = vsel %vm580_vm0, %v7338_v34, inf }
 0x1d1   : > { %v7349_v44 = vadd.f32 %v7335_v31, %v918_v41  ;;  %1085 = vmin.xlane.f32.xlu1 %v1084_v43  ;;  %v1078_v57 = vsel %vm580_vm0, %v7341_v35, inf }
 0x1d2   : > { %1079 = vmin.xlane.f32.xlu0 %v1078_v57  ;;  %v1087_v45 = vsel %vm580_vm0, %v7344_v38, inf }
 0x1d3   : > { %v1081_v48 = vsel %vm580_vm0, %v7349_v44, inf }
 0x1d5   : > { %1088 = vmin.xlane.f32.xlu1 %v1087_v45  ;;  %v6634_v46 = vpop.f32.mrb[4].mxu1 }
 0x1d6   : > { %1082 = vmin.xlane.f32.xlu0 %v1081_v48  ;;  %v931_v51 = vpop.f32.mrb[5].mxu1  ;;  %v7361_v60 = vadd.f32 %v6634_v46, %v7335_v31 }
 0x1d7   : > { %v7358_v53 = vadd.f32 %v7335_v31, %v931_v51  ;;  %v6635_v56 = vpop.f32.mrb[6].mxu1 }
 0x1d8   : > { %v934_v59 = vpop.f32.mrb[7].mxu1  ;;  %v7369_v8 = vadd.f32 %v6635_v56, %v7335_v31  ;;  %v1096_v14 = vsel %vm580_vm0, %v7361_v60, inf }
 0x1d9   : > { %v7364_v63 = vadd.f32 %v7335_v31, %v934_v59  ;;  %v1090_v5 = vsel %vm580_vm0, %v7358_v53, inf }
 0x1da   : > { %1091 = vmin.xlane.f32.xlu0 %v1090_v5  ;;  %v1099_v26 = vsel %vm580_vm0, %v7369_v8, inf }
 0x1db   : > { %v1093_v11 = vsel %vm580_vm0, %v7364_v63, inf }
 0x1dc   : > { %1094 = vmin.xlane.f32.xlu1 %v1093_v11 }
 0x1dd   : > { %v6638_v13 = vpop.f32.mrb[8].mxu1 }
 0x1de   : > { %1097 = vmin.xlane.f32.xlu0 %v1096_v14  ;;  %v947_v16 = vpop.f32.mrb[9].mxu1  ;;  %v7381_v33 = vadd.f32 %v6638_v13, %v7335_v31 }
 0x1df   : > { %v7376_v23 = vadd.f32 %v7335_v31, %v947_v16  ;;  %v6639_v25 = vpop.f32.mrb[10].mxu1 }
 0x1e0   : > { %1100 = vmin.xlane.f32.xlu1 %v1099_v26  ;;  %v950_v28 = vpop.f32.mrb[11].mxu1  ;;  %v7389_v41 = vadd.f32 %v6639_v25, %v7335_v31  ;;  %v1108_v45 = vsel %vm580_vm0, %v7381_v33, inf }
 0x1e1   : > { %v7384_v58 = vadd.f32 %v7335_v31, %v950_v28  ;;  %v1102_v36 = vsel %vm580_vm0, %v7376_v23, inf }
 0x1e2   : > { %1103 = vmin.xlane.f32.xlu0 %v1102_v36  ;;  %v1111_v56 = vsel %vm580_vm0, %v7389_v41, inf }
 0x1e3   : > { %v1105_v43 = vsel %vm580_vm0, %v7384_v58, inf }
 0x1e4   : > { %1106 = vmin.xlane.f32.xlu1 %v1105_v43 }
 0x1e5   : > { %v6642_v57 = vpop.f32.mrb[12].mxu1 }
 0x1e6   : > { %1109 = vmin.xlane.f32.xlu0 %v1108_v45  ;;  %v963_v46 = vpop.f32.mrb[13].mxu1  ;;  %v7401_v5 = vadd.f32 %v6642_v57, %v7335_v31 }
 0x1e7   : > { %v7396_v48 = vadd.f32 %v7335_v31, %v963_v46  ;;  %v6643_v51 = vpop.f32.mrb[14].mxu1 }
 0x1e8   : > { %1112 = vmin.xlane.f32.xlu1 %v1111_v56  ;;  %v966_v59 = vpop.f32.mrb[15].mxu1  ;;  %v7409_v14 = vadd.f32 %v6643_v51, %v7335_v31  ;;  %v1120_v26 = vsel %vm580_vm0, %v7401_v5, inf }
 0x1e9   : > { %v7404_v11 = vadd.f32 %v7335_v31, %v966_v59  ;;  %v1114_v13 = vsel %vm580_vm0, %v7396_v48, inf }
 0x1ea   : > { %1115 = vmin.xlane.f32.xlu0 %v1114_v13  ;;  %v1123_v57 = vsel %vm580_vm0, %v7409_v14, inf }
 0x1eb   : > { %v1117_v16 = vsel %vm580_vm0, %v7404_v11, inf }
 0x1ec   : > { %1118 = vmin.xlane.f32.xlu1 %v1117_v16 }
 0x1ed   : > { %v6646_v25 = vpop.f32.mrb[16].mxu1 }
 0x1ee   : > { %1121 = vmin.xlane.f32.xlu0 %v1120_v26  ;;  %v979_v28 = vpop.f32.mrb[17].mxu1  ;;  %v7421_v46 = vadd.f32 %v6646_v25, %v7335_v31 }
 0x1ef   : > { %v7416_v36 = vadd.f32 %v7335_v31, %v979_v28  ;;  %v6647_v43 = vpop.f32.mrb[18].mxu1 }
 0x1f0   : > { %1124 = vmin.xlane.f32.xlu1 %v1123_v57  ;;  %v982_v45 = vpop.f32.mrb[19].mxu1  ;;  %v7429_v59 = vadd.f32 %v6647_v43, %v7335_v31  ;;  %v1132_v26 = vsel %vm580_vm0, %v7421_v46, inf }
 0x1f1   : > { %v7424_v51 = vadd.f32 %v7335_v31, %v982_v45  ;;  %v1126_v56 = vsel %vm580_vm0, %v7416_v36, inf }
 0x1f2   : > { %1127 = vmin.xlane.f32.xlu0 %v1126_v56  ;;  %v1135_v45 = vsel %vm580_vm0, %v7429_v59, inf }
 0x1f3   : > { %v1129_v13 = vsel %vm580_vm0, %v7424_v51, inf }
 0x1f4   : > { %1130 = vmin.xlane.f32.xlu1 %v1129_v13 }
 0x1f5   : > { %v6650_v16 = vpop.f32.mrb[20].mxu1 }
 0x1f6   : > { %1133 = vmin.xlane.f32.xlu0 %v1132_v26  ;;  %v995_v25 = vpop.f32.mrb[21].mxu1  ;;  %v7441_v56 = vadd.f32 %v6650_v16, %v7335_v31 }
 0x1f7   : > { %v7436_v28 = vadd.f32 %v7335_v31, %v995_v25  ;;  %v6651_v57 = vpop.f32.mrb[22].mxu1 }
 0x1f8   : > { %1136 = vmin.xlane.f32.xlu1 %v1135_v45  ;;  %v998_v43 = vpop.f32.mrb[23].mxu1  ;;  %v7449_v26 = vadd.f32 %v6651_v57, %v7335_v31  ;;  %v1144_v45 = vsel %vm580_vm0, %v7441_v56, inf }
 0x1f9   : > { %v7444_v13 = vadd.f32 %v7335_v31, %v998_v43  ;;  %v1138_v54 = vsel %vm580_vm0, %v7436_v28, inf }
 0x1fa   : > { %1139 = vmin.xlane.f32.xlu0 %v1138_v54  ;;  %v1147_v54 = vsel %vm580_vm0, %v7449_v26, inf }
 0x1fb   : > { %v1141_v25 = vsel %vm580_vm0, %v7444_v13, inf }
 0x1fc   : > { %1142 = vmin.xlane.f32.xlu1 %v1141_v25 }
 0x1fd   : > { %v6654_v18 = vpop.f32.mrb[24].mxu1 }
 0x1fe   : > { %1145 = vmin.xlane.f32.xlu0 %v1144_v45  ;;  %v1011_v16 = vpop.f32.mrb[25].mxu1  ;;  %v7461_v15 = vadd.f32 %v6654_v18, %v7335_v31 }
 0x1ff   : > { %v7456_v43 = vadd.f32 %v7335_v31, %v1011_v16  ;;  %v6655_v21 = vpop.f32.mrb[26].mxu1 }
 0x200   : > { %1148 = vmin.xlane.f32.xlu1 %v1147_v54  ;;  %v1014_v57 = vpop.f32.mrb[27].mxu1  ;;  %v7469_v45 = vadd.f32 %v6655_v21, %v7335_v31  ;;  %v1156_v54 = vsel %vm580_vm0, %v7461_v15, inf }
 0x201   : > { %v7464_v25 = vadd.f32 %v7335_v31, %v1014_v57  ;;  %v1150_v24 = vsel %vm580_vm0, %v7456_v43, inf }
 0x202   : > { %1151 = vmin.xlane.f32.xlu0 %v1150_v24  ;;  %v1159_v24 = vsel %vm580_vm0, %v7469_v45, inf }
 0x203   : > { %v1153_v16 = vsel %vm580_vm0, %v7464_v25, inf }
 0x204   : > { %1154 = vmin.xlane.f32.xlu1 %v1153_v16 }
 0x205   : > { %v6658_v3 = vpop.f32.mrb[28].mxu1 }
 0x206   : > { %1157 = vmin.xlane.f32.xlu0 %v1156_v54  ;;  %v1027_v18 = vpop.f32.mrb[29].mxu1  ;;  %v7484_v16 = vadd.f32 %v6658_v3, %v7335_v31  ;;  %v11475_v3 = vlaneseq }
 0x207   : > { %v7476_v57 = vadd.f32 %v7335_v31, %v1027_v18  ;;  %v6659_v4 = vpop.f32.mrb[30].mxu1 }
 0x208   : > { %v7481_v21 = vadd.f32 %v6659_v4, %v7335_v31  ;;  %1160 = vmin.xlane.f32.xlu1 %v1159_v24  ;;  %v1030_v61 = vpop.f32.mrb[31].mxu1  ;;  %v1168_v4 = vsel %vm580_vm0, %v7484_v16, inf  ;;  %v7498_v49 = vand.u32 127, %v11475_v3 }
 0x209   : > { %v7487_v6 = vadd.f32 %v7335_v31, %v1030_v61  ;;  %v1162_v54 = vsel %vm580_vm0, %v7476_v57, inf }
 0x20a   : > { %1163 = vmin.xlane.f32.xlu0 %v1162_v54  ;;  %v1171_v24 = vsel %vm580_vm0, %v7481_v21, inf  ;;  %11476 = vst [vmem:[#allocation35_spill] sm:$0xff] %v7498_v49 }
 0x20b   : > { %v1165_v18 = vsel %vm580_vm0, %v7487_v6, inf }
 0x20c   : > { %1166 = vmin.xlane.f32.xlu1 %v1165_v18 }
 0x20e   : > { %1169 = vmin.xlane.f32.xlu0 %v1168_v4 }
 0x210   : > { %1172 = vmin.xlane.f32.xlu1 %v1171_v24 }
 0x25e   : > { %v1086_v61 = vpop.xlane.xlu1 %1085 }
 0x25f   : > { %vm1176_vm2 = vcmp.eq.f32.partialorder %v7338_v34, %v1086_v61  ;;  %v1080_v31 = vpop.xlane.xlu0 %1079 }
 0x260   : > { %v1208_v54 = vsel %vm1176_vm2, %v7498_v49, 64  ;;  %vm1174_vm3 = vcmp.eq.f32.partialorder %v7341_v35, %v1080_v31 }
 0x261   : > { %v1206_v18 = vsel %vm1174_vm3, %v7498_v49, 64  ;;  %v7508_v47 = vsel %vm580_vm0, %v1208_v54, 2147483647 }
 0x262   : > { %v1089_v50 = vpop.xlane.xlu1 %1088  ;;  %v7505_v4 = vsel %vm580_vm0, %v1206_v18, 2147483647  ;;  %v1270_v31 = vshra.s32 %v7508_v47, 16 }
 0x263   : > { %vm1177_vm4 = vcmp.eq.f32.partialorder %v7344_v38, %v1089_v50  ;;  %v1083_v24 = vpop.xlane.xlu0 %1082  ;;  %v1240_v3 = vshra.s32 %v7505_v4, 16 }
 0x264   : > { %v1209_v34 = vsel %vm1177_vm4, %v7498_v49, 64  ;;  %vm1175_vm5 = vcmp.eq.f32.partialorder %v7349_v44, %v1083_v24 }
 0x265   : > { %v1207_v35 = vsel %vm1175_vm5, %v7498_v49, 64  ;;  %v7515_v61 = vcvt.s32.f32 %v1240_v3  ;;  %v7522_v54 = vsel %vm580_vm0, %v1209_v34, 2147483647  ;;  %v7528_v3 = vcvt.s32.f32 %v1270_v31 }
 0x266   : > { %v7519_v18 = vsel %vm580_vm0, %v1207_v35, 2147483647  ;;  %v1285_v35 = vshra.s32 %v7522_v54, 16 }
 0x267   : > { %v1092_v50 = vpop.xlane.xlu0 %1091  ;;  %1243 = vmin.xlane.f32.xlu0 %v7515_v61  ;;  %v1255_v38 = vshra.s32 %v7519_v18, 16 }
 0x268   : > { %vm1178_vm6 = vcmp.eq.f32.partialorder %v7358_v53, %v1092_v50 }
 0x269   : > { %v1210_v44 = vsel %vm1178_vm6, %v7498_v49, 64  ;;  %v1095_v24 = vpop.xlane.xlu1 %1094  ;;  %v7530_v52 = vcvt.s32.f32 %v1255_v38 }
 0x26a   : > { %vm1179_vm7 = vcmp.eq.f32.partialorder %v7364_v63, %v1095_v24  ;;  %v7535_v34 = vsel %vm580_vm0, %v1210_v44, 2147483647  ;;  %v7548_v44 = vcvt.s32.f32 %v1285_v35 }
 0x26b   : > { %v1211_v39 = vsel %vm1179_vm7, %v7498_v49, 64  ;;  %v1098_v40 = vpop.xlane.xlu0 %1097  ;;  %1273 = vmin.xlane.f32.xlu0 %v7528_v3  ;;  %1258 = vmin.xlane.f32.xlu1 %v7530_v52  ;;  %v1300_v53 = vshra.s32 %v7535_v34, 16 }
 0x26c   : > { %vm1180_vm8 = vcmp.eq.f32.partialorder %v7361_v60, %v1098_v40  ;;  %v7543_v31 = vsel %vm580_vm0, %v1211_v39, 2147483647 }
 0x26d   : > { %v1212_v50 = vsel %vm1180_vm8, %v7498_v49, 64  ;;  %v1101_v63 = vpop.xlane.xlu1 %1100  ;;  %v7546_v38 = vcvt.s32.f32 %v1300_v53  ;;  %v1315_v24 = vshra.s32 %v7543_v31, 16 }
 0x26e   : > { %vm1181_vm9 = vcmp.eq.f32.partialorder %v7369_v8, %v1101_v63  ;;  %v7553_v37 = vsel %vm580_vm0, %v1212_v50, 2147483647 }
 0x26f   : > { %v1213_v42 = vsel %vm1181_vm9, %v7498_v49, 64  ;;  %v1104_v40 = vpop.xlane.xlu0 %1103  ;;  %1303 = vmin.xlane.f32.xlu0 %v7546_v38  ;;  %1288 = vmin.xlane.f32.xlu1 %v7548_v44  ;;  %v1330_v39 = vshra.s32 %v7553_v37, 16  ;;  %v7566_v50 = vcvt.s32.f32 %v1315_v24 }
 0x270   : > { %vm1182_vm10 = vcmp.eq.f32.partialorder %v7376_v23, %v1104_v40  ;;  %v7561_v60 = vsel %vm580_vm0, %v1213_v42, 2147483647 }
 0x271   : > { %v1214_v35 = vsel %vm1182_vm10, %v7498_v49, 64  ;;  %v1107_v8 = vpop.xlane.xlu1 %1106  ;;  %v7564_v53 = vcvt.s32.f32 %v1330_v39  ;;  %v1345_v63 = vshra.s32 %v7561_v60, 16 }
 0x272   : > { %vm1183_vm11 = vcmp.eq.f32.partialorder %v7384_v58, %v1107_v8  ;;  %v7571_v29 = vsel %vm580_vm0, %v1214_v35, 2147483647 }
 0x273   : > { %v1215_v30 = vsel %vm1183_vm11, %v7498_v49, 64  ;;  %v1110_v23 = vpop.xlane.xlu0 %1109  ;;  %1333 = vmin.xlane.f32.xlu0 %v7564_v53  ;;  %1318 = vmin.xlane.f32.xlu1 %v7566_v50  ;;  %v1360_v42 = vshra.s32 %v7571_v29, 16  ;;  %v7584_v35 = vcvt.s32.f32 %v1345_v63 }
 0x274   : > { %vm1184_vm12 = vcmp.eq.f32.partialorder %v7381_v33, %v1110_v23  ;;  %v7579_v24 = vsel %vm580_vm0, %v1215_v30, 2147483647 }
 0x275   : > { %v1216_v40 = vsel %vm1184_vm12, %v7498_v49, 64  ;;  %v1113_v58 = vpop.xlane.xlu1 %1112  ;;  %v7582_v39 = vcvt.s32.f32 %v1360_v42  ;;  %v1375_v8 = vshra.s32 %v7579_v24, 16 }
 0x276   : > { %vm1185_vm13 = vcmp.eq.f32.partialorder %v7389_v41, %v1113_v58  ;;  %v7589_v27 = vsel %vm580_vm0, %v1216_v40, 2147483647 }
 0x277   : > { %v1217_v32 = vsel %vm1185_vm13, %v7498_v49, 64  ;;  %v1116_v33 = vpop.xlane.xlu0 %1115  ;;  %1363 = vmin.xlane.f32.xlu0 %v7582_v39  ;;  %1348 = vmin.xlane.f32.xlu1 %v7584_v35  ;;  %v1390_v30 = vshra.s32 %v7589_v27, 16  ;;  %v7602_v40 = vcvt.s32.f32 %v1375_v8 }
 0x278   : > { %vm1186_vm14 = vcmp.eq.f32.partialorder %v7396_v48, %v1116_v33  ;;  %v7597_v63 = vsel %vm580_vm0, %v1217_v32, 2147483647 }
 0x279   : > { %v1218_v23 = vsel %vm1186_vm14, %v7498_v49, 64  ;;  %v1119_v41 = vpop.xlane.xlu1 %1118  ;;  %v7600_v42 = vcvt.s32.f32 %v1390_v30  ;;  %v1405_v58 = vshra.s32 %v7597_v63, 16 }
 0x27a   : > { %vm1187_vm15 = vcmp.eq.f32.partialorder %v7404_v11, %v1119_v41  ;;  %v7607_v19 = vsel %vm580_vm0, %v1218_v23, 2147483647 }
 0x27b   : > { %v1219_v20 = vsel %vm1187_vm15, %v7498_v49, 64  ;;  %v1122_v48 = vpop.xlane.xlu0 %1121  ;;  %1393 = vmin.xlane.f32.xlu0 %v7600_v42  ;;  %1378 = vmin.xlane.f32.xlu1 %v7602_v40  ;;  %v1420_v32 = vshra.s32 %v7607_v19, 16  ;;  %v7620_v23 = vcvt.s32.f32 %v1405_v58 }
 0x27c   : > { %vm1188_vm2 = vcmp.eq.f32.partialorder %v7401_v5, %v1122_v48  ;;  %v7615_v8 = vsel %vm580_vm0, %v1219_v20, 2147483647 }
 0x27d   : > { %v1220_v33 = vsel %vm1188_vm2, %v7498_v49, 64  ;;  %v1125_v11 = vpop.xlane.xlu1 %1124  ;;  %v7618_v30 = vcvt.s32.f32 %v1420_v32  ;;  %v1435_v41 = vshra.s32 %v7615_v8, 16 }
 0x27e   : > { %vm1189_vm3 = vcmp.eq.f32.partialorder %v7409_v14, %v1125_v11  ;;  %v7625_v17 = vsel %vm580_vm0, %v1220_v33, 2147483647 }
 0x27f   : > { %v1221_v22 = vsel %vm1189_vm3, %v7498_v49, 64  ;;  %v1128_v5 = vpop.xlane.xlu0 %1127  ;;  %1423 = vmin.xlane.f32.xlu0 %v7618_v30  ;;  %1408 = vmin.xlane.f32.xlu1 %v7620_v23  ;;  %v1450_v20 = vshra.s32 %v7625_v17, 16  ;;  %v7638_v33 = vcvt.s32.f32 %v1435_v41 }
 0x280   : > { %vm1190_vm4 = vcmp.eq.f32.partialorder %v7416_v36, %v1128_v5  ;;  %v7633_v58 = vsel %vm580_vm0, %v1221_v22, 2147483647 }
 0x281   : > { %v1222_v48 = vsel %vm1190_vm4, %v7498_v49, 64  ;;  %v1131_v14 = vpop.xlane.xlu1 %1130  ;;  %v7636_v32 = vcvt.s32.f32 %v1450_v20  ;;  %v1465_v11 = vshra.s32 %v7633_v58, 16 }
 0x282   : > { %vm1191_vm5 = vcmp.eq.f32.partialorder %v7424_v51, %v1131_v14  ;;  %v7643_v9 = vsel %vm580_vm0, %v1222_v48, 2147483647 }
 0x283   : > { %v1223_v10 = vsel %vm1191_vm5, %v7498_v49, 64  ;;  %v1134_v36 = vpop.xlane.xlu0 %1133  ;;  %1453 = vmin.xlane.f32.xlu0 %v7636_v32  ;;  %1438 = vmin.xlane.f32.xlu1 %v7638_v33  ;;  %v1480_v22 = vshra.s32 %v7643_v9, 16  ;;  %v7656_v48 = vcvt.s32.f32 %v1465_v11 }
 0x284   : > { %vm1192_vm6 = vcmp.eq.f32.partialorder %v7421_v46, %v1134_v36  ;;  %v7651_v41 = vsel %vm580_vm0, %v1223_v10, 2147483647 }
 0x285   : > { %v1224_v5 = vsel %vm1192_vm6, %v7498_v49, 64  ;;  %v1137_v51 = vpop.xlane.xlu1 %1136  ;;  %v7654_v20 = vcvt.s32.f32 %v1480_v22  ;;  %v1495_v14 = vshra.s32 %v7651_v41, 16 }
 0x286   : > { %vm1193_vm7 = vcmp.eq.f32.partialorder %v7429_v59, %v1137_v51  ;;  %v7661_v7 = vsel %vm580_vm0, %v1224_v5, 2147483647 }
 0x287   : > { %v1225_v12 = vsel %vm1193_vm7, %v7498_v49, 64  ;;  %v1140_v46 = vpop.xlane.xlu0 %1139  ;;  %1483 = vmin.xlane.f32.xlu0 %v7654_v20  ;;  %1468 = vmin.xlane.f32.xlu1 %v7656_v48  ;;  %v1510_v10 = vshra.s32 %v7661_v7, 16  ;;  %v7674_v5 = vcvt.s32.f32 %v1495_v14 }
 0x288   : > { %vm1194_vm8 = vcmp.eq.f32.partialorder %v7436_v28, %v1140_v46  ;;  %v7669_v11 = vsel %vm580_vm0, %v1225_v12, 2147483647 }
 0x289   : > { %v1226_v36 = vsel %vm1194_vm8, %v7498_v49, 64  ;;  %v1143_v59 = vpop.xlane.xlu1 %1142  ;;  %v7672_v22 = vcvt.s32.f32 %v1510_v10  ;;  %v1525_v51 = vshra.s32 %v7669_v11, 16 }
 0x28a   : > { %vm1195_vm9 = vcmp.eq.f32.partialorder %v7444_v13, %v1143_v59  ;;  %v7679_v2 = vsel %vm580_vm0, %v1226_v36, 2147483647 }
 0x28b   : > { %v1227_v62 = vsel %vm1195_vm9, %v7498_v49, 64  ;;  %v1146_v28 = vpop.xlane.xlu0 %1145  ;;  %1513 = vmin.xlane.f32.xlu0 %v7672_v22  ;;  %1498 = vmin.xlane.f32.xlu1 %v7674_v5  ;;  %v1540_v12 = vshra.s32 %v7679_v2, 16  ;;  %v7692_v36 = vcvt.s32.f32 %v1525_v51 }
 0x28c   : > { %vm1196_vm10 = vcmp.eq.f32.partialorder %v7441_v56, %v1146_v28  ;;  %v7687_v14 = vsel %vm580_vm0, %v1227_v62, 2147483647 }
 0x28d   : > { %v1228_v46 = vsel %vm1196_vm10, %v7498_v49, 64  ;;  %v1149_v13 = vpop.xlane.xlu1 %1148  ;;  %v7690_v10 = vcvt.s32.f32 %v1540_v12  ;;  %11477 = vst [vmem:[#allocation36_spill] sm:$0xff] %v7692_v36  ;;  %v1555_v59 = vshra.s32 %v7687_v14, 16 }
 0x28e   : > { %vm1197_vm11 = vcmp.eq.f32.partialorder %v7449_v26, %v1149_v13  ;;  %v7697_v0 = vsel %vm580_vm0, %v1228_v46, 2147483647 }
 0x28f   : > { %v1229_v1 = vsel %vm1197_vm11, %v7498_v49, 64  ;;  %v1152_v56 = vpop.xlane.xlu0 %1151  ;;  %1543 = vmin.xlane.f32.xlu0 %v7690_v10  ;;  %1528 = vmin.xlane.f32.xlu1 %v7692_v36  ;;  %v1570_v62 = vshra.s32 %v7697_v0, 16  ;;  %v7710_v46 = vcvt.s32.f32 %v1555_v59 }
 0x290   : > { %vm1198_vm12 = vcmp.eq.f32.partialorder %v7456_v43, %v1152_v56  ;;  %v7705_v51 = vsel %vm580_vm0, %v1229_v1, 2147483647 }
 0x291   : > { %v1230_v28 = vsel %vm1198_vm12, %v7498_v49, 64  ;;  %v1155_v26 = vpop.xlane.xlu1 %1154  ;;  %v7708_v12 = vcvt.s32.f32 %v1570_v62  ;;  %11479 = vst [vmem:[#allocation38_spill] sm:$0xff] %v7710_v46  ;;  %v1585_v13 = vshra.s32 %v7705_v51, 16 }
 0x292   : > { %vm1199_vm13 = vcmp.eq.f32.partialorder %v7464_v25, %v1155_v26  ;;  %v7715_v55 = vsel %vm580_vm0, %v1230_v28, 2147483647 }
 0x293   : > { %11478 = vst [vmem:[#allocation37_spill] sm:$0xff] %v7708_v12  ;;  %v1231_v36 = vsel %vm1199_vm13, %v7498_v49, 64  ;;  %v1158_v43 = vpop.xlane.xlu0 %1157  ;;  %1573 = vmin.xlane.f32.xlu0 %v7708_v12  ;;  %1558 = vmin.xlane.f32.xlu1 %v7710_v46  ;;  %v1600_v1 = vshra.s32 %v7715_v55, 16  ;;  %v7728_v28 = vcvt.s32.f32 %v1585_v13 }
 0x294   : > { %vm1200_vm14 = vcmp.eq.f32.partialorder %v7461_v15, %v1158_v43  ;;  %v7723_v59 = vsel %vm580_vm0, %v1231_v36, 2147483647 }
 0x295   : > { %v1232_v56 = vsel %vm1200_vm14, %v7498_v49, 64  ;;  %v1161_v25 = vpop.xlane.xlu1 %1160  ;;  %v7726_v62 = vcvt.s32.f32 %v1600_v1  ;;  %11481 = vst [vmem:[#allocation40_spill] sm:$0xff] %v7728_v28  ;;  %v1615_v26 = vshra.s32 %v7723_v59, 16 }
 0x296   : > { %vm1201_vm15 = vcmp.eq.f32.partialorder %v7469_v45, %v1161_v25  ;;  %v7733_v46 = vsel %vm580_vm0, %v1232_v56, 2147483647 }
 0x297   : > { %11480 = vst [vmem:[#allocation39_spill] sm:$0xff] %v7726_v62  ;;  %v1233_v12 = vsel %vm1201_vm15, %v7498_v49, 64  ;;  %1603 = vmin.xlane.f32.xlu0 %v7726_v62  ;;  %v1164_v15 = vpop.xlane.xlu0 %1163  ;;  %1588 = vmin.xlane.f32.xlu1 %v7728_v28  ;;  %v1630_v36 = vshra.s32 %v7733_v46, 16  ;;  %v7746_v56 = vcvt.s32.f32 %v1615_v26 }
 0x298   : > { %vm1202_vm2 = vcmp.eq.f32.partialorder %v7476_v57, %v1164_v15  ;;  %v7741_v13 = vsel %vm580_vm0, %v1233_v12, 2147483647 }
 0x299   : > { %v1234_v43 = vsel %vm1202_vm2, %v7498_v49, 64  ;;  %v1167_v45 = vpop.xlane.xlu1 %1166  ;;  %v7744_v1 = vcvt.s32.f32 %v1630_v36  ;;  %11483 = vst [vmem:[#allocation42_spill] sm:$0xff] %v7746_v56  ;;  %v1645_v25 = vshra.s32 %v7741_v13, 16 }
 0x29a   : > { %vm1203_vm3 = vcmp.eq.f32.partialorder %v7487_v6, %v1167_v45  ;;  %v7751_v28 = vsel %vm580_vm0, %v1234_v43, 2147483647 }
 0x29b   : > { %11482 = vst [vmem:[#allocation41_spill] sm:$0xff] %v7744_v1  ;;  %v1235_v62 = vsel %vm1203_vm3, %v7498_v49, 64  ;;  %1633 = vmin.xlane.f32.xlu0 %v7744_v1  ;;  %v1170_v57 = vpop.xlane.xlu0 %1169  ;;  %1618 = vmin.xlane.f32.xlu1 %v7746_v56  ;;  %v1660_v12 = vshra.s32 %v7751_v28, 16  ;;  %v7764_v43 = vcvt.s32.f32 %v1645_v25 }
 0x29c   : > { %vm1204_vm4 = vcmp.eq.f32.partialorder %v7484_v16, %v1170_v57  ;;  %v7759_v26 = vsel %vm580_vm0, %v1235_v62, 2147483647 }
 0x29d   : > { %v1236_v15 = vsel %vm1204_vm4, %v7498_v49, 64  ;;  %v1173_v6 = vpop.xlane.xlu1 %1172  ;;  %v7762_v36 = vcvt.s32.f32 %v1660_v12  ;;  %v1675_v45 = vshra.s32 %v7759_v26, 16 }
 0x29e   : > { %vm1205_vm5 = vcmp.eq.f32.partialorder %v7481_v21, %v1173_v6  ;;  %v7769_v56 = vsel %vm580_vm0, %v1236_v15, 2147483647  ;;  %v792_v15 = vld [vmem:[%s11027_s2] sm:$0xff]  ;;  %v794_v6 = vld [vmem:[%s11027_s2 + $0x10] sm:$0xff] }
 0x29f   : > { %v1237_v1 = vsel %vm1205_vm5, %v7498_v49, 64  ;;  %1663 = vmin.xlane.f32.xlu0 %v7762_v36  ;;  %1648 = vmin.xlane.f32.xlu1 %v7764_v43  ;;  %v1690_v16 = vshra.s32 %v7769_v56, 16  ;;  %v7780_v57 = vcvt.s32.f32 %v1675_v45  ;;  %v796_v49 = vld [vmem:[%s11027_s2 + $0x20] sm:$0xff] }
 0x2a0   : > { %v7776_v62 = vsel %vm580_vm0, %v1237_v1, 2147483647  ;;  %v793_v1 = vld [vmem:[%s11027_s2 + $0x8] sm:$0xff] }
 0x2a1   : > { %11484 = vst [vmem:[#allocation43_spill] sm:$0xff] %v7776_v62  ;;  %v7778_v25 = vcvt.s32.f32 %v1690_v16  ;;  %11486 = vst [vmem:[#allocation45_spill] sm:$0xff] %v7780_v57  ;;  %v1705_v21 = vshra.s32 %v7776_v62, 16  ;;  %v6960_v45 = vpack.c.bf16 %v793_v1, %v792_v15  ;;  %v795_v16 = vld [vmem:[%s11027_s2 + $0x18] sm:$0xff]  ;;  %v798_v15 = vld [vmem:[%s11027_s2 + $0x30] sm:$0xff] }
 0x2a2   : > { %v799_v1 = vld [vmem:[%s11027_s2 + $0x38] sm:$0xff] }
 0x2a3   : > { %11485 = vst [vmem:[#allocation44_spill] sm:$0xff] %v7778_v25  ;;  %1693 = vmin.xlane.f32.xlu0 %v7778_v25  ;;  %1678 = vmin.xlane.f32.xlu1 %v7780_v57  ;;  %v7785_v12 = vcvt.s32.f32 %v1705_v21  ;;  %v6964_v21 = vpack.c.bf16 %v795_v16, %v794_v6  ;;  %v6972_v6 = vpack.c.bf16 %v799_v1, %v798_v15  ;;  %v1239_v16 = vand.u32 65535, %v7505_v4 }
 0x2a4   : > { %6961 = vmatprep.subr.bf16.mxu1 %v6960_v45  ;;  %v1299_v4 = vand.u32 65535, %v7535_v34  ;;  %v1329_v34 = vand.u32 65535, %v7553_v37  ;;  %v1359_v37 = vand.u32 65535, %v7571_v29  ;;  %v1389_v29 = vand.u32 65535, %v7589_v27 }
 0x2a5   : > { %11487 = vst [vmem:[#allocation46_spill] sm:$0xff] %v7785_v12  ;;  %6963 = vmatpush3.bf16.msra.mxu1 %v6960_v45  ;;  %v1241_v45 = vcvt.s32.f32 %v1239_v16  ;;  %v1419_v27 = vand.u32 65535, %v7607_v19  ;;  %v1449_v19 = vand.u32 65535, %v7625_v17  ;;  %v1479_v17 = vand.u32 65535, %v7643_v9 }
 0x2a6   : > { %6965 = vmatprep.subr.bf16.mxu1 %v6964_v21  ;;  %v1301_v16 = vcvt.s32.f32 %v1299_v4  ;;  %v1509_v9 = vand.u32 65535, %v7661_v7  ;;  %v1539_v7 = vand.u32 65535, %v7679_v2  ;;  %v1569_v2 = vand.u32 65535, %v7697_v0 }
 0x2a7   : > { %1708 = vmin.xlane.f32.xlu1 %v7785_v12  ;;  %v797_v12 = vld [vmem:[%s11027_s2 + $0x28] sm:$0xff]  ;;  %v1599_v0 = vand.u32 65535, %v7715_v55  ;;  %v1629_v55 = vand.u32 65535, %v7733_v46  ;;  %v1659_v46 = vand.u32 65535, %v7751_v28  ;;  %v1689_v28 = vand.u32 65535, %v7769_v56 }
 0x2a8   : > { %v6968_v57 = vpack.c.bf16 %v797_v12, %v796_v49  ;;  %v1269_v49 = vand.u32 65535, %v7508_v47  ;;  %v1254_v12 = vand.u32 65535, %v7519_v18 }
 0x2a9   : > { %6967 = vmatpush3.bf16.msra.mxu1 %v6964_v21 }
 0x2aa   : > { %6969 = vmatprep.subr.bf16.mxu1 %v6968_v57  ;;  %v1256_v1 = vcvt.s32.f32 %v1254_v12 }
 0x2ad   : > { %6971 = vmatpush3.bf16.msra.mxu1 %v6968_v57  ;;  %v1271_v57 = vcvt.s32.f32 %v1269_v49 }
 0x2ae   : > { %6973 = vmatprep.subr.bf16.mxu1 %v6972_v6 }
 0x2b1   : > { %6975 = vmatpush3.bf16.msra.mxu1 %v6972_v6  ;;  %v1284_v6 = vand.u32 65535, %v7522_v54  ;;  %v1314_v54 = vand.u32 65535, %v7543_v31  ;;  %v1344_v31 = vand.u32 65535, %v7561_v60  ;;  %v1374_v60 = vand.u32 65535, %v7579_v24 }
 0x2b2   : > { %v1404_v24 = vand.u32 65535, %v7597_v63  ;;  %v1434_v63 = vand.u32 65535, %v7615_v8  ;;  %v1464_v8 = vand.u32 65535, %v7633_v58  ;;  %v1494_v58 = vand.u32 65535, %v7651_v41 }
 0x2b3   : > { %v1524_v41 = vand.u32 65535, %v7669_v11  ;;  %v1554_v11 = vand.u32 65535, %v7687_v14  ;;  %v1584_v14 = vand.u32 65535, %v7705_v51  ;;  %v1614_v51 = vand.u32 65535, %v7723_v59 }
 0x2b4   : > { %v1644_v59 = vand.u32 65535, %v7741_v13  ;;  %v1674_v13 = vand.u32 65535, %v7759_v26  ;;  %v11496_v26 = vld [vmem:[#allocation44_spill] sm:$0xff] }
 0x2f4   : > { %v7813_v25 = vpop.xlane.xlu0 %1243 }
 0x2f5   : > { %vm1245_vm6 = vcmp.eq.f32.partialorder %v7515_v61, %v7813_v25 }
 0x2f6   : > { %v1246_v62 = vsel %vm1245_vm6, %v1241_v45, inf  ;;  %v1286_v45 = vcvt.s32.f32 %v1284_v6 }
 0x2f7   : > { %1247 = vmin.xlane.f32.xlu0 %v1246_v62 }
 0x2f8   : > { %v7819_v21 = vpop.xlane.xlu0 %1273  ;;  %v7821_v15 = vpop.xlane.xlu1 %1258 }
 0x2f9   : > { %vm1275_vm7 = vcmp.eq.f32.partialorder %v7528_v3, %v7819_v21  ;;  %vm1260_vm8 = vcmp.eq.f32.partialorder %v7530_v52, %v7821_v15 }
 0x2fa   : > { %v1276_v47 = vsel %vm1275_vm7, %v1271_v57, inf  ;;  %v1261_v61 = vsel %vm1260_vm8, %v1256_v1, inf  ;;  %v1331_v57 = vcvt.s32.f32 %v1329_v34  ;;  %v1316_v1 = vcvt.s32.f32 %v1314_v54 }
 0x2fb   : > { %1277 = vmin.xlane.f32.xlu0 %v1276_v47  ;;  %1262 = vmin.xlane.f32.xlu1 %v1261_v61  ;;  %v1361_v47 = vcvt.s32.f32 %v1359_v37  ;;  %v1346_v61 = vcvt.s32.f32 %v1344_v31  ;;  %v1391_v34 = vcvt.s32.f32 %v1389_v29  ;;  %v1376_v54 = vcvt.s32.f32 %v1374_v60 }
 0x2fc   : > { %v7829_v18 = vpop.xlane.xlu0 %1303  ;;  %v7831_v62 = vpop.xlane.xlu1 %1288  ;;  %v1481_v29 = vcvt.s32.f32 %v1479_v17  ;;  %v1466_v60 = vcvt.s32.f32 %v1464_v8 }
 0x2fd   : > { %vm1305_vm9 = vcmp.eq.f32.partialorder %v7546_v38, %v7829_v18  ;;  %vm1290_vm10 = vcmp.eq.f32.partialorder %v7548_v44, %v7831_v62 }
 0x2fe   : > { %v1306_v52 = vsel %vm1305_vm9, %v1301_v16, inf  ;;  %v1291_v3 = vsel %vm1290_vm10, %v1286_v45, inf }
 0x2ff   : > { %1307 = vmin.xlane.f32.xlu0 %v1306_v52  ;;  %1292 = vmin.xlane.f32.xlu1 %v1291_v3 }
 0x300   : > { %v7839_v49 = vpop.xlane.xlu0 %1333  ;;  %v7841_v12 = vpop.xlane.xlu1 %1318 }
 0x301   : > { %vm1335_vm11 = vcmp.eq.f32.partialorder %v7564_v53, %v7839_v49  ;;  %vm1320_vm12 = vcmp.eq.f32.partialorder %v7566_v50, %v7841_v12 }
 0x302   : > { %v1336_v38 = vsel %vm1335_vm11, %v1331_v57, inf  ;;  %v1321_v44 = vsel %vm1320_vm12, %v1316_v1, inf  ;;  %v1421_v57 = vcvt.s32.f32 %v1419_v27  ;;  %v1406_v1 = vcvt.s32.f32 %v1404_v24 }
 0x303   : > { %1337 = vmin.xlane.f32.xlu0 %v1336_v38  ;;  %1322 = vmin.xlane.f32.xlu1 %v1321_v44  ;;  %v1451_v38 = vcvt.s32.f32 %v1449_v19  ;;  %v1436_v44 = vcvt.s32.f32 %v1434_v63  ;;  %v1571_v63 = vcvt.s32.f32 %v1569_v2  ;;  %v1661_v2 = vcvt.s32.f32 %v1659_v46 }
 0x304   : > { %v7849_v4 = vpop.xlane.xlu0 %1363  ;;  %v7851_v6 = vpop.xlane.xlu1 %1348 }
 0x305   : > { %vm1365_vm13 = vcmp.eq.f32.partialorder %v7582_v39, %v7849_v4  ;;  %vm1350_vm14 = vcmp.eq.f32.partialorder %v7584_v35, %v7851_v6 }
 0x306   : > { %v1366_v53 = vsel %vm1365_vm13, %v1361_v47, inf  ;;  %v1351_v50 = vsel %vm1350_vm14, %v1346_v61, inf }
 0x307   : > { %1367 = vmin.xlane.f32.xlu0 %v1366_v53  ;;  %1352 = vmin.xlane.f32.xlu1 %v1351_v50 }
 0x308   : > { %v7859_v16 = vpop.xlane.xlu0 %1393  ;;  %v7861_v45 = vpop.xlane.xlu1 %1378 }
 0x309   : > { %vm1395_vm15 = vcmp.eq.f32.partialorder %v7600_v42, %v7859_v16  ;;  %vm1380_vm2 = vcmp.eq.f32.partialorder %v7602_v40, %v7861_v45 }
 0x30a   : > { %v1396_v39 = vsel %vm1395_vm15, %v1391_v34, inf  ;;  %v1381_v35 = vsel %vm1380_vm2, %v1376_v54, inf  ;;  %v1511_v34 = vcvt.s32.f32 %v1509_v9  ;;  %v1496_v54 = vcvt.s32.f32 %v1494_v58 }
 0x30b   : > { %1397 = vmin.xlane.f32.xlu0 %v1396_v39  ;;  %1382 = vmin.xlane.f32.xlu1 %v1381_v35  ;;  %v1541_v39 = vcvt.s32.f32 %v1539_v7  ;;  %v1526_v35 = vcvt.s32.f32 %v1524_v41  ;;  %v11493_v7 = vld [vmem:[#allocation41_spill] sm:$0xff]  ;;  %v11494_v41 = vld [vmem:[#allocation42_spill] sm:$0xff] }
 0x30c   : > { %v7869_v52 = vpop.xlane.xlu0 %1423  ;;  %v7871_v3 = vpop.xlane.xlu1 %1408 }
 0x30d   : > { %vm1425_vm3 = vcmp.eq.f32.partialorder %v7618_v30, %v7869_v52  ;;  %vm1410_vm4 = vcmp.eq.f32.partialorder %v7620_v23, %v7871_v3 }
 0x30e   : > { %v1426_v42 = vsel %vm1425_vm3, %v1421_v57, inf  ;;  %v1411_v40 = vsel %vm1410_vm4, %v1406_v1, inf }
 0x30f   : > { %1427 = vmin.xlane.f32.xlu0 %v1426_v42  ;;  %1412 = vmin.xlane.f32.xlu1 %v1411_v40  ;;  %v1556_v42 = vcvt.s32.f32 %v1554_v11  ;;  %v11489_v40 = vld [vmem:[#allocation37_spill] sm:$0xff]  ;;  %v1646_v11 = vcvt.s32.f32 %v1644_v59  ;;  %v1310_v59 = vcvt.f32.s32 %v7829_v18 }
 0x310   : > { %v7879_v37 = vpop.xlane.xlu0 %1453  ;;  %v7881_v31 = vpop.xlane.xlu1 %1438 }
 0x311   : > { %vm1455_vm5 = vcmp.eq.f32.partialorder %v7636_v32, %v7879_v37  ;;  %vm1440_vm6 = vcmp.eq.f32.partialorder %v7638_v33, %v7881_v31  ;;  %v1311_v18 = vshll.u32 %v1310_v59, 16 }
 0x312   : > { %v1456_v30 = vsel %vm1455_vm5, %v1451_v38, inf  ;;  %v1441_v23 = vsel %vm1440_vm6, %v1436_v44, inf }
 0x313   : > { %1457 = vmin.xlane.f32.xlu0 %v1456_v30  ;;  %1442 = vmin.xlane.f32.xlu1 %v1441_v23  ;;  %v1601_v30 = vcvt.s32.f32 %v1599_v0  ;;  %v1586_v23 = vcvt.s32.f32 %v1584_v14  ;;  %v1676_v0 = vcvt.s32.f32 %v1674_v13  ;;  %v11495_v14 = vld [vmem:[#allocation43_spill] sm:$0xff] }
 0x314   : > { %v7889_v47 = vpop.xlane.xlu0 %1483  ;;  %v7891_v61 = vpop.xlane.xlu1 %1468  ;;  %v1704_v56 = vand.u32 65535, %v11495_v14 }
 0x315   : > { %vm1485_vm7 = vcmp.eq.f32.partialorder %v7654_v20, %v7889_v47  ;;  %vm1470_vm8 = vcmp.eq.f32.partialorder %v7656_v48, %v7891_v61 }
 0x316   : > { %v1486_v32 = vsel %vm1485_vm7, %v1481_v29, inf  ;;  %v1471_v33 = vsel %vm1470_vm8, %v1466_v60, inf  ;;  %v11491_v29 = vld [vmem:[#allocation39_spill] sm:$0xff]  ;;  %v11492_v60 = vld [vmem:[#allocation40_spill] sm:$0xff] }
 0x317   : > { %1487 = vmin.xlane.f32.xlu0 %v1486_v32  ;;  %1472 = vmin.xlane.f32.xlu1 %v1471_v33 }
 0x318   : > { %v7899_v53 = vpop.xlane.xlu0 %1513  ;;  %v7901_v50 = vpop.xlane.xlu1 %1498 }
 0x319   : > { %vm1515_vm9 = vcmp.eq.f32.partialorder %v7672_v22, %v7899_v53  ;;  %vm1500_vm10 = vcmp.eq.f32.partialorder %v7674_v5, %v7901_v50  ;;  %v11488_v22 = vld [vmem:[#allocation36_spill] sm:$0xff] }
 0x31a   : > { %v1516_v20 = vsel %vm1515_vm9, %v1511_v34, inf  ;;  %v1501_v48 = vsel %vm1500_vm10, %v1496_v54, inf  ;;  %v1631_v34 = vcvt.s32.f32 %v1629_v55  ;;  %v1616_v54 = vcvt.s32.f32 %v1614_v51  ;;  %v7030_v55 = vld [vmem:[%s11028_s3 + $0x18] sm:$0xff]  }
 0x31b   : > { %1517 = vmin.xlane.f32.xlu0 %v1516_v20  ;;  %1502 = vmin.xlane.f32.xlu1 %v1501_v48  ;;  %v1250_v51 = vcvt.f32.s32 %v7813_v25  ;;  %v11500_v25 = vld [vmem:[#allocation35_spill] sm:$0xff] }
 0x31c   : > { %v7909_v27 = vpop.xlane.xlu0 %1543  ;;  %v7911_v24 = vpop.xlane.xlu1 %1528 }
 0x31d   : > { %vm1545_vm11 = vcmp.eq.f32.partialorder %v7690_v10, %v7909_v27  ;;  %vm1530_vm12 = vcmp.eq.f32.partialorder %v11488_v22, %v7911_v24  ;;  %v11490_v10 = vld [vmem:[#allocation38_spill] sm:$0xff] }
 0x31e   : > { %v1546_v5 = vsel %vm1545_vm11, %v1541_v39, inf  ;;  %v1531_v57 = vsel %vm1530_vm12, %v1526_v35, inf }
 0x31f   : > { %1547 = vmin.xlane.f32.xlu0 %v1546_v5  ;;  %1532 = vmin.xlane.f32.xlu1 %v1531_v57 }
 0x320   : > { %v7919_v1 = vpop.xlane.xlu0 %1573  ;;  %v7921_v19 = vpop.xlane.xlu1 %1558 }
 0x321   : > { %vm1575_vm13 = vcmp.eq.f32.partialorder %v11489_v40, %v7919_v1  ;;  %vm1560_vm14 = vcmp.eq.f32.partialorder %v11490_v10, %v7921_v19 }
 0x322   : > { %v1576_v38 = vsel %vm1575_vm13, %v1571_v63, inf  ;;  %v1561_v44 = vsel %vm1560_vm14, %v1556_v42, inf  ;;  %v1691_v42 = vcvt.s32.f32 %v1689_v28 }
 0x323   : > { %1577 = vmin.xlane.f32.xlu0 %v1576_v38  ;;  %1562 = vmin.xlane.f32.xlu1 %v1561_v44  ;;  %v1706_v38 = vcvt.s32.f32 %v1704_v56  ;;  %v11498_v44 = vld [vmem:[#allocation46_spill] sm:$0xff] }
 0x324   : > { %v7929_v17 = vpop.xlane.xlu0 %1603  ;;  %v7931_v8 = vpop.xlane.xlu1 %1588 }
 0x325   : > { %vm1605_vm15 = vcmp.eq.f32.partialorder %v11491_v29, %v7929_v17  ;;  %vm1590_vm2 = vcmp.eq.f32.partialorder %v11492_v60, %v7931_v8  ;;  %v1280_v29 = vcvt.f32.s32 %v7819_v21  ;;  %v11126_v21 = vmov 0.0  }
 0x326   : > { %v1606_v9 = vsel %vm1605_vm15, %v1601_v30, inf  ;;  %v1591_v58 = vsel %vm1590_vm2, %v1586_v23, inf  ;;  %v7029_v23 = vld [vmem:[%s11028_s3 + $0x10] sm:$0xff]  }
 0x327   : > { %1607 = vmin.xlane.f32.xlu0 %v1606_v9  ;;  %1592 = vmin.xlane.f32.xlu1 %v1591_v58  ;;  %v1251_v9 = vshll.u32 %v1250_v51, 16  ;;  %v1265_v58 = vcvt.f32.s32 %v7821_v15  ;;  %v1281_v46 = vshll.u32 %v1280_v29, 16 }
 0x328   : > { %v7939_v32 = vpop.xlane.xlu0 %1633  ;;  %v7941_v33 = vpop.xlane.xlu1 %1618  ;;  %6724 = vmatprep.subr.bf16.mxu0 %v7029_v23 }
 0x329   : > { %vm1635_vm3 = vcmp.eq.f32.partialorder %v11493_v7, %v7939_v32  ;;  %vm1620_vm4 = vcmp.eq.f32.partialorder %v11494_v41, %v7941_v33  ;;  %6725 = vmatpush3.bf16.msra.mxu0 %v7029_v23  ;;  %v1295_v7 = vcvt.f32.s32 %v7831_v62  ;;  %v1340_v62 = vcvt.f32.s32 %v7839_v49 }
 0x32a   : > { %v1636_v20 = vsel %vm1635_vm3, %v1631_v34, inf  ;;  %v1621_v48 = vsel %vm1620_vm4, %v1616_v54, inf  ;;  %6726 = vmatprep.subr.bf16.mxu0 %v7030_v55 }
 0x32b   : > { %1637 = vmin.xlane.f32.xlu0 %v1636_v20  ;;  %1622 = vmin.xlane.f32.xlu1 %v1621_v48  ;;  %v1266_v48 = vshll.u32 %v1265_v58, 16  ;;  %v1341_v49 = vshll.u32 %v1340_v62, 16 }
 0x32c   : > { %v7949_v39 = vpop.xlane.xlu0 %1663  ;;  %v7951_v35 = vpop.xlane.xlu1 %1648 }
 0x32d   : > { %vm1665_vm5 = vcmp.eq.f32.partialorder %v7762_v36, %v7949_v39  ;;  %vm1650_vm6 = vcmp.eq.f32.partialorder %v7764_v43, %v7951_v35  ;;  %v11497_v36 = vld [vmem:[#allocation45_spill] sm:$0xff]  ;;  %6727 = vmatpush3.bf16.msra.mxu0 %v7030_v55 }
 0x32e   : > { %v1666_v22 = vsel %vm1665_vm5, %v1661_v2, inf  ;;  %v1651_v5 = vsel %vm1650_vm6, %v1646_v11, inf }
 0x32f   : > { %1667 = vmin.xlane.f32.xlu0 %v1666_v22  ;;  %1652 = vmin.xlane.f32.xlu1 %v1651_v5  ;;  %v1296_v22 = vshll.u32 %v1295_v7, 16  ;;  %v1325_v5 = vcvt.f32.s32 %v7841_v12 }
 0x330   : > { %v7959_v57 = vpop.xlane.xlu0 %1693  ;;  %v7961_v63 = vpop.xlane.xlu1 %1678 }
 0x331   : > { %vm1695_vm7 = vcmp.eq.f32.partialorder %v11496_v26, %v7959_v57  ;;  %vm1680_vm8 = vcmp.eq.f32.partialorder %v11497_v36, %v7961_v63  ;;  %v1326_v12 = vshll.u32 %v1325_v5, 16 }
 0x332   : > { %v1696_v40 = vsel %vm1695_vm7, %v1691_v42, inf  ;;  %v1681_v43 = vsel %vm1680_vm8, %v1676_v0, inf }
 0x333   : > { %1697 = vmin.xlane.f32.xlu0 %v1696_v40  ;;  %1682 = vmin.xlane.f32.xlu1 %v1681_v43 }
 0x334   : > { %v7968_v10 = vpop.xlane.xlu1 %1708 }
 0x335   : > { %vm1710_vm9 = vcmp.eq.f32.partialorder %v11498_v44, %v7968_v10  ;;  %v1355_v44 = vcvt.f32.s32 %v7851_v6 }
 0x336   : > { %v1711_v30 = vsel %vm1710_vm9, %v1706_v38, inf  ;;  %v1370_v38 = vcvt.f32.s32 %v7849_v4 }
 0x337   : > { %1712 = vmin.xlane.f32.xlu1 %v1711_v30  ;;  %v1356_v58 = vshll.u32 %v1355_v44, 16 }
 0x338   : > { %v1371_v6 = vshll.u32 %v1370_v38, 16 }
 0x384   : > { %v1248_v60 = vpop.xlane.xlu0 %1247 }
 0x385   : > { %v1249_v34 = vcvt.f32.s32 %v1248_v60 }
 0x387   : > { %v7981_v54 = vadd.s32 %v1251_v9, %v1249_v34  ;;  %v1400_v34 = vcvt.f32.s32 %v7859_v16 }
 0x388   : > { %v1278_v41 = vpop.xlane.xlu0 %1277  ;;  %v1263_v20 = vpop.xlane.xlu1 %1262 }
 0x389   : > { %11499 = vst [vmem:[#allocation36_spill] sm:$0xff] %v7981_v54  ;;  %v1279_v2 = vcvt.f32.s32 %v1278_v41  ;;  %v1264_v11 = vcvt.f32.s32 %v1263_v20  ;;  %vm1718_vm10 = vcmp.eq.s32.totalorder %v11500_v25, %v7981_v54 }
 0x38a   : > { %v6100_v28 = vsel %vm1718_vm10, 1.0, %v11126_v21 }
 0x38b   : > { %v7988_v15 = vadd.s32 %v1281_v46, %v1279_v2  ;;  %v7990_v13 = vadd.s32 %v1266_v48, %v1264_v11  ;;  %6676 = vmatprep.mubr.msk.f32.mxu1 %vm580_vm0, %v6100_v28  ;;  %v1385_v46 = vcvt.f32.s32 %v7861_v45  ;;  %v1401_v45 = vshll.u32 %v1400_v34, 16 }
 0x38c   : > { %v1308_v42 = vpop.xlane.xlu0 %1307  ;;  %v1293_v0 = vpop.xlane.xlu1 %1292 }
 0x38d   : > { %11501 = vst [vmem:[#allocation37_spill] sm:$0xff] %v7988_v15  ;;  %11502 = vst [vmem:[#allocation38_spill] sm:$0xff] %v7990_v13  ;;  %vm1719_vm11 = vcmp.eq.s32.totalorder %v11500_v25, %v7990_v13  ;;  %v1309_v14 = vcvt.f32.s32 %v1308_v42  ;;  %v1294_v56 = vcvt.f32.s32 %v1293_v0  ;;  %vm1720_vm12 = vcmp.eq.s32.totalorder %v11500_v25, %v7988_v15 }
 0x38e   : > { %v6101_v26 = vsel %vm1719_vm11, 1.0, %v11126_v21  ;;  %v6102_v36 = vsel %vm1720_vm12, 1.0, %v11126_v21  ;;  %v1386_v28 = vshll.u32 %v1385_v46, 16 }
 0x38f   : > { %v8001_v40 = vadd.s32 %v1311_v18, %v1309_v14  ;;  %v8003_v43 = vadd.s32 %v1296_v22, %v1294_v56  ;;  %6677 = vmatmul.mubr.msk.f32.vlgmr.msra.gmra.mrb[32].mxu1 %vm580_vm0, %v6101_v26  ;;  %v1430_v18 = vcvt.f32.s32 %v7869_v52  ;;  %v1415_v22 = vcvt.f32.s32 %v7871_v3 }
 0x390   : > { %v1338_v30 = vpop.xlane.xlu0 %1337  ;;  %6679 = vmatprep.mubr.msk.f32.mxu1 %vm580_vm0, %v6102_v36  ;;  %v1323_v23 = vpop.xlane.xlu1 %1322 }
 0x391   : > { %11503 = vst [vmem:[#allocation39_spill] sm:$0xff] %v8001_v40  ;;  %11504 = vst [vmem:[#allocation40_spill] sm:$0xff] %v8003_v43  ;;  %v1339_v55 = vcvt.f32.s32 %v1338_v30  ;;  %v1324_v51 = vcvt.f32.s32 %v1323_v23  ;;  %vm1721_vm13 = vcmp.eq.s32.totalorder %v11500_v25, %v8003_v43  ;;  %vm1722_vm14 = vcmp.eq.s32.totalorder %v11500_v25, %v8001_v40 }
 0x392   : > { %v6103_v29 = vsel %vm1721_vm13, 1.0, %v11126_v21  ;;  %v6104_v60 = vsel %vm1722_vm14, 1.0, %v11126_v21  ;;  %v1431_v3 = vshll.u32 %v1430_v18, 16  ;;  %v1416_v36 = vshll.u32 %v1415_v22, 16 }
 0x393   : > { %v8015_v9 = vadd.s32 %v1341_v49, %v1339_v55  ;;  %v8017_v4 = vadd.s32 %v1326_v12, %v1324_v51  ;;  %6680 = vmatmul.mubr.msk.f32.gmra.mrb[34].mxu1 %vm580_vm0, %v6103_v29  ;;  %v1460_v49 = vcvt.f32.s32 %v7879_v37  ;;  %v1445_v12 = vcvt.f32.s32 %v7881_v31 }
 0x394   : > { %v1368_v59 = vpop.xlane.xlu0 %1367  ;;  %6682 = vmatprep.mubr.msk.f32.mxu1 %vm580_vm0, %v6104_v60  ;;  %v1353_v7 = vpop.xlane.xlu1 %1352 }
 0x395   : > { %11505 = vst [vmem:[#allocation41_spill] sm:$0xff] %v8015_v9  ;;  %11506 = vst [vmem:[#allocation42_spill] sm:$0xff] %v8017_v4  ;;  %v1369_v41 = vcvt.f32.s32 %v1368_v59  ;;  %v1354_v20 = vcvt.f32.s32 %v1353_v7  ;;  %vm1723_vm15 = vcmp.eq.s32.totalorder %v11500_v25, %v8017_v4  ;;  %vm1724_vm2 = vcmp.eq.s32.totalorder %v11500_v25, %v8015_v9 }
 0x396   : > { %v6105_v48 = vsel %vm1723_vm15, 1.0, %v11126_v21  ;;  %v6106_v2 = vsel %vm1724_vm2, 1.0, %v11126_v21  ;;  %v1461_v31 = vshll.u32 %v1460_v49, 16  ;;  %v1446_v60 = vshll.u32 %v1445_v12, 16 }
 0x397   : > { %v8029_v11 = vadd.s32 %v1371_v6, %v1369_v41  ;;  %v8031_v16 = vadd.s32 %v1356_v58, %v1354_v20  ;;  %6683 = vmatmul.mubr.msk.f32.gmra.mrb[36].mxu1 %vm580_vm0, %v6105_v48  ;;  %v1490_v6 = vcvt.f32.s32 %v7889_v47  ;;  %v1475_v58 = vcvt.f32.s32 %v7891_v61 }
 0x398   : > { %v1398_v62 = vpop.xlane.xlu0 %1397  ;;  %6685 = vmatprep.mubr.msk.f32.mxu1 %vm580_vm0, %v6106_v2  ;;  %v1383_v5 = vpop.xlane.xlu1 %1382 }
 0x399   : > { %11507 = vst [vmem:[#allocation43_spill] sm:$0xff] %v8029_v11  ;;  %11508 = vst [vmem:[#allocation44_spill] sm:$0xff] %v8031_v16  ;;  %v1399_v42 = vcvt.f32.s32 %v1398_v62  ;;  %v1384_v0 = vcvt.f32.s32 %v1383_v5  ;;  %vm1725_vm3 = vcmp.eq.s32.totalorder %v11500_v25, %v8031_v16  ;;  %vm1726_vm4 = vcmp.eq.s32.totalorder %v11500_v25, %v8029_v11 }
 0x39a   : > { %v6107_v14 = vsel %vm1725_vm3, 1.0, %v11126_v21  ;;  %v6108_v56 = vsel %vm1726_vm4, 1.0, %v11126_v21  ;;  %v1491_v61 = vshll.u32 %v1490_v6, 16  ;;  %v1476_v2 = vshll.u32 %v1475_v58, 16 }
 0x39b   : > { %v8043_v26 = vadd.s32 %v1401_v45, %v1399_v42  ;;  %v8045_v52 = vadd.s32 %v1386_v28, %v1384_v0  ;;  %6686 = vmatmul.mubr.msk.f32.gmra.mrb[38].mxu1 %vm580_vm0, %v6107_v14  ;;  %v1520_v45 = vcvt.f32.s32 %v7899_v53  ;;  %v1505_v28 = vcvt.f32.s32 %v7901_v50 }
 0x39c   : > { %v1428_v38 = vpop.xlane.xlu0 %1427  ;;  %6688 = vmatprep.mubr.msk.f32.mxu1 %vm580_vm0, %v6108_v56  ;;  %v1413_v44 = vpop.xlane.xlu1 %1412 }
 0x39d   : > { %11509 = vst [vmem:[#allocation45_spill] sm:$0xff] %v8043_v26  ;;  %11510 = vst [vmem:[#allocation46_spill] sm:$0xff] %v8045_v52  ;;  %v1429_v30 = vcvt.f32.s32 %v1428_v38  ;;  %v1414_v23 = vcvt.f32.s32 %v1413_v44  ;;  %vm1727_vm5 = vcmp.eq.s32.totalorder %v11500_v25, %v8045_v52  ;;  %vm1728_vm6 = vcmp.eq.s32.totalorder %v11500_v25, %v8043_v26  ;;  %v11575_v52 = vld [vmem:[#allocation11_spill] sm:$0xff] }
 0x39e   : > { %v6109_v55 = vsel %vm1727_vm5, 1.0, %v11126_v21  ;;  %v6110_v51 = vsel %vm1728_vm6, 1.0, %v11126_v21  ;;  %v1521_v50 = vshll.u32 %v1520_v45, 16  ;;  %v1506_v56 = vshll.u32 %v1505_v28, 16 }
 0x39f   : > { %v8057_v29 = vadd.s32 %v1431_v3, %v1429_v30  ;;  %v8059_v37 = vadd.s32 %v1416_v36, %v1414_v23  ;;  %6689 = vmatmul.mubr.msk.f32.gmra.mrb[40].mxu1 %vm580_vm0, %v6109_v55  ;;  %v1550_v3 = vcvt.f32.s32 %v7909_v27  ;;  %v1535_v36 = vcvt.f32.s32 %v7911_v24 }
 0x3a0   : > { %v1458_v34 = vpop.xlane.xlu0 %1457  ;;  %6691 = vmatprep.mubr.msk.f32.mxu1 %vm580_vm0, %v6110_v51  ;;  %v1443_v46 = vpop.xlane.xlu1 %1442 }
 0x3a1   : > { %11511 = vst [vmem:[#allocation47_spill] sm:$0xff] %v8057_v29  ;;  %11512 = vst [vmem:[#allocation48_spill] sm:$0xff] %v8059_v37  ;;  %v1459_v59 = vcvt.f32.s32 %v1458_v34  ;;  %v1444_v7 = vcvt.f32.s32 %v1443_v46  ;;  %vm1729_vm7 = vcmp.eq.s32.totalorder %v11500_v25, %v8059_v37  ;;  %vm1730_vm8 = vcmp.eq.s32.totalorder %v11500_v25, %v8057_v29  ;;  %v11570_v29 = vld [vmem:[#allocation8_spill] sm:$0xff] }
 0x3a2   : > { %v6111_v41 = vsel %vm1729_vm7, 1.0, %v11126_v21  ;;  %v6112_v20 = vsel %vm1730_vm8, 1.0, %v11126_v21  ;;  %v1551_v24 = vshll.u32 %v1550_v3, 16  ;;  %v1536_v51 = vshll.u32 %v1535_v36, 16 }
 0x3a3   : > { %v8071_v48 = vadd.s32 %v1461_v31, %v1459_v59  ;;  %v8073_v47 = vadd.s32 %v1446_v60, %v1444_v7  ;;  %6692 = vmatmul.mubr.msk.f32.gmra.mrb[42].mxu1 %vm580_vm0, %v6111_v41  ;;  %v1580_v31 = vcvt.f32.s32 %v7919_v1  ;;  %v1565_v60 = vcvt.f32.s32 %v7921_v19 }
 0x3a4   : > { %v1488_v18 = vpop.xlane.xlu0 %1487  ;;  %6694 = vmatprep.mubr.msk.f32.mxu1 %vm580_vm0, %v6112_v20  ;;  %v1473_v22 = vpop.xlane.xlu1 %1472 }
 0x3a5   : > { %11513 = vst [vmem:[#allocation49_spill] sm:$0xff] %v8071_v48  ;;  %11514 = vst [vmem:[#allocation50_spill] sm:$0xff] %v8073_v47  ;;  %v1489_v62 = vcvt.f32.s32 %v1488_v18  ;;  %v1474_v5 = vcvt.f32.s32 %v1473_v22  ;;  %vm1731_vm9 = vcmp.eq.s32.totalorder %v11500_v25, %v8073_v47  ;;  %vm1732_vm10 = vcmp.eq.s32.totalorder %v11500_v25, %v8071_v48 }
 0x3a6   : > { %v6113_v42 = vsel %vm1731_vm9, 1.0, %v11126_v21  ;;  %v6114_v0 = vsel %vm1732_vm10, 1.0, %v11126_v21  ;;  %v1581_v19 = vshll.u32 %v1580_v31, 16  ;;  %v1566_v20 = vshll.u32 %v1565_v60, 16 }
 0x3a7   : > { %v8085_v14 = vadd.s32 %v1491_v61, %v1489_v62  ;;  %v8087_v53 = vadd.s32 %v1476_v2, %v1474_v5  ;;  %6695 = vmatmul.mubr.msk.f32.gmra.mrb[44].mxu1 %vm580_vm0, %v6113_v42  ;;  %v1610_v61 = vcvt.f32.s32 %v7929_v17  ;;  %v1595_v2 = vcvt.f32.s32 %v7931_v8 }
 0x3a8   : > { %v1518_v49 = vpop.xlane.xlu0 %1517  ;;  %6697 = vmatprep.mubr.msk.f32.mxu1 %vm580_vm0, %v6114_v0  ;;  %v1503_v12 = vpop.xlane.xlu1 %1502 }
 0x3a9   : > { %11515 = vst [vmem:[#allocation51_spill] sm:$0xff] %v8085_v14  ;;  %11516 = vst [vmem:[#allocation52_spill] sm:$0xff] %v8087_v53  ;;  %v1519_v38 = vcvt.f32.s32 %v1518_v49  ;;  %v1504_v44 = vcvt.f32.s32 %v1503_v12  ;;  %vm1733_vm11 = vcmp.eq.s32.totalorder %v11500_v25, %v8087_v53  ;;  %vm1734_vm12 = vcmp.eq.s32.totalorder %v11500_v25, %v8085_v14  ;;  %v11562_v14 = vld [vmem:[#allocation7_spill] sm:$0xff] }
 0x3aa   : > { %v6115_v30 = vsel %vm1733_vm11, 1.0, %v11126_v21  ;;  %v6116_v23 = vsel %vm1734_vm12, 1.0, %v11126_v21  ;;  %v1611_v8 = vshll.u32 %v1610_v61, 16  ;;  %v1596_v0 = vshll.u32 %v1595_v2, 16 }
 0x3ab   : > { %v8099_v55 = vadd.s32 %v1521_v50, %v1519_v38  ;;  %v8101_v27 = vadd.s32 %v1506_v56, %v1504_v44  ;;  %6698 = vmatmul.mubr.msk.f32.gmra.mrb[46].mxu1 %vm580_vm0, %v6115_v30  ;;  %v1640_v50 = vcvt.f32.s32 %v7939_v32  ;;  %v1625_v56 = vcvt.f32.s32 %v7941_v33 }
 0x3ac   : > { %v1548_v6 = vpop.xlane.xlu0 %1547  ;;  %6700 = vmatprep.mubr.msk.f32.mxu1 %vm580_vm0, %v6116_v23  ;;  %v1533_v58 = vpop.xlane.xlu1 %1532 }
 0x3ad   : > { %11517 = vst [vmem:[#allocation53_spill] sm:$0xff] %v8099_v55  ;;  %11518 = vst [vmem:[#allocation54_spill] sm:$0xff] %v8101_v27  ;;  %v1549_v34 = vcvt.f32.s32 %v1548_v6  ;;  %v1534_v46 = vcvt.f32.s32 %v1533_v58  ;;  %vm1735_vm13 = vcmp.eq.s32.totalorder %v11500_v25, %v8101_v27  ;;  %vm1736_vm14 = vcmp.eq.s32.totalorder %v11500_v25, %v8099_v55 }
 0x3ae   : > { %v6117_v59 = vsel %vm1735_vm13, 1.0, %v11126_v21  ;;  %v6118_v7 = vsel %vm1736_vm14, 1.0, %v11126_v21  ;;  %v1641_v33 = vshll.u32 %v1640_v50, 16  ;;  %v1626_v23 = vshll.u32 %v1625_v56, 16 }
 0x3af   : > { %v8113_v41 = vadd.s32 %v1551_v24, %v1549_v34  ;;  %v8115_v1 = vadd.s32 %v1536_v51, %v1534_v46  ;;  %6701 = vmatmul.mubr.msk.f32.gmra.mrb[48].mxu1 %vm580_vm0, %v6117_v59  ;;  %v1670_v24 = vcvt.f32.s32 %v7949_v39  ;;  %v1655_v51 = vcvt.f32.s32 %v7951_v35 }
 0x3b0   : > { %v1578_v45 = vpop.xlane.xlu0 %1577  ;;  %6703 = vmatprep.mubr.msk.f32.mxu1 %vm580_vm0, %v6118_v7  ;;  %v1563_v28 = vpop.xlane.xlu1 %1562 }
 0x3b1   : > { %11519 = vst [vmem:[#allocation55_spill] sm:$0xff] %v8113_v41  ;;  %11520 = vst [vmem:[#allocation56_spill] sm:$0xff] %v8115_v1  ;;  %v1579_v18 = vcvt.f32.s32 %v1578_v45  ;;  %v1564_v22 = vcvt.f32.s32 %v1563_v28  ;;  %vm1737_vm15 = vcmp.eq.s32.totalorder %v11500_v25, %v8115_v1  ;;  %vm1738_vm2 = vcmp.eq.s32.totalorder %v11500_v25, %v8113_v41  ;;  %v11560_v1 = vld [vmem:[#allocation10_spill] sm:$0xff] }
 0x3b2   : > { %v6119_v62 = vsel %vm1737_vm15, 1.0, %v11126_v21  ;;  %v6120_v5 = vsel %vm1738_vm2, 1.0, %v11126_v21  ;;  %v1671_v35 = vshll.u32 %v1670_v24, 16  ;;  %v1656_v7 = vshll.u32 %v1655_v51, 16 }
 0x3b3   : > { %v8127_v42 = vadd.s32 %v1581_v19, %v1579_v18  ;;  %v8129_v17 = vadd.s32 %v1566_v20, %v1564_v22  ;;  %6704 = vmatmul.mubr.msk.f32.gmra.mrb[50].mxu1 %vm580_vm0, %v6119_v62  ;;  %v1700_v19 = vcvt.f32.s32 %v7959_v57  ;;  %v1685_v20 = vcvt.f32.s32 %v7961_v63 }
 0x3b4   : > { %v1608_v3 = vpop.xlane.xlu0 %1607  ;;  %6706 = vmatprep.mubr.msk.f32.mxu1 %vm580_vm0, %v6120_v5  ;;  %v1593_v36 = vpop.xlane.xlu1 %1592 }
 0x3b5   : > { %11521 = vst [vmem:[#allocation57_spill] sm:$0xff] %v8127_v42  ;;  %11522 = vst [vmem:[#allocation58_spill] sm:$0xff] %v8129_v17  ;;  %v1609_v49 = vcvt.f32.s32 %v1608_v3  ;;  %v1594_v12 = vcvt.f32.s32 %v1593_v36  ;;  %vm1739_vm3 = vcmp.eq.s32.totalorder %v11500_v25, %v8129_v17  ;;  %vm1740_vm4 = vcmp.eq.s32.totalorder %v11500_v25, %v8127_v42 }
 0x3b6   : > { %v6121_v38 = vsel %vm1739_vm3, 1.0, %v11126_v21  ;;  %v6122_v44 = vsel %vm1740_vm4, 1.0, %v11126_v21  ;;  %v1701_v63 = vshll.u32 %v1700_v19, 16  ;;  %v1686_v5 = vshll.u32 %v1685_v20, 16 }
 0x3b7   : > { %v8141_v30 = vadd.s32 %v1611_v8, %v1609_v49  ;;  %v8143_v32 = vadd.s32 %v1596_v0, %v1594_v12  ;;  %6707 = vmatmul.mubr.msk.f32.gmra.mrb[52].mxu1 %vm580_vm0, %v6121_v38  ;;  %v1715_v8 = vcvt.f32.s32 %v7968_v10 }
 0x3b8   : > { %v1638_v31 = vpop.xlane.xlu0 %1637  ;;  %6709 = vmatprep.mubr.msk.f32.mxu1 %vm580_vm0, %v6122_v44  ;;  %v1623_v60 = vpop.xlane.xlu1 %1622 }
 0x3b9   : > { %11523 = vst [vmem:[#allocation59_spill] sm:$0xff] %v8141_v30  ;;  %11524 = vst [vmem:[#allocation60_spill] sm:$0xff] %v8143_v32  ;;  %v1639_v6 = vcvt.f32.s32 %v1638_v31  ;;  %v1624_v58 = vcvt.f32.s32 %v1623_v60  ;;  %vm1741_vm5 = vcmp.eq.s32.totalorder %v11500_v25, %v8143_v32  ;;  %vm1742_vm6 = vcmp.eq.s32.totalorder %v11500_v25, %v8141_v30  ;;  %v11532_v60 = vld [vmem:[#allocation2_spill] sm:$0xff] }
 0x3ba   : > { %v6123_v34 = vsel %vm1741_vm5, 1.0, %v11126_v21  ;;  %v6124_v46 = vsel %vm1742_vm6, 1.0, %v11126_v21  ;;  %v1716_v44 = vshll.u32 %v1715_v8, 16  ;;  %v368_v19 = vadd.s32 16, %v11532_v60  ;;  %v11558_v32 = vld [vmem:[#allocation6_spill] sm:$0xff] }
 0x3bb   : > { %v8155_v59 = vadd.s32 %v1641_v33, %v1639_v6  ;;  %v8157_v39 = vadd.s32 %v1626_v23, %v1624_v58  ;;  %6710 = vmatmul.mubr.msk.f32.gmra.mrb[54].mxu1 %vm580_vm0, %v6123_v34  ;;  %v367_v6 = vadd.s32 8, %v11532_v60  ;;  %v369_v58 = vadd.s32 24, %v11532_v60 }
 0x3bc   : > { %v1668_v61 = vpop.xlane.xlu0 %1667  ;;  %6712 = vmatprep.mubr.msk.f32.mxu1 %vm580_vm0, %v6124_v46  ;;  %v1653_v2 = vpop.xlane.xlu1 %1652  ;;  %v8205_v34 = vstv %s6029_s29  ;;  %v371_v20 = vadd.s32 40, %v11532_v60  ;;  %v375_v8 = vadd.s32 72, %v11532_v60  ;;  %v388_v17 = vadd.s32 176, %v11532_v60 }
 0x3bd   : > { %11525 = vst [vmem:[#allocation61_spill] sm:$0xff] %v8155_v59  ;;  %11526 = vst [vmem:[#allocation62_spill] sm:$0xff] %v8157_v39  ;;  %v1669_v45 = vcvt.f32.s32 %v1668_v61  ;;  %v1654_v28 = vcvt.f32.s32 %v1653_v2  ;;  %vm1743_vm7 = vcmp.eq.s32.totalorder %v11500_v25, %v8157_v39  ;;  %vm1744_vm8 = vcmp.eq.s32.totalorder %v11500_v25, %v8155_v59 }
 0x3be   : > { %v6125_v18 = vsel %vm1743_vm7, 1.0, %v11126_v21  ;;  %v6126_v22 = vsel %vm1744_vm8, 1.0, %v11126_v21  ;;  %v401_v46 = vadd.s32 %v8205_v34, %v367_v6  ;;  %v370_v61 = vadd.s32 32, %v11532_v60 }
 0x3bf   : > { %v8169_v62 = vadd.s32 %v1671_v35, %v1669_v45  ;;  %v8171_v57 = vadd.s32 %v1656_v7, %v1654_v28  ;;  %6713 = vmatmul.mubr.msk.f32.gmra.mrb[56].mxu1 %vm580_vm0, %v6125_v18  ;;  %v400_v35 = vadd.s32 %v8205_v34, %v11532_v60  ;;  %v403_v7 = vadd.s32 %v8205_v34, %v369_v58 }
 0x3c0   : > { %v1698_v0 = vpop.xlane.xlu0 %1697  ;;  %6715 = vmatprep.mubr.msk.f32.mxu1 %vm580_vm0, %v6126_v22  ;;  %v1683_v50 = vpop.xlane.xlu1 %1682  ;;  %v373_v2 = vadd.s32 56, %v11532_v60  ;;  %v372_v45 = vadd.s32 48, %v11532_v60  ;;  %vm433_vm14 = vcmp.lt.s32.totalorder %v401_v46, 640  ;;  %v402_v28 = vadd.s32 %v8205_v34, %v368_v19 }
 0x3c1   : > { %11527 = vst [vmem:[#allocation63_spill] sm:$0xff] %v8169_v62  ;;  %11528 = vst [vmem:[#allocation64_spill] sm:$0xff] %v8171_v57  ;;  %v1699_v56 = vcvt.f32.s32 %v1698_v0  ;;  %v1684_v3 = vcvt.f32.s32 %v1683_v50  ;;  %vm1745_vm9 = vcmp.eq.s32.totalorder %v11500_v25, %v8171_v57  ;;  %vm1746_vm10 = vcmp.eq.s32.totalorder %v11500_v25, %v8169_v62  ;;  %v11556_v57 = vld [vmem:[#allocation3_spill] sm:$0xff] }
 0x3c2   : > { %v6127_v36 = vsel %vm1745_vm9, 1.0, %v11126_v21  ;;  %v6128_v49 = vsel %vm1746_vm10, 1.0, %v11126_v21  ;;  %vm432_vm15 = vcmp.lt.s32.totalorder %v400_v35, 640  ;;  %vm435_vm2 = vcmp.lt.s32.totalorder %v403_v7, 640 }
 0x3c3   : > { %v8182_v12 = vadd.s32 %v1701_v63, %v1699_v56  ;;  %v8184_v38 = vadd.s32 %v1686_v5, %v1684_v3  ;;  %6716 = vmatmul.mubr.msk.f32.gmra.mrb[58].mxu1 %vm580_vm0, %v6127_v36  ;;  %v405_v18 = vadd.s32 %v8205_v34, %v371_v20  ;;  %v404_v22 = vadd.s32 %v8205_v34, %v370_v61 }
 0x3c4   : > { %6718 = vmatprep.mubr.msk.f32.mxu1 %vm580_vm0, %v6128_v49  ;;  %v1713_v10 = vpop.xlane.xlu1 %1712  ;;  %v407_v63 = vadd.s32 %v8205_v34, %v373_v2  ;;  %v406_v5 = vadd.s32 %v8205_v34, %v372_v45  ;;  %v374_v0 = vadd.s32 64, %v11532_v60  ;;  %v377_v50 = vadd.s32 88, %v11532_v60 }
 0x3c5   : > { %11529 = vst [vmem:[#allocation65_spill] sm:$0xff] %v8182_v12  ;;  %11530 = vst [vmem:[#allocation66_spill] sm:$0xff] %v8184_v38  ;;  %v1714_v33 = vcvt.f32.s32 %v1713_v10  ;;  %vm1747_vm11 = vcmp.eq.s32.totalorder %v11500_v25, %v8184_v38  ;;  %vm1748_vm12 = vcmp.eq.s32.totalorder %v11500_v25, %v8182_v12  ;;  %v8225_v56 = vsel %vm433_vm14, 1.0, %v11126_v21 }
 0x3c6   : > { %v6129_v23 = vsel %vm1747_vm11, 1.0, %v11126_v21  ;;  %v6130_v24 = vsel %vm1748_vm12, 1.0, %v11126_v21  ;;  %11533 = vst [vmem:[#allocation68_spill] sm:$0xff] %v8225_v56  ;;  %v8228_v3 = vsel %vm432_vm15, 1.0, %v11126_v21  ;;  %v376_v36 = vadd.s32 80, %v11532_v60 }
 0x3c7   : > { %v8194_v51 = vadd.s32 %v1716_v44, %v1714_v33  ;;  %6719 = vmatmul.mubr.msk.f32.gmra.mrb[60].mxu1 %vm580_vm0, %v6129_v23  ;;  %11534 = vst [vmem:[#allocation69_spill] sm:$0xff] %v8228_v3  ;;  %v379_v49 = vadd.s32 104, %v11532_v60  ;;  %v8233_v10 = vsel %vm435_vm2, 1.0, %v11126_v21  ;;  %vm434_vm3 = vcmp.lt.s32.totalorder %v402_v28, 640 }
 0x3c8   : > { %6721 = vmatprep.mubr.msk.f32.mxu1 %vm580_vm0, %v6130_v24  ;;  %11535 = vst [vmem:[#allocation70_spill] sm:$0xff] %v8233_v10  ;;  %v378_v44 = vadd.s32 96, %v11532_v60  ;;  %v381_v33 = vadd.s32 120, %v11532_v60  ;;  %vm437_vm4 = vcmp.lt.s32.totalorder %v405_v18, 640  ;;  %vm436_vm5 = vcmp.lt.s32.totalorder %v404_v22, 640 }
 0x3c9   : > { %11531 = vst [vmem:[#allocation67_spill] sm:$0xff] %v8194_v51  ;;  %vm1749_vm13 = vcmp.eq.s32.totalorder %v11500_v25, %v8194_v51  ;;  %vm439_vm6 = vcmp.lt.s32.totalorder %v407_v63, 640  ;;  %vm438_vm7 = vcmp.lt.s32.totalorder %v406_v5, 640  ;;  %v409_v23 = vadd.s32 %v8205_v34, %v375_v8 }
 0x3ca   : > { %v6131_v31 = vsel %vm1749_vm13, 1.0, %v11126_v21  ;;  %v408_v24 = vadd.s32 %v8205_v34, %v374_v0  ;;  %v380_v6 = vadd.s32 112, %v11532_v60  ;;  %v410_v58 = vadd.s32 %v8205_v34, %v376_v36 }
 0x3cb   : > { %6722 = vmatmul.mubr.msk.f32.gmra.mrb[62].mxu1 %vm580_vm0, %v6131_v31  ;;  %v411_v31 = vadd.s32 %v8205_v34, %v377_v50  ;;  %v413_v46 = vadd.s32 %v8205_v34, %v379_v49  ;;  %v383_v35 = vadd.s32 136, %v11532_v60  ;;  %v382_v7 = vadd.s32 128, %v11532_v60 }
 0x3cc   : > { %v8246_v19 = vsel %vm434_vm3, 1.0, %v11126_v21  ;;  %v412_v20 = vadd.s32 %v8205_v34, %v378_v44  ;;  %v415_v61 = vadd.s32 %v8205_v34, %v381_v33  ;;  %v385_v2 = vadd.s32 152, %v11532_v60 }
 0x3cd   : > { %11536 = vst [vmem:[#allocation71_spill] sm:$0xff] %v8246_v19  ;;  %v8253_v45 = vsel %vm437_vm4, 1.0, %v11126_v21  ;;  %v8257_v28 = vsel %vm436_vm5, 1.0, %v11126_v21  ;;  %v8261_v8 = vsel %vm439_vm6, 1.0, %v11126_v21  ;;  %v8265_v0 = vsel %vm438_vm7, 1.0, %v11126_v21 }
 0x3ce   : > { %11537 = vst [vmem:[#allocation72_spill] sm:$0xff] %v8253_v45  ;;  %11538 = vst [vmem:[#allocation73_spill] sm:$0xff] %v8257_v28  ;;  %vm441_vm8 = vcmp.lt.s32.totalorder %v409_v23, 640  ;;  %vm440_vm9 = vcmp.lt.s32.totalorder %v408_v24, 640  ;;  %vm443_vm10 = vcmp.lt.s32.totalorder %v411_v31, 640  ;;  %v414_v50 = vadd.s32 %v8205_v34, %v380_v6 }
 0x3cf   : > { %11539 = vst [vmem:[#allocation74_spill] sm:$0xff] %v8261_v8  ;;  %11540 = vst [vmem:[#allocation75_spill] sm:$0xff] %v8265_v0  ;;  %vm442_vm11 = vcmp.lt.s32.totalorder %v410_v58, 640  ;;  %vm445_vm12 = vcmp.lt.s32.totalorder %v413_v46, 640  ;;  %v417_v18 = vadd.s32 %v8205_v34, %v383_v35  ;;  %v416_v22 = vadd.s32 %v8205_v34, %v382_v7  ;;  %v11548_v35 = vld [vmem:[#allocation5_spill] sm:$0xff] }
 0x3d0   : > { %vm444_vm13 = vcmp.lt.s32.totalorder %v412_v20, 640  ;;  %vm447_vm14 = vcmp.lt.s32.totalorder %v415_v61, 640  ;;  %v419_v63 = vadd.s32 %v8205_v34, %v385_v2  ;;  %v384_v36 = vadd.s32 144, %v11532_v60 }
 0x3d1   : > { %v8273_v5 = vsel %vm441_vm8, 1.0, %v11126_v21  ;;  %v8276_v49 = vsel %vm440_vm9, 1.0, %v11126_v21  ;;  %v8279_v44 = vsel %vm443_vm10, 1.0, %v11126_v21  ;;  %v387_v33 = vadd.s32 168, %v11532_v60 }
 0x3d2   : > { %11541 = vst [vmem:[#allocation76_spill] sm:$0xff] %v8273_v5  ;;  %11542 = vst [vmem:[#allocation77_spill] sm:$0xff] %v8276_v49  ;;  %v8283_v23 = vsel %vm442_vm11, 1.0, %v11126_v21  ;;  %v8286_v24 = vsel %vm445_vm12, 1.0, %v11126_v21  ;;  %vm446_vm15 = vcmp.lt.s32.totalorder %v414_v50, 640  ;;  %v386_v31 = vadd.s32 160, %v11532_v60 }
 0x3d3   : > { %11543 = vst [vmem:[#allocation78_spill] sm:$0xff] %v8279_v44  ;;  %11544 = vst [vmem:[#allocation79_spill] sm:$0xff] %v8283_v23  ;;  %v8290_v58 = vsel %vm444_vm13, 1.0, %v11126_v21  ;;  %v8293_v46 = vsel %vm447_vm14, 1.0, %v11126_v21  ;;  %vm449_vm2 = vcmp.lt.s32.totalorder %v417_v18, 640  ;;  %vm448_vm3 = vcmp.lt.s32.totalorder %v416_v22, 640 }
 0x3d4   : > { %11545 = vst [vmem:[#allocation80_spill] sm:$0xff] %v8286_v24  ;;  %11546 = vst [vmem:[#allocation81_spill] sm:$0xff] %v8290_v58  ;;  %vm451_vm4 = vcmp.lt.s32.totalorder %v419_v63, 640  ;;  %v418_v2 = vadd.s32 %v8205_v34, %v384_v36  ;;  %v11550_v50 = vld [vmem:[#allocation4_spill] sm:$0xff]  ;;  %v8305_v38 = vsel %vm446_vm15, 1.0, %v11126_v21  ;;  %v421_v18 = vadd.s32 %v8205_v34, %v387_v33 }
 0x3d5   : > { %11547 = vst [vmem:[#allocation82_spill] sm:$0xff] %v8293_v46  ;;  %11552 = vst [vmem:[#allocation85_spill] sm:$0xff] %v8305_v38  ;;  %v8310_v62 = vsel %vm449_vm2, 1.0, %v11126_v21  ;;  %v420_v63 = vadd.s32 %v8205_v34, %v386_v31  ;;  %v389_v33 = vadd.s32 184, %v11532_v60 }
 0x3d6   : > { %11553 = vst [vmem:[#allocation86_spill] sm:$0xff] %v8310_v62  ;;  %vm450_vm5 = vcmp.lt.s32.totalorder %v418_v2, 640  ;;  %vm453_vm6 = vcmp.lt.s32.totalorder %v421_v18, 640 }
 0x3d7   : > { %vm452_vm7 = vcmp.lt.s32.totalorder %v420_v63, 640 }
 0x462   : > { %v6678_v6 = vpop.f32.mrb[32].mxu1 }
 0x463   : > { %v2136_v7 = vsub.f32 %v6678_v6, %v11548_v35  ;;  %v8297_v20 = vsub.f32 %v11548_v35, %v6678_v6  ;;  %v1976_v61 = vpop.f32.mrb[33].mxu1  ;;  %v8313_v6 = vsel %vm448_vm3, 1.0, %v11126_v21  ;;  %v8320_v35 = vsel %vm451_vm4, 1.0, %v11126_v21 }
 0x464   : > { %v2135_v51 = vsub.f32 %v1976_v61, %v11550_v50  ;;  %v8302_v12 = vsub.f32 %v11550_v50, %v1976_v61  ;;  %11554 = vst [vmem:[#allocation87_spill] sm:$0xff] %v8313_v6  ;;  %11555 = vst [vmem:[#allocation88_spill] sm:$0xff] %v8320_v35 }
 0x465   : > { %11549 = vst [vmem:[#allocation83_spill] sm:$0xff] %v8297_v20  ;;  %v2168_v22 = vmul.f32 %v8225_v56, %v2136_v7 }
 0x466   : > { %11551 = vst [vmem:[#allocation84_spill] sm:$0xff] %v8302_v12  ;;  %v2167_v36 = vmul.f32 %v8228_v3, %v2135_v51  ;;  %v2349_v61 = vpack.c.bf16 %v8297_v20, %v8302_v12  ;;  %v6681_v50 = vpop.f32.mrb[34].mxu1 }
 0x467   : > { %v2200_v7 = vmul.f32 %v2168_v22, %v2168_v22  ;;  %v2138_v59 = vsub.f32 %v6681_v50, %v11556_v57  ;;  %v8325_v39 = vsub.f32 %v11556_v57, %v6681_v50  ;;  %v1986_v30 = vpop.f32.mrb[35].mxu1 }
 0x468   : > { %v2199_v31 = vmul.f32 %v2167_v36, %v2167_v36  ;;  %v2137_v51 = vsub.f32 %v1986_v30, %v11558_v32  ;;  %v8329_v42 = vsub.f32 %v11558_v32, %v1986_v30  ;;  %6728 = vmatprep.mubr.msk.bf16.mxu0 %vm832_vm1, %v2349_v61  ;;  %v423_v30 = vadd.s32 %v8205_v34, %v389_v33 }
 0x469   : > { %11557 = vst [vmem:[#allocation89_spill] sm:$0xff] %v8325_v39  ;;  %v2232_v21 = vsel %vm832_vm1, %v2200_v7, 0.0  ;;  %v2170_v22 = vmul.f32 %v8233_v10, %v2138_v59 }
 0x46a   : > { %11559 = vst [vmem:[#allocation90_spill] sm:$0xff] %v8329_v42  ;;  %v2231_v50 = vsel %vm832_vm1, %v2199_v31, 0.0  ;;  %v2169_v57 = vmul.f32 %v8246_v19, %v2137_v51  ;;  %v2350_v36 = vpack.c.bf16 %v8325_v39, %v8329_v42  ;;  %v6684_v41 = vpop.f32.mrb[36].mxu1  ;;  %v11564_v51 = vmov 0.0  }
 0x46b   : > { %v2233_v32 = vadd.f32 %v2232_v21, %v2231_v50  ;;  %v2202_v61 = vmul.f32 %v2170_v22, %v2170_v22  ;;  %v2140_v55 = vsub.f32 %v6684_v41, %v11560_v1  ;;  %v8342_v7 = vsub.f32 %v11560_v1, %v6684_v41  ;;  %v1996_v59 = vpop.f32.mrb[37].mxu1 }
 0x46c   : > { %v2201_v27 = vmul.f32 %v2169_v57, %v2169_v57  ;;  %v2139_v53 = vsub.f32 %v1996_v59, %v11562_v14  ;;  %v8346_v31 = vsub.f32 %v11562_v14, %v1996_v59  ;;  %6729 = vmatmul.mubr.msk.bf16.vlgmr.msra.gmra.mrb[32].mxu0 %vm832_vm1, %v2350_v36  ;;  %v8351_v48 = vsel %vm450_vm5, 1.0, %v11564_v51  ;;  %v11568_v59 = vld [vmem:[#allocation9_spill] sm:$0xff] }
 0x46d   : > { %11561 = vst [vmem:[#allocation91_spill] sm:$0xff] %v8342_v7  ;;  %11565 = vst [vmem:[#allocation93_spill] sm:$0xff] %v8351_v48  ;;  %v2172_v21 = vmul.f32 %v8253_v45, %v2140_v55  ;;  %v8356_v33 = vsel %vm453_vm6, 1.0, %v11564_v51  ;;  %v8360_v41 = vsel %vm452_vm7, 1.0, %v11564_v51  ;;  %v422_v57 = vadd.s32 %v8205_v34, %v388_v17 }
 0x46e   : > { %11563 = vst [vmem:[#allocation92_spill] sm:$0xff] %v8346_v31  ;;  %11566 = vst [vmem:[#allocation94_spill] sm:$0xff] %v8356_v33  ;;  %v2234_v22 = vsel %vm832_vm1, %v2201_v27, 0.0  ;;  %v2171_v50 = vmul.f32 %v8257_v28, %v2139_v53  ;;  %v2351_v2 = vpack.c.bf16 %v8342_v7, %v8346_v31  ;;  %v6687_v36 = vpop.f32.mrb[38].mxu1  ;;  %vm455_vm8 = vcmp.lt.s32.totalorder %v423_v30, 640 }
 0x46f   : > { %11567 = vst [vmem:[#allocation95_spill] sm:$0xff] %v8360_v41  ;;  %v2236_v55 = vsel %vm832_vm1, %v2202_v61, 0.0  ;;  %v2235_v18 = vadd.f32 %v2234_v22, %v2233_v32  ;;  %v2142_v14 = vsub.f32 %v6687_v36, %v11568_v59  ;;  %v8370_v63 = vsub.f32 %v11568_v59, %v6687_v36  ;;  %v2006_v1 = vpop.f32.mrb[39].mxu1 }
 0x470   : > { %v2204_v47 = vmul.f32 %v2172_v21, %v2172_v21  ;;  %v2203_v17 = vmul.f32 %v2171_v50, %v2171_v50  ;;  %v2141_v27 = vsub.f32 %v2006_v1, %v11570_v29  ;;  %v8374_v53 = vsub.f32 %v11570_v29, %v2006_v1  ;;  %6732 = vmatprep.mubr.msk.bf16.mxu0 %vm832_vm1, %v2351_v2  ;;  %v11573_v2 = vld [vmem:[#allocation14_spill] sm:$0xff] }
 0x471   : > { %11569 = vst [vmem:[#allocation96_spill] sm:$0xff] %v8370_v63  ;;  %v2237_v37 = vadd.f32 %v2236_v55, %v2235_v18  ;;  %v2174_v30 = vmul.f32 %v8261_v8, %v2142_v14  ;;  %v8379_v32 = vsel %vm455_vm8, 1.0, %v11564_v51  ;;  %v391_v61 = vadd.s32 200, %v11532_v60 }
 0x472   : > { %11571 = vst [vmem:[#allocation97_spill] sm:$0xff] %v8374_v53  ;;  %11572 = vst [vmem:[#allocation98_spill] sm:$0xff] %v8379_v32  ;;  %v2238_v22 = vsel %vm832_vm1, %v2203_v17, 0.0  ;;  %v2173_v21 = vmul.f32 %v8265_v0, %v2141_v27  ;;  %v2352_v50 = vpack.c.bf16 %v8370_v63, %v8374_v53  ;;  %v6690_v36 = vpop.f32.mrb[40].mxu1  ;;  %vm454_vm9 = vcmp.lt.s32.totalorder %v422_v57, 640 }
 0x473   : > { %v2239_v1 = vadd.f32 %v2238_v22, %v2237_v37  ;;  %v2206_v29 = vmul.f32 %v2174_v30, %v2174_v30  ;;  %v2144_v55 = vsub.f32 %v6690_v36, %v11573_v2  ;;  %v8388_v14 = vsub.f32 %v11573_v2, %v6690_v36  ;;  %v2016_v18 = vpop.f32.mrb[41].mxu1 }
 0x474   : > { %v2240_v59 = vsel %vm832_vm1, %v2204_v47, 0.0  ;;  %v2205_v26 = vmul.f32 %v2173_v21, %v2173_v21  ;;  %v2143_v17 = vsub.f32 %v2016_v18, %v11575_v52  ;;  %v8393_v27 = vsub.f32 %v11575_v52, %v2016_v18  ;;  %6733 = vmatmul.mubr.msk.bf16.gmra.mrb[36].mxu0 %vm832_vm1, %v2352_v50 }
 0x475   : > { %11574 = vst [vmem:[#allocation99_spill] sm:$0xff] %v8388_v14  ;;  %v2241_v11 = vadd.f32 %v2240_v59, %v2239_v1  ;;  %v2176_v37 = vmul.f32 %v8273_v5, %v2144_v55  ;;  %v425_v30 = vadd.s32 %v8205_v34, %v391_v61  ;;  %v390_v22 = vadd.s32 192, %v11532_v60  ;;  %v11578_v1 = vld [vmem:[#allocation13_spill] sm:$0xff] }
 0x476   : > { %11576 = vst [vmem:[#allocation100_spill] sm:$0xff] %v8393_v27  ;;  %v2242_v36 = vsel %vm832_vm1, %v2205_v26, 0.0  ;;  %v2175_v2 = vmul.f32 %v8276_v49, %v2143_v17  ;;  %v2353_v47 = vpack.c.bf16 %v8388_v14, %v8393_v27  ;;  %v6693_v21 = vpop.f32.mrb[42].mxu1  ;;  %v8405_v18 = vsel %vm454_vm9, 1.0, %v11564_v51  ;;  %v11580_v17 = vld [vmem:[#allocation12_spill] sm:$0xff] }
 0x477   : > { %11577 = vst [vmem:[#allocation101_spill] sm:$0xff] %v8405_v18  ;;  %v2244_v59 = vsel %vm832_vm1, %v2206_v29, 0.0  ;;  %v2243_v50 = vadd.f32 %v2242_v36, %v2241_v11  ;;  %v2146_v55 = vsub.f32 %v6693_v21, %v11578_v1  ;;  %v8410_v61 = vsub.f32 %v11578_v1, %v6693_v21  ;;  %v2026_v52 = vpop.f32.mrb[43].mxu1  ;;  %v11582_v1 = vld [vmem:[#allocation18_spill] sm:$0xff] }
 0x478   : > { %v2208_v26 = vmul.f32 %v2176_v37, %v2176_v37  ;;  %v2207_v16 = vmul.f32 %v2175_v2, %v2175_v2  ;;  %v2145_v9 = vsub.f32 %v2026_v52, %v11580_v17  ;;  %v8414_v4 = vsub.f32 %v11580_v17, %v2026_v52  ;;  %6736 = vmatprep.mubr.msk.bf16.mxu0 %vm832_vm1, %v2353_v47 }
 0x479   : > { %11579 = vst [vmem:[#allocation102_spill] sm:$0xff] %v8410_v61  ;;  %v2245_v57 = vadd.f32 %v2244_v59, %v2243_v50  ;;  %v2178_v40 = vmul.f32 %v8279_v44, %v2146_v55  ;;  %vm457_vm10 = vcmp.lt.s32.totalorder %v425_v30, 640  ;;  %v424_v11 = vadd.s32 %v8205_v34, %v390_v22 }
 0x47a   : > { %11581 = vst [vmem:[#allocation103_spill] sm:$0xff] %v8414_v4  ;;  %v2246_v29 = vsel %vm832_vm1, %v2207_v16, 0.0  ;;  %v2177_v36 = vmul.f32 %v8283_v23, %v2145_v9  ;;  %v2354_v2 = vpack.c.bf16 %v8410_v61, %v8414_v4  ;;  %v6696_v37 = vpop.f32.mrb[44].mxu1  ;;  %v393_v21 = vadd.s32 216, %v11532_v60  ;;  %v11584_v16 = vld [vmem:[#allocation15_spill] sm:$0xff] }
 0x47b   : > { %v2247_v52 = vadd.f32 %v2246_v29, %v2245_v57  ;;  %v2210_v17 = vmul.f32 %v2178_v40, %v2178_v40  ;;  %v2148_v47 = vsub.f32 %v6696_v37, %v11582_v1  ;;  %v8426_v59 = vsub.f32 %v11582_v1, %v6696_v37  ;;  %v2036_v50 = vpop.f32.mrb[45].mxu1 }
 0x47c   : > { %v2248_v22 = vsel %vm832_vm1, %v2208_v26, 0.0  ;;  %v2209_v55 = vmul.f32 %v2177_v36, %v2177_v36  ;;  %v2147_v43 = vsub.f32 %v2036_v50, %v11584_v16  ;;  %v8431_v9 = vsub.f32 %v11584_v16, %v2036_v50  ;;  %6737 = vmatmul.mubr.msk.bf16.gmra.mrb[40].mxu0 %vm832_vm1, %v2354_v2 }
 0x47d   : > { %11583 = vst [vmem:[#allocation104_spill] sm:$0xff] %v8426_v59  ;;  %v2249_v15 = vadd.f32 %v2248_v22, %v2247_v52  ;;  %v2180_v57 = vmul.f32 %v8286_v24, %v2148_v47  ;;  %v8437_v40 = vsel %vm457_vm10, 1.0, %v11564_v51  ;;  %vm456_vm11 = vcmp.lt.s32.totalorder %v424_v11, 640  ;;  %v11587_v22 = vld [vmem:[#allocation17_spill] sm:$0xff] }
 0x47e   : > { %11585 = vst [vmem:[#allocation105_spill] sm:$0xff] %v8431_v9  ;;  %11586 = vst [vmem:[#allocation106_spill] sm:$0xff] %v8437_v40  ;;  %v2250_v29 = vsel %vm832_vm1, %v2209_v55, 0.0  ;;  %v2179_v26 = vmul.f32 %v8290_v58, %v2147_v43  ;;  %v2355_v36 = vpack.c.bf16 %v8426_v59, %v8431_v9  ;;  %v6699_v37 = vpop.f32.mrb[46].mxu1  ;;  %v427_v50 = vadd.s32 %v8205_v34, %v393_v21  ;;  %v11589_v55 = vld [vmem:[#allocation16_spill] sm:$0xff] }
 0x47f   : > { %v2252_v2 = vsel %vm832_vm1, %v2210_v17, 0.0  ;;  %v2251_v52 = vadd.f32 %v2250_v29, %v2249_v15  ;;  %v2150_v47 = vsub.f32 %v6699_v37, %v11587_v22  ;;  %v8447_v30 = vsub.f32 %v11587_v22, %v6699_v37  ;;  %v2046_v16 = vpop.f32.mrb[47].mxu1 }
 0x480   : > { %v2212_v1 = vmul.f32 %v2180_v57, %v2180_v57  ;;  %v2211_v13 = vmul.f32 %v2179_v26, %v2179_v26  ;;  %v2149_v54 = vsub.f32 %v2046_v16, %v11589_v55  ;;  %v8451_v43 = vsub.f32 %v11589_v55, %v2046_v16  ;;  %6740 = vmatprep.mubr.msk.bf16.mxu0 %vm832_vm1, %v2355_v36 }
 0x481   : > { %11588 = vst [vmem:[#allocation107_spill] sm:$0xff] %v8447_v30  ;;  %v2253_v58 = vadd.f32 %v2252_v2, %v2251_v52  ;;  %v2182_v21 = vmul.f32 %v8293_v46, %v2150_v47  ;;  %v8457_v15 = vsel %vm456_vm11, 1.0, %v11564_v51  ;;  %v392_v17 = vadd.s32 208, %v11532_v60  ;;  %v11592_v2 = vld [vmem:[#allocation22_spill] sm:$0xff]  ;;  %v11594_v46 = vld [vmem:[#allocation19_spill] sm:$0xff] }
 0x482   : > { %11590 = vst [vmem:[#allocation108_spill] sm:$0xff] %v8451_v43  ;;  %11591 = vst [vmem:[#allocation109_spill] sm:$0xff] %v8457_v15  ;;  %v2254_v29 = vsel %vm832_vm1, %v2211_v13, 0.0  ;;  %v2181_v57 = vmul.f32 %v8305_v38, %v2149_v54  ;;  %v2356_v26 = vpack.c.bf16 %v8447_v30, %v8451_v43  ;;  %v6702_v16 = vpop.f32.mrb[48].mxu1  ;;  %vm459_vm12 = vcmp.lt.s32.totalorder %v427_v50, 640 }
 0x483   : > { %v2255_v37 = vadd.f32 %v2254_v29, %v2253_v58  ;;  %v2214_v36 = vmul.f32 %v2182_v21, %v2182_v21  ;;  %v2152_v52 = vsub.f32 %v6702_v16, %v11592_v2  ;;  %v8466_v47 = vsub.f32 %v11592_v2, %v6702_v16  ;;  %v2056_v11 = vpop.f32.mrb[49].mxu1 }
 0x484   : > { %v2256_v55 = vsel %vm832_vm1, %v2212_v1, 0.0  ;;  %v2213_v22 = vmul.f32 %v2181_v57, %v2181_v57  ;;  %v2151_v13 = vsub.f32 %v2056_v11, %v11594_v46  ;;  %v8471_v54 = vsub.f32 %v11594_v46, %v2056_v11  ;;  %6741 = vmatmul.mubr.msk.bf16.gmra.mrb[44].mxu0 %vm832_vm1, %v2356_v26 }
 0x485   : > { %11593 = vst [vmem:[#allocation110_spill] sm:$0xff] %v8466_v47  ;;  %v2257_v38 = vadd.f32 %v2256_v55, %v2255_v37  ;;  %v2184_v58 = vmul.f32 %v8310_v62, %v2152_v52  ;;  %v426_v21 = vadd.s32 %v8205_v34, %v392_v17  ;;  %v395_v29 = vadd.s32 232, %v11532_v60  ;;  %v11597_v37 = vld [vmem:[#allocation21_spill] sm:$0xff] }
 0x486   : > { %11595 = vst [vmem:[#allocation111_spill] sm:$0xff] %v8471_v54  ;;  %v2258_v16 = vsel %vm832_vm1, %v2213_v22, 0.0  ;;  %v2183_v2 = vmul.f32 %v8313_v6, %v2151_v13  ;;  %v2357_v1 = vpack.c.bf16 %v8466_v47, %v8471_v54  ;;  %v6705_v57 = vpop.f32.mrb[50].mxu1  ;;  %v8483_v11 = vsel %vm459_vm12, 1.0, %v11564_v51  ;;  %v11599_v13 = vld [vmem:[#allocation20_spill] sm:$0xff] }
 0x487   : > { %11596 = vst [vmem:[#allocation112_spill] sm:$0xff] %v8483_v11  ;;  %v2260_v55 = vsel %vm832_vm1, %v2214_v36, 0.0  ;;  %v2259_v26 = vadd.f32 %v2258_v16, %v2257_v38  ;;  %v2154_v52 = vsub.f32 %v6705_v57, %v11597_v37  ;;  %v8488_v17 = vsub.f32 %v11597_v37, %v6705_v57  ;;  %v2066_v46 = vpop.f32.mrb[51].mxu1  ;;  %v11601_v37 = vld [vmem:[#allocation26_spill] sm:$0xff] }
 0x488   : > { %v2216_v22 = vmul.f32 %v2184_v58, %v2184_v58  ;;  %v2215_v62 = vmul.f32 %v2183_v2, %v2183_v2  ;;  %v2153_v6 = vsub.f32 %v2066_v46, %v11599_v13  ;;  %v8492_v54 = vsub.f32 %v11599_v13, %v2066_v46  ;;  %6744 = vmatprep.mubr.msk.bf16.mxu0 %vm832_vm1, %v2357_v1 }
 0x489   : > { %11598 = vst [vmem:[#allocation113_spill] sm:$0xff] %v8488_v17  ;;  %v2261_v50 = vadd.f32 %v2260_v55, %v2259_v26  ;;  %v2186_v47 = vmul.f32 %v8320_v35, %v2154_v52  ;;  %vm458_vm13 = vcmp.lt.s32.totalorder %v426_v21, 640  ;;  %v394_v38 = vadd.s32 224, %v11532_v60 }
 0x48a   : > { %11600 = vst [vmem:[#allocation114_spill] sm:$0xff] %v8492_v54  ;;  %v2262_v36 = vsel %vm832_vm1, %v2215_v62, 0.0  ;;  %v2185_v16 = vmul.f32 %v8351_v48, %v2153_v6  ;;  %v2358_v2 = vpack.c.bf16 %v8488_v17, %v8492_v54  ;;  %v6708_v58 = vpop.f32.mrb[52].mxu1  ;;  %v429_v57 = vadd.s32 %v8205_v34, %v395_v29  ;;  %v11603_v62 = vld [vmem:[#allocation23_spill] sm:$0xff] }
 0x48b   : > { %v2263_v46 = vadd.f32 %v2262_v36, %v2261_v50  ;;  %v2218_v13 = vmul.f32 %v2186_v47, %v2186_v47  ;;  %v2156_v1 = vsub.f32 %v6708_v58, %v11601_v37  ;;  %v8504_v55 = vsub.f32 %v11601_v37, %v6708_v58  ;;  %v2076_v26 = vpop.f32.mrb[53].mxu1  ;;  %v11608_v37 = vld [vmem:[#allocation24_spill] sm:$0xff] }
 0x48c   : > { %v2264_v52 = vsel %vm832_vm1, %v2216_v22, 0.0  ;;  %v2217_v35 = vmul.f32 %v2185_v16, %v2185_v16  ;;  %v2155_v43 = vsub.f32 %v2076_v26, %v11603_v62  ;;  %v8509_v6 = vsub.f32 %v11603_v62, %v2076_v26  ;;  %6745 = vmatmul.mubr.msk.bf16.gmra.mrb[48].mxu0 %vm832_vm1, %v2358_v2  ;;  %v11606_v26 = vld [vmem:[#allocation25_spill] sm:$0xff] }
 0x48d   : > { %11602 = vst [vmem:[#allocation115_spill] sm:$0xff] %v8504_v55  ;;  %v2265_v48 = vadd.f32 %v2264_v52, %v2263_v46  ;;  %v2188_v29 = vmul.f32 %v8356_v33, %v2156_v1  ;;  %v8515_v47 = vsel %vm458_vm13, 1.0, %v11564_v51  ;;  %v428_v50 = vadd.s32 %v8205_v34, %v394_v38 }
 0x48e   : > { %11604 = vst [vmem:[#allocation116_spill] sm:$0xff] %v8509_v6  ;;  %11605 = vst [vmem:[#allocation117_spill] sm:$0xff] %v8515_v47  ;;  %v2266_v36 = vsel %vm832_vm1, %v2217_v35, 0.0  ;;  %v2187_v22 = vmul.f32 %v8360_v41, %v2155_v43  ;;  %v2359_v16 = vpack.c.bf16 %v8504_v55, %v8509_v6  ;;  %v6711_v58 = vpop.f32.mrb[54].mxu1  ;;  %vm461_vm14 = vcmp.lt.s32.totalorder %v429_v57, 640 }
 0x48f   : > { %v2268_v2 = vsel %vm832_vm1, %v2218_v13, 0.0  ;;  %v2267_v46 = vadd.f32 %v2266_v36, %v2265_v48  ;;  %v2158_v1 = vsub.f32 %v6711_v58, %v11606_v26  ;;  %v8525_v21 = vsub.f32 %v11606_v26, %v6711_v58  ;;  %v2086_v52 = vpop.f32.mrb[55].mxu1 }
 0x490   : > { %v2220_v62 = vmul.f32 %v2188_v29, %v2188_v29  ;;  %v2219_v38 = vmul.f32 %v2187_v22, %v2187_v22  ;;  %v2157_v35 = vsub.f32 %v2086_v52, %v11608_v37  ;;  %v8529_v43 = vsub.f32 %v11608_v37, %v2086_v52  ;;  %6748 = vmatprep.mubr.msk.bf16.mxu0 %vm832_vm1, %v2359_v16 }
 0x491   : > { %11607 = vst [vmem:[#allocation118_spill] sm:$0xff] %v8525_v21  ;;  %v2269_v41 = vadd.f32 %v2268_v2, %v2267_v46  ;;  %v2190_v57 = vmul.f32 %v8379_v32, %v2158_v1  ;;  %v8534_v48 = vsel %vm461_vm14, 1.0, %v11564_v51  ;;  %v397_v13 = vadd.s32 248, %v11532_v60  ;;  %v11611_v2 = vld [vmem:[#allocation30_spill] sm:$0xff] }
 0x492   : > { %11609 = vst [vmem:[#allocation119_spill] sm:$0xff] %v8529_v43  ;;  %11610 = vst [vmem:[#allocation120_spill] sm:$0xff] %v8534_v48  ;;  %v2270_v36 = vsel %vm832_vm1, %v2219_v38, 0.0  ;;  %v2189_v29 = vmul.f32 %v8405_v18, %v2157_v35  ;;  %v2360_v22 = vpack.c.bf16 %v8525_v21, %v8529_v43  ;;  %v6714_v58 = vpop.f32.mrb[56].mxu1  ;;  %v396_v52 = vadd.s32 240, %v11532_v60  ;;  %v11613_v38 = vld [vmem:[#allocation27_spill] sm:$0xff] }
 0x493   : > { %v2271_v37 = vadd.f32 %v2270_v36, %v2269_v41  ;;  %v2222_v16 = vmul.f32 %v2190_v57, %v2190_v57  ;;  %v2160_v46 = vsub.f32 %v6714_v58, %v11611_v2  ;;  %v8544_v1 = vsub.f32 %v11611_v2, %v6714_v58  ;;  %v2096_v26 = vpop.f32.mrb[57].mxu1 }
 0x494   : > { %v2272_v32 = vsel %vm832_vm1, %v2220_v62, 0.0  ;;  %v2221_v33 = vmul.f32 %v2189_v29, %v2189_v29  ;;  %v2159_v6 = vsub.f32 %v2096_v26, %v11613_v38  ;;  %v8549_v35 = vsub.f32 %v11613_v38, %v2096_v26  ;;  %6749 = vmatmul.mubr.msk.bf16.gmra.mrb[52].mxu0 %vm832_vm1, %v2360_v22  ;;  %v11615_v22 = vld [vmem:[#allocation29_spill] sm:$0xff] }
 0x495   : > { %11612 = vst [vmem:[#allocation121_spill] sm:$0xff] %v8544_v1  ;;  %v2273_v18 = vadd.f32 %v2272_v32, %v2271_v37  ;;  %v2192_v41 = vmul.f32 %v8437_v40, %v2160_v46  ;;  %vm460_vm15 = vcmp.lt.s32.totalorder %v428_v50, 640  ;;  %v431_v57 = vadd.s32 %v8205_v34, %v397_v13 }
 0x496   : > { %11614 = vst [vmem:[#allocation122_spill] sm:$0xff] %v8549_v35  ;;  %v2274_v36 = vsel %vm832_vm1, %v2221_v33, 0.0  ;;  %v2191_v58 = vmul.f32 %v8457_v15, %v2159_v6  ;;  %v2361_v62 = vpack.c.bf16 %v8544_v1, %v8549_v35  ;;  %v6717_v29 = vpop.f32.mrb[58].mxu1  ;;  %v430_v2 = vadd.s32 %v8205_v34, %v396_v52  ;;  %v11617_v33 = vld [vmem:[#allocation28_spill] sm:$0xff] }
 0x497   : > { %v2276_v26 = vsel %vm832_vm1, %v2222_v16, 0.0  ;;  %v2275_v38 = vadd.f32 %v2274_v36, %v2273_v18  ;;  %v2162_v32 = vsub.f32 %v6717_v29, %v11615_v22  ;;  %v8562_v37 = vsub.f32 %v11615_v22, %v6717_v29  ;;  %v2106_v46 = vpop.f32.mrb[59].mxu1 }
 0x498   : > { %v2224_v13 = vmul.f32 %v2192_v41, %v2192_v41  ;;  %v2223_v40 = vmul.f32 %v2191_v58, %v2191_v58  ;;  %v2161_v43 = vsub.f32 %v2106_v46, %v11617_v33  ;;  %v8566_v6 = vsub.f32 %v11617_v33, %v2106_v46  ;;  %6752 = vmatprep.mubr.msk.bf16.mxu0 %vm832_vm1, %v2361_v62  ;;  %v11620_v62 = vld [vmem:[#allocation34_spill] sm:$0xff]  ;;  %v11622_v33 = vld [vmem:[#allocation31_spill] sm:$0xff] }
 0x499   : > { %11616 = vst [vmem:[#allocation123_spill] sm:$0xff] %v8562_v37  ;;  %v2277_v15 = vadd.f32 %v2276_v26, %v2275_v38  ;;  %v2194_v34 = vmul.f32 %v8483_v11, %v2162_v32  ;;  %v8572_v18 = vsel %vm460_vm15, 1.0, %v11564_v51  ;;  %vm463_vm2 = vcmp.lt.s32.totalorder %v431_v57, 640 }
 0x49a   : > { %11618 = vst [vmem:[#allocation124_spill] sm:$0xff] %v8566_v6  ;;  %11619 = vst [vmem:[#allocation125_spill] sm:$0xff] %v8572_v18  ;;  %v2278_v52 = vsel %vm832_vm1, %v2223_v40, 0.0  ;;  %v2193_v16 = vmul.f32 %v8515_v47, %v2161_v43  ;;  %v2362_v41 = vpack.c.bf16 %v8562_v37, %v8566_v6  ;;  %v6720_v36 = vpop.f32.mrb[60].mxu1  ;;  %vm462_vm3 = vcmp.lt.s32.totalorder %v430_v2, 640 }
 0x49b   : > { %v2279_v58 = vadd.f32 %v2278_v52, %v2277_v15  ;;  %v2226_v29 = vmul.f32 %v2194_v34, %v2194_v34  ;;  %v2164_v38 = vsub.f32 %v6720_v36, %v11620_v62  ;;  %v8580_v26 = vsub.f32 %v11620_v62, %v6720_v36  ;;  %v2116_v50 = vpop.f32.mrb[61].mxu1 }
 0x49c   : > { %v2280_v32 = vsel %vm832_vm1, %v2224_v13, 0.0  ;;  %v2225_v46 = vmul.f32 %v2193_v16, %v2193_v16  ;;  %v2163_v40 = vsub.f32 %v2116_v50, %v11622_v33  ;;  %v8585_v43 = vsub.f32 %v11622_v33, %v2116_v50  ;;  %6753 = vmatmul.mubr.msk.bf16.gmra.mrb[56].mxu0 %vm832_vm1, %v2362_v41 }
 0x49d   : > { %11621 = vst [vmem:[#allocation126_spill] sm:$0xff] %v8580_v26  ;;  %v2281_v22 = vadd.f32 %v2280_v32, %v2279_v58  ;;  %v2196_v15 = vmul.f32 %v8534_v48, %v2164_v38  ;;  %v8591_v34 = vsel %vm463_vm2, 1.0, %v11564_v51  ;;  %v8599_v50 = vsel %vm462_vm3, 1.0, %v11564_v51  ;;  %v11626_v38 = vld [vmem:[#allocation33_spill] sm:$0xff] }
 0x49e   : > { %11623 = vst [vmem:[#allocation127_spill] sm:$0xff] %v8585_v43  ;;  %11624 = vst [vmem:[#allocation128_spill] sm:$0xff] %v8591_v34  ;;  %v2282_v52 = vsel %vm832_vm1, %v2225_v46, 0.0  ;;  %v2195_v36 = vmul.f32 %v8572_v18, %v2163_v40  ;;  %v2363_v13 = vpack.c.bf16 %v8580_v26, %v8585_v43  ;;  %v6723_v16 = vpop.f32.mrb[62].mxu1  ;;  %v2284_v41 = vsel %vm832_vm1, %v2226_v29, 0.0  ;;  %v11628_v40 = vld [vmem:[#allocation32_spill] sm:$0xff] }
 0x49f   : > { %11625 = vst [vmem:[#allocation129_spill] sm:$0xff] %v8599_v50  ;;  %v2283_v58 = vadd.f32 %v2282_v52, %v2281_v22  ;;  %v2166_v32 = vsub.f32 %v6723_v16, %v11626_v38  ;;  %v8604_v57 = vsub.f32 %v11626_v38, %v6723_v16  ;;  %v2126_v33 = vpop.f32.mrb[63].mxu1  ;;  %v2228_v46 = vmul.f32 %v2196_v15, %v2196_v15 }
 0x4a0   : > { %v2227_v62 = vmul.f32 %v2195_v36, %v2195_v36  ;;  %v2165_v18 = vsub.f32 %v2126_v33, %v11628_v40  ;;  %v8608_v48 = vsub.f32 %v11628_v40, %v2126_v33  ;;  %6756 = vmatprep.mubr.msk.bf16.mxu0 %vm832_vm1, %v2363_v13 }
 0x4a1   : > { %11627 = vst [vmem:[#allocation130_spill] sm:$0xff] %v8604_v57  ;;  %v2285_v2 = vadd.f32 %v2284_v41, %v2283_v58  ;;  %v2198_v43 = vmul.f32 %v8591_v34, %v2166_v32  ;;  %v2288_v15 = vsel %vm832_vm1, %v2228_v46, 0.0 }
 0x4a2   : > { %11629 = vst [vmem:[#allocation131_spill] sm:$0xff] %v8608_v48  ;;  %v2286_v22 = vsel %vm832_vm1, %v2227_v62, 0.0  ;;  %v2197_v29 = vmul.f32 %v8599_v50, %v2165_v18  ;;  %v2364_v52 = vpack.c.bf16 %v8604_v57, %v8608_v48  ;;  %v2588_v18 = vsub.s32 3, %v11532_v60  ;;  %v7035_v62 = vld [vmem:[%s11030_s5] sm:$0xff] }
 0x4a3   : > { %v2287_v16 = vadd.f32 %v2286_v22, %v2285_v2  ;;  %v2230_v36 = vmul.f32 %v2198_v43, %v2198_v43 }
 0x4a4   : > { %v2229_v38 = vmul.f32 %v2197_v29, %v2197_v29  ;;  %6757 = vmatmul.mubr.msk.bf16.gmra.mrb[60].mxu0 %vm832_vm1, %v2364_v52  ;;  %v8626_v2 = vrot.slane %v7035_v62, %v2588_v18 }
 0x4a5   : > { %v2289_v33 = vadd.f32 %v2288_v15, %v2287_v16  ;;  %v2292_v58 = vsel %vm832_vm1, %v2230_v36, 0.0 }
 0x4a6   : > { %v2290_v13 = vsel %vm832_vm1, %v2229_v38, 0.0 }
 0x4a7   : > { %v2291_v41 = vadd.f32 %v2290_v13, %v2289_v33 }
 0x4a9   : > { %v8620_v32 = vadd.f32 %v2292_v58, %v2291_v41 }
 0x4ab   : > { %11630 = vst [vmem:[#allocation132_spill] sm:$0xff] %v8620_v32 }
 0x53f   : > { %v6730_v43 = vpop.f32.mrb[32].mxu0 }
 0x540   : > { %v2459_v46 = vpop.f32.mrb[33].mxu0  ;;  %v8632_v52 = vadd.f32 %v6730_v43, %v8626_v2 }
 0x541   : > { %v8629_v22 = vadd.f32 %v8626_v2, %v2459_v46  ;;  %v6731_v29 = vpop.f32.mrb[34].mxu0 }
 0x542   : > { %v2462_v38 = vpop.f32.mrb[35].mxu0  ;;  %v8640_v36 = vadd.f32 %v6731_v29, %v8626_v2  ;;  %v2628_v41 = vsel %vm580_vm0, %v8632_v52, inf }
 0x543   : > { %v8635_v16 = vadd.f32 %v8626_v2, %v2462_v38  ;;  %v2622_v15 = vsel %vm580_vm0, %v8629_v22, inf }
 0x544   : > { %2623 = vmin.xlane.f32.xlu0 %v2622_v15  ;;  %v2631_v43 = vsel %vm580_vm0, %v8640_v36, inf }
 0x545   : > { %v2625_v33 = vsel %vm580_vm0, %v8635_v16, inf }
 0x546   : > { %2626 = vmin.xlane.f32.xlu1 %v2625_v33 }
 0x547   : > { %v6734_v13 = vpop.f32.mrb[36].mxu0 }
 0x548   : > { %2629 = vmin.xlane.f32.xlu0 %v2628_v41  ;;  %v2475_v58 = vpop.f32.mrb[37].mxu0  ;;  %v8652_v29 = vadd.f32 %v6734_v13, %v8626_v2 }
 0x549   : > { %v8647_v18 = vadd.f32 %v8626_v2, %v2475_v58  ;;  %v6735_v62 = vpop.f32.mrb[38].mxu0 }
 0x54a   : > { %2632 = vmin.xlane.f32.xlu1 %v2631_v43  ;;  %v2478_v46 = vpop.f32.mrb[39].mxu0  ;;  %v8660_v33 = vadd.f32 %v6735_v62, %v8626_v2  ;;  %v2640_v43 = vsel %vm580_vm0, %v8652_v29, inf }
 0x54b   : > { %v8655_v38 = vadd.f32 %v8626_v2, %v2478_v46  ;;  %v2634_v15 = vsel %vm580_vm0, %v8647_v18, inf }
 0x54c   : > { %2635 = vmin.xlane.f32.xlu0 %v2634_v15  ;;  %v2643_v15 = vsel %vm580_vm0, %v8660_v33, inf }
 0x54d   : > { %v2637_v41 = vsel %vm580_vm0, %v8655_v38, inf }
 0x54e   : > { %2638 = vmin.xlane.f32.xlu1 %v2637_v41 }
 0x54f   : > { %v6738_v58 = vpop.f32.mrb[40].mxu0 }
 0x550   : > { %2641 = vmin.xlane.f32.xlu0 %v2640_v43  ;;  %v2491_v13 = vpop.f32.mrb[41].mxu0  ;;  %v8672_v32 = vadd.f32 %v6738_v58, %v8626_v2 }
 0x551   : > { %v8667_v46 = vadd.f32 %v8626_v2, %v2491_v13  ;;  %v6739_v40 = vpop.f32.mrb[42].mxu0 }
 0x552   : > { %2644 = vmin.xlane.f32.xlu1 %v2643_v15  ;;  %v2494_v62 = vpop.f32.mrb[43].mxu0  ;;  %v8680_v43 = vadd.f32 %v6739_v40, %v8626_v2  ;;  %v2652_v15 = vsel %vm580_vm0, %v8672_v32, inf }
 0x553   : > { %v8675_v41 = vadd.f32 %v8626_v2, %v2494_v62  ;;  %v2646_v60 = vsel %vm580_vm0, %v8667_v46, inf }
 0x554   : > { %2647 = vmin.xlane.f32.xlu0 %v2646_v60  ;;  %v2655_v60 = vsel %vm580_vm0, %v8680_v43, inf }
 0x555   : > { %v2649_v13 = vsel %vm580_vm0, %v8675_v41, inf }
 0x556   : > { %2650 = vmin.xlane.f32.xlu1 %v2649_v13 }
 0x557   : > { %v6742_v50 = vpop.f32.mrb[44].mxu0 }
 0x558   : > { %2653 = vmin.xlane.f32.xlu0 %v2652_v15  ;;  %v2507_v58 = vpop.f32.mrb[45].mxu0  ;;  %v8692_v48 = vadd.f32 %v6742_v50, %v8626_v2 }
 0x559   : > { %v8687_v62 = vadd.f32 %v8626_v2, %v2507_v58  ;;  %v6743_v34 = vpop.f32.mrb[46].mxu0 }
 0x55a   : > { %2656 = vmin.xlane.f32.xlu1 %v2655_v60  ;;  %v2510_v40 = vpop.f32.mrb[47].mxu0  ;;  %v8700_v15 = vadd.f32 %v6743_v34, %v8626_v2  ;;  %v2664_v60 = vsel %vm580_vm0, %v8692_v48, inf }
 0x55b   : > { %v8695_v13 = vadd.f32 %v8626_v2, %v2510_v40  ;;  %v2658_v57 = vsel %vm580_vm0, %v8687_v62, inf }
 0x55c   : > { %2659 = vmin.xlane.f32.xlu0 %v2658_v57  ;;  %v2667_v57 = vsel %vm580_vm0, %v8700_v15, inf }
 0x55d   : > { %v2661_v58 = vsel %vm580_vm0, %v8695_v13, inf }
 0x55e   : > { %2662 = vmin.xlane.f32.xlu1 %v2661_v58 }
 0x55f   : > { %v6746_v26 = vpop.f32.mrb[48].mxu0 }
 0x560   : > { %2665 = vmin.xlane.f32.xlu0 %v2664_v60  ;;  %v2523_v50 = vpop.f32.mrb[49].mxu0  ;;  %v8712_v11 = vadd.f32 %v6746_v26, %v8626_v2 }
 0x561   : > { %v8707_v40 = vadd.f32 %v8626_v2, %v2523_v50  ;;  %v6747_v47 = vpop.f32.mrb[50].mxu0 }
 0x562   : > { %2668 = vmin.xlane.f32.xlu1 %v2667_v57  ;;  %v2526_v34 = vpop.f32.mrb[51].mxu0  ;;  %v8720_v60 = vadd.f32 %v6747_v47, %v8626_v2  ;;  %v2676_v57 = vsel %vm580_vm0, %v8712_v11, inf }
 0x563   : > { %v8715_v58 = vadd.f32 %v8626_v2, %v2526_v34  ;;  %v2670_v6 = vsel %vm580_vm0, %v8707_v40, inf }
 0x564   : > { %2671 = vmin.xlane.f32.xlu0 %v2670_v6  ;;  %v2679_v6 = vsel %vm580_vm0, %v8720_v60, inf }
 0x565   : > { %v2673_v50 = vsel %vm580_vm0, %v8715_v58, inf }
 0x566   : > { %2674 = vmin.xlane.f32.xlu1 %v2673_v50 }
 0x567   : > { %v6750_v37 = vpop.f32.mrb[52].mxu0 }
 0x568   : > { %2677 = vmin.xlane.f32.xlu0 %v2676_v57  ;;  %v2539_v26 = vpop.f32.mrb[53].mxu0  ;;  %v8732_v1 = vadd.f32 %v6750_v37, %v8626_v2 }
 0x569   : > { %v8727_v34 = vadd.f32 %v8626_v2, %v2539_v26  ;;  %v6751_v35 = vpop.f32.mrb[54].mxu0 }
 0x56a   : > { %2680 = vmin.xlane.f32.xlu1 %v2679_v6  ;;  %v2542_v47 = vpop.f32.mrb[55].mxu0  ;;  %v8740_v57 = vadd.f32 %v6751_v35, %v8626_v2  ;;  %v2688_v6 = vsel %vm580_vm0, %v8732_v1, inf }
 0x56b   : > { %v8735_v50 = vadd.f32 %v8626_v2, %v2542_v47  ;;  %v2682_v21 = vsel %vm580_vm0, %v8727_v34, inf }
 0x56c   : > { %2683 = vmin.xlane.f32.xlu0 %v2682_v21  ;;  %v2691_v21 = vsel %vm580_vm0, %v8740_v57, inf }
 0x56d   : > { %v2685_v26 = vsel %vm580_vm0, %v8735_v50, inf }
 0x56e   : > { %2686 = vmin.xlane.f32.xlu1 %v2685_v26 }
 0x56f   : > { %v6754_v55 = vpop.f32.mrb[56].mxu0 }
 0x570   : > { %2689 = vmin.xlane.f32.xlu0 %v2688_v6  ;;  %v2555_v37 = vpop.f32.mrb[57].mxu0  ;;  %v8752_v17 = vadd.f32 %v6754_v55, %v8626_v2 }
 0x571   : > { %v8747_v47 = vadd.f32 %v8626_v2, %v2555_v37  ;;  %v6755_v54 = vpop.f32.mrb[58].mxu0 }
 0x572   : > { %2692 = vmin.xlane.f32.xlu1 %v2691_v21  ;;  %v2558_v35 = vpop.f32.mrb[59].mxu0  ;;  %v8760_v6 = vadd.f32 %v6755_v54, %v8626_v2  ;;  %v2700_v21 = vsel %vm580_vm0, %v8752_v17, inf }
 0x573   : > { %v8755_v26 = vadd.f32 %v8626_v2, %v2558_v35  ;;  %v2694_v30 = vsel %vm580_vm0, %v8747_v47, inf }
 0x574   : > { %2695 = vmin.xlane.f32.xlu0 %v2694_v30  ;;  %v2703_v30 = vsel %vm580_vm0, %v8760_v6, inf }
 0x575   : > { %v2697_v37 = vsel %vm580_vm0, %v8755_v26, inf }
 0x576   : > { %2698 = vmin.xlane.f32.xlu1 %v2697_v37 }
 0x577   : > { %v6758_v24 = vpop.f32.mrb[60].mxu0 }
 0x578   : > { %2701 = vmin.xlane.f32.xlu0 %v2700_v21  ;;  %v2571_v55 = vpop.f32.mrb[61].mxu0  ;;  %v8772_v59 = vadd.f32 %v6758_v24, %v8626_v2 }
 0x579   : > { %v8767_v35 = vadd.f32 %v8626_v2, %v2571_v55  ;;  %v6759_v9 = vpop.f32.mrb[62].mxu0 }
 0x57a   : > { %2704 = vmin.xlane.f32.xlu1 %v2703_v30  ;;  %v2574_v54 = vpop.f32.mrb[63].mxu0  ;;  %v8780_v21 = vadd.f32 %v6759_v9, %v8626_v2  ;;  %v2712_v30 = vsel %vm580_vm0, %v8772_v59, inf }
 0x57b   : > { %v8775_v37 = vadd.f32 %v8626_v2, %v2574_v54  ;;  %v2706_v23 = vsel %vm580_vm0, %v8767_v35, inf }
 0x57c   : > { %2707 = vmin.xlane.f32.xlu0 %v2706_v23  ;;  %v2715_v24 = vsel %vm580_vm0, %v8780_v21, inf }
 0x57d   : > { %v2709_v55 = vsel %vm580_vm0, %v8775_v37, inf }
 0x57e   : > { %2710 = vmin.xlane.f32.xlu1 %v2709_v55 }
 0x580   : > { %2713 = vmin.xlane.f32.xlu0 %v2712_v30 }
 0x582   : > { %2716 = vmin.xlane.f32.xlu1 %v2715_v24 }
 0x5d1   : > { %v2624_v54 = vpop.xlane.xlu0 %2623 }
 0x5d2   : > { %vm2718_vm4 = vcmp.eq.f32.partialorder %v8629_v22, %v2624_v54 }
 0x5d3   : > { %v2750_v23 = vsel %vm2718_vm4, %v11500_v25, 64  ;;  %v2627_v44 = vpop.xlane.xlu1 %2626 }
 0x5d4   : > { %v8791_v9 = vsel %vm580_vm0, %v2750_v23, 2147483647  ;;  %vm2719_vm5 = vcmp.eq.f32.partialorder %v8635_v16, %v2627_v44 }
 0x5d5   : > { %v2751_v2 = vsel %vm2719_vm5, %v11500_v25, 64  ;;  %v2630_v55 = vpop.xlane.xlu0 %2629  ;;  %v2784_v30 = vshra.s32 %v8791_v9, 16 }
 0x5d6   : > { %v8797_v4 = vsel %vm580_vm0, %v2751_v2, 2147483647  ;;  %vm2720_vm6 = vcmp.eq.f32.partialorder %v8632_v52, %v2630_v55 }
 0x5d7   : > { %v2752_v22 = vsel %vm2720_vm6, %v11500_v25, 64  ;;  %v2633_v24 = vpop.xlane.xlu1 %2632  ;;  %v8801_v54 = vcvt.s32.f32 %v2784_v30  ;;  %v2799_v23 = vshra.s32 %v8797_v4, 16 }
 0x5d8   : > { %v8805_v61 = vsel %vm580_vm0, %v2752_v22, 2147483647  ;;  %vm2721_vm7 = vcmp.eq.f32.partialorder %v8640_v36, %v2633_v24 }
 0x5d9   : > { %v2753_v44 = vsel %vm2721_vm7, %v11500_v25, 64  ;;  %v2636_v16 = vpop.xlane.xlu0 %2635  ;;  %2787 = vmin.xlane.f32.xlu0 %v8801_v54  ;;  %v8810_v2 = vcvt.s32.f32 %v2799_v23  ;;  %v2814_v52 = vshra.s32 %v8805_v61, 16 }
 0x5da   : > { %v8814_v55 = vsel %vm580_vm0, %v2753_v44, 2147483647  ;;  %vm2722_vm8 = vcmp.eq.f32.partialorder %v8647_v18, %v2636_v16 }
 0x5db   : > { %v2754_v30 = vsel %vm2722_vm8, %v11500_v25, 64  ;;  %2802 = vmin.xlane.f32.xlu1 %v8810_v2  ;;  %v2639_v22 = vpop.xlane.xlu1 %2638  ;;  %v8819_v36 = vcvt.s32.f32 %v2814_v52  ;;  %v2829_v24 = vshra.s32 %v8814_v55, 16 }
 0x5dc   : > { %v8823_v49 = vsel %vm580_vm0, %v2754_v30, 2147483647  ;;  %vm2723_vm9 = vcmp.eq.f32.partialorder %v8655_v38, %v2639_v22 }
 0x5dd   : > { %v2755_v23 = vsel %vm2723_vm9, %v11500_v25, 64  ;;  %v2642_v44 = vpop.xlane.xlu0 %2641  ;;  %2817 = vmin.xlane.f32.xlu0 %v8819_v36  ;;  %v8828_v18 = vcvt.s32.f32 %v2829_v24  ;;  %v2844_v16 = vshra.s32 %v8823_v49, 16 }
 0x5de   : > { %v8832_v5 = vsel %vm580_vm0, %v2755_v23, 2147483647  ;;  %vm2724_vm10 = vcmp.eq.f32.partialorder %v8652_v29, %v2642_v44 }
 0x5df   : > { %v2756_v52 = vsel %vm2724_vm10, %v11500_v25, 64  ;;  %2832 = vmin.xlane.f32.xlu1 %v8828_v18  ;;  %v2645_v30 = vpop.xlane.xlu1 %2644  ;;  %v8837_v38 = vcvt.s32.f32 %v2844_v16  ;;  %v2859_v22 = vshra.s32 %v8832_v5, 16 }
 0x5e0   : > { %v8841_v27 = vsel %vm580_vm0, %v2756_v52, 2147483647  ;;  %vm2725_vm11 = vcmp.eq.f32.partialorder %v8660_v33, %v2645_v30 }
 0x5e1   : > { %v2757_v24 = vsel %vm2725_vm11, %v11500_v25, 64  ;;  %v2648_v23 = vpop.xlane.xlu0 %2647  ;;  %2847 = vmin.xlane.f32.xlu0 %v8837_v38  ;;  %v8846_v29 = vcvt.s32.f32 %v2859_v22  ;;  %v2874_v44 = vshra.s32 %v8841_v27, 16 }
 0x5e2   : > { %v8850_v14 = vsel %vm580_vm0, %v2757_v24, 2147483647  ;;  %vm2726_vm12 = vcmp.eq.f32.partialorder %v8667_v46, %v2648_v23 }
 0x5e3   : > { %v2758_v16 = vsel %vm2726_vm12, %v11500_v25, 64  ;;  %2862 = vmin.xlane.f32.xlu1 %v8846_v29  ;;  %v2651_v52 = vpop.xlane.xlu1 %2650  ;;  %v8855_v33 = vcvt.s32.f32 %v2874_v44  ;;  %v2889_v30 = vshra.s32 %v8850_v14, 16 }
 0x5e4   : > { %v8859_v0 = vsel %vm580_vm0, %v2758_v16, 2147483647  ;;  %vm2727_vm13 = vcmp.eq.f32.partialorder %v8675_v41, %v2651_v52 }
 0x5e5   : > { %v2759_v22 = vsel %vm2727_vm13, %v11500_v25, 64  ;;  %v2654_v24 = vpop.xlane.xlu0 %2653  ;;  %2877 = vmin.xlane.f32.xlu0 %v8855_v33  ;;  %v8864_v46 = vcvt.s32.f32 %v2889_v30  ;;  %v2904_v23 = vshra.s32 %v8859_v0, 16 }
 0x5e6   : > { %v8868_v8 = vsel %vm580_vm0, %v2759_v22, 2147483647  ;;  %vm2728_vm14 = vcmp.eq.f32.partialorder %v8672_v32, %v2654_v24 }
 0x5e7   : > { %v2760_v44 = vsel %vm2728_vm14, %v11500_v25, 64  ;;  %2892 = vmin.xlane.f32.xlu1 %v8864_v46  ;;  %v2657_v16 = vpop.xlane.xlu1 %2656  ;;  %v8873_v41 = vcvt.s32.f32 %v2904_v23  ;;  %v2919_v52 = vshra.s32 %v8868_v8, 16 }
 0x5e8   : > { %v8877_v53 = vsel %vm580_vm0, %v2760_v44, 2147483647  ;;  %vm2729_vm15 = vcmp.eq.f32.partialorder %v8680_v43, %v2657_v16 }
 0x5e9   : > { %v2761_v30 = vsel %vm2729_vm15, %v11500_v25, 64  ;;  %v2660_v22 = vpop.xlane.xlu0 %2659  ;;  %2907 = vmin.xlane.f32.xlu0 %v8873_v41  ;;  %v8882_v32 = vcvt.s32.f32 %v2919_v52  ;;  %v2934_v24 = vshra.s32 %v8877_v53, 16 }
 0x5ea   : > { %v8886_v63 = vsel %vm580_vm0, %v2761_v30, 2147483647  ;;  %vm2730_vm2 = vcmp.eq.f32.partialorder %v8687_v62, %v2660_v22 }
 0x5eb   : > { %v2762_v23 = vsel %vm2730_vm2, %v11500_v25, 64  ;;  %2922 = vmin.xlane.f32.xlu1 %v8882_v32  ;;  %v2663_v44 = vpop.xlane.xlu1 %2662  ;;  %v8891_v43 = vcvt.s32.f32 %v2934_v24  ;;  %v2949_v16 = vshra.s32 %v8886_v63, 16 }
 0x5ec   : > { %v8895_v28 = vsel %vm580_vm0, %v2762_v23, 2147483647  ;;  %vm2731_vm3 = vcmp.eq.f32.partialorder %v8695_v13, %v2663_v44 }
 0x5ed   : > { %v2763_v52 = vsel %vm2731_vm3, %v11500_v25, 64  ;;  %v2666_v30 = vpop.xlane.xlu0 %2665  ;;  %2937 = vmin.xlane.f32.xlu0 %v8891_v43  ;;  %v8900_v62 = vcvt.s32.f32 %v2949_v16  ;;  %v2964_v22 = vshra.s32 %v8895_v28, 16 }
 0x5ee   : > { %v8904_v45 = vsel %vm580_vm0, %v2763_v52, 2147483647  ;;  %vm2732_vm4 = vcmp.eq.f32.partialorder %v8692_v48, %v2666_v30 }
 0x5ef   : > { %v2764_v24 = vsel %vm2732_vm4, %v11500_v25, 64  ;;  %2952 = vmin.xlane.f32.xlu1 %v8900_v62  ;;  %v2669_v23 = vpop.xlane.xlu1 %2668  ;;  %v8909_v13 = vcvt.s32.f32 %v2964_v22  ;;  %v2979_v44 = vshra.s32 %v8904_v45, 16 }
 0x5f0   : > { %v8913_v31 = vsel %vm580_vm0, %v2764_v24, 2147483647  ;;  %vm2733_vm5 = vcmp.eq.f32.partialorder %v8700_v15, %v2669_v23 }
 0x5f1   : > { %v2765_v16 = vsel %vm2733_vm5, %v11500_v25, 64  ;;  %v2672_v52 = vpop.xlane.xlu0 %2671  ;;  %2967 = vmin.xlane.f32.xlu0 %v8909_v13  ;;  %v8918_v48 = vcvt.s32.f32 %v2979_v44  ;;  %v2994_v30 = vshra.s32 %v8913_v31, 16 }
 0x5f2   : > { %v8922_v7 = vsel %vm580_vm0, %v2765_v16, 2147483647  ;;  %vm2734_vm6 = vcmp.eq.f32.partialorder %v8707_v40, %v2672_v52 }
 0x5f3   : > { %v2766_v22 = vsel %vm2734_vm6, %v11500_v25, 64  ;;  %2982 = vmin.xlane.f32.xlu1 %v8918_v48  ;;  %v2675_v24 = vpop.xlane.xlu1 %2674  ;;  %v8927_v15 = vcvt.s32.f32 %v2994_v30  ;;  %v3009_v23 = vshra.s32 %v8922_v7, 16 }
 0x5f4   : > { %v8931_v19 = vsel %vm580_vm0, %v2766_v22, 2147483647  ;;  %vm2735_vm7 = vcmp.eq.f32.partialorder %v8715_v58, %v2675_v24 }
 0x5f5   : > { %v2767_v44 = vsel %vm2735_vm7, %v11500_v25, 64  ;;  %v2678_v16 = vpop.xlane.xlu0 %2677  ;;  %2997 = vmin.xlane.f32.xlu0 %v8927_v15  ;;  %v8936_v40 = vcvt.s32.f32 %v3009_v23  ;;  %v3024_v52 = vshra.s32 %v8931_v19, 16 }
 0x5f6   : > { %v8940_v10 = vsel %vm580_vm0, %v2767_v44, 2147483647  ;;  %vm2736_vm8 = vcmp.eq.f32.partialorder %v8712_v11, %v2678_v16 }
 0x5f7   : > { %v2768_v30 = vsel %vm2736_vm8, %v11500_v25, 64  ;;  %3012 = vmin.xlane.f32.xlu1 %v8936_v40  ;;  %v2681_v22 = vpop.xlane.xlu1 %2680  ;;  %v8945_v58 = vcvt.s32.f32 %v3024_v52  ;;  %v3039_v24 = vshra.s32 %v8940_v10, 16 }
 0x5f8   : > { %v8949_v42 = vsel %vm580_vm0, %v2768_v30, 2147483647  ;;  %vm2737_vm9 = vcmp.eq.f32.partialorder %v8720_v60, %v2681_v22 }
 0x5f9   : > { %v2769_v23 = vsel %vm2737_vm9, %v11500_v25, 64  ;;  %v2684_v44 = vpop.xlane.xlu0 %2683  ;;  %3027 = vmin.xlane.f32.xlu0 %v8945_v58  ;;  %v8954_v11 = vcvt.s32.f32 %v3039_v24  ;;  %v3054_v16 = vshra.s32 %v8949_v42, 16 }
 0x5fa   : > { %v8958_v39 = vsel %vm580_vm0, %v2769_v23, 2147483647  ;;  %vm2738_vm10 = vcmp.eq.f32.partialorder %v8727_v34, %v2684_v44 }
 0x5fb   : > { %v2770_v52 = vsel %vm2738_vm10, %v11500_v25, 64  ;;  %3042 = vmin.xlane.f32.xlu1 %v8954_v11  ;;  %v2687_v30 = vpop.xlane.xlu1 %2686  ;;  %v8963_v60 = vcvt.s32.f32 %v3054_v16  ;;  %v3069_v22 = vshra.s32 %v8958_v39, 16 }
 0x5fc   : > { %v8967_v3 = vsel %vm580_vm0, %v2770_v52, 2147483647  ;;  %vm2739_vm11 = vcmp.eq.f32.partialorder %v8735_v50, %v2687_v30 }
 0x5fd   : > { %v2771_v24 = vsel %vm2739_vm11, %v11500_v25, 64  ;;  %v2690_v23 = vpop.xlane.xlu0 %2689  ;;  %3057 = vmin.xlane.f32.xlu0 %v8963_v60  ;;  %v8972_v34 = vcvt.s32.f32 %v3069_v22  ;;  %v3084_v44 = vshra.s32 %v8967_v3, 16 }
 0x5fe   : > { %v8976_v56 = vsel %vm580_vm0, %v2771_v24, 2147483647  ;;  %vm2740_vm12 = vcmp.eq.f32.partialorder %v8732_v1, %v2690_v23 }
 0x5ff   : > { %v2772_v16 = vsel %vm2740_vm12, %v11500_v25, 64  ;;  %3072 = vmin.xlane.f32.xlu1 %v8972_v34  ;;  %v2693_v52 = vpop.xlane.xlu1 %2692  ;;  %v8981_v50 = vcvt.s32.f32 %v3084_v44  ;;  %v3099_v30 = vshra.s32 %v8976_v56, 16 }
 0x600   : > { %v8985_v12 = vsel %vm580_vm0, %v2772_v16, 2147483647  ;;  %vm2741_vm13 = vcmp.eq.f32.partialorder %v8740_v57, %v2693_v52 }
 0x601   : > { %v2773_v22 = vsel %vm2741_vm13, %v11500_v25, 64  ;;  %v2696_v24 = vpop.xlane.xlu0 %2695  ;;  %3087 = vmin.xlane.f32.xlu0 %v8981_v50  ;;  %v8990_v1 = vcvt.s32.f32 %v3099_v30  ;;  %v3114_v23 = vshra.s32 %v8985_v12, 16 }
 0x602   : > { %v8994_v20 = vsel %vm580_vm0, %v2773_v22, 2147483647  ;;  %vm2742_vm14 = vcmp.eq.f32.partialorder %v8747_v47, %v2696_v24 }
 0x603   : > { %11631 = vst [vmem:[#allocation133_spill] sm:$0xff] %v8990_v1  ;;  %v2774_v44 = vsel %vm2742_vm14, %v11500_v25, 64  ;;  %3102 = vmin.xlane.f32.xlu1 %v8990_v1  ;;  %v2699_v16 = vpop.xlane.xlu1 %2698  ;;  %v8999_v57 = vcvt.s32.f32 %v3114_v23  ;;  %v3129_v52 = vshra.s32 %v8994_v20, 16 }
 0x604   : > { %v9003_v51 = vsel %vm580_vm0, %v2774_v44, 2147483647  ;;  %vm2743_vm15 = vcmp.eq.f32.partialorder %v8755_v26, %v2699_v16 }
 0x605   : > { %11632 = vst [vmem:[#allocation134_spill] sm:$0xff] %v8999_v57  ;;  %v2775_v30 = vsel %vm2743_vm15, %v11500_v25, 64  ;;  %v2702_v22 = vpop.xlane.xlu0 %2701  ;;  %3117 = vmin.xlane.f32.xlu0 %v8999_v57  ;;  %v9008_v47 = vcvt.s32.f32 %v3129_v52  ;;  %v3144_v24 = vshra.s32 %v9003_v51, 16 }
 0x606   : > { %v9012_v1 = vsel %vm580_vm0, %v2775_v30, 2147483647  ;;  %vm2744_vm2 = vcmp.eq.f32.partialorder %v8752_v17, %v2702_v22 }
 0x607   : > { %11633 = vst [vmem:[#allocation135_spill] sm:$0xff] %v9008_v47  ;;  %v2776_v23 = vsel %vm2744_vm2, %v11500_v25, 64  ;;  %3132 = vmin.xlane.f32.xlu1 %v9008_v47  ;;  %v2705_v44 = vpop.xlane.xlu1 %2704  ;;  %v9017_v26 = vcvt.s32.f32 %v3144_v24  ;;  %v3159_v16 = vshra.s32 %v9012_v1, 16 }
 0x608   : > { %v9021_v57 = vsel %vm580_vm0, %v2776_v23, 2147483647  ;;  %vm2745_vm3 = vcmp.eq.f32.partialorder %v8760_v6, %v2705_v44 }
 0x609   : > { %11634 = vst [vmem:[#allocation136_spill] sm:$0xff] %v9017_v26  ;;  %v2777_v52 = vsel %vm2745_vm3, %v11500_v25, 64  ;;  %3147 = vmin.xlane.f32.xlu0 %v9017_v26  ;;  %v2708_v30 = vpop.xlane.xlu0 %2707  ;;  %v9026_v17 = vcvt.s32.f32 %v3159_v16  ;;  %v3174_v22 = vshra.s32 %v9021_v57, 16 }
 0x60a   : > { %v9030_v47 = vsel %vm580_vm0, %v2777_v52, 2147483647  ;;  %vm2746_vm4 = vcmp.eq.f32.partialorder %v8767_v35, %v2708_v30 }
 0x60b   : > { %11635 = vst [vmem:[#allocation137_spill] sm:$0xff] %v9026_v17  ;;  %v2778_v24 = vsel %vm2746_vm4, %v11500_v25, 64  ;;  %3162 = vmin.xlane.f32.xlu1 %v9026_v17  ;;  %v2711_v23 = vpop.xlane.xlu1 %2710  ;;  %v9035_v6 = vcvt.s32.f32 %v3174_v22  ;;  %v3189_v44 = vshra.s32 %v9030_v47, 16 }
 0x60c   : > { %v9039_v26 = vsel %vm580_vm0, %v2778_v24, 2147483647  ;;  %vm2747_vm5 = vcmp.eq.f32.partialorder %v8775_v37, %v2711_v23 }
 0x60d   : > { %11636 = vst [vmem:[#allocation138_spill] sm:$0xff] %v9035_v6  ;;  %v2779_v16 = vsel %vm2747_vm5, %v11500_v25, 64  ;;  %3177 = vmin.xlane.f32.xlu0 %v9035_v6  ;;  %v2714_v52 = vpop.xlane.xlu0 %2713  ;;  %v9044_v35 = vcvt.s32.f32 %v3189_v44  ;;  %v3204_v30 = vshra.s32 %v9039_v26, 16 }
 0x60e   : > { %v9048_v17 = vsel %vm580_vm0, %v2779_v16, 2147483647  ;;  %vm2748_vm6 = vcmp.eq.f32.partialorder %v8772_v59, %v2714_v52 }
 0x60f   : > { %v2780_v22 = vsel %vm2748_vm6, %v11500_v25, 64  ;;  %3192 = vmin.xlane.f32.xlu1 %v9044_v35  ;;  %v2717_v24 = vpop.xlane.xlu1 %2716  ;;  %v9053_v37 = vcvt.s32.f32 %v3204_v30  ;;  %v3219_v23 = vshra.s32 %v9048_v17, 16 }
 0x610   : > { %v9057_v6 = vsel %vm580_vm0, %v2780_v22, 2147483647  ;;  %vm2749_vm7 = vcmp.eq.f32.partialorder %v8780_v21, %v2717_v24  ;;  %v6164_v24 = vld [vmem:[%s11027_s2 + $0x40] sm:$0xff] }
 0x611   : > { %11637 = vst [vmem:[#allocation139_spill] sm:$0xff] %v9053_v37  ;;  %11638 = vst [vmem:[#allocation140_spill] sm:$0xff] %v9057_v6  ;;  %v2781_v44 = vsel %vm2749_vm7, %v11500_v25, 64  ;;  %3207 = vmin.xlane.f32.xlu0 %v9053_v37  ;;  %v9062_v16 = vcvt.s32.f32 %v3219_v23  ;;  %v3234_v59 = vshra.s32 %v9057_v6, 16  ;;  %v6165_v23 = vld [vmem:[%s11027_s2 + $0x48] sm:$0xff] }
 0x612   : > { %v9066_v52 = vsel %vm580_vm0, %v2781_v44, 2147483647  ;;  %v6166_v44 = vld [vmem:[%s11027_s2 + $0x50] sm:$0xff] }
 0x613   : > { %11639 = vst [vmem:[#allocation141_spill] sm:$0xff] %v9062_v16  ;;  %11640 = vst [vmem:[#allocation142_spill] sm:$0xff] %v9066_v52  ;;  %3222 = vmin.xlane.f32.xlu1 %v9062_v16  ;;  %v9069_v30 = vcvt.s32.f32 %v3234_v59  ;;  %v3249_v22 = vshra.s32 %v9066_v52, 16  ;;  %v6976_v59 = vpack.c.bf16 %v6165_v23, %v6164_v24  ;;  %v6170_v24 = vld [vmem:[%s11027_s2 + $0x70] sm:$0xff]  ;;  %v6171_v23 = vld [vmem:[%s11027_s2 + $0x78] sm:$0xff] }
 0x615   : > { %11641 = vst [vmem:[#allocation143_spill] sm:$0xff] %v9069_v30  ;;  %3237 = vmin.xlane.f32.xlu0 %v9069_v30  ;;  %v9073_v21 = vcvt.s32.f32 %v3249_v22  ;;  %v6167_v22 = vld [vmem:[%s11027_s2 + $0x58] sm:$0xff]  ;;  %v6169_v30 = vld [vmem:[%s11027_s2 + $0x68] sm:$0xff]  ;;  %6977 = vmatprep.subr.bf16.mxu1 %v6976_v59 }
 0x616   : > { %v6980_v25 = vpack.c.bf16 %v6167_v22, %v6166_v44  ;;  %6979 = vmatpush3.bf16.msra.mxu1 %v6976_v59  ;;  %v6988_v44 = vpack.c.bf16 %v6171_v23, %v6170_v24  ;;  %v2783_v22 = vand.u32 65535, %v8791_v9  ;;  %v2798_v59 = vand.u32 65535, %v8797_v4 }
 0x617   : > { %11642 = vst [vmem:[#allocation144_spill] sm:$0xff] %v9073_v21  ;;  %3252 = vmin.xlane.f32.xlu1 %v9073_v21  ;;  %v6168_v21 = vld [vmem:[%s11027_s2 + $0x60] sm:$0xff]  ;;  %v2843_v23 = vand.u32 65535, %v8823_v49  ;;  %v2873_v49 = vand.u32 65535, %v8841_v27  ;;  %v2903_v27 = vand.u32 65535, %v8859_v0  ;;  %v2933_v0 = vand.u32 65535, %v8877_v53 }
 0x618   : > { %6981 = vmatprep.subr.bf16.mxu1 %v6980_v25  ;;  %v6984_v16 = vpack.c.bf16 %v6169_v30, %v6168_v21  ;;  %v2785_v30 = vcvt.s32.f32 %v2783_v22  ;;  %v2813_v21 = vand.u32 65535, %v8805_v61  ;;  %v2800_v6 = vcvt.s32.f32 %v2798_v59 }
 0x619   : > { %v2845_v22 = vcvt.s32.f32 %v2843_v23  ;;  %v2905_v23 = vcvt.s32.f32 %v2903_v27  ;;  %v2963_v53 = vand.u32 65535, %v8895_v28  ;;  %v2993_v28 = vand.u32 65535, %v8913_v31 }
 0x61a   : > { %6983 = vmatpush3.bf16.msra.mxu1 %v6980_v25  ;;  %v2815_v24 = vcvt.s32.f32 %v2813_v21  ;;  %v3023_v31 = vand.u32 65535, %v8931_v19  ;;  %v3053_v19 = vand.u32 65535, %v8949_v42  ;;  %v3083_v42 = vand.u32 65535, %v8967_v3 }
 0x61b   : > { %6985 = vmatprep.subr.bf16.mxu1 %v6984_v16  ;;  %v2995_v27 = vcvt.s32.f32 %v2993_v28  ;;  %v3113_v3 = vand.u32 65535, %v8985_v12  ;;  %v3143_v12 = vand.u32 65535, %v9003_v51  ;;  %v11644_v28 = vld [vmem:[#allocation134_spill] sm:$0xff]  ;;  %v3173_v51 = vand.u32 65535, %v9021_v57 }
 0x61c   : > { %v3203_v57 = vand.u32 65535, %v9039_v26 }
 0x61e   : > { %6987 = vmatpush3.bf16.msra.mxu1 %v6984_v16  ;;  %v2828_v16 = vand.u32 65535, %v8814_v55  ;;  %v2858_v55 = vand.u32 65535, %v8832_v5  ;;  %v2888_v5 = vand.u32 65535, %v8850_v14  ;;  %v2918_v14 = vand.u32 65535, %v8868_v8 }
 0x61f   : > { %6989 = vmatprep.subr.bf16.mxu1 %v6988_v44  ;;  %v2948_v8 = vand.u32 65535, %v8886_v63  ;;  %v2978_v63 = vand.u32 65535, %v8904_v45  ;;  %v3008_v45 = vand.u32 65535, %v8922_v7  ;;  %v3038_v7 = vand.u32 65535, %v8940_v10 }
 0x620   : > { %v3068_v10 = vand.u32 65535, %v8958_v39  ;;  %v3098_v39 = vand.u32 65535, %v8976_v56  ;;  %v3128_v56 = vand.u32 65535, %v8994_v20  ;;  %v3158_v20 = vand.u32 65535, %v9012_v1 }
 0x621   : > { %v3188_v1 = vand.u32 65535, %v9030_v47  ;;  %v3218_v47 = vand.u32 65535, %v9048_v17 }
 0x622   : > { %6991 = vmatpush3.bf16.msra.mxu1 %v6988_v44  ;;  %v2830_v44 = vcvt.s32.f32 %v2828_v16 }
 0x666   : > { %v9102_v52 = vpop.xlane.xlu0 %2787 }
 0x667   : > { %vm2789_vm8 = vcmp.eq.f32.partialorder %v8801_v54, %v9102_v52 }
 0x668   : > { %v9107_v37 = vpop.xlane.xlu1 %2802  ;;  %v2790_v25 = vsel %vm2789_vm8, %v2785_v30, inf  ;;  %v2860_v30 = vcvt.s32.f32 %v2858_v55 }
 0x669   : > { %2791 = vmin.xlane.f32.xlu0 %v2790_v25  ;;  %vm2804_vm9 = vcmp.eq.f32.partialorder %v8810_v2, %v9107_v37  ;;  %v2875_v25 = vcvt.s32.f32 %v2873_v49  ;;  %v2950_v49 = vcvt.s32.f32 %v2948_v8 }
 0x66a   : > { %v9112_v9 = vpop.xlane.xlu0 %2817  ;;  %v2805_v4 = vsel %vm2804_vm9, %v2800_v6, inf }
 0x66b   : > { %2806 = vmin.xlane.f32.xlu1 %v2805_v4  ;;  %vm2819_vm10 = vcmp.eq.f32.partialorder %v8819_v36, %v9112_v9  ;;  %v2890_v4 = vcvt.s32.f32 %v2888_v5 }
 0x66c   : > { %v9117_v61 = vpop.xlane.xlu1 %2832  ;;  %v2820_v54 = vsel %vm2819_vm10, %v2815_v24, inf }
 0x66d   : > { %2821 = vmin.xlane.f32.xlu0 %v2820_v54  ;;  %vm2834_vm11 = vcmp.eq.f32.partialorder %v8828_v18, %v9117_v61 }
 0x66e   : > { %v9122_v2 = vpop.xlane.xlu0 %2847  ;;  %v2835_v6 = vsel %vm2834_vm11, %v2830_v44, inf  ;;  %v2920_v44 = vcvt.s32.f32 %v2918_v14 }
 0x66f   : > { %2836 = vmin.xlane.f32.xlu1 %v2835_v6  ;;  %vm2849_vm12 = vcmp.eq.f32.partialorder %v8837_v38, %v9122_v2  ;;  %v2935_v6 = vcvt.s32.f32 %v2933_v0  ;;  %v3040_v0 = vcvt.s32.f32 %v3038_v7 }
 0x670   : > { %v9127_v36 = vpop.xlane.xlu1 %2862  ;;  %v2850_v59 = vsel %vm2849_vm12, %v2845_v22, inf }
 0x671   : > { %2851 = vmin.xlane.f32.xlu0 %v2850_v59  ;;  %vm2864_vm13 = vcmp.eq.f32.partialorder %v8846_v29, %v9127_v36 }
 0x672   : > { %v9132_v18 = vpop.xlane.xlu0 %2877  ;;  %v2865_v21 = vsel %vm2864_vm13, %v2860_v30, inf  ;;  %v2965_v30 = vcvt.s32.f32 %v2963_v53  ;;  %v3085_v53 = vcvt.s32.f32 %v3083_v42  ;;  %v3190_v42 = vcvt.s32.f32 %v3188_v1 }
 0x673   : > { %2866 = vmin.xlane.f32.xlu1 %v2865_v21  ;;  %vm2879_vm14 = vcmp.eq.f32.partialorder %v8855_v33, %v9132_v18  ;;  %v2980_v21 = vcvt.s32.f32 %v2978_v63  ;;  %v11643_v63 = vld [vmem:[#allocation133_spill] sm:$0xff] }
 0x674   : > { %v9137_v38 = vpop.xlane.xlu1 %2892  ;;  %v2880_v16 = vsel %vm2879_vm14, %v2875_v25, inf }
 0x675   : > { %2881 = vmin.xlane.f32.xlu0 %v2880_v16  ;;  %vm2894_vm15 = vcmp.eq.f32.partialorder %v8864_v46, %v9137_v38 }
 0x676   : > { %v9142_v29 = vpop.xlane.xlu0 %2907  ;;  %v2895_v24 = vsel %vm2894_vm15, %v2890_v4, inf  ;;  %v3010_v4 = vcvt.s32.f32 %v3008_v45  ;;  %v11645_v45 = vld [vmem:[#allocation135_spill] sm:$0xff] }
 0x677   : > { %2896 = vmin.xlane.f32.xlu1 %v2895_v24  ;;  %vm2909_vm2 = vcmp.eq.f32.partialorder %v8873_v41, %v9142_v29  ;;  %v3025_v24 = vcvt.s32.f32 %v3023_v31  ;;  %v3145_v31 = vcvt.s32.f32 %v3143_v12  ;;  %v11653_v12 = vld [vmem:[#allocation143_spill] sm:$0xff] }
 0x678   : > { %v9147_v33 = vpop.xlane.xlu1 %2922  ;;  %v2910_v54 = vsel %vm2909_vm2, %v2905_v23, inf }
 0x679   : > { %2911 = vmin.xlane.f32.xlu0 %v2910_v54  ;;  %vm2924_vm3 = vcmp.eq.f32.partialorder %v8882_v32, %v9147_v33 }
 0x67a   : > { %v9152_v46 = vpop.xlane.xlu0 %2937  ;;  %v2925_v55 = vsel %vm2924_vm3, %v2920_v44, inf  ;;  %v3055_v44 = vcvt.s32.f32 %v3053_v19 }
 0x67b   : > { %2926 = vmin.xlane.f32.xlu1 %v2925_v55  ;;  %vm2939_vm4 = vcmp.eq.f32.partialorder %v8891_v43, %v9152_v46  ;;  %v3070_v55 = vcvt.s32.f32 %v3068_v10  ;;  %v11648_v10 = vld [vmem:[#allocation138_spill] sm:$0xff] }
 0x67c   : > { %v9157_v41 = vpop.xlane.xlu1 %2952  ;;  %v2940_v22 = vsel %vm2939_vm4, %v2935_v6, inf }
 0x67d   : > { %2941 = vmin.xlane.f32.xlu0 %v2940_v22  ;;  %vm2954_vm5 = vcmp.eq.f32.partialorder %v8900_v62, %v9157_v41 }
 0x67e   : > { %v9162_v32 = vpop.xlane.xlu0 %2967  ;;  %v2955_v59 = vsel %vm2954_vm5, %v2950_v49, inf  ;;  %v3100_v49 = vcvt.s32.f32 %v3098_v39  ;;  %v3205_v39 = vcvt.s32.f32 %v3203_v57 }
 0x67f   : > { %2956 = vmin.xlane.f32.xlu1 %v2955_v59  ;;  %vm2969_vm6 = vcmp.eq.f32.partialorder %v8909_v13, %v9162_v32 }
 0x680   : > { %v9167_v43 = vpop.xlane.xlu1 %2982  ;;  %v2970_v5 = vsel %vm2969_vm6, %v2965_v30, inf  ;;  %v3115_v30 = vcvt.s32.f32 %v3113_v3 }
 0x681   : > { %2971 = vmin.xlane.f32.xlu0 %v2970_v5  ;;  %vm2984_vm7 = vcmp.eq.f32.partialorder %v8918_v48, %v9167_v43 }
 0x682   : > { %v9172_v62 = vpop.xlane.xlu0 %2997  ;;  %v2985_v25 = vsel %vm2984_vm7, %v2980_v21, inf  ;;  %v3130_v21 = vcvt.s32.f32 %v3128_v56  ;;  %v11651_v56 = vld [vmem:[#allocation142_spill] sm:$0xff] }
 0x683   : > { %2986 = vmin.xlane.f32.xlu1 %v2985_v25  ;;  %vm2999_vm8 = vcmp.eq.f32.partialorder %v8927_v15, %v9172_v62  ;;  %v3248_v17 = vand.u32 65535, %v11651_v56 }
 0x684   : > { %v9177_v13 = vpop.xlane.xlu1 %3012  ;;  %v3000_v16 = vsel %vm2999_vm8, %v2995_v27, inf }
 0x685   : > { %3001 = vmin.xlane.f32.xlu0 %v3000_v16  ;;  %vm3014_vm9 = vcmp.eq.f32.partialorder %v8936_v40, %v9177_v13  ;;  %v11646_v16 = vld [vmem:[#allocation136_spill] sm:$0xff] }
 0x686   : > { %v9182_v48 = vpop.xlane.xlu0 %3027  ;;  %v3015_v14 = vsel %vm3014_vm9, %v3010_v4, inf }
 0x687   : > { %3016 = vmin.xlane.f32.xlu1 %v3015_v14  ;;  %vm3029_vm10 = vcmp.eq.f32.partialorder %v8945_v58, %v9182_v48  ;;  %v3160_v14 = vcvt.s32.f32 %v3158_v20  ;;  %v11654_v20 = vld [vmem:[#allocation144_spill] sm:$0xff] }
 0x688   : > { %v9187_v15 = vpop.xlane.xlu1 %3042  ;;  %v3030_v23 = vsel %vm3029_vm10, %v3025_v24, inf  ;;  %v11647_v24 = vld [vmem:[#allocation137_spill] sm:$0xff] }
 0x689   : > { %3031 = vmin.xlane.f32.xlu0 %v3030_v23  ;;  %vm3044_vm11 = vcmp.eq.f32.partialorder %v8954_v11, %v9187_v15 }
 0x68a   : > { %v9192_v40 = vpop.xlane.xlu0 %3057  ;;  %v3045_v54 = vsel %vm3044_vm11, %v3040_v0, inf  ;;  %v3175_v0 = vcvt.s32.f32 %v3173_v51  ;;  %v2794_v51 = vcvt.f32.s32 %v9102_v52 }
 0x68b   : > { %3046 = vmin.xlane.f32.xlu1 %v3045_v54  ;;  %vm3059_vm12 = vcmp.eq.f32.partialorder %v8963_v60, %v9192_v40 }
 0x68c   : > { %v9197_v58 = vpop.xlane.xlu1 %3072  ;;  %v3060_v8 = vsel %vm3059_vm12, %v3055_v44, inf  ;;  %v2795_v1 = vshll.u32 %v2794_v51, 16 }
 0x68d   : > { %3061 = vmin.xlane.f32.xlu0 %v3060_v8  ;;  %vm3074_vm13 = vcmp.eq.f32.partialorder %v8972_v34, %v9197_v58 }
 0x68e   : > { %v9202_v11 = vpop.xlane.xlu0 %3087  ;;  %v3075_v6 = vsel %vm3074_vm13, %v3070_v55, inf }
 0x68f   : > { %3076 = vmin.xlane.f32.xlu1 %v3075_v6  ;;  %vm3089_vm14 = vcmp.eq.f32.partialorder %v8981_v50, %v9202_v11  ;;  %v11649_v6 = vld [vmem:[#allocation140_spill] sm:$0xff] }
 0x690   : > { %v9207_v60 = vpop.xlane.xlu1 %3102  ;;  %v3090_v22 = vsel %vm3089_vm14, %v3085_v53, inf  ;;  %v3233_v26 = vand.u32 65535, %v11649_v6  ;;  %v11650_v53 = vld [vmem:[#allocation139_spill] sm:$0xff]  ;;  %v11658_v6 = vmov 0.0  }
 0x691   : > { %3091 = vmin.xlane.f32.xlu0 %v3090_v22  ;;  %vm3104_vm15 = vcmp.eq.f32.partialorder %v11643_v63, %v9207_v60  ;;  %v11652_v63 = vld [vmem:[#allocation141_spill] sm:$0xff] }
 0x692   : > { %v9212_v34 = vpop.xlane.xlu0 %3117  ;;  %v3105_v59 = vsel %vm3104_vm15, %v3100_v49, inf  ;;  %v3220_v49 = vcvt.s32.f32 %v3218_v47 }
 0x693   : > { %3106 = vmin.xlane.f32.xlu1 %v3105_v59  ;;  %vm3119_vm2 = vcmp.eq.f32.partialorder %v11644_v28, %v9212_v34 }
 0x694   : > { %v9217_v50 = vpop.xlane.xlu1 %3132  ;;  %v3120_v5 = vsel %vm3119_vm2, %v3115_v30, inf  ;;  %v3235_v30 = vcvt.s32.f32 %v3233_v26 }
 0x695   : > { %3121 = vmin.xlane.f32.xlu0 %v3120_v5  ;;  %vm3134_vm3 = vcmp.eq.f32.partialorder %v11645_v45, %v9217_v50 }
 0x696   : > { %v9222_v25 = vpop.xlane.xlu0 %3147  ;;  %v3135_v27 = vsel %vm3134_vm3, %v3130_v21, inf  ;;  %v3250_v21 = vcvt.s32.f32 %v3248_v17 }
 0x697   : > { %3136 = vmin.xlane.f32.xlu1 %v3135_v27  ;;  %vm3149_vm4 = vcmp.eq.f32.partialorder %v11646_v16, %v9222_v25  ;;  %v7031_v27 = vld [vmem:[%s11028_s3 + $0x20] sm:$0xff]   ;;  %v2809_v16 = vcvt.f32.s32 %v9107_v37  ;;  %v11657_v37 = vld [vmem:[#allocation35_spill] sm:$0xff] }
 0x698   : > { %v9227_v4 = vpop.xlane.xlu1 %3162  ;;  %v3150_v7 = vsel %vm3149_vm4, %v3145_v31, inf  ;;  %v7032_v31 = vld [vmem:[%s11028_s3 + $0x28] sm:$0xff]   ;;  %6824 = vmatprep.subr.bf16.mxu0 %v7031_v27 }
 0x699   : > { %3151 = vmin.xlane.f32.xlu0 %v3150_v7  ;;  %vm3164_vm5 = vcmp.eq.f32.partialorder %v11647_v24, %v9227_v4  ;;  %6825 = vmatpush3.bf16.msra.mxu0 %v7031_v27  ;;  %v2824_v7 = vcvt.f32.s32 %v9112_v9 }
 0x69a   : > { %v9232_v19 = vpop.xlane.xlu0 %3177  ;;  %v3165_v23 = vsel %vm3164_vm5, %v3160_v14, inf  ;;  %6826 = vmatprep.subr.bf16.mxu0 %v7032_v31 }
 0x69b   : > { %3166 = vmin.xlane.f32.xlu1 %v3165_v23  ;;  %vm3179_vm6 = vcmp.eq.f32.partialorder %v11648_v10, %v9232_v19 }
 0x69c   : > { %v9237_v54 = vpop.xlane.xlu1 %3192  ;;  %v3180_v44 = vsel %vm3179_vm6, %v3175_v0, inf  ;;  %v2810_v0 = vshll.u32 %v2809_v16, 16 }
 0x69d   : > { %3181 = vmin.xlane.f32.xlu0 %v3180_v44  ;;  %vm3194_vm7 = vcmp.eq.f32.partialorder %v9044_v35, %v9237_v54  ;;  %6827 = vmatpush3.bf16.msra.mxu0 %v7032_v31  ;;  %v2825_v44 = vshll.u32 %v2824_v7, 16  ;;  %v2914_v31 = vcvt.f32.s32 %v9142_v29 }
 0x69e   : > { %v9242_v8 = vpop.xlane.xlu0 %3207  ;;  %v3195_v55 = vsel %vm3194_vm7, %v3190_v42, inf  ;;  %v2839_v42 = vcvt.f32.s32 %v9117_v61 }
 0x69f   : > { %3196 = vmin.xlane.f32.xlu1 %v3195_v55  ;;  %vm3209_vm8 = vcmp.eq.f32.partialorder %v11650_v53, %v9242_v8  ;;  %v2854_v55 = vcvt.f32.s32 %v9122_v2  ;;  %v2869_v53 = vcvt.f32.s32 %v9127_v36  ;;  %v2884_v2 = vcvt.f32.s32 %v9132_v18 }
 0x6a0   : > { %v9247_v3 = vpop.xlane.xlu1 %3222  ;;  %v3210_v22 = vsel %vm3209_vm8, %v3205_v39, inf  ;;  %v2840_v61 = vshll.u32 %v2839_v42, 16 }
 0x6a1   : > { %3211 = vmin.xlane.f32.xlu0 %v3210_v22  ;;  %vm3224_vm9 = vcmp.eq.f32.partialorder %v11652_v63, %v9247_v3  ;;  %v2855_v63 = vshll.u32 %v2854_v55, 16 }
 0x6a2   : > { %v9252_v35 = vpop.xlane.xlu0 %3237  ;;  %v3225_v59 = vsel %vm3224_vm9, %v3220_v49, inf }
 0x6a3   : > { %3226 = vmin.xlane.f32.xlu1 %v3225_v59  ;;  %vm3239_vm10 = vcmp.eq.f32.partialorder %v11653_v12, %v9252_v35 }
 0x6a4   : > { %v9256_v28 = vpop.xlane.xlu1 %3252  ;;  %v3240_v5 = vsel %vm3239_vm10, %v3235_v30, inf }
 0x6a5   : > { %3241 = vmin.xlane.f32.xlu0 %v3240_v5  ;;  %vm3254_vm11 = vcmp.eq.f32.partialorder %v11654_v20, %v9256_v28  ;;  %v2870_v5 = vshll.u32 %v2869_v53, 16 }
 0x6a6   : > { %v3255_v45 = vsel %vm3254_vm11, %v3250_v21, inf  ;;  %v2899_v21 = vcvt.f32.s32 %v9137_v38 }
 0x6a7   : > { %3256 = vmin.xlane.f32.xlu1 %v3255_v45  ;;  %v2885_v45 = vshll.u32 %v2884_v2, 16 }
 0x6f6   : > { %v2792_v14 = vpop.xlane.xlu0 %2791 }
 0x6f7   : > { %v2793_v24 = vcvt.f32.s32 %v2792_v14  ;;  %v2900_v14 = vshll.u32 %v2899_v21, 16 }
 0x6f8   : > { %v2807_v23 = vpop.xlane.xlu1 %2806 }
 0x6f9   : > { %v9269_v57 = vadd.s32 %v2795_v1, %v2793_v24  ;;  %v2808_v10 = vcvt.f32.s32 %v2807_v23  ;;  %v2929_v1 = vcvt.f32.s32 %v9147_v33 }
 0x6fa   : > { %v2822_v47 = vpop.xlane.xlu0 %2821 }
 0x6fb   : > { %11655 = vst [vmem:[#allocation133_spill] sm:$0xff] %v9269_v57  ;;  %v9273_v39 = vadd.s32 %v2810_v0, %v2808_v10  ;;  %v2823_v52 = vcvt.f32.s32 %v2822_v47  ;;  %vm3262_vm12 = vcmp.eq.s32.totalorder %v11657_v37, %v9269_v57  ;;  %v2915_v10 = vshll.u32 %v2914_v31, 16 }
 0x6fc   : > { %v2837_v9 = vpop.xlane.xlu1 %2836  ;;  %v6194_v26 = vsel %vm3262_vm12, 1.0, %v11658_v6 }
 0x6fd   : > { %11656 = vst [vmem:[#allocation134_spill] sm:$0xff] %v9273_v39  ;;  %vm3263_vm13 = vcmp.eq.s32.totalorder %v11657_v37, %v9273_v39  ;;  %v9281_v22 = vadd.s32 %v2825_v44, %v2823_v52  ;;  %6776 = vmatprep.mubr.msk.f32.mxu1 %vm580_vm0, %v6194_v26  ;;  %v2838_v56 = vcvt.f32.s32 %v2837_v9  ;;  %v2944_v44 = vcvt.f32.s32 %v9152_v46 }
 0x6fe   : > { %v6195_v49 = vsel %vm3263_vm13, 1.0, %v11658_v6  ;;  %v2852_v17 = vpop.xlane.xlu0 %2851  ;;  %v2930_v52 = vshll.u32 %v2929_v1, 16  ;;  %v2959_v9 = vcvt.f32.s32 %v9157_v41 }
 0x6ff   : > { %11659 = vst [vmem:[#allocation135_spill] sm:$0xff] %v9281_v22  ;;  %v2853_v59 = vcvt.f32.s32 %v2852_v17  ;;  %6777 = vmatmul.mubr.msk.f32.vlgmr.msra.gmra.mrb[64].mxu1 %vm580_vm0, %v6195_v49  ;;  %vm3264_vm14 = vcmp.eq.s32.totalorder %v11657_v37, %v9281_v22  ;;  %v9289_v36 = vadd.s32 %v2840_v61, %v2838_v56  ;;  %v2945_v2 = vshll.u32 %v2944_v44, 16 }
 0x700   : > { %v2867_v30 = vpop.xlane.xlu1 %2866  ;;  %v6196_v12 = vsel %vm3264_vm14, 1.0, %v11658_v6  ;;  %v2974_v49 = vcvt.f32.s32 %v9162_v32 }
 0x701   : > { %11660 = vst [vmem:[#allocation136_spill] sm:$0xff] %v9289_v36  ;;  %v9293_v18 = vadd.s32 %v2855_v63, %v2853_v59  ;;  %v2868_v20 = vcvt.f32.s32 %v2867_v30  ;;  %6779 = vmatprep.mubr.msk.f32.mxu1 %vm580_vm0, %v6196_v12  ;;  %vm3265_vm15 = vcmp.eq.s32.totalorder %v11657_v37, %v9289_v36  ;;  %v2960_v59 = vshll.u32 %v2959_v9, 16 }
 0x702   : > { %v2882_v27 = vpop.xlane.xlu0 %2881  ;;  %v6197_v7 = vsel %vm3265_vm15, 1.0, %v11658_v6  ;;  %v2989_v30 = vcvt.f32.s32 %v9167_v43 }
 0x703   : > { %11661 = vst [vmem:[#allocation137_spill] sm:$0xff] %v9293_v18  ;;  %v9299_v51 = vadd.s32 %v2870_v5, %v2868_v20  ;;  %v2883_v16 = vcvt.f32.s32 %v2882_v27  ;;  %6780 = vmatmul.mubr.msk.f32.gmra.mrb[66].mxu1 %vm580_vm0, %v6197_v7  ;;  %vm3266_vm2 = vcmp.eq.s32.totalorder %v11657_v37, %v9293_v18  ;;  %v2975_v20 = vshll.u32 %v2974_v49, 16 }
 0x704   : > { %v2897_v38 = vpop.xlane.xlu1 %2896  ;;  %v6198_v0 = vsel %vm3266_vm2, 1.0, %v11658_v6  ;;  %v2990_v7 = vshll.u32 %v2989_v30, 16 }
 0x705   : > { %11662 = vst [vmem:[#allocation138_spill] sm:$0xff] %v9299_v51  ;;  %v9306_v24 = vadd.s32 %v2885_v45, %v2883_v16  ;;  %v2898_v23 = vcvt.f32.s32 %v2897_v38  ;;  %vm3267_vm3 = vcmp.eq.s32.totalorder %v11657_v37, %v9299_v51  ;;  %6782 = vmatprep.mubr.msk.f32.mxu1 %vm580_vm0, %v6198_v0  ;;  %v3004_v45 = vcvt.f32.s32 %v9172_v62 }
 0x706   : > { %v2912_v29 = vpop.xlane.xlu0 %2911  ;;  %v6199_v55 = vsel %vm3267_vm3, 1.0, %v11658_v6  ;;  %v3019_v38 = vcvt.f32.s32 %v9177_v13 }
 0x707   : > { %11663 = vst [vmem:[#allocation140_spill] sm:$0xff] %v9306_v24  ;;  %v9312_v42 = vadd.s32 %v2900_v14, %v2898_v23  ;;  %v2913_v47 = vcvt.f32.s32 %v2912_v29  ;;  %vm3268_vm4 = vcmp.eq.s32.totalorder %v11657_v37, %v9306_v24  ;;  %6783 = vmatmul.mubr.msk.f32.gmra.mrb[68].mxu1 %vm580_vm0, %v6199_v55  ;;  %v3005_v0 = vshll.u32 %v3004_v45, 16 }
 0x708   : > { %v2927_v33 = vpop.xlane.xlu1 %2926  ;;  %v6200_v46 = vsel %vm3268_vm4, 1.0, %v11658_v6  ;;  %v3034_v29 = vcvt.f32.s32 %v9182_v48  ;;  %v3020_v55 = vshll.u32 %v3019_v38, 16 }
 0x709   : > { %11664 = vst [vmem:[#allocation139_spill] sm:$0xff] %v9312_v42  ;;  %v9319_v26 = vadd.s32 %v2915_v10, %v2913_v47  ;;  %v2928_v53 = vcvt.f32.s32 %v2927_v33  ;;  %vm3269_vm5 = vcmp.eq.s32.totalorder %v11657_v37, %v9312_v42  ;;  %6785 = vmatprep.mubr.msk.f32.mxu1 %vm580_vm0, %v6200_v46  ;;  %v3049_v33 = vcvt.f32.s32 %v9187_v15 }
 0x70a   : > { %v2942_v61 = vpop.xlane.xlu0 %2941  ;;  %v6201_v41 = vsel %vm3269_vm5, 1.0, %v11658_v6  ;;  %v3035_v46 = vshll.u32 %v3034_v29, 16 }
 0x70b   : > { %11665 = vst [vmem:[#allocation142_spill] sm:$0xff] %v9319_v26  ;;  %v9326_v56 = vadd.s32 %v2930_v52, %v2928_v53  ;;  %v2943_v17 = vcvt.f32.s32 %v2942_v61  ;;  %vm3270_vm6 = vcmp.eq.s32.totalorder %v11657_v37, %v9319_v26  ;;  %6786 = vmatmul.mubr.msk.f32.gmra.mrb[70].mxu1 %vm580_vm0, %v6201_v41  ;;  %v3064_v61 = vcvt.f32.s32 %v9192_v40 }
 0x70c   : > { %v2957_v63 = vpop.xlane.xlu1 %2956  ;;  %v6202_v32 = vsel %vm3270_vm6, 1.0, %v11658_v6  ;;  %v3050_v41 = vshll.u32 %v3049_v33, 16 }
 0x70d   : > { %11666 = vst [vmem:[#allocation141_spill] sm:$0xff] %v9326_v56  ;;  %v9333_v12 = vadd.s32 %v2945_v2, %v2943_v17  ;;  %v2958_v5 = vcvt.f32.s32 %v2957_v63  ;;  %vm3271_vm7 = vcmp.eq.s32.totalorder %v11657_v37, %v9326_v56  ;;  %6788 = vmatprep.mubr.msk.f32.mxu1 %vm580_vm0, %v6202_v32  ;;  %v3079_v63 = vcvt.f32.s32 %v9197_v58 }
 0x70e   : > { %v2972_v21 = vpop.xlane.xlu0 %2971  ;;  %v6203_v43 = vsel %vm3271_vm7, 1.0, %v11658_v6  ;;  %v3065_v32 = vshll.u32 %v3064_v61, 16 }
 0x70f   : > { %11667 = vst [vmem:[#allocation143_spill] sm:$0xff] %v9333_v12  ;;  %v9340_v27 = vadd.s32 %v2960_v59, %v2958_v5  ;;  %v2973_v31 = vcvt.f32.s32 %v2972_v21  ;;  %vm3272_vm8 = vcmp.eq.s32.totalorder %v11657_v37, %v9333_v12  ;;  %6789 = vmatmul.mubr.msk.f32.gmra.mrb[72].mxu1 %vm580_vm0, %v6203_v43  ;;  %v3094_v21 = vcvt.f32.s32 %v9202_v11 }
 0x710   : > { %v2987_v16 = vpop.xlane.xlu1 %2986  ;;  %v6204_v62 = vsel %vm3272_vm8, 1.0, %v11658_v6  ;;  %v3080_v43 = vshll.u32 %v3079_v63, 16 }
 0x711   : > { %11668 = vst [vmem:[#allocation144_spill] sm:$0xff] %v9340_v27  ;;  %v9347_v14 = vadd.s32 %v2975_v20, %v2973_v31  ;;  %v2988_v1 = vcvt.f32.s32 %v2987_v16  ;;  %vm3273_vm9 = vcmp.eq.s32.totalorder %v11657_v37, %v9340_v27  ;;  %6791 = vmatprep.mubr.msk.f32.mxu1 %vm580_vm0, %v6204_v62  ;;  %v3109_v16 = vcvt.f32.s32 %v9207_v60 }
 0x712   : > { %v3002_v23 = vpop.xlane.xlu0 %3001  ;;  %v6205_v13 = vsel %vm3273_vm9, 1.0, %v11658_v6  ;;  %v3095_v62 = vshll.u32 %v3094_v21, 16 }
 0x713   : > { %11669 = vst [vmem:[#allocation145_spill] sm:$0xff] %v9347_v14  ;;  %v9354_v10 = vadd.s32 %v2990_v7, %v2988_v1  ;;  %v3003_v44 = vcvt.f32.s32 %v3002_v23  ;;  %vm3274_vm10 = vcmp.eq.s32.totalorder %v11657_v37, %v9347_v14  ;;  %6792 = vmatmul.mubr.msk.f32.gmra.mrb[74].mxu1 %vm580_vm0, %v6205_v13  ;;  %v3124_v23 = vcvt.f32.s32 %v9212_v34 }
 0x714   : > { %v3017_v47 = vpop.xlane.xlu1 %3016  ;;  %v6206_v48 = vsel %vm3274_vm10, 1.0, %v11658_v6  ;;  %v3110_v13 = vshll.u32 %v3109_v16, 16 }
 0x715   : > { %11670 = vst [vmem:[#allocation146_spill] sm:$0xff] %v9354_v10  ;;  %v9361_v52 = vadd.s32 %v3005_v0, %v3003_v44  ;;  %v3018_v9 = vcvt.f32.s32 %v3017_v47  ;;  %vm3275_vm11 = vcmp.eq.s32.totalorder %v11657_v37, %v9354_v10  ;;  %6794 = vmatprep.mubr.msk.f32.mxu1 %vm580_vm0, %v6206_v48  ;;  %v3139_v47 = vcvt.f32.s32 %v9217_v50 }
 0x716   : > { %v3032_v53 = vpop.xlane.xlu0 %3031  ;;  %v6207_v15 = vsel %vm3275_vm11, 1.0, %v11658_v6  ;;  %v3125_v48 = vshll.u32 %v3124_v23, 16 }
 0x717   : > { %11671 = vst [vmem:[#allocation147_spill] sm:$0xff] %v9361_v52  ;;  %v9368_v2 = vadd.s32 %v3020_v55, %v3018_v9  ;;  %v3033_v49 = vcvt.f32.s32 %v3032_v53  ;;  %vm3276_vm12 = vcmp.eq.s32.totalorder %v11657_v37, %v9361_v52  ;;  %6795 = vmatmul.mubr.msk.f32.gmra.mrb[76].mxu1 %vm580_vm0, %v6207_v15  ;;  %v3154_v53 = vcvt.f32.s32 %v9222_v25 }
 0x718   : > { %v3047_v17 = vpop.xlane.xlu1 %3046  ;;  %v6208_v40 = vsel %vm3276_vm12, 1.0, %v11658_v6  ;;  %v3140_v15 = vshll.u32 %v3139_v47, 16 }
 0x719   : > { %11672 = vst [vmem:[#allocation148_spill] sm:$0xff] %v9368_v2  ;;  %v9375_v59 = vadd.s32 %v3035_v46, %v3033_v49  ;;  %v3048_v30 = vcvt.f32.s32 %v3047_v17  ;;  %vm3277_vm13 = vcmp.eq.s32.totalorder %v11657_v37, %v9368_v2  ;;  %6797 = vmatprep.mubr.msk.f32.mxu1 %vm580_vm0, %v6208_v40  ;;  %v3169_v17 = vcvt.f32.s32 %v9227_v4 }
 0x71a   : > { %v3062_v5 = vpop.xlane.xlu0 %3061  ;;  %v6209_v58 = vsel %vm3277_vm13, 1.0, %v11658_v6  ;;  %v3155_v40 = vshll.u32 %v3154_v53, 16 }
 0x71b   : > { %11673 = vst [vmem:[#allocation149_spill] sm:$0xff] %v9375_v59  ;;  %v9382_v20 = vadd.s32 %v3050_v41, %v3048_v30  ;;  %v3063_v45 = vcvt.f32.s32 %v3062_v5  ;;  %vm3278_vm14 = vcmp.eq.s32.totalorder %v11657_v37, %v9375_v59  ;;  %6798 = vmatmul.mubr.msk.f32.gmra.mrb[78].mxu1 %vm580_vm0, %v6209_v58  ;;  %v3184_v5 = vcvt.f32.s32 %v9232_v19 }
 0x71c   : > { %v3077_v31 = vpop.xlane.xlu1 %3076  ;;  %v6210_v11 = vsel %vm3278_vm14, 1.0, %v11658_v6  ;;  %v3170_v58 = vshll.u32 %v3169_v17, 16 }
 0x71d   : > { %11674 = vst [vmem:[#allocation150_spill] sm:$0xff] %v9382_v20  ;;  %v9389_v7 = vadd.s32 %v3065_v32, %v3063_v45  ;;  %v3078_v38 = vcvt.f32.s32 %v3077_v31  ;;  %vm3279_vm15 = vcmp.eq.s32.totalorder %v11657_v37, %v9382_v20  ;;  %6800 = vmatprep.mubr.msk.f32.mxu1 %vm580_vm0, %v6210_v11  ;;  %v3199_v31 = vcvt.f32.s32 %v9237_v54 }
 0x71e   : > { %v3092_v1 = vpop.xlane.xlu0 %3091  ;;  %v6211_v60 = vsel %vm3279_vm15, 1.0, %v11658_v6  ;;  %v3185_v11 = vshll.u32 %v3184_v5, 16 }
 0x71f   : > { %11675 = vst [vmem:[#allocation151_spill] sm:$0xff] %v9389_v7  ;;  %v9396_v0 = vadd.s32 %v3080_v43, %v3078_v38  ;;  %v3093_v29 = vcvt.f32.s32 %v3092_v1  ;;  %vm3280_vm2 = vcmp.eq.s32.totalorder %v11657_v37, %v9389_v7  ;;  %6801 = vmatmul.mubr.msk.f32.gmra.mrb[80].mxu1 %vm580_vm0, %v6211_v60  ;;  %v3214_v1 = vcvt.f32.s32 %v9242_v8 }
 0x720   : > { %v3107_v44 = vpop.xlane.xlu1 %3106  ;;  %v6212_v34 = vsel %vm3280_vm2, 1.0, %v11658_v6  ;;  %v3200_v60 = vshll.u32 %v3199_v31, 16 }
 0x721   : > { %11676 = vst [vmem:[#allocation152_spill] sm:$0xff] %v9396_v0  ;;  %v9403_v55 = vadd.s32 %v3095_v62, %v3093_v29  ;;  %v3108_v33 = vcvt.f32.s32 %v3107_v44  ;;  %vm3281_vm3 = vcmp.eq.s32.totalorder %v11657_v37, %v9396_v0  ;;  %6803 = vmatprep.mubr.msk.f32.mxu1 %vm580_vm0, %v6212_v34  ;;  %v3229_v44 = vcvt.f32.s32 %v9247_v3 }
 0x722   : > { %v3122_v9 = vpop.xlane.xlu0 %3121  ;;  %v6213_v50 = vsel %vm3281_vm3, 1.0, %v11658_v6  ;;  %v3215_v34 = vshll.u32 %v3214_v1, 16  ;;  %v11689_v1 = vld [vmem:[#allocation83_spill] sm:$0xff] }
 0x723   : > { %11677 = vst [vmem:[#allocation153_spill] sm:$0xff] %v9403_v55  ;;  %v9410_v46 = vadd.s32 %v3110_v13, %v3108_v33  ;;  %v3123_v61 = vcvt.f32.s32 %v3122_v9  ;;  %vm3282_vm4 = vcmp.eq.s32.totalorder %v11657_v37, %v9403_v55  ;;  %6804 = vmatmul.mubr.msk.f32.gmra.mrb[82].mxu1 %vm580_vm0, %v6213_v50  ;;  %v3244_v9 = vcvt.f32.s32 %v9252_v35 }
 0x724   : > { %v3137_v49 = vpop.xlane.xlu1 %3136  ;;  %v6214_v25 = vsel %vm3282_vm4, 1.0, %v11658_v6  ;;  %v3230_v50 = vshll.u32 %v3229_v44, 16 }
 0x725   : > { %11678 = vst [vmem:[#allocation154_spill] sm:$0xff] %v9410_v46  ;;  %v9417_v41 = vadd.s32 %v3125_v48, %v3123_v61  ;;  %v3138_v63 = vcvt.f32.s32 %v3137_v49  ;;  %vm3283_vm5 = vcmp.eq.s32.totalorder %v11657_v37, %v9410_v46  ;;  %6806 = vmatprep.mubr.msk.f32.mxu1 %vm580_vm0, %v6214_v25  ;;  %v3259_v49 = vcvt.f32.s32 %v9256_v28 }
 0x726   : > { %v3152_v30 = vpop.xlane.xlu0 %3151  ;;  %v6215_v4 = vsel %vm3283_vm5, 1.0, %v11658_v6  ;;  %v3245_v25 = vshll.u32 %v3244_v9, 16 }
 0x727   : > { %11679 = vst [vmem:[#allocation155_spill] sm:$0xff] %v9417_v41  ;;  %v9424_v32 = vadd.s32 %v3140_v15, %v3138_v63  ;;  %v3153_v21 = vcvt.f32.s32 %v3152_v30  ;;  %vm3284_vm6 = vcmp.eq.s32.totalorder %v11657_v37, %v9417_v41  ;;  %6807 = vmatmul.mubr.msk.f32.gmra.mrb[84].mxu1 %vm580_vm0, %v6215_v4 }
 0x728   : > { %v3167_v45 = vpop.xlane.xlu1 %3166  ;;  %v6216_v19 = vsel %vm3284_vm6, 1.0, %v11658_v6 }
 0x729   : > { %11680 = vst [vmem:[#allocation156_spill] sm:$0xff] %v9424_v32  ;;  %v9431_v43 = vadd.s32 %v3155_v40, %v3153_v21  ;;  %v3168_v16 = vcvt.f32.s32 %v3167_v45  ;;  %vm3285_vm7 = vcmp.eq.s32.totalorder %v11657_v37, %v9424_v32  ;;  %6809 = vmatprep.mubr.msk.f32.mxu1 %vm580_vm0, %v6216_v19  ;;  %v3260_v21 = vshll.u32 %v3259_v49, 16  ;;  %v11695_v49 = vld [vmem:[#allocation89_spill] sm:$0xff] }
 0x72a   : > { %v3182_v38 = vpop.xlane.xlu0 %3181  ;;  %v6217_v54 = vsel %vm3285_vm7, 1.0, %v11658_v6 }
 0x72b   : > { %11681 = vst [vmem:[#allocation157_spill] sm:$0xff] %v9431_v43  ;;  %v9438_v62 = vadd.s32 %v3170_v58, %v3168_v16  ;;  %v3183_v23 = vcvt.f32.s32 %v3182_v38  ;;  %vm3286_vm8 = vcmp.eq.s32.totalorder %v11657_v37, %v9431_v43  ;;  %6810 = vmatmul.mubr.msk.f32.gmra.mrb[86].mxu1 %vm580_vm0, %v6217_v54 }
 0x72c   : > { %v3197_v29 = vpop.xlane.xlu1 %3196  ;;  %v6218_v8 = vsel %vm3286_vm8, 1.0, %v11658_v6 }
 0x72d   : > { %11682 = vst [vmem:[#allocation158_spill] sm:$0xff] %v9438_v62  ;;  %v9445_v13 = vadd.s32 %v3185_v11, %v3183_v23  ;;  %v3198_v47 = vcvt.f32.s32 %v3197_v29  ;;  %vm3287_vm9 = vcmp.eq.s32.totalorder %v11657_v37, %v9438_v62  ;;  %6812 = vmatprep.mubr.msk.f32.mxu1 %vm580_vm0, %v6218_v8  ;;  %v11693_v8 = vld [vmem:[#allocation68_spill] sm:$0xff] }
 0x72e   : > { %v3212_v33 = vpop.xlane.xlu0 %3211  ;;  %v6219_v3 = vsel %vm3287_vm9, 1.0, %v11658_v6 }
 0x72f   : > { %11683 = vst [vmem:[#allocation159_spill] sm:$0xff] %v9445_v13  ;;  %v9452_v48 = vadd.s32 %v3200_v60, %v3198_v47  ;;  %v3213_v53 = vcvt.f32.s32 %v3212_v33  ;;  %vm3288_vm10 = vcmp.eq.s32.totalorder %v11657_v37, %v9445_v13  ;;  %6813 = vmatmul.mubr.msk.f32.gmra.mrb[88].mxu1 %vm580_vm0, %v6219_v3  ;;  %v11691_v60 = vld [vmem:[#allocation84_spill] sm:$0xff] }
 0x730   : > { %v3227_v61 = vpop.xlane.xlu1 %3226  ;;  %v6220_v35 = vsel %vm3288_vm10, 1.0, %v11658_v6 }
 0x731   : > { %11684 = vst [vmem:[#allocation160_spill] sm:$0xff] %v9452_v48  ;;  %v9459_v15 = vadd.s32 %v3215_v34, %v3213_v53  ;;  %v3228_v17 = vcvt.f32.s32 %v3227_v61  ;;  %vm3289_vm11 = vcmp.eq.s32.totalorder %v11657_v37, %v9452_v48  ;;  %6815 = vmatprep.mubr.msk.f32.mxu1 %vm580_vm0, %v6220_v35  ;;  %v11694_v34 = vld [vmem:[#allocation69_spill] sm:$0xff] }
 0x732   : > { %v3242_v63 = vpop.xlane.xlu0 %3241  ;;  %v6221_v5 = vsel %vm3289_vm11, 1.0, %v11658_v6 }
 0x733   : > { %11685 = vst [vmem:[#allocation161_spill] sm:$0xff] %v9459_v15  ;;  %v9465_v30 = vadd.s32 %v3230_v50, %v3228_v17  ;;  %v3243_v40 = vcvt.f32.s32 %v3242_v63  ;;  %vm3290_vm12 = vcmp.eq.s32.totalorder %v11657_v37, %v9459_v15  ;;  %6816 = vmatmul.mubr.msk.f32.gmra.mrb[90].mxu1 %vm580_vm0, %v6221_v5 }
 0x734   : > { %v3257_v28 = vpop.xlane.xlu1 %3256  ;;  %v6222_v58 = vsel %vm3290_vm12, 1.0, %v11658_v6 }
 0x735   : > { %11686 = vst [vmem:[#allocation162_spill] sm:$0xff] %v9465_v30  ;;  %v9471_v4 = vadd.s32 %v3245_v25, %v3243_v40  ;;  %v3258_v45 = vcvt.f32.s32 %v3257_v28  ;;  %vm3291_vm13 = vcmp.eq.s32.totalorder %v11657_v37, %v9465_v30  ;;  %6818 = vmatprep.mubr.msk.f32.mxu1 %vm580_vm0, %v6222_v58  ;;  %v11697_v40 = vld [vmem:[#allocation90_spill] sm:$0xff] }
 0x736   : > { %v6223_v16 = vsel %vm3291_vm13, 1.0, %v11658_v6 }
 0x737   : > { %11687 = vst [vmem:[#allocation163_spill] sm:$0xff] %v9471_v4  ;;  %v9477_v31 = vadd.s32 %v3260_v21, %v3258_v45  ;;  %vm3292_vm14 = vcmp.eq.s32.totalorder %v11657_v37, %v9471_v4  ;;  %6819 = vmatmul.mubr.msk.f32.gmra.mrb[92].mxu1 %vm580_vm0, %v6223_v16  ;;  %v11699_v45 = vld [vmem:[#allocation70_spill] sm:$0xff] }
 0x738   : > { %v6224_v19 = vsel %vm3292_vm14, 1.0, %v11658_v6 }
 0x739   : > { %11688 = vst [vmem:[#allocation164_spill] sm:$0xff] %v9477_v31  ;;  %vm3293_vm15 = vcmp.eq.s32.totalorder %v11657_v37, %v9477_v31  ;;  %6821 = vmatprep.mubr.msk.f32.mxu1 %vm580_vm0, %v6224_v19  ;;  %v11700_v19 = vld [vmem:[#allocation71_spill] sm:$0xff] }
 0x73a   : > { %v6225_v38 = vsel %vm3293_vm15, 1.0, %v11658_v6 }
 0x73b   : > { %6822 = vmatmul.mubr.msk.f32.gmra.mrb[94].mxu1 %vm580_vm0, %v6225_v38 }
 0x7d2   : > { %v6778_v11 = vpop.f32.mrb[64].mxu1 }
 0x7d3   : > { %v3680_v23 = vsub.f32 %v6778_v11, %v11689_v1  ;;  %v9492_v54 = vsub.f32 %v11689_v1, %v6778_v11  ;;  %v3520_v29 = vpop.f32.mrb[65].mxu1 }
 0x7d4   : > { %v3679_v44 = vsub.f32 %v3520_v29, %v11691_v60  ;;  %v9496_v47 = vsub.f32 %v11691_v60, %v3520_v29  ;;  %v11701_v60 = vld [vmem:[#allocation91_spill] sm:$0xff] }
 0x7d5   : > { %11690 = vst [vmem:[#allocation83_spill] sm:$0xff] %v9492_v54  ;;  %v3712_v33 = vmul.f32 %v11693_v8, %v3680_v23 }
 0x7d6   : > { %11692 = vst [vmem:[#allocation84_spill] sm:$0xff] %v9496_v47  ;;  %v3711_v9 = vmul.f32 %v11694_v34, %v3679_v44  ;;  %v3893_v53 = vpack.c.bf16 %v9492_v54, %v9496_v47  ;;  %v6781_v61 = vpop.f32.mrb[66].mxu1 }
 0x7d7   : > { %v3744_v3 = vmul.f32 %v3712_v33, %v3712_v33  ;;  %v3682_v17 = vsub.f32 %v6781_v61, %v11695_v49  ;;  %v9504_v35 = vsub.f32 %v11695_v49, %v6781_v61  ;;  %v3530_v63 = vpop.f32.mrb[67].mxu1  ;;  %v11705_v49 = vld [vmem:[#allocation72_spill] sm:$0xff] }
 0x7d8   : > { %v3743_v50 = vmul.f32 %v3711_v9, %v3711_v9  ;;  %6828 = vmatprep.mubr.msk.bf16.mxu0 %vm832_vm1, %v3893_v53  ;;  %v3681_v5 = vsub.f32 %v3530_v63, %v11697_v40  ;;  %v9510_v28 = vsub.f32 %v11697_v40, %v3530_v63  ;;  %v11703_v53 = vld [vmem:[#allocation92_spill] sm:$0xff] }
 0x7d9   : > { %11696 = vst [vmem:[#allocation89_spill] sm:$0xff] %v9504_v35  ;;  %v3776_v25 = vsel %vm832_vm1, %v3744_v3, 0.0  ;;  %v3714_v58 = vmul.f32 %v11699_v45, %v3682_v17 }
 0x7da   : > { %11698 = vst [vmem:[#allocation90_spill] sm:$0xff] %v9510_v28  ;;  %v3775_v21 = vsel %vm832_vm1, %v3743_v50, 0.0  ;;  %v3713_v38 = vmul.f32 %v11700_v19, %v3681_v5  ;;  %v3894_v11 = vpack.c.bf16 %v9504_v35, %v9510_v28  ;;  %v6784_v1 = vpop.f32.mrb[68].mxu1  ;;  %v11709_v19 = vld [vmem:[#allocation97_spill] sm:$0xff] }
 0x7db   : > { %v3777_v16 = vadd.f32 %v3776_v25, %v3775_v21  ;;  %v3746_v23 = vmul.f32 %v3714_v58, %v3714_v58  ;;  %v3684_v44 = vsub.f32 %v6784_v1, %v11701_v60  ;;  %v9519_v33 = vsub.f32 %v11701_v60, %v6784_v1  ;;  %v3540_v9 = vpop.f32.mrb[69].mxu1  ;;  %v11706_v25 = vld [vmem:[#allocation73_spill] sm:$0xff] }
 0x7dc   : > { %v3745_v29 = vmul.f32 %v3713_v38, %v3713_v38  ;;  %6829 = vmatmul.mubr.msk.bf16.vlgmr.msra.gmra.mrb[64].mxu0 %vm832_vm1, %v3894_v11  ;;  %v3683_v3 = vsub.f32 %v3540_v9, %v11703_v53  ;;  %v9524_v61 = vsub.f32 %v11703_v53, %v3540_v9  ;;  %v11707_v11 = vld [vmem:[#allocation96_spill] sm:$0xff] }
 0x7dd   : > { %11702 = vst [vmem:[#allocation91_spill] sm:$0xff] %v9519_v33  ;;  %v3716_v17 = vmul.f32 %v11705_v49, %v3684_v44  ;;  %v3780_v58 = vsel %vm832_vm1, %v3746_v23, 0.0 }
 0x7de   : > { %11704 = vst [vmem:[#allocation92_spill] sm:$0xff] %v9524_v61  ;;  %v3778_v50 = vsel %vm832_vm1, %v3745_v29, 0.0  ;;  %v3715_v40 = vmul.f32 %v11706_v25, %v3683_v3  ;;  %v3895_v5 = vpack.c.bf16 %v9519_v33, %v9524_v61  ;;  %v6787_v21 = vpop.f32.mrb[70].mxu1  ;;  %v11711_v3 = vld [vmem:[#allocation74_spill] sm:$0xff] }
 0x7df   : > { %v3779_v63 = vadd.f32 %v3778_v50, %v3777_v16  ;;  %v3748_v38 = vmul.f32 %v3716_v17, %v3716_v17  ;;  %v3686_v1 = vsub.f32 %v6787_v21, %v11707_v11  ;;  %v9534_v60 = vsub.f32 %v11707_v11, %v6787_v21  ;;  %v3550_v9 = vpop.f32.mrb[71].mxu1  ;;  %v11712_v17 = vld [vmem:[#allocation75_spill] sm:$0xff] }
 0x7e0   : > { %v3747_v53 = vmul.f32 %v3715_v40, %v3715_v40  ;;  %v3685_v44 = vsub.f32 %v3550_v9, %v11709_v19  ;;  %v9538_v16 = vsub.f32 %v11709_v19, %v3550_v9  ;;  %6832 = vmatprep.mubr.msk.bf16.mxu0 %vm832_vm1, %v3895_v5 }
 0x7e1   : > { %11708 = vst [vmem:[#allocation96_spill] sm:$0xff] %v9534_v60  ;;  %v3781_v29 = vadd.f32 %v3780_v58, %v3779_v63  ;;  %v3718_v50 = vmul.f32 %v11711_v3, %v3686_v1  ;;  %v11713_v63 = vld [vmem:[#allocation99_spill] sm:$0xff]  ;;  %v3784_v5 = vsel %vm832_vm1, %v3748_v38, 0.0  ;;  %v11715_v1 = vld [vmem:[#allocation100_spill] sm:$0xff] }
 0x7e2   : > { %11710 = vst [vmem:[#allocation97_spill] sm:$0xff] %v9538_v16  ;;  %v3782_v23 = vsel %vm832_vm1, %v3747_v53, 0.0  ;;  %v3717_v25 = vmul.f32 %v11712_v17, %v3685_v44  ;;  %v3896_v21 = vpack.c.bf16 %v9534_v60, %v9538_v16  ;;  %v6790_v11 = vpop.f32.mrb[72].mxu1  ;;  %v11717_v17 = vld [vmem:[#allocation76_spill] sm:$0xff]  ;;  %v11719_v60 = vld [vmem:[#allocation102_spill] sm:$0xff] }
 0x7e3   : > { %v3783_v49 = vadd.f32 %v3782_v23, %v3781_v29  ;;  %v3750_v40 = vmul.f32 %v3718_v50, %v3718_v50  ;;  %v3688_v58 = vsub.f32 %v6790_v11, %v11713_v63  ;;  %v9548_v61 = vsub.f32 %v11713_v63, %v6790_v11  ;;  %v3560_v19 = vpop.f32.mrb[73].mxu1  ;;  %v11718_v23 = vld [vmem:[#allocation77_spill] sm:$0xff] }
 0x7e4   : > { %v3749_v9 = vmul.f32 %v3717_v25, %v3717_v25  ;;  %v3687_v3 = vsub.f32 %v3560_v19, %v11715_v1  ;;  %v9553_v53 = vsub.f32 %v11715_v1, %v3560_v19  ;;  %6833 = vmatmul.mubr.msk.bf16.gmra.mrb[68].mxu0 %vm832_vm1, %v3896_v21 }
 0x7e5   : > { %11714 = vst [vmem:[#allocation99_spill] sm:$0xff] %v9548_v61  ;;  %v3785_v44 = vadd.f32 %v3784_v5, %v3783_v49  ;;  %v3720_v29 = vmul.f32 %v11717_v17, %v3688_v58  ;;  %v3788_v25 = vsel %vm832_vm1, %v3750_v40, 0.0  ;;  %v11721_v58 = vld [vmem:[#allocation103_spill] sm:$0xff] }
 0x7e6   : > { %11716 = vst [vmem:[#allocation100_spill] sm:$0xff] %v9553_v53  ;;  %v3786_v50 = vsel %vm832_vm1, %v3749_v9, 0.0  ;;  %v3719_v16 = vmul.f32 %v11718_v23, %v3687_v3  ;;  %v3897_v11 = vpack.c.bf16 %v9548_v61, %v9553_v53  ;;  %v6793_v63 = vpop.f32.mrb[74].mxu1  ;;  %v11723_v23 = vld [vmem:[#allocation78_spill] sm:$0xff]  ;;  %v11725_v53 = vld [vmem:[#allocation104_spill] sm:$0xff] }
 0x7e7   : > { %v3787_v38 = vadd.f32 %v3786_v50, %v3785_v44  ;;  %v3690_v33 = vsub.f32 %v6793_v63, %v11719_v60  ;;  %v9564_v19 = vsub.f32 %v11719_v60, %v6793_v63  ;;  %v3570_v21 = vpop.f32.mrb[75].mxu1  ;;  %v3752_v49 = vmul.f32 %v3720_v29, %v3720_v29  ;;  %v11724_v44 = vld [vmem:[#allocation79_spill] sm:$0xff] }
 0x7e8   : > { %v3751_v5 = vmul.f32 %v3719_v16, %v3719_v16  ;;  %v3689_v1 = vsub.f32 %v3570_v21, %v11721_v58  ;;  %v9568_v9 = vsub.f32 %v11721_v58, %v3570_v21  ;;  %6836 = vmatprep.mubr.msk.bf16.mxu0 %vm832_vm1, %v3897_v11 }
 0x7e9   : > { %11720 = vst [vmem:[#allocation102_spill] sm:$0xff] %v9564_v19  ;;  %v3789_v3 = vadd.f32 %v3788_v25, %v3787_v38  ;;  %v3722_v17 = vmul.f32 %v11723_v23, %v3690_v33  ;;  %v3792_v11 = vsel %vm832_vm1, %v3752_v49, 0.0  ;;  %v11727_v33 = vld [vmem:[#allocation105_spill] sm:$0xff] }
 0x7ea   : > { %11722 = vst [vmem:[#allocation103_spill] sm:$0xff] %v9568_v9  ;;  %v3790_v40 = vsel %vm832_vm1, %v3751_v5, 0.0  ;;  %v3721_v50 = vmul.f32 %v11724_v44, %v3689_v1  ;;  %v3898_v60 = vpack.c.bf16 %v9564_v19, %v9568_v9  ;;  %v6796_v63 = vpop.f32.mrb[76].mxu1  ;;  %v11729_v44 = vld [vmem:[#allocation80_spill] sm:$0xff]  ;;  %v11731_v9 = vld [vmem:[#allocation107_spill] sm:$0xff] }
 0x7eb   : > { %v3791_v29 = vadd.f32 %v3790_v40, %v3789_v3  ;;  %v3754_v16 = vmul.f32 %v3722_v17, %v3722_v17  ;;  %v3692_v61 = vsub.f32 %v6796_v63, %v11725_v53  ;;  %v9578_v21 = vsub.f32 %v11725_v53, %v6796_v63  ;;  %v3580_v58 = vpop.f32.mrb[77].mxu1  ;;  %v11730_v40 = vld [vmem:[#allocation81_spill] sm:$0xff] }
 0x7ec   : > { %v3753_v25 = vmul.f32 %v3721_v50, %v3721_v50  ;;  %v3691_v38 = vsub.f32 %v3580_v58, %v11727_v33  ;;  %v9583_v5 = vsub.f32 %v11727_v33, %v3580_v58  ;;  %6837 = vmatmul.mubr.msk.bf16.gmra.mrb[72].mxu0 %vm832_vm1, %v3898_v60 }
 0x7ed   : > { %11726 = vst [vmem:[#allocation104_spill] sm:$0xff] %v9578_v21  ;;  %v3793_v1 = vadd.f32 %v3792_v11, %v3791_v29  ;;  %v3724_v3 = vmul.f32 %v11729_v44, %v3692_v61  ;;  %v3796_v49 = vsel %vm832_vm1, %v3754_v16, 0.0  ;;  %v11733_v61 = vld [vmem:[#allocation108_spill] sm:$0xff] }
 0x7ee   : > { %11728 = vst [vmem:[#allocation105_spill] sm:$0xff] %v9583_v5  ;;  %v3794_v17 = vsel %vm832_vm1, %v3753_v25, 0.0  ;;  %v3723_v23 = vmul.f32 %v11730_v40, %v3691_v38  ;;  %v3899_v53 = vpack.c.bf16 %v9578_v21, %v9583_v5  ;;  %v6799_v63 = vpop.f32.mrb[78].mxu1  ;;  %v11735_v40 = vld [vmem:[#allocation82_spill] sm:$0xff] }
 0x7ef   : > { %v3795_v50 = vadd.f32 %v3794_v17, %v3793_v1  ;;  %v3694_v19 = vsub.f32 %v6799_v63, %v11731_v9  ;;  %v9594_v58 = vsub.f32 %v11731_v9, %v6799_v63  ;;  %v3590_v60 = vpop.f32.mrb[79].mxu1  ;;  %v3756_v29 = vmul.f32 %v3724_v3, %v3724_v3  ;;  %v11736_v1 = vld [vmem:[#allocation85_spill] sm:$0xff]  ;;  %v11737_v5 = vld [vmem:[#allocation110_spill] sm:$0xff] }
 0x7f0   : > { %v3755_v11 = vmul.f32 %v3723_v23, %v3723_v23  ;;  %v3693_v33 = vsub.f32 %v3590_v60, %v11733_v61  ;;  %v9598_v25 = vsub.f32 %v11733_v61, %v3590_v60  ;;  %6840 = vmatprep.mubr.msk.bf16.mxu0 %vm832_vm1, %v3899_v53 }
 0x7f1   : > { %11732 = vst [vmem:[#allocation107_spill] sm:$0xff] %v9594_v58  ;;  %v3797_v38 = vadd.f32 %v3796_v49, %v3795_v50  ;;  %v3726_v44 = vmul.f32 %v11735_v40, %v3694_v19  ;;  %v3800_v53 = vsel %vm832_vm1, %v3756_v29, 0.0  ;;  %v11739_v19 = vld [vmem:[#allocation111_spill] sm:$0xff] }
 0x7f2   : > { %11734 = vst [vmem:[#allocation108_spill] sm:$0xff] %v9598_v25  ;;  %v3798_v16 = vsel %vm832_vm1, %v3755_v11, 0.0  ;;  %v3725_v17 = vmul.f32 %v11736_v1, %v3693_v33  ;;  %v3900_v9 = vpack.c.bf16 %v9594_v58, %v9598_v25  ;;  %v6802_v63 = vpop.f32.mrb[80].mxu1  ;;  %v11741_v1 = vld [vmem:[#allocation86_spill] sm:$0xff]  ;;  %v11743_v25 = vld [vmem:[#allocation113_spill] sm:$0xff] }
 0x7f3   : > { %v3799_v3 = vadd.f32 %v3798_v16, %v3797_v38  ;;  %v3758_v23 = vmul.f32 %v3726_v44, %v3726_v44  ;;  %v3696_v21 = vsub.f32 %v6802_v63, %v11737_v5  ;;  %v9608_v60 = vsub.f32 %v11737_v5, %v6802_v63  ;;  %v3600_v61 = vpop.f32.mrb[81].mxu1  ;;  %v11742_v16 = vld [vmem:[#allocation87_spill] sm:$0xff] }
 0x7f4   : > { %v3757_v49 = vmul.f32 %v3725_v17, %v3725_v17  ;;  %v3695_v50 = vsub.f32 %v3600_v61, %v11739_v19  ;;  %v9613_v11 = vsub.f32 %v11739_v19, %v3600_v61  ;;  %6841 = vmatmul.mubr.msk.bf16.gmra.mrb[76].mxu0 %vm832_vm1, %v3900_v9 }
 0x7f5   : > { %11738 = vst [vmem:[#allocation110_spill] sm:$0xff] %v9608_v60  ;;  %v3801_v33 = vadd.f32 %v3800_v53, %v3799_v3  ;;  %v3728_v38 = vmul.f32 %v11741_v1, %v3696_v21  ;;  %v3804_v29 = vsel %vm832_vm1, %v3758_v23, 0.0  ;;  %v11745_v21 = vld [vmem:[#allocation114_spill] sm:$0xff] }
 0x7f6   : > { %11740 = vst [vmem:[#allocation111_spill] sm:$0xff] %v9613_v11  ;;  %v3802_v44 = vsel %vm832_vm1, %v3757_v49, 0.0  ;;  %v3727_v40 = vmul.f32 %v11742_v16, %v3695_v50  ;;  %v3901_v5 = vpack.c.bf16 %v9608_v60, %v9613_v11  ;;  %v6805_v63 = vpop.f32.mrb[82].mxu1  ;;  %v11747_v16 = vld [vmem:[#allocation88_spill] sm:$0xff]  ;;  %v11749_v11 = vld [vmem:[#allocation115_spill] sm:$0xff] }
 0x7f7   : > { %v3803_v17 = vadd.f32 %v3802_v44, %v3801_v33  ;;  %v3698_v58 = vsub.f32 %v6805_v63, %v11743_v25  ;;  %v9624_v61 = vsub.f32 %v11743_v25, %v6805_v63  ;;  %v3610_v9 = vpop.f32.mrb[83].mxu1  ;;  %v3760_v3 = vmul.f32 %v3728_v38, %v3728_v38  ;;  %v11748_v33 = vld [vmem:[#allocation93_spill] sm:$0xff] }
 0x7f8   : > { %v3759_v53 = vmul.f32 %v3727_v40, %v3727_v40  ;;  %v3697_v19 = vsub.f32 %v3610_v9, %v11745_v21  ;;  %v9628_v49 = vsub.f32 %v11745_v21, %v3610_v9  ;;  %6844 = vmatprep.mubr.msk.bf16.mxu0 %vm832_vm1, %v3901_v5 }
 0x7f9   : > { %11744 = vst [vmem:[#allocation113_spill] sm:$0xff] %v9624_v61  ;;  %v3805_v50 = vadd.f32 %v3804_v29, %v3803_v17  ;;  %v3730_v1 = vmul.f32 %v11747_v16, %v3698_v58  ;;  %v3808_v5 = vsel %vm832_vm1, %v3760_v3, 0.0  ;;  %v11751_v58 = vld [vmem:[#allocation116_spill] sm:$0xff] }
 0x7fa   : > { %11746 = vst [vmem:[#allocation114_spill] sm:$0xff] %v9628_v49  ;;  %v3806_v23 = vsel %vm832_vm1, %v3759_v53, 0.0  ;;  %v3729_v44 = vmul.f32 %v11748_v33, %v3697_v19  ;;  %v3902_v25 = vpack.c.bf16 %v9624_v61, %v9628_v49  ;;  %v6808_v63 = vpop.f32.mrb[84].mxu1  ;;  %v11753_v33 = vld [vmem:[#allocation94_spill] sm:$0xff] }
 0x7fb   : > { %v3807_v38 = vadd.f32 %v3806_v23, %v3805_v50  ;;  %v3762_v40 = vmul.f32 %v3730_v1, %v3730_v1  ;;  %v3700_v60 = vsub.f32 %v6808_v63, %v11749_v11  ;;  %v9638_v9 = vsub.f32 %v11749_v11, %v6808_v63  ;;  %v3620_v21 = vpop.f32.mrb[85].mxu1  ;;  %v11754_v23 = vld [vmem:[#allocation95_spill] sm:$0xff]  ;;  %v11755_v49 = vld [vmem:[#allocation118_spill] sm:$0xff] }
 0x7fc   : > { %v3761_v29 = vmul.f32 %v3729_v44, %v3729_v44  ;;  %v3699_v17 = vsub.f32 %v3620_v21, %v11751_v58  ;;  %v9643_v53 = vsub.f32 %v11751_v58, %v3620_v21  ;;  %6845 = vmatmul.mubr.msk.bf16.gmra.mrb[80].mxu0 %vm832_vm1, %v3902_v25 }
 0x7fd   : > { %11750 = vst [vmem:[#allocation115_spill] sm:$0xff] %v9638_v9  ;;  %v3809_v19 = vadd.f32 %v3808_v5, %v3807_v38  ;;  %v3732_v50 = vmul.f32 %v11753_v33, %v3700_v60  ;;  %v3812_v3 = vsel %vm832_vm1, %v3762_v40, 0.0  ;;  %v11757_v60 = vld [vmem:[#allocation119_spill] sm:$0xff] }
 0x7fe   : > { %11752 = vst [vmem:[#allocation116_spill] sm:$0xff] %v9643_v53  ;;  %v3810_v1 = vsel %vm832_vm1, %v3761_v29, 0.0  ;;  %v3731_v16 = vmul.f32 %v11754_v23, %v3699_v17  ;;  %v3903_v11 = vpack.c.bf16 %v9638_v9, %v9643_v53  ;;  %v6811_v63 = vpop.f32.mrb[86].mxu1  ;;  %v11759_v23 = vld [vmem:[#allocation98_spill] sm:$0xff]  ;;  %v11761_v53 = vld [vmem:[#allocation121_spill] sm:$0xff] }
 0x7ff   : > { %v3811_v44 = vadd.f32 %v3810_v1, %v3809_v19  ;;  %v3702_v61 = vsub.f32 %v6811_v63, %v11755_v49  ;;  %v9654_v21 = vsub.f32 %v11755_v49, %v6811_v63  ;;  %v3630_v25 = vpop.f32.mrb[87].mxu1  ;;  %v3764_v38 = vmul.f32 %v3732_v50, %v3732_v50  ;;  %v11760_v19 = vld [vmem:[#allocation101_spill] sm:$0xff] }
 0x800   : > { %v3763_v5 = vmul.f32 %v3731_v16, %v3731_v16  ;;  %v3701_v58 = vsub.f32 %v3630_v25, %v11757_v60  ;;  %v9658_v29 = vsub.f32 %v11757_v60, %v3630_v25  ;;  %6848 = vmatprep.mubr.msk.bf16.mxu0 %vm832_vm1, %v3903_v11 }
 0x801   : > { %11756 = vst [vmem:[#allocation118_spill] sm:$0xff] %v9654_v21  ;;  %v3813_v17 = vadd.f32 %v3812_v3, %v3811_v44  ;;  %v3734_v33 = vmul.f32 %v11759_v23, %v3702_v61  ;;  %v3816_v11 = vsel %vm832_vm1, %v3764_v38, 0.0  ;;  %v11763_v61 = vld [vmem:[#allocation122_spill] sm:$0xff] }
 0x802   : > { %11758 = vst [vmem:[#allocation119_spill] sm:$0xff] %v9658_v29  ;;  %v3814_v40 = vsel %vm832_vm1, %v3763_v5, 0.0  ;;  %v3733_v1 = vmul.f32 %v11760_v19, %v3701_v58  ;;  %v3904_v49 = vpack.c.bf16 %v9654_v21, %v9658_v29  ;;  %v6814_v63 = vpop.f32.mrb[88].mxu1  ;;  %v11765_v19 = vld [vmem:[#allocation106_spill] sm:$0xff]  ;;  %v11767_v29 = vld [vmem:[#allocation123_spill] sm:$0xff] }
 0x803   : > { %v3815_v50 = vadd.f32 %v3814_v40, %v3813_v17  ;;  %v3766_v16 = vmul.f32 %v3734_v33, %v3734_v33  ;;  %v3704_v9 = vsub.f32 %v6814_v63, %v11761_v53  ;;  %v9668_v25 = vsub.f32 %v11761_v53, %v6814_v63  ;;  %v3640_v60 = vpop.f32.mrb[89].mxu1  ;;  %v11766_v40 = vld [vmem:[#allocation109_spill] sm:$0xff] }
 0x804   : > { %v3765_v3 = vmul.f32 %v3733_v1, %v3733_v1  ;;  %v3703_v44 = vsub.f32 %v3640_v60, %v11763_v61  ;;  %v9673_v5 = vsub.f32 %v11763_v61, %v3640_v60  ;;  %6849 = vmatmul.mubr.msk.bf16.gmra.mrb[84].mxu0 %vm832_vm1, %v3904_v49 }
 0x805   : > { %11762 = vst [vmem:[#allocation121_spill] sm:$0xff] %v9668_v25  ;;  %v3817_v58 = vadd.f32 %v3816_v11, %v3815_v50  ;;  %v3736_v17 = vmul.f32 %v11765_v19, %v3704_v9  ;;  %v3820_v38 = vsel %vm832_vm1, %v3766_v16, 0.0  ;;  %v11769_v9 = vld [vmem:[#allocation124_spill] sm:$0xff] }
 0x806   : > { %11764 = vst [vmem:[#allocation122_spill] sm:$0xff] %v9673_v5  ;;  %v3818_v33 = vsel %vm832_vm1, %v3765_v3, 0.0  ;;  %v3735_v23 = vmul.f32 %v11766_v40, %v3703_v44  ;;  %v3905_v53 = vpack.c.bf16 %v9668_v25, %v9673_v5  ;;  %v6817_v63 = vpop.f32.mrb[90].mxu1  ;;  %v11771_v40 = vld [vmem:[#allocation112_spill] sm:$0xff]  ;;  %v11773_v5 = vld [vmem:[#allocation126_spill] sm:$0xff] }
 0x807   : > { %v3819_v1 = vadd.f32 %v3818_v33, %v3817_v58  ;;  %v3706_v21 = vsub.f32 %v6817_v63, %v11767_v29  ;;  %v9684_v60 = vsub.f32 %v11767_v29, %v6817_v63  ;;  %v3650_v49 = vpop.f32.mrb[91].mxu1  ;;  %v3768_v50 = vmul.f32 %v3736_v17, %v3736_v17  ;;  %v11772_v58 = vld [vmem:[#allocation117_spill] sm:$0xff] }
 0x808   : > { %v3767_v11 = vmul.f32 %v3735_v23, %v3735_v23  ;;  %v3705_v61 = vsub.f32 %v3650_v49, %v11769_v9  ;;  %v9688_v3 = vsub.f32 %v11769_v9, %v3650_v49  ;;  %6852 = vmatprep.mubr.msk.bf16.mxu0 %vm832_vm1, %v3905_v53 }
 0x809   : > { %11768 = vst [vmem:[#allocation123_spill] sm:$0xff] %v9684_v60  ;;  %v3821_v44 = vadd.f32 %v3820_v38, %v3819_v1  ;;  %v3738_v19 = vmul.f32 %v11771_v40, %v3706_v21  ;;  %v3824_v53 = vsel %vm832_vm1, %v3768_v50, 0.0  ;;  %v11775_v21 = vld [vmem:[#allocation127_spill] sm:$0xff] }
 0x80a   : > { %11770 = vst [vmem:[#allocation124_spill] sm:$0xff] %v9688_v3  ;;  %v3822_v16 = vsel %vm832_vm1, %v3767_v11, 0.0  ;;  %v3737_v33 = vmul.f32 %v11772_v58, %v3705_v61  ;;  %v3906_v29 = vpack.c.bf16 %v9684_v60, %v9688_v3  ;;  %v6820_v63 = vpop.f32.mrb[92].mxu1  ;;  %v11777_v58 = vld [vmem:[#allocation120_spill] sm:$0xff]  ;;  %v11779_v3 = vld [vmem:[#allocation130_spill] sm:$0xff] }
 0x80b   : > { %v3823_v17 = vadd.f32 %v3822_v16, %v3821_v44  ;;  %v3770_v23 = vmul.f32 %v3738_v19, %v3738_v19  ;;  %v3708_v25 = vsub.f32 %v6820_v63, %v11773_v5  ;;  %v9698_v49 = vsub.f32 %v11773_v5, %v6820_v63  ;;  %v3660_v9 = vpop.f32.mrb[93].mxu1  ;;  %v11778_v16 = vld [vmem:[#allocation125_spill] sm:$0xff] }
 0x80c   : > { %v3769_v38 = vmul.f32 %v3737_v33, %v3737_v33  ;;  %v3707_v1 = vsub.f32 %v3660_v9, %v11775_v21  ;;  %v9703_v11 = vsub.f32 %v11775_v21, %v3660_v9  ;;  %6853 = vmatmul.mubr.msk.bf16.gmra.mrb[88].mxu0 %vm832_vm1, %v3906_v29 }
 0x80d   : > { %11774 = vst [vmem:[#allocation126_spill] sm:$0xff] %v9698_v49  ;;  %v3825_v61 = vadd.f32 %v3824_v53, %v3823_v17  ;;  %v3740_v44 = vmul.f32 %v11777_v58, %v3708_v25  ;;  %v3828_v50 = vsel %vm832_vm1, %v3770_v23, 0.0  ;;  %v11781_v25 = vld [vmem:[#allocation131_spill] sm:$0xff] }
 0x80e   : > { %11776 = vst [vmem:[#allocation127_spill] sm:$0xff] %v9703_v11  ;;  %v3826_v19 = vsel %vm832_vm1, %v3769_v38, 0.0  ;;  %v3739_v40 = vmul.f32 %v11778_v16, %v3707_v1  ;;  %v3907_v5 = vpack.c.bf16 %v9698_v49, %v9703_v11  ;;  %v6823_v63 = vpop.f32.mrb[94].mxu1  ;;  %v11783_v16 = vld [vmem:[#allocation128_spill] sm:$0xff] }
 0x80f   : > { %v3827_v33 = vadd.f32 %v3826_v19, %v3825_v61  ;;  %v3710_v60 = vsub.f32 %v6823_v63, %v11779_v3  ;;  %v9714_v9 = vsub.f32 %v11779_v3, %v6823_v63  ;;  %v3670_v29 = vpop.f32.mrb[95].mxu1  ;;  %v3772_v17 = vmul.f32 %v3740_v44, %v3740_v44  ;;  %v11784_v61 = vld [vmem:[#allocation129_spill] sm:$0xff] }
 0x810   : > { %v3771_v53 = vmul.f32 %v3739_v40, %v3739_v40  ;;  %v3709_v21 = vsub.f32 %v3670_v29, %v11781_v25  ;;  %v9718_v38 = vsub.f32 %v11781_v25, %v3670_v29  ;;  %6856 = vmatprep.mubr.msk.bf16.mxu0 %vm832_vm1, %v3907_v5 }
 0x811   : > { %11780 = vst [vmem:[#allocation130_spill] sm:$0xff] %v9714_v9  ;;  %v3829_v1 = vadd.f32 %v3828_v50, %v3827_v33  ;;  %v3742_v58 = vmul.f32 %v11783_v16, %v3710_v60  ;;  %v3832_v40 = vsel %vm832_vm1, %v3772_v17, 0.0 }
 0x812   : > { %11782 = vst [vmem:[#allocation131_spill] sm:$0xff] %v9718_v38  ;;  %v3830_v23 = vsel %vm832_vm1, %v3771_v53, 0.0  ;;  %v3741_v19 = vmul.f32 %v11784_v61, %v3709_v21  ;;  %v3908_v3 = vpack.c.bf16 %v9714_v9, %v9718_v38  ;;  %v11786_v53 = vld [vmem:[#allocation2_spill] sm:$0xff] }
 0x813   : > { %v3831_v63 = vadd.f32 %v3830_v23, %v3829_v1  ;;  %v3774_v44 = vmul.f32 %v3742_v58, %v3742_v58  ;;  %v4132_v25 = vsub.s32 4, %v11786_v53  ;;  %v7036_v21 = vld [vmem:[%s11030_s5] sm:$0xff] }
 0x814   : > { %v3773_v11 = vmul.f32 %v3741_v19, %v3741_v19  ;;  %6857 = vmatmul.mubr.msk.bf16.gmra.mrb[92].mxu0 %vm832_vm1, %v3908_v3 }
 0x815   : > { %v3833_v29 = vadd.f32 %v3832_v40, %v3831_v63  ;;  %v3836_v60 = vsel %vm832_vm1, %v3774_v44, 0.0  ;;  %v9736_v1 = vrot.slane %v7036_v21, %v4132_v25 }
 0x816   : > { %v3834_v5 = vsel %vm832_vm1, %v3773_v11, 0.0 }
 0x817   : > { %v3835_v50 = vadd.f32 %v3834_v5, %v3833_v29 }
 0x819   : > { %v9730_v33 = vadd.f32 %v3836_v60, %v3835_v50 }
 0x81b   : > { %11785 = vst [vmem:[#allocation165_spill] sm:$0xff] %v9730_v33 }
 0x8af   : > { %v6830_v58 = vpop.f32.mrb[64].mxu0 }
 0x8b0   : > { %v4003_v17 = vpop.f32.mrb[65].mxu0  ;;  %v9742_v3 = vadd.f32 %v6830_v58, %v9736_v1 }
 0x8b1   : > { %v9739_v23 = vadd.f32 %v9736_v1, %v4003_v17  ;;  %v6831_v19 = vpop.f32.mrb[66].mxu0 }
 0x8b2   : > { %v4006_v11 = vpop.f32.mrb[67].mxu0  ;;  %v9750_v44 = vadd.f32 %v6831_v19, %v9736_v1  ;;  %v4172_v5 = vsel %vm580_vm0, %v9742_v3, inf }
 0x8b3   : > { %v9745_v63 = vadd.f32 %v9736_v1, %v4006_v11  ;;  %v4166_v40 = vsel %vm580_vm0, %v9739_v23, inf }
 0x8b4   : > { %4167 = vmin.xlane.f32.xlu0 %v4166_v40  ;;  %v4175_v25 = vsel %vm580_vm0, %v9750_v44, inf }
 0x8b5   : > { %v4169_v29 = vsel %vm580_vm0, %v9745_v63, inf }
 0x8b6   : > { %4170 = vmin.xlane.f32.xlu1 %v4169_v29 }
 0x8b7   : > { %v6834_v50 = vpop.f32.mrb[68].mxu0 }
 0x8b8   : > { %4173 = vmin.xlane.f32.xlu0 %v4172_v5  ;;  %v4019_v60 = vpop.f32.mrb[69].mxu0  ;;  %v9762_v19 = vadd.f32 %v6834_v50, %v9736_v1 }
 0x8b9   : > { %v9759_v21 = vadd.f32 %v9736_v1, %v4019_v60  ;;  %v6835_v58 = vpop.f32.mrb[70].mxu0 }
 0x8ba   : > { %4176 = vmin.xlane.f32.xlu1 %v4175_v25  ;;  %v4022_v17 = vpop.f32.mrb[71].mxu0  ;;  %v9770_v29 = vadd.f32 %v6835_v58, %v9736_v1  ;;  %v4184_v25 = vsel %vm580_vm0, %v9762_v19, inf }
 0x8bb   : > { %v9765_v11 = vadd.f32 %v9736_v1, %v4022_v17  ;;  %v4178_v40 = vsel %vm580_vm0, %v9759_v21, inf }
 0x8bc   : > { %4179 = vmin.xlane.f32.xlu0 %v4178_v40  ;;  %v4187_v40 = vsel %vm580_vm0, %v9770_v29, inf }
 0x8bd   : > { %v4181_v5 = vsel %vm580_vm0, %v9765_v11, inf }
 0x8be   : > { %4182 = vmin.xlane.f32.xlu1 %v4181_v5 }
 0x8bf   : > { %v6838_v60 = vpop.f32.mrb[72].mxu0 }
 0x8c0   : > { %4185 = vmin.xlane.f32.xlu0 %v4184_v25  ;;  %v4035_v50 = vpop.f32.mrb[73].mxu0  ;;  %v9782_v61 = vadd.f32 %v6838_v60, %v9736_v1 }
 0x8c1   : > { %v9777_v17 = vadd.f32 %v9736_v1, %v4035_v50  ;;  %v6839_v53 = vpop.f32.mrb[74].mxu0 }
 0x8c2   : > { %4188 = vmin.xlane.f32.xlu1 %v4187_v40  ;;  %v4038_v58 = vpop.f32.mrb[75].mxu0  ;;  %v9790_v25 = vadd.f32 %v6839_v53, %v9736_v1  ;;  %v4196_v40 = vsel %vm580_vm0, %v9782_v61, inf }
 0x8c3   : > { %v9785_v5 = vadd.f32 %v9736_v1, %v4038_v58  ;;  %v4190_v16 = vsel %vm580_vm0, %v9777_v17, inf }
 0x8c4   : > { %4191 = vmin.xlane.f32.xlu0 %v4190_v16  ;;  %v4199_v16 = vsel %vm580_vm0, %v9790_v25, inf }
 0x8c5   : > { %v4193_v50 = vsel %vm580_vm0, %v9785_v5, inf }
 0x8c6   : > { %4194 = vmin.xlane.f32.xlu1 %v4193_v50 }
 0x8c7   : > { %v6842_v38 = vpop.f32.mrb[76].mxu0 }
 0x8c8   : > { %4197 = vmin.xlane.f32.xlu0 %v4196_v40  ;;  %v4051_v60 = vpop.f32.mrb[77].mxu0  ;;  %v9802_v49 = vadd.f32 %v6842_v38, %v9736_v1 }
 0x8c9   : > { %v9797_v58 = vadd.f32 %v9736_v1, %v4051_v60  ;;  %v6843_v9 = vpop.f32.mrb[78].mxu0 }
 0x8ca   : > { %4200 = vmin.xlane.f32.xlu1 %v4199_v16  ;;  %v4054_v53 = vpop.f32.mrb[79].mxu0  ;;  %v9810_v40 = vadd.f32 %v6843_v9, %v9736_v1  ;;  %v4208_v16 = vsel %vm580_vm0, %v9802_v49, inf }
 0x8cb   : > { %v9805_v50 = vadd.f32 %v9736_v1, %v4054_v53  ;;  %v4202_v45 = vsel %vm580_vm0, %v9797_v58, inf }
 0x8cc   : > { %4203 = vmin.xlane.f32.xlu0 %v4202_v45  ;;  %v4211_v45 = vsel %vm580_vm0, %v9810_v40, inf }
 0x8cd   : > { %v4205_v60 = vsel %vm580_vm0, %v9805_v50, inf }
 0x8ce   : > { %4206 = vmin.xlane.f32.xlu1 %v4205_v60 }
 0x8cf   : > { %v6846_v28 = vpop.f32.mrb[80].mxu0 }
 0x8d0   : > { %4209 = vmin.xlane.f32.xlu0 %v4208_v16  ;;  %v4067_v38 = vpop.f32.mrb[81].mxu0  ;;  %v9822_v34 = vadd.f32 %v6846_v28, %v9736_v1 }
 0x8d1   : > { %v9817_v53 = vadd.f32 %v9736_v1, %v4067_v38  ;;  %v6847_v35 = vpop.f32.mrb[82].mxu0 }
 0x8d2   : > { %4212 = vmin.xlane.f32.xlu1 %v4211_v45  ;;  %v4070_v9 = vpop.f32.mrb[83].mxu0  ;;  %v9830_v16 = vadd.f32 %v6847_v35, %v9736_v1  ;;  %v4220_v45 = vsel %vm580_vm0, %v9822_v34, inf }
 0x8d3   : > { %v9825_v60 = vadd.f32 %v9736_v1, %v4070_v9  ;;  %v4214_v8 = vsel %vm580_vm0, %v9817_v53, inf }
 0x8d4   : > { %4215 = vmin.xlane.f32.xlu0 %v4214_v8  ;;  %v4223_v8 = vsel %vm580_vm0, %v9830_v16, inf }
 0x8d5   : > { %v4217_v38 = vsel %vm580_vm0, %v9825_v60, inf }
 0x8d6   : > { %4218 = vmin.xlane.f32.xlu1 %v4217_v38 }
 0x8d7   : > { %v6850_v47 = vpop.f32.mrb[84].mxu0 }
 0x8d8   : > { %4221 = vmin.xlane.f32.xlu0 %v4220_v45  ;;  %v4083_v28 = vpop.f32.mrb[85].mxu0  ;;  %v9842_v31 = vadd.f32 %v6850_v47, %v9736_v1 }
 0x8d9   : > { %v9837_v9 = vadd.f32 %v9736_v1, %v4083_v28  ;;  %v6851_v54 = vpop.f32.mrb[86].mxu0 }
 0x8da   : > { %4224 = vmin.xlane.f32.xlu1 %v4223_v8  ;;  %v4086_v35 = vpop.f32.mrb[87].mxu0  ;;  %v9850_v45 = vadd.f32 %v6851_v54, %v9736_v1  ;;  %v4232_v8 = vsel %vm580_vm0, %v9842_v31, inf }
 0x8db   : > { %v9845_v38 = vadd.f32 %v9736_v1, %v4086_v35  ;;  %v4226_v4 = vsel %vm580_vm0, %v9837_v9, inf }
 0x8dc   : > { %4227 = vmin.xlane.f32.xlu0 %v4226_v4  ;;  %v4235_v4 = vsel %vm580_vm0, %v9850_v45, inf }
 0x8dd   : > { %v4229_v28 = vsel %vm580_vm0, %v9845_v38, inf }
 0x8de   : > { %4230 = vmin.xlane.f32.xlu1 %v4229_v28 }
 0x8df   : > { %v6854_v30 = vpop.f32.mrb[88].mxu0 }
 0x8e0   : > { %4233 = vmin.xlane.f32.xlu0 %v4232_v8  ;;  %v4099_v47 = vpop.f32.mrb[89].mxu0  ;;  %v9862_v6 = vadd.f32 %v6854_v30, %v9736_v1 }
 0x8e1   : > { %v9857_v35 = vadd.f32 %v9736_v1, %v4099_v47  ;;  %v6855_v15 = vpop.f32.mrb[90].mxu0 }
 0x8e2   : > { %4236 = vmin.xlane.f32.xlu1 %v4235_v4  ;;  %v4102_v54 = vpop.f32.mrb[91].mxu0  ;;  %v9870_v8 = vadd.f32 %v6855_v15, %v9736_v1  ;;  %v4244_v4 = vsel %vm580_vm0, %v9862_v6, inf }
 0x8e3   : > { %v9865_v28 = vadd.f32 %v9736_v1, %v4102_v54  ;;  %v4238_v48 = vsel %vm580_vm0, %v9857_v35, inf }
 0x8e4   : > { %4239 = vmin.xlane.f32.xlu0 %v4238_v48  ;;  %v4247_v48 = vsel %vm580_vm0, %v9870_v8, inf }
 0x8e5   : > { %v4241_v47 = vsel %vm580_vm0, %v9865_v28, inf }
 0x8e6   : > { %4242 = vmin.xlane.f32.xlu1 %v4241_v47 }
 0x8e7   : > { %v6858_v13 = vpop.f32.mrb[92].mxu0 }
 0x8e8   : > { %4245 = vmin.xlane.f32.xlu0 %v4244_v4  ;;  %v4115_v30 = vpop.f32.mrb[93].mxu0  ;;  %v9885_v47 = vadd.f32 %v6858_v13, %v9736_v1 }
 0x8e9   : > { %v9877_v54 = vadd.f32 %v9736_v1, %v4115_v30  ;;  %v6859_v62 = vpop.f32.mrb[94].mxu0 }
 0x8ea   : > { %v9882_v15 = vadd.f32 %v6859_v62, %v9736_v1  ;;  %4248 = vmin.xlane.f32.xlu1 %v4247_v48  ;;  %v4118_v43 = vpop.f32.mrb[95].mxu0  ;;  %v4256_v62 = vsel %vm580_vm0, %v9885_v47, inf }
 0x8eb   : > { %v9888_v32 = vadd.f32 %v9736_v1, %v4118_v43  ;;  %v4250_v4 = vsel %vm580_vm0, %v9877_v54, inf }
 0x8ec   : > { %4251 = vmin.xlane.f32.xlu0 %v4250_v4  ;;  %v4259_v48 = vsel %vm580_vm0, %v9882_v15, inf }
 0x8ed   : > { %v4253_v30 = vsel %vm580_vm0, %v9888_v32, inf }
 0x8ee   : > { %4254 = vmin.xlane.f32.xlu1 %v4253_v30 }
 0x8f0   : > { %4257 = vmin.xlane.f32.xlu0 %v4256_v62 }
 0x8f2   : > { %4260 = vmin.xlane.f32.xlu1 %v4259_v48 }
 0x941   : > { %v4168_v13 = vpop.xlane.xlu0 %4167 }
 0x942   : > { %vm4262_vm2 = vcmp.eq.f32.partialorder %v9739_v23, %v4168_v13 }
 0x943   : > { %v4294_v43 = vsel %vm4262_vm2, %v11657_v37, 64  ;;  %v4171_v1 = vpop.xlane.xlu1 %4170 }
 0x944   : > { %v9901_v4 = vsel %vm580_vm0, %v4294_v43, 2147483647  ;;  %vm4263_vm3 = vcmp.eq.f32.partialorder %v9745_v63, %v4171_v1 }
 0x945   : > { %v4295_v30 = vsel %vm4263_vm3, %v11657_v37, 64  ;;  %v4174_v41 = vpop.xlane.xlu0 %4173  ;;  %v4328_v62 = vshra.s32 %v9901_v4, 16 }
 0x946   : > { %v9907_v46 = vsel %vm580_vm0, %v4295_v30, 2147483647  ;;  %vm4264_vm4 = vcmp.eq.f32.partialorder %v9742_v3, %v4174_v41 }
 0x947   : > { %v4343_v23 = vshra.s32 %v9907_v46, 16  ;;  %v4296_v48 = vsel %vm4264_vm4, %v11657_v37, 64  ;;  %v4177_v13 = vpop.xlane.xlu1 %4176  ;;  %v9912_v55 = vcvt.s32.f32 %v4328_v62 }
 0x948   : > { %v9915_v43 = vsel %vm580_vm0, %v4296_v48, 2147483647  ;;  %vm4265_vm5 = vcmp.eq.f32.partialorder %v9750_v44, %v4177_v13 }
 0x949   : > { %v4358_v63 = vshra.s32 %v9915_v43, 16  ;;  %v4297_v1 = vsel %vm4265_vm5, %v11657_v37, 64  ;;  %4331 = vmin.xlane.f32.xlu0 %v9912_v55  ;;  %v9921_v30 = vcvt.s32.f32 %v4343_v23  ;;  %v4180_v3 = vpop.xlane.xlu0 %4179 }
 0x94a   : > { %v9924_v41 = vsel %vm580_vm0, %v4297_v1, 2147483647  ;;  %vm4266_vm6 = vcmp.eq.f32.partialorder %v9759_v21, %v4180_v3 }
 0x94b   : > { %v4373_v62 = vshra.s32 %v9924_v41, 16  ;;  %4346 = vmin.xlane.f32.xlu1 %v9921_v30  ;;  %v9929_v48 = vcvt.s32.f32 %v4358_v63  ;;  %v4298_v44 = vsel %vm4266_vm6, %v11657_v37, 64  ;;  %v4183_v13 = vpop.xlane.xlu1 %4182 }
 0x94c   : > { %v9933_v0 = vsel %vm580_vm0, %v4298_v44, 2147483647  ;;  %vm4267_vm7 = vcmp.eq.f32.partialorder %v9765_v11, %v4183_v13 }
 0x94d   : > { %4361 = vmin.xlane.f32.xlu0 %v9929_v48  ;;  %v9937_v23 = vcvt.s32.f32 %v4373_v62  ;;  %v4388_v1 = vshra.s32 %v9933_v0, 16  ;;  %v4299_v21 = vsel %vm4267_vm7, %v11657_v37, 64  ;;  %v4186_v3 = vpop.xlane.xlu0 %4185 }
 0x94e   : > { %v9942_v63 = vsel %vm580_vm0, %v4299_v21, 2147483647  ;;  %vm4268_vm8 = vcmp.eq.f32.partialorder %v9762_v19, %v4186_v3 }
 0x94f   : > { %4376 = vmin.xlane.f32.xlu1 %v9937_v23  ;;  %v4403_v44 = vshra.s32 %v9942_v63, 16  ;;  %v4300_v11 = vsel %vm4268_vm8, %v11657_v37, 64  ;;  %v4189_v13 = vpop.xlane.xlu1 %4188  ;;  %v9948_v7 = vcvt.s32.f32 %v4388_v1 }
 0x950   : > { %v9951_v62 = vsel %vm580_vm0, %v4300_v11, 2147483647  ;;  %vm4269_vm9 = vcmp.eq.f32.partialorder %v9770_v29, %v4189_v13 }
 0x951   : > { %v4418_v20 = vshra.s32 %v9951_v62, 16  ;;  %v4301_v21 = vsel %vm4269_vm9, %v11657_v37, 64  ;;  %v4192_v59 = vpop.xlane.xlu0 %4191  ;;  %4391 = vmin.xlane.f32.xlu0 %v9948_v7  ;;  %v9957_v19 = vcvt.s32.f32 %v4403_v44 }
 0x952   : > { %v9960_v3 = vsel %vm580_vm0, %v4301_v21, 2147483647  ;;  %vm4270_vm10 = vcmp.eq.f32.partialorder %v9777_v17, %v4192_v59 }
 0x953   : > { %v4433_v1 = vshra.s32 %v9960_v3, 16  ;;  %v4302_v11 = vsel %vm4270_vm10, %v11657_v37, 64  ;;  %4406 = vmin.xlane.f32.xlu1 %v9957_v19  ;;  %v4195_v29 = vpop.xlane.xlu1 %4194  ;;  %v9966_v13 = vcvt.s32.f32 %v4418_v20 }
 0x954   : > { %v9969_v2 = vsel %vm580_vm0, %v4302_v11, 2147483647  ;;  %vm4271_vm11 = vcmp.eq.f32.partialorder %v9785_v5, %v4195_v29 }
 0x955   : > { %v4448_v44 = vshra.s32 %v9969_v2, 16  ;;  %v4303_v21 = vsel %vm4271_vm11, %v11657_v37, 64  ;;  %v4198_v52 = vpop.xlane.xlu0 %4197  ;;  %4421 = vmin.xlane.f32.xlu0 %v9966_v13  ;;  %v9975_v59 = vcvt.s32.f32 %v4433_v1 }
 0x956   : > { %v9978_v17 = vsel %vm580_vm0, %v4303_v21, 2147483647  ;;  %vm4272_vm12 = vcmp.eq.f32.partialorder %v9782_v61, %v4198_v52 }
 0x957   : > { %v4463_v20 = vshra.s32 %v9978_v17, 16  ;;  %v4304_v11 = vsel %vm4272_vm12, %v11657_v37, 64  ;;  %4436 = vmin.xlane.f32.xlu1 %v9975_v59  ;;  %v4201_v5 = vpop.xlane.xlu1 %4200  ;;  %v9984_v29 = vcvt.s32.f32 %v4448_v44 }
 0x958   : > { %v9987_v10 = vsel %vm580_vm0, %v4304_v11, 2147483647  ;;  %vm4273_vm13 = vcmp.eq.f32.partialorder %v9790_v25, %v4201_v5 }
 0x959   : > { %v4478_v1 = vshra.s32 %v9987_v10, 16  ;;  %v4305_v21 = vsel %vm4273_vm13, %v11657_v37, 64  ;;  %v4204_v14 = vpop.xlane.xlu0 %4203  ;;  %4451 = vmin.xlane.f32.xlu0 %v9984_v29  ;;  %v9993_v52 = vcvt.s32.f32 %v4463_v20 }
 0x95a   : > { %v9996_v61 = vsel %vm580_vm0, %v4305_v21, 2147483647  ;;  %vm4274_vm14 = vcmp.eq.f32.partialorder %v9797_v58, %v4204_v14 }
 0x95b   : > { %v4493_v44 = vshra.s32 %v9996_v61, 16  ;;  %v4306_v11 = vsel %vm4274_vm14, %v11657_v37, 64  ;;  %4466 = vmin.xlane.f32.xlu1 %v9993_v52  ;;  %v4207_v25 = vpop.xlane.xlu1 %4206  ;;  %v10002_v5 = vcvt.s32.f32 %v4478_v1 }
 0x95c   : > { %v10005_v27 = vsel %vm580_vm0, %v4306_v11, 2147483647  ;;  %vm4275_vm15 = vcmp.eq.f32.partialorder %v9805_v50, %v4207_v25 }
 0x95d   : > { %v4508_v20 = vshra.s32 %v10005_v27, 16  ;;  %v4307_v21 = vsel %vm4275_vm15, %v11657_v37, 64  ;;  %v4210_v12 = vpop.xlane.xlu0 %4209  ;;  %4481 = vmin.xlane.f32.xlu0 %v10002_v5  ;;  %v10011_v14 = vcvt.s32.f32 %v4493_v44 }
 0x95e   : > { %v10014_v58 = vsel %vm580_vm0, %v4307_v21, 2147483647  ;;  %vm4276_vm2 = vcmp.eq.f32.partialorder %v9802_v49, %v4210_v12 }
 0x95f   : > { %v4523_v1 = vshra.s32 %v10014_v58, 16  ;;  %v4308_v11 = vsel %vm4276_vm2, %v11657_v37, 64  ;;  %4496 = vmin.xlane.f32.xlu1 %v10011_v14  ;;  %v4213_v50 = vpop.xlane.xlu1 %4212  ;;  %v10020_v25 = vcvt.s32.f32 %v4508_v20 }
 0x960   : > { %v10023_v56 = vsel %vm580_vm0, %v4308_v11, 2147483647  ;;  %vm4277_vm3 = vcmp.eq.f32.partialorder %v9810_v40, %v4213_v50 }
 0x961   : > { %v4538_v44 = vshra.s32 %v10023_v56, 16  ;;  %v4309_v21 = vsel %vm4277_vm3, %v11657_v37, 64  ;;  %v4216_v26 = vpop.xlane.xlu0 %4215  ;;  %4511 = vmin.xlane.f32.xlu0 %v10020_v25  ;;  %v10029_v12 = vcvt.s32.f32 %v4523_v1 }
 0x962   : > { %v10032_v49 = vsel %vm580_vm0, %v4309_v21, 2147483647  ;;  %vm4278_vm4 = vcmp.eq.f32.partialorder %v9817_v53, %v4216_v26 }
 0x963   : > { %v4553_v20 = vshra.s32 %v10032_v49, 16  ;;  %v4310_v11 = vsel %vm4278_vm4, %v11657_v37, 64  ;;  %4526 = vmin.xlane.f32.xlu1 %v10029_v12  ;;  %v4219_v40 = vpop.xlane.xlu1 %4218  ;;  %v10038_v50 = vcvt.s32.f32 %v4538_v44 }
 0x964   : > { %v10041_v42 = vsel %vm580_vm0, %v4310_v11, 2147483647  ;;  %vm4279_vm5 = vcmp.eq.f32.partialorder %v9825_v60, %v4219_v40 }
 0x965   : > { %v4568_v1 = vshra.s32 %v10041_v42, 16  ;;  %v4311_v21 = vsel %vm4279_vm5, %v11657_v37, 64  ;;  %v4222_v24 = vpop.xlane.xlu0 %4221  ;;  %4541 = vmin.xlane.f32.xlu0 %v10038_v50  ;;  %v10047_v26 = vcvt.s32.f32 %v4553_v20 }
 0x966   : > { %v10050_v53 = vsel %vm580_vm0, %v4311_v21, 2147483647  ;;  %vm4280_vm6 = vcmp.eq.f32.partialorder %v9822_v34, %v4222_v24 }
 0x967   : > { %v4583_v44 = vshra.s32 %v10050_v53, 16  ;;  %v4312_v11 = vsel %vm4280_vm6, %v11657_v37, 64  ;;  %4556 = vmin.xlane.f32.xlu1 %v10047_v26  ;;  %v4225_v60 = vpop.xlane.xlu1 %4224  ;;  %v10056_v40 = vcvt.s32.f32 %v4568_v1 }
 0x968   : > { %v10059_v51 = vsel %vm580_vm0, %v4312_v11, 2147483647  ;;  %vm4281_vm7 = vcmp.eq.f32.partialorder %v9830_v16, %v4225_v60 }
 0x969   : > { %v4598_v20 = vshra.s32 %v10059_v51, 16  ;;  %v4313_v21 = vsel %vm4281_vm7, %v11657_v37, 64  ;;  %v4228_v18 = vpop.xlane.xlu0 %4227  ;;  %4571 = vmin.xlane.f32.xlu0 %v10056_v40  ;;  %v10065_v24 = vcvt.s32.f32 %v4583_v44 }
 0x96a   : > { %v10068_v34 = vsel %vm580_vm0, %v4313_v21, 2147483647  ;;  %vm4282_vm8 = vcmp.eq.f32.partialorder %v9837_v9, %v4228_v18 }
 0x96b   : > { %v4613_v1 = vshra.s32 %v10068_v34, 16  ;;  %v4314_v11 = vsel %vm4282_vm8, %v11657_v37, 64  ;;  %4586 = vmin.xlane.f32.xlu1 %v10065_v24  ;;  %v4231_v16 = vpop.xlane.xlu1 %4230  ;;  %v10074_v60 = vcvt.s32.f32 %v4598_v20 }
 0x96c   : > { %v10077_v36 = vsel %vm580_vm0, %v4314_v11, 2147483647  ;;  %vm4283_vm9 = vcmp.eq.f32.partialorder %v9845_v38, %v4231_v16 }
 0x96d   : > { %v4628_v44 = vshra.s32 %v10077_v36, 16  ;;  %v4315_v21 = vsel %vm4283_vm9, %v11657_v37, 64  ;;  %v4234_v22 = vpop.xlane.xlu0 %4233  ;;  %4601 = vmin.xlane.f32.xlu0 %v10074_v60  ;;  %v10083_v18 = vcvt.s32.f32 %v4613_v1 }
 0x96e   : > { %v10086_v9 = vsel %vm580_vm0, %v4315_v21, 2147483647  ;;  %vm4284_vm10 = vcmp.eq.f32.partialorder %v9842_v31, %v4234_v22 }
 0x96f   : > { %v4643_v20 = vshra.s32 %v10086_v9, 16  ;;  %v4316_v11 = vsel %vm4284_vm10, %v11657_v37, 64  ;;  %4616 = vmin.xlane.f32.xlu1 %v10083_v18  ;;  %v4237_v38 = vpop.xlane.xlu1 %4236  ;;  %v10092_v16 = vcvt.s32.f32 %v4628_v44 }
 0x970   : > { %v10095_v39 = vsel %vm580_vm0, %v4316_v11, 2147483647  ;;  %vm4285_vm11 = vcmp.eq.f32.partialorder %v9850_v45, %v4237_v38 }
 0x971   : > { %11787 = vst [vmem:[#allocation166_spill] sm:$0xff] %v10092_v16  ;;  %v4658_v1 = vshra.s32 %v10095_v39, 16  ;;  %v4317_v21 = vsel %vm4285_vm11, %v11657_v37, 64  ;;  %v4240_v57 = vpop.xlane.xlu0 %4239  ;;  %4631 = vmin.xlane.f32.xlu0 %v10092_v16  ;;  %v10101_v22 = vcvt.s32.f32 %v4643_v20 }
 0x972   : > { %v10104_v31 = vsel %vm580_vm0, %v4317_v21, 2147483647  ;;  %vm4286_vm12 = vcmp.eq.f32.partialorder %v9857_v35, %v4240_v57 }
 0x973   : > { %v4673_v44 = vshra.s32 %v10104_v31, 16  ;;  %v4318_v11 = vsel %vm4286_vm12, %v11657_v37, 64  ;;  %4646 = vmin.xlane.f32.xlu1 %v10101_v22  ;;  %v4243_v45 = vpop.xlane.xlu1 %4242  ;;  %v10110_v38 = vcvt.s32.f32 %v4658_v1 }
 0x974   : > { %v10113_v33 = vsel %vm580_vm0, %v4318_v11, 2147483647  ;;  %vm4287_vm13 = vcmp.eq.f32.partialorder %v9865_v28, %v4243_v45 }
 0x975   : > { %11788 = vst [vmem:[#allocation167_spill] sm:$0xff] %v10113_v33  ;;  %v4688_v20 = vshra.s32 %v10113_v33, 16  ;;  %v4319_v21 = vsel %vm4287_vm13, %v11657_v37, 64  ;;  %v4246_v16 = vpop.xlane.xlu0 %4245  ;;  %4661 = vmin.xlane.f32.xlu0 %v10110_v38  ;;  %v10119_v57 = vcvt.s32.f32 %v4673_v44 }
 0x976   : > { %v10122_v35 = vsel %vm580_vm0, %v4319_v21, 2147483647  ;;  %vm4288_vm14 = vcmp.eq.f32.partialorder %v9862_v6, %v4246_v16 }
 0x977   : > { %11789 = vst [vmem:[#allocation168_spill] sm:$0xff] %v10122_v35  ;;  %v4703_v1 = vshra.s32 %v10122_v35, 16  ;;  %v4320_v11 = vsel %vm4288_vm14, %v11657_v37, 64  ;;  %4676 = vmin.xlane.f32.xlu1 %v10119_v57  ;;  %v4249_v28 = vpop.xlane.xlu1 %4248  ;;  %v10128_v45 = vcvt.s32.f32 %v4688_v20 }
 0x978   : > { %v10131_v33 = vsel %vm580_vm0, %v4320_v11, 2147483647  ;;  %vm4289_vm15 = vcmp.eq.f32.partialorder %v9870_v8, %v4249_v28 }
 0x979   : > { %11790 = vst [vmem:[#allocation169_spill] sm:$0xff] %v10131_v33  ;;  %v4718_v44 = vshra.s32 %v10131_v33, 16  ;;  %v4321_v21 = vsel %vm4289_vm15, %v11657_v37, 64  ;;  %4691 = vmin.xlane.f32.xlu0 %v10128_v45  ;;  %v4252_v6 = vpop.xlane.xlu0 %4251  ;;  %v10137_v16 = vcvt.s32.f32 %v4703_v1 }
 0x97a   : > { %v10140_v35 = vsel %vm580_vm0, %v4321_v21, 2147483647  ;;  %vm4290_vm2 = vcmp.eq.f32.partialorder %v9877_v54, %v4252_v6 }
 0x97b   : > { %11791 = vst [vmem:[#allocation170_spill] sm:$0xff] %v10140_v35  ;;  %v4733_v20 = vshra.s32 %v10140_v35, 16  ;;  %v4322_v11 = vsel %vm4290_vm2, %v11657_v37, 64  ;;  %4706 = vmin.xlane.f32.xlu1 %v10137_v16  ;;  %v4255_v8 = vpop.xlane.xlu1 %4254  ;;  %v10146_v28 = vcvt.s32.f32 %v4718_v44 }
 0x97c   : > { %v10149_v33 = vsel %vm580_vm0, %v4322_v11, 2147483647  ;;  %vm4291_vm3 = vcmp.eq.f32.partialorder %v9888_v32, %v4255_v8 }
 0x97d   : > { %11792 = vst [vmem:[#allocation171_spill] sm:$0xff] %v10149_v33  ;;  %v4748_v1 = vshra.s32 %v10149_v33, 16  ;;  %v4323_v21 = vsel %vm4291_vm3, %v11657_v37, 64  ;;  %4721 = vmin.xlane.f32.xlu0 %v10146_v28  ;;  %v4258_v54 = vpop.xlane.xlu0 %4257  ;;  %v10155_v6 = vcvt.s32.f32 %v4733_v20 }
 0x97e   : > { %v10158_v35 = vsel %vm580_vm0, %v4323_v21, 2147483647  ;;  %vm4292_vm4 = vcmp.eq.f32.partialorder %v9885_v47, %v4258_v54 }
 0x97f   : > { %11793 = vst [vmem:[#allocation172_spill] sm:$0xff] %v10155_v6  ;;  %v4763_v44 = vshra.s32 %v10158_v35, 16  ;;  %v4324_v11 = vsel %vm4292_vm4, %v11657_v37, 64  ;;  %4736 = vmin.xlane.f32.xlu1 %v10155_v6  ;;  %v4261_v32 = vpop.xlane.xlu1 %4260  ;;  %v10164_v8 = vcvt.s32.f32 %v4748_v1 }
 0x980   : > { %v10167_v33 = vsel %vm580_vm0, %v4324_v11, 2147483647  ;;  %vm4293_vm5 = vcmp.eq.f32.partialorder %v9882_v15, %v4261_v32  ;;  %v6259_v11 = vld [vmem:[%s11027_s2 + $0x88] sm:$0xff]  ;;  %v6260_v32 = vld [vmem:[%s11027_s2 + $0x90] sm:$0xff] }
 0x981   : > { %v4778_v20 = vshra.s32 %v10167_v33, 16  ;;  %v4325_v21 = vsel %vm4293_vm5, %v11657_v37, 64  ;;  %4751 = vmin.xlane.f32.xlu0 %v10164_v8  ;;  %v10173_v47 = vcvt.s32.f32 %v4763_v44  ;;  %v6258_v44 = vld [vmem:[%s11027_s2 + $0x80] sm:$0xff] }
 0x982   : > { %v10176_v54 = vsel %vm580_vm0, %v4325_v21, 2147483647  ;;  %v6262_v37 = vld [vmem:[%s11027_s2 + $0xa0] sm:$0xff] }
 0x983   : > { %11794 = vst [vmem:[#allocation173_spill] sm:$0xff] %v10173_v47  ;;  %11795 = vst [vmem:[#allocation174_spill] sm:$0xff] %v10176_v54  ;;  %v4793_v6 = vshra.s32 %v10176_v54, 16  ;;  %4766 = vmin.xlane.f32.xlu1 %v10173_v47  ;;  %v10180_v1 = vcvt.s32.f32 %v4778_v20  ;;  %v6992_v20 = vpack.c.bf16 %v6259_v11, %v6258_v44  ;;  %v6264_v44 = vld [vmem:[%s11027_s2 + $0xb0] sm:$0xff]  ;;  %v6265_v11 = vld [vmem:[%s11027_s2 + $0xb8] sm:$0xff]  ;;  %v4372_v54 = vand.u32 65535, %v9924_v41 }
 0x985   : > { %11796 = vst [vmem:[#allocation175_spill] sm:$0xff] %v10180_v1  ;;  %4781 = vmin.xlane.f32.xlu0 %v10180_v1  ;;  %v10183_v15 = vcvt.s32.f32 %v4793_v6  ;;  %v6261_v6 = vld [vmem:[%s11027_s2 + $0x98] sm:$0xff]  ;;  %6993 = vmatprep.subr.bf16.mxu1 %v6992_v20 }
 0x986   : > { %v6996_v21 = vpack.c.bf16 %v6261_v6, %v6260_v32  ;;  %6995 = vmatpush3.bf16.msra.mxu1 %v6992_v20  ;;  %v7004_v32 = vpack.c.bf16 %v6265_v11, %v6264_v44  ;;  %v4327_v6 = vand.u32 65535, %v9901_v4  ;;  %v4342_v20 = vand.u32 65535, %v9907_v46 }
 0x987   : > { %11797 = vst [vmem:[#allocation176_spill] sm:$0xff] %v10183_v15  ;;  %4796 = vmin.xlane.f32.xlu1 %v10183_v15  ;;  %v6263_v15 = vld [vmem:[%s11027_s2 + $0xa8] sm:$0xff]  ;;  %v4387_v11 = vand.u32 65535, %v9933_v0 }
 0x988   : > { %6997 = vmatprep.subr.bf16.mxu1 %v6996_v21  ;;  %v7000_v1 = vpack.c.bf16 %v6263_v15, %v6262_v37  ;;  %v4357_v37 = vand.u32 65535, %v9915_v43  ;;  %v4329_v47 = vcvt.s32.f32 %v4327_v6  ;;  %v4417_v6 = vand.u32 65535, %v9951_v62 }
 0x989   : > { %v4389_v0 = vcvt.s32.f32 %v4387_v11 }
 0x98a   : > { %6999 = vmatpush3.bf16.msra.mxu1 %v6996_v21  ;;  %v4359_v43 = vcvt.s32.f32 %v4357_v37 }
 0x98b   : > { %7001 = vmatprep.subr.bf16.mxu1 %v7000_v1 }
 0x98e   : > { %7003 = vmatpush3.bf16.msra.mxu1 %v7000_v1  ;;  %v4344_v1 = vcvt.s32.f32 %v4342_v20 }
 0x98f   : > { %7005 = vmatprep.subr.bf16.mxu1 %v7004_v32 }
 0x992   : > { %7007 = vmatpush3.bf16.msra.mxu1 %v7004_v32  ;;  %v4374_v32 = vcvt.s32.f32 %v4372_v54 }
 0x9d6   : > { %v10213_v15 = vpop.xlane.xlu0 %4331 }
 0x9d7   : > { %vm4333_vm6 = vcmp.eq.f32.partialorder %v9912_v55, %v10213_v15 }
 0x9d8   : > { %v10218_v21 = vpop.xlane.xlu1 %4346  ;;  %v4334_v44 = vsel %vm4333_vm6, %v4329_v47, inf  ;;  %v4402_v47 = vand.u32 65535, %v9942_v63 }
 0x9d9   : > { %vm4348_vm7 = vcmp.eq.f32.partialorder %v9921_v30, %v10218_v21  ;;  %4335 = vmin.xlane.f32.xlu0 %v4334_v44 }
 0x9da   : > { %v10222_v4 = vpop.xlane.xlu0 %4361  ;;  %v4349_v46 = vsel %vm4348_vm7, %v4344_v1, inf  ;;  %v4404_v63 = vcvt.s32.f32 %v4402_v47  ;;  %v4419_v1 = vcvt.s32.f32 %v4417_v6 }
 0x9db   : > { %vm4363_vm8 = vcmp.eq.f32.partialorder %v9929_v48, %v10222_v4  ;;  %4350 = vmin.xlane.f32.xlu1 %v4349_v46  ;;  %v4432_v48 = vand.u32 65535, %v9960_v3 }
 0x9dc   : > { %v10227_v55 = vpop.xlane.xlu1 %4376  ;;  %v4364_v41 = vsel %vm4363_vm8, %v4359_v43, inf }
 0x9dd   : > { %vm4378_vm9 = vcmp.eq.f32.partialorder %v9937_v23, %v10227_v55  ;;  %4365 = vmin.xlane.f32.xlu0 %v4364_v41  ;;  %v4447_v23 = vand.u32 65535, %v9969_v2  ;;  %v4434_v43 = vcvt.s32.f32 %v4432_v48  ;;  %v4477_v2 = vand.u32 65535, %v9987_v10 }
 0x9de   : > { %v4379_v30 = vsel %vm4378_vm9, %v4374_v32, inf  ;;  %v10233_v20 = vpop.xlane.xlu0 %4391  ;;  %v4507_v10 = vand.u32 65535, %v10005_v27  ;;  %v4537_v27 = vand.u32 65535, %v10023_v56  ;;  %v4567_v56 = vand.u32 65535, %v10041_v42 }
 0x9df   : > { %4380 = vmin.xlane.f32.xlu1 %v4379_v30  ;;  %vm4393_vm10 = vcmp.eq.f32.partialorder %v9948_v7, %v10233_v20  ;;  %v4462_v7 = vand.u32 65535, %v9978_v17  ;;  %v4449_v41 = vcvt.s32.f32 %v4447_v23  ;;  %v4479_v6 = vcvt.s32.f32 %v4477_v2 }
 0x9e0   : > { %v10238_v37 = vpop.xlane.xlu1 %4406  ;;  %v4394_v54 = vsel %vm4393_vm10, %v4389_v0, inf  ;;  %v4597_v42 = vand.u32 65535, %v10059_v51  ;;  %v4627_v51 = vand.u32 65535, %v10077_v36  ;;  %v4657_v36 = vand.u32 65535, %v10095_v39 }
 0x9e1   : > { %vm4408_vm11 = vcmp.eq.f32.partialorder %v9957_v19, %v10238_v37  ;;  %4395 = vmin.xlane.f32.xlu0 %v4394_v54  ;;  %v4464_v47 = vcvt.s32.f32 %v4462_v7  ;;  %v4539_v7 = vcvt.s32.f32 %v4537_v27 }
 0x9e2   : > { %v10243_v62 = vpop.xlane.xlu0 %4421  ;;  %v4409_v44 = vsel %vm4408_vm11, %v4404_v63, inf  ;;  %v4509_v63 = vcvt.s32.f32 %v4507_v10 }
 0x9e3   : > { %vm4423_vm12 = vcmp.eq.f32.partialorder %v9966_v13, %v10243_v62  ;;  %4410 = vmin.xlane.f32.xlu1 %v4409_v44  ;;  %v4492_v13 = vand.u32 65535, %v9996_v61 }
 0x9e4   : > { %v10248_v3 = vpop.xlane.xlu1 %4436  ;;  %v4424_v46 = vsel %vm4423_vm12, %v4419_v1, inf }
 0x9e5   : > { %vm4438_vm13 = vcmp.eq.f32.partialorder %v9975_v59, %v10248_v3  ;;  %4425 = vmin.xlane.f32.xlu0 %v4424_v46  ;;  %v4494_v48 = vcvt.s32.f32 %v4492_v13 }
 0x9e6   : > { %v10253_v19 = vpop.xlane.xlu0 %4451  ;;  %v4439_v11 = vsel %vm4438_vm13, %v4434_v43, inf }
 0x9e7   : > { %vm4453_vm14 = vcmp.eq.f32.partialorder %v9984_v29, %v10253_v19  ;;  %4440 = vmin.xlane.f32.xlu1 %v4439_v11  ;;  %v4522_v29 = vand.u32 65535, %v10014_v58  ;;  %v4569_v11 = vcvt.s32.f32 %v4567_v56 }
 0x9e8   : > { %v10258_v17 = vpop.xlane.xlu1 %4466  ;;  %v4454_v32 = vsel %vm4453_vm14, %v4449_v41, inf }
 0x9e9   : > { %vm4468_vm15 = vcmp.eq.f32.partialorder %v9993_v52, %v10258_v17  ;;  %4455 = vmin.xlane.f32.xlu0 %v4454_v32  ;;  %v4524_v44 = vcvt.s32.f32 %v4522_v29  ;;  %v4629_v29 = vcvt.s32.f32 %v4627_v51 }
 0x9ea   : > { %v10263_v59 = vpop.xlane.xlu0 %4481  ;;  %v4469_v30 = vsel %vm4468_vm15, %v4464_v47, inf  ;;  %v4599_v47 = vcvt.s32.f32 %v4597_v42 }
 0x9eb   : > { %vm4483_vm2 = vcmp.eq.f32.partialorder %v10002_v5, %v10263_v59  ;;  %4470 = vmin.xlane.f32.xlu1 %v4469_v30  ;;  %v4552_v5 = vand.u32 65535, %v10032_v49 }
 0x9ec   : > { %v10268_v61 = vpop.xlane.xlu1 %4496  ;;  %v4484_v0 = vsel %vm4483_vm2, %v4479_v6, inf }
 0x9ed   : > { %vm4498_vm3 = vcmp.eq.f32.partialorder %v10011_v14, %v10268_v61  ;;  %4485 = vmin.xlane.f32.xlu0 %v4484_v0  ;;  %v4554_v43 = vcvt.s32.f32 %v4552_v5  ;;  %v11798_v0 = vld [vmem:[#allocation166_spill] sm:$0xff]  ;;  %v4659_v5 = vcvt.s32.f32 %v4657_v36 }
 0x9ee   : > { %v10273_v52 = vpop.xlane.xlu0 %4511  ;;  %v4499_v54 = vsel %vm4498_vm3, %v4494_v48, inf }
 0x9ef   : > { %vm4513_vm4 = vcmp.eq.f32.partialorder %v10020_v25, %v10273_v52  ;;  %4500 = vmin.xlane.f32.xlu1 %v4499_v54  ;;  %v4582_v25 = vand.u32 65535, %v10050_v53 }
 0x9f0   : > { %v10278_v58 = vpop.xlane.xlu1 %4526  ;;  %v4514_v23 = vsel %vm4513_vm4, %v4509_v63, inf }
 0x9f1   : > { %vm4528_vm5 = vcmp.eq.f32.partialorder %v10029_v12, %v10278_v58  ;;  %4515 = vmin.xlane.f32.xlu0 %v4514_v23  ;;  %v4584_v13 = vcvt.s32.f32 %v4582_v25  ;;  %v11801_v23 = vld [vmem:[#allocation168_spill] sm:$0xff] }
 0x9f2   : > { %v10283_v14 = vpop.xlane.xlu0 %4541  ;;  %v4529_v1 = vsel %vm4528_vm5, %v4524_v44, inf }
 0x9f3   : > { %vm4543_vm6 = vcmp.eq.f32.partialorder %v10038_v50, %v10283_v14  ;;  %4530 = vmin.xlane.f32.xlu1 %v4529_v1  ;;  %v4612_v50 = vand.u32 65535, %v10068_v34 }
 0x9f4   : > { %v10288_v49 = vpop.xlane.xlu1 %4556  ;;  %v4544_v46 = vsel %vm4543_vm6, %v4539_v7, inf }
 0x9f5   : > { %vm4558_vm7 = vcmp.eq.f32.partialorder %v10047_v26, %v10288_v49  ;;  %4545 = vmin.xlane.f32.xlu0 %v4544_v46  ;;  %v4614_v30 = vcvt.s32.f32 %v4612_v50 }
 0x9f6   : > { %v10293_v12 = vpop.xlane.xlu0 %4571  ;;  %v4559_v2 = vsel %vm4558_vm7, %v4554_v43, inf }
 0x9f7   : > { %vm4573_vm8 = vcmp.eq.f32.partialorder %v10056_v40, %v10293_v12  ;;  %4560 = vmin.xlane.f32.xlu1 %v4559_v2  ;;  %v4642_v40 = vand.u32 65535, %v10086_v9 }
 0x9f8   : > { %v10298_v53 = vpop.xlane.xlu1 %4586  ;;  %v4574_v41 = vsel %vm4573_vm8, %v4569_v11, inf }
 0x9f9   : > { %vm4588_vm9 = vcmp.eq.f32.partialorder %v10065_v24, %v10298_v53  ;;  %4575 = vmin.xlane.f32.xlu0 %v4574_v41  ;;  %v4644_v27 = vcvt.s32.f32 %v4642_v40 }
 0x9fa   : > { %v10303_v26 = vpop.xlane.xlu0 %4601  ;;  %v4589_v32 = vsel %vm4588_vm9, %v4584_v13, inf }
 0x9fb   : > { %vm4603_vm10 = vcmp.eq.f32.partialorder %v10074_v60, %v10303_v26  ;;  %4590 = vmin.xlane.f32.xlu1 %v4589_v32  ;;  %v4672_v60 = vand.u32 65535, %v10104_v31  ;;  %v4702_v31 = vand.u32 65535, %v11801_v23 }
 0x9fc   : > { %v10308_v34 = vpop.xlane.xlu1 %4616  ;;  %v4604_v10 = vsel %vm4603_vm10, %v4599_v47, inf }
 0x9fd   : > { %vm4618_vm11 = vcmp.eq.f32.partialorder %v10083_v18, %v10308_v34  ;;  %4605 = vmin.xlane.f32.xlu0 %v4604_v10  ;;  %v11799_v18 = vld [vmem:[#allocation167_spill] sm:$0xff]  ;;  %v4674_v1 = vcvt.s32.f32 %v4672_v60  ;;  %v4704_v50 = vcvt.s32.f32 %v4702_v31  ;;  %v11818_v31 = vld [vmem:[#allocation176_spill] sm:$0xff] }
 0x9fe   : > { %v10313_v24 = vpop.xlane.xlu0 %4631  ;;  %v4619_v6 = vsel %vm4618_vm11, %v4614_v30, inf  ;;  %v4687_v39 = vand.u32 65535, %v11799_v18  ;;  %v11810_v30 = vld [vmem:[#allocation172_spill] sm:$0xff]  ;;  %vm5551_vm11 = vcmask 7168  }
 0x9ff   : > { %vm4633_vm12 = vcmp.eq.f32.partialorder %v11798_v0, %v10313_v24  ;;  %4620 = vmin.xlane.f32.xlu1 %v4619_v6 }
 0xa00   : > { %v10318_v9 = vpop.xlane.xlu1 %4646  ;;  %v4634_v48 = vsel %vm4633_vm12, %v4629_v29, inf  ;;  %v4689_v43 = vcvt.s32.f32 %v4687_v39 }
 0xa01   : > { %vm4648_vm13 = vcmp.eq.f32.partialorder %v10101_v22, %v10318_v9  ;;  %4635 = vmin.xlane.f32.xlu0 %v4634_v48  ;;  %v11803_v22 = vld [vmem:[#allocation169_spill] sm:$0xff] }
 0xa02   : > { %v10323_v54 = vpop.xlane.xlu0 %4661  ;;  %v4649_v63 = vsel %vm4648_vm13, %v4644_v27, inf  ;;  %v4717_v7 = vand.u32 65535, %v11803_v22  ;;  %v11814_v27 = vld [vmem:[#allocation173_spill] sm:$0xff] }
 0xa03   : > { %11800 = vst [vmem:[#allocation166_spill] sm:$0xff] %v10323_v54  ;;  %vm4663_vm14 = vcmp.eq.f32.partialorder %v10110_v38, %v10323_v54  ;;  %4650 = vmin.xlane.f32.xlu1 %v4649_v63  ;;  %v11805_v38 = vld [vmem:[#allocation170_spill] sm:$0xff]  ;;  %v11816_v63 = vld [vmem:[#allocation175_spill] sm:$0xff]  ;;  %v11820_v22 = vld [vmem:[#allocation165_spill] sm:$0xff] }
 0xa04   : > { %v10328_v44 = vpop.xlane.xlu1 %4676  ;;  %v4664_v56 = vsel %vm4663_vm14, %v4659_v5, inf  ;;  %v4732_v42 = vand.u32 65535, %v11805_v38  ;;  %v4719_v32 = vcvt.s32.f32 %v4717_v7  ;;  %v11821_v7 = vld [vmem:[#allocation133_spill] sm:$0xff] }
 0xa05   : > { %11802 = vst [vmem:[#allocation167_spill] sm:$0xff] %v10328_v44  ;;  %vm4678_vm15 = vcmp.eq.f32.partialorder %v10119_v57, %v10328_v44  ;;  %4665 = vmin.xlane.f32.xlu0 %v4664_v56  ;;  %v11807_v57 = vld [vmem:[#allocation171_spill] sm:$0xff]  ;;  %v11870_v44 = vld [vmem:[#allocation56_spill] sm:$0xff] }
 0xa06   : > { %v10333_v25 = vpop.xlane.xlu0 %4691  ;;  %v4679_v46 = vsel %vm4678_vm15, %v4674_v1, inf  ;;  %v4747_v41 = vand.u32 65535, %v11807_v57  ;;  %v4734_v10 = vcvt.s32.f32 %v4732_v42  ;;  %v11819_v1 = vld [vmem:[#allocation132_spill] sm:$0xff]  ;;  %v11823_v42 = vld [vmem:[#allocation135_spill] sm:$0xff] }
 0xa07   : > { %11804 = vst [vmem:[#allocation168_spill] sm:$0xff] %v10333_v25  ;;  %vm4693_vm2 = vcmp.eq.f32.partialorder %v10128_v45, %v10333_v25  ;;  %4680 = vmin.xlane.f32.xlu1 %v4679_v46  ;;  %v4762_v45 = vand.u32 65535, %v10158_v35  ;;  %v5423_v46 = vshll.u32 %v11821_v7, 8  ;;  %v11837_v7 = vld [vmem:[#allocation146_spill] sm:$0xff] }
 0xa08   : > { %v10338_v2 = vpop.xlane.xlu1 %4706  ;;  %v4694_v11 = vsel %vm4693_vm2, %v4689_v43, inf  ;;  %v4749_v29 = vcvt.s32.f32 %v4747_v41  ;;  %v11822_v43 = vld [vmem:[#allocation134_spill] sm:$0xff]  ;;  %v11825_v41 = vld [vmem:[#allocation137_spill] sm:$0xff] }
 0xa09   : > { %11806 = vst [vmem:[#allocation169_spill] sm:$0xff] %v10338_v2  ;;  %vm4708_vm3 = vcmp.eq.f32.partialorder %v10137_v16, %v10338_v2  ;;  %4695 = vmin.xlane.f32.xlu0 %v4694_v11  ;;  %v4777_v16 = vand.u32 65535, %v10167_v33  ;;  %v4764_v48 = vcvt.s32.f32 %v4762_v45  ;;  %v5424_v38 = vshll.u32 %v11822_v43, 8 }
 0xa0a   : > { %v10343_v13 = vpop.xlane.xlu0 %4721  ;;  %v4709_v51 = vsel %vm4708_vm3, %v4704_v50, inf  ;;  %v5425_v11 = vshll.u32 %v11823_v42, 8  ;;  %v11824_v50 = vld [vmem:[#allocation136_spill] sm:$0xff]  ;;  %v5436_v43 = vshll.u32 %v11837_v7, 8  ;;  %v11838_v42 = vld [vmem:[#allocation147_spill] sm:$0xff]  ;;  %v11847_v7 = vld [vmem:[#allocation45_spill] sm:$0xff] }
 0xa0b   : > { %11808 = vst [vmem:[#allocation170_spill] sm:$0xff] %v10343_v13  ;;  %vm4723_vm4 = vcmp.eq.f32.partialorder %v10146_v28, %v10343_v13  ;;  %4710 = vmin.xlane.f32.xlu1 %v4709_v51  ;;  %v11812_v28 = vld [vmem:[#allocation174_spill] sm:$0xff]  ;;  %v4779_v39 = vcvt.s32.f32 %v4777_v16  ;;  %v5426_v57 = vshll.u32 %v11824_v50, 8  ;;  %v5427_v51 = vshll.u32 %v11825_v41, 8  ;;  %v11839_v41 = vld [vmem:[#allocation40_spill] sm:$0xff]  ;;  %v11866_v13 = vld [vmem:[#allocation53_spill] sm:$0xff] }
 0xa0c   : > { %v10348_v47 = vpop.xlane.xlu1 %4736  ;;  %v4724_v40 = vsel %vm4723_vm4, %v4719_v32, inf  ;;  %v4792_v35 = vand.u32 65535, %v11812_v28  ;;  %v11826_v32 = vld [vmem:[#allocation138_spill] sm:$0xff]  ;;  %v11830_v28 = vld [vmem:[#allocation141_spill] sm:$0xff]  ;;  %v5437_v50 = vshll.u32 %v11838_v42, 8  ;;  %v11848_v42 = vld [vmem:[#allocation48_spill] sm:$0xff] }
 0xa0d   : > { %11809 = vst [vmem:[#allocation171_spill] sm:$0xff] %v10348_v47  ;;  %vm4738_vm5 = vcmp.eq.f32.partialorder %v11810_v30, %v10348_v47  ;;  %4725 = vmin.xlane.f32.xlu0 %v4724_v40  ;;  %v5428_v45 = vshll.u32 %v11826_v32, 8  ;;  %v11827_v40 = vld [vmem:[#allocation140_spill] sm:$0xff]  ;;  %v11828_v30 = vld [vmem:[#allocation139_spill] sm:$0xff]  ;;  %v10397_v32 = vor.u32 %v5426_v57, %v11839_v41  ;;  %v11849_v41 = vld [vmem:[#allocation149_spill] sm:$0xff] }
 0xa0e   : > { %v10353_v36 = vpop.xlane.xlu0 %4751  ;;  %v4739_v6 = vsel %vm4738_vm5, %v4734_v10, inf  ;;  %v4794_v23 = vcvt.s32.f32 %v4792_v35  ;;  %v5429_v10 = vshll.u32 %v11827_v40, 8  ;;  %v5430_v16 = vshll.u32 %v11828_v30, 8 }
 0xa0f   : > { %11811 = vst [vmem:[#allocation172_spill] sm:$0xff] %v10353_v36  ;;  %vm4753_vm6 = vcmp.eq.f32.partialorder %v10164_v8, %v10353_v36  ;;  %4740 = vmin.xlane.f32.xlu1 %v4739_v6  ;;  %v11829_v6 = vld [vmem:[#allocation142_spill] sm:$0xff]  ;;  %v5432_v35 = vshll.u32 %v11830_v28, 8  ;;  %v11861_v36 = vld [vmem:[#allocation157_spill] sm:$0xff] }
 0xa10   : > { %v10358_v0 = vpop.xlane.xlu1 %4766  ;;  %v4754_v60 = vsel %vm4753_vm6, %v4749_v29, inf  ;;  %v5431_v29 = vshll.u32 %v11829_v6, 8  ;;  %v11842_v6 = vld [vmem:[#allocation148_spill] sm:$0xff] }
 0xa11   : > { %11813 = vst [vmem:[#allocation174_spill] sm:$0xff] %v10358_v0  ;;  %vm4768_vm7 = vcmp.eq.f32.partialorder %v11814_v27, %v10358_v0  ;;  %4755 = vmin.xlane.f32.xlu0 %v4754_v60  ;;  %v11831_v60 = vld [vmem:[#allocation36_spill] sm:$0xff]  ;;  %v11832_v27 = vld [vmem:[#allocation38_spill] sm:$0xff]  ;;  %v5438_v28 = vshll.u32 %v11842_v6, 8  ;;  %v11851_v6 = vld [vmem:[#allocation47_spill] sm:$0xff] }
 0xa12   : > { %v10362_v18 = vpop.xlane.xlu0 %4781  ;;  %v4769_v33 = vsel %vm4768_vm7, %v4764_v48, inf  ;;  %v10383_v48 = vor.u32 %v5423_v46, %v11831_v60  ;;  %v11840_v46 = vld [vmem:[#allocation39_spill] sm:$0xff]  ;;  %v11843_v60 = vld [vmem:[#allocation41_spill] sm:$0xff] }
 0xa13   : > { %11815 = vst [vmem:[#allocation173_spill] sm:$0xff] %v10362_v18  ;;  %vm4783_vm8 = vcmp.eq.f32.partialorder %v11816_v63, %v10362_v18  ;;  %4770 = vmin.xlane.f32.xlu1 %v4769_v33  ;;  %v10386_v33 = vor.u32 %v5424_v38, %v11832_v27  ;;  %v10400_v40 = vor.u32 %v5427_v51, %v11840_v46  ;;  %v11841_v38 = vld [vmem:[#allocation42_spill] sm:$0xff]  ;;  %v11844_v27 = vld [vmem:[#allocation44_spill] sm:$0xff]  ;;  %v5439_v46 = vshll.u32 %v11849_v41, 8 }
 0xa14   : > { %v10366_v8 = vpop.xlane.xlu1 %4796  ;;  %v4784_v5 = vsel %vm4783_vm8, %v4779_v39, inf  ;;  %v11833_v39 = vld [vmem:[#allocation143_spill] sm:$0xff]  ;;  %v10403_v30 = vor.u32 %v5428_v45, %v11841_v38  ;;  %v11850_v38 = vld [vmem:[#allocation150_spill] sm:$0xff] }
 0xa15   : > { %11817 = vst [vmem:[#allocation175_spill] sm:$0xff] %v10366_v8  ;;  %vm4798_vm9 = vcmp.eq.f32.partialorder %v11818_v31, %v10366_v8  ;;  %4785 = vmin.xlane.f32.xlu0 %v4784_v5  ;;  %v5433_v63 = vshll.u32 %v11833_v39, 8  ;;  %v11834_v5 = vld [vmem:[#allocation144_spill] sm:$0xff]  ;;  %v11835_v31 = vld [vmem:[#allocation37_spill] sm:$0xff]  ;;  %v10410_v39 = vor.u32 %v5430_v16, %v11844_v27  ;;  %v11852_v16 = vld [vmem:[#allocation50_spill] sm:$0xff] }
 0xa16   : > { %v4799_v56 = vsel %vm4798_vm9, %v4794_v23, inf  ;;  %v5434_v23 = vshll.u32 %v11834_v5, 8  ;;  %v11845_v5 = vld [vmem:[#allocation43_spill] sm:$0xff]  ;;  %v10430_v27 = vor.u32 %v5436_v43, %v11852_v16  ;;  %v11857_v8 = vld [vmem:[#allocation153_spill] sm:$0xff]  ;;  %v11858_v18 = vld [vmem:[#allocation154_spill] sm:$0xff] }
 0xa17   : > { %4800 = vmin.xlane.f32.xlu1 %v4799_v56  ;;  %v10391_v56 = vor.u32 %v5425_v11, %v11835_v31  ;;  %v10407_v11 = vor.u32 %v5429_v10, %v11843_v60  ;;  %v10413_v31 = vor.u32 %v5431_v29, %v11845_v5  ;;  %v10419_v51 = vor.u32 %v5433_v63, %v11847_v7  ;;  %v11853_v29 = vld [vmem:[#allocation49_spill] sm:$0xff]  ;;  %v11855_v63 = vld [vmem:[#allocation52_spill] sm:$0xff] }
 0xa18   : > { %v10422_v45 = vor.u32 %v5434_v23, %v11848_v42  ;;  %v5440_v10 = vshll.u32 %v11850_v38, 8  ;;  %v10433_v5 = vor.u32 %v5437_v50, %v11853_v29  ;;  %v10437_v7 = vor.u32 %v5438_v28, %v11855_v63  ;;  %v11856_v23 = vld [vmem:[#allocation152_spill] sm:$0xff]  ;;  %v11862_v29 = vld [vmem:[#allocation51_spill] sm:$0xff]  ;;  %v11865_v63 = vld [vmem:[#allocation158_spill] sm:$0xff] }
 0xa19   : > { %2294 = vadd.xlane.f32.xlu0 %v11819_v1  ;;  %v11836_v1 = vld [vmem:[#allocation145_spill] sm:$0xff]  ;;  %v5442_v42 = vshll.u32 %v11856_v23, 8  ;;  %v5443_v41 = vshll.u32 %v11857_v8, 8  ;;  %v4338_v38 = vcvt.f32.s32 %v10213_v15  ;;  %v11860_v43 = vld [vmem:[#allocation156_spill] sm:$0xff]  ;;  %v5447_v50 = vshll.u32 %v11861_v36, 8 }
 0xa1a   : > { %v5446_v16 = vshll.u32 %v11860_v43, 8  ;;  %v10447_v47 = vor.u32 %v5439_v46, %v11862_v29  ;;  %v5448_v23 = vshll.u32 %v11865_v63, 8  ;;  %v4353_v8 = vcvt.f32.s32 %v10218_v21  ;;  %v11871_v29 = vld [vmem:[#allocation55_spill] sm:$0xff] }
 0xa1b   : > { %3838 = vadd.xlane.f32.xlu1 %v11820_v22  ;;  %v5435_v22 = vshll.u32 %v11836_v1, 8  ;;  %v11846_v1 = vld [vmem:[#allocation46_spill] sm:$0xff]  ;;  %v4368_v43 = vcvt.f32.s32 %v10222_v4  ;;  %v10461_v46 = vor.u32 %v5442_v42, %v11870_v44 }
 0xa1c   : > { %v10416_v57 = vor.u32 %v5432_v35, %v11846_v1  ;;  %v11854_v35 = vld [vmem:[#allocation151_spill] sm:$0xff]  ;;  %v11876_v44 = vld [vmem:[#allocation62_spill] sm:$0xff] }
 0xa1d   : > { %v10427_v60 = vor.u32 %v5435_v22, %v11851_v6  ;;  %v5441_v1 = vshll.u32 %v11854_v35, 8  ;;  %v5444_v22 = vshll.u32 %v11858_v18, 8  ;;  %v11859_v6 = vld [vmem:[#allocation155_spill] sm:$0xff]  ;;  %v11863_v35 = vld [vmem:[#allocation54_spill] sm:$0xff]  ;;  %v10479_v42 = vor.u32 %v5448_v23, %v11876_v44 }
 0xa1e   : > { %v5445_v0 = vshll.u32 %v11859_v6, 8  ;;  %v10450_v28 = vor.u32 %v5440_v10, %v11863_v35  ;;  %v11868_v18 = vld [vmem:[#allocation159_spill] sm:$0xff]  ;;  %v11869_v6 = vld [vmem:[#allocation160_spill] sm:$0xff]  ;;  %v10464_v10 = vor.u32 %v5443_v41, %v11871_v29  ;;  %v4339_v35 = vshll.u32 %v4338_v38, 16 }
 0xa1f   : > { %v10455_v15 = vor.u32 %v5441_v1, %v11866_v13  ;;  %v5449_v2 = vshll.u32 %v11868_v18, 8  ;;  %v5450_v25 = vshll.u32 %v11869_v6, 8  ;;  %v11873_v13 = vld [vmem:[#allocation57_spill] sm:$0xff]  ;;  %v11874_v18 = vld [vmem:[#allocation60_spill] sm:$0xff]  ;;  %v11875_v6 = vld [vmem:[#allocation59_spill] sm:$0xff]  ;;  %v4354_v41 = vshll.u32 %v4353_v8, 16 }
 0xa20   : > { %11864 = vst [vmem:[#allocation176_spill] sm:$0xff] %v10450_v28  ;;  %v11872_v28 = vld [vmem:[#allocation58_spill] sm:$0xff]  ;;  %v10470_v1 = vor.u32 %v5445_v0, %v11873_v13  ;;  %v10476_v4 = vor.u32 %v5447_v50, %v11875_v6  ;;  %v7034_v0 = vld [vmem:[%s11029_s4 + $0x8] sm:$0xff]   ;;  %v11878_v50 = vld [vmem:[#allocation64_spill] sm:$0xff]  ;;  %v4369_v23 = vshll.u32 %v4368_v43, 16  ;;  %v4383_v8 = vcvt.f32.s32 %v10227_v55 }
 0xa21   : > { %11867 = vst [vmem:[#allocation132_spill] sm:$0xff] %v10455_v15  ;;  %v10467_v21 = vor.u32 %v5444_v22, %v11872_v28  ;;  %v10473_v15 = vor.u32 %v5446_v16, %v11874_v18  ;;  %v7033_v22 = vld [vmem:[%s11029_s4] sm:$0xff]   ;;  %v11877_v16 = vld [vmem:[#allocation61_spill] sm:$0xff]  ;;  %v11879_v18 = vld [vmem:[#allocation35_spill] sm:$0xff]  ;;  %v4398_v6 = vcvt.f32.s32 %v10233_v20  ;;  %v4413_v44 = vcvt.f32.s32 %v10238_v37 }
 0xa22   : > { %v10488_v28 = vor.u32 %v5449_v2, %v11877_v16  ;;  %6924 = vmatprep.subr.bf16.mxu0 %v7033_v22  ;;  %v11880_v55 = vmov 0.0   ;;  %v11881_v20 = vld [vmem:[#allocation161_spill] sm:$0xff] }
 0xa23   : > { %6925 = vmatpush3.bf16.msra.mxu0 %v7033_v22  ;;  %v5451_v37 = vshll.u32 %v11881_v20, 8 }
 0xa24   : > { %6926 = vmatprep.subr.bf16.mxu0 %v7034_v0 }
 0xa27   : > { %6927 = vmatpush3.bf16.msra.mxu0 %v7034_v0 }
 0xa66   : > { %v4336_v36 = vpop.xlane.xlu0 %4335 }
 0xa67   : > { %v4337_v63 = vcvt.f32.s32 %v4336_v36  ;;  %v10491_v36 = vor.u32 %v5450_v25, %v11878_v50 }
 0xa68   : > { %v4351_v54 = vpop.xlane.xlu1 %4350 }
 0xa69   : > { %v4340_v29 = vadd.s32 %v4339_v35, %v4337_v63  ;;  %v4352_v38 = vcvt.f32.s32 %v4351_v54 }
 0xa6a   : > { %v4366_v35 = vpop.xlane.xlu0 %4365 }
 0xa6b   : > { %v5487_v63 = vshll.u32 %v4340_v29, 16  ;;  %v4355_v54 = vadd.s32 %v4354_v41, %v4352_v38  ;;  %v4367_v13 = vcvt.f32.s32 %v4366_v35  ;;  %vm4806_vm10 = vcmp.eq.s32.totalorder %v11879_v18, %v4340_v29 }
 0xa6c   : > { %v4381_v25 = vpop.xlane.xlu1 %4380  ;;  %v6288_v2 = vsel %vm4806_vm10, 1.0, %v11880_v55  ;;  %v4384_v38 = vshll.u32 %v4383_v8, 16  ;;  %v4428_v35 = vcvt.f32.s32 %v10243_v62  ;;  %v4414_v62 = vshll.u32 %v4413_v44, 16 }
 0xa6d   : > { %v5519_v43 = vor.u32 %v5487_v63, %v10383_v48  ;;  %vm4807_vm12 = vcmp.eq.s32.totalorder %v11879_v18, %v4355_v54  ;;  %v5488_v41 = vshll.u32 %v4355_v54, 16  ;;  %v4370_v29 = vadd.s32 %v4369_v23, %v4367_v13  ;;  %6876 = vmatprep.mubr.msk.f32.mxu1 %vm580_vm0, %v6288_v2 }
 0xa6e   : > { %v6289_v16 = vsel %vm4807_vm12, 1.0, %v11880_v55  ;;  %v4382_v50 = vcvt.f32.s32 %v4381_v25  ;;  %v4396_v63 = vpop.xlane.xlu0 %4395  ;;  %v4399_v23 = vshll.u32 %v4398_v6, 16  ;;  %v11882_v25 = vld [vmem:[#allocation162_spill] sm:$0xff]  ;;  %v4429_v0 = vshll.u32 %v4428_v35, 16 }
 0xa6f   : > { %5552 = vst.msk [vmem:[%s10501_s17] sm:$0xff] %vm5551_vm11, %v5519_v43  ;;  %v5520_v48 = vor.u32 %v5488_v41, %v10386_v33  ;;  %v5489_v22 = vshll.u32 %v4370_v29, 16  ;;  %6877 = vmatmul.mubr.msk.f32.vlgmr.msra.gmra.mrb[96].mxu1 %vm580_vm0, %v6289_v16  ;;  %vm4808_vm13 = vcmp.eq.s32.totalorder %v11879_v18, %v4370_v29  ;;  %v4397_v13 = vcvt.f32.s32 %v4396_v63 }
 0xa70   : > { %v4385_v54 = vadd.s32 %v4384_v38, %v4382_v50  ;;  %v6290_v8 = vsel %vm4808_vm13, 1.0, %v11880_v55  ;;  %v5452_v2 = vshll.u32 %v11882_v25, 8  ;;  %v4443_v43 = vcvt.f32.s32 %v10248_v3  ;;  %v4411_v41 = vpop.xlane.xlu1 %4410  ;;  %v11883_v38 = vld [vmem:[#allocation63_spill] sm:$0xff] }
 0xa71   : > { %5553 = vst.msk [vmem:[%s10501_s17 + $0x8] sm:$0xff] %vm5551_vm11, %v5520_v48  ;;  %v5521_v33 = vor.u32 %v5489_v22, %v10391_v56  ;;  %6879 = vmatprep.mubr.msk.f32.mxu1 %vm580_vm0, %v6290_v8  ;;  %v4400_v6 = vadd.s32 %v4399_v23, %v4397_v13  ;;  %v4412_v20 = vcvt.f32.s32 %v4411_v41  ;;  %v10524_v16 = vor.u32 %v5451_v37, %v11883_v38  ;;  %v11884_v23 = vld [vmem:[#allocation66_spill] sm:$0xff] }
 0xa72   : > { %v5490_v29 = vshll.u32 %v4385_v54, 16  ;;  %vm4809_vm14 = vcmp.eq.s32.totalorder %v11879_v18, %v4385_v54  ;;  %v4458_v44 = vcvt.f32.s32 %v10253_v19  ;;  %v4426_v3 = vpop.xlane.xlu0 %4425  ;;  %v10533_v37 = vor.u32 %v5452_v2, %v11884_v23 }
 0xa73   : > { %5554 = vst.msk [vmem:[%s10501_s17 + $0x10] sm:$0xff] %vm5551_vm11, %v5521_v33  ;;  %v6291_v56 = vsel %vm4809_vm14, 1.0, %v11880_v55  ;;  %v5491_v48 = vshll.u32 %v4400_v6, 16  ;;  %v4415_v22 = vadd.s32 %v4414_v62, %v4412_v20  ;;  %v4427_v63 = vcvt.f32.s32 %v4426_v3 }
 0xa74   : > { %v5522_v50 = vor.u32 %v5490_v29, %v10397_v32  ;;  %6880 = vmatmul.mubr.msk.f32.gmra.mrb[98].mxu1 %vm580_vm0, %v6291_v56  ;;  %v4444_v54 = vshll.u32 %v4443_v43, 16  ;;  %v4473_v35 = vcvt.f32.s32 %v10258_v17  ;;  %v4441_v19 = vpop.xlane.xlu1 %4440  ;;  %vm4810_vm15 = vcmp.eq.s32.totalorder %v11879_v18, %v4400_v6 }
 0xa75   : > { %v5523_v13 = vor.u32 %v5491_v48, %v10400_v40  ;;  %v5492_v32 = vshll.u32 %v4415_v22, 16  ;;  %v4430_v8 = vadd.s32 %v4429_v0, %v4427_v63  ;;  %v4442_v25 = vcvt.f32.s32 %v4441_v19 }
 0xa76   : > { %5555 = vst.msk [vmem:[%s10501_s17 + $0x18] sm:$0xff] %vm5551_vm11, %v5522_v50  ;;  %v4459_v62 = vshll.u32 %v4458_v44, 16  ;;  %v4488_v33 = vcvt.f32.s32 %v10263_v59  ;;  %v6292_v2 = vsel %vm4810_vm15, 1.0, %v11880_v55  ;;  %v4456_v41 = vpop.xlane.xlu0 %4455  ;;  %vm4811_vm2 = vcmp.eq.s32.totalorder %v11879_v18, %v4415_v22 }
 0xa77   : > { %5556 = vst.msk [vmem:[%s10501_s17 + $0x20] sm:$0xff] %vm5551_vm11, %v5523_v13  ;;  %v5524_v17 = vor.u32 %v5492_v32, %v10403_v30  ;;  %v5493_v43 = vshll.u32 %v4430_v8, 16  ;;  %v4445_v29 = vadd.s32 %v4444_v54, %v4442_v25  ;;  %6882 = vmatprep.mubr.msk.f32.mxu1 %vm580_vm0, %v6292_v2  ;;  %v4457_v40 = vcvt.f32.s32 %v4456_v41 }
 0xa78   : > { %v4474_v6 = vshll.u32 %v4473_v35, 16  ;;  %v4503_v20 = vcvt.f32.s32 %v10268_v61  ;;  %v6293_v59 = vsel %vm4811_vm2, 1.0, %v11880_v55  ;;  %v4471_v38 = vpop.xlane.xlu1 %4470  ;;  %vm4812_vm3 = vcmp.eq.s32.totalorder %v11879_v18, %v4430_v8 }
 0xa79   : > { %5557 = vst.msk [vmem:[%s10501_s17 + $0x28] sm:$0xff] %vm5551_vm11, %v5524_v17  ;;  %v5525_v0 = vor.u32 %v5493_v43, %v10407_v11  ;;  %v5494_v44 = vshll.u32 %v4445_v29, 16  ;;  %v4460_v30 = vadd.s32 %v4459_v62, %v4457_v40  ;;  %6883 = vmatmul.mubr.msk.f32.gmra.mrb[100].mxu1 %vm580_vm0, %v6293_v59  ;;  %v4472_v3 = vcvt.f32.s32 %v4471_v38 }
 0xa7a   : > { %v4489_v56 = vshll.u32 %v4488_v33, 16  ;;  %v4518_v50 = vcvt.f32.s32 %v10273_v52  ;;  %v6294_v61 = vsel %vm4812_vm3, 1.0, %v11880_v55  ;;  %v4486_v48 = vpop.xlane.xlu0 %4485  ;;  %vm4813_vm4 = vcmp.eq.s32.totalorder %v11879_v18, %v4445_v29 }
 0xa7b   : > { %5558 = vst.msk [vmem:[%s10501_s17 + $0x30] sm:$0xff] %vm5551_vm11, %v5525_v0  ;;  %v5526_v22 = vor.u32 %v5494_v44, %v10410_v39  ;;  %v5495_v63 = vshll.u32 %v4460_v30, 16  ;;  %v4475_v11 = vadd.s32 %v4474_v6, %v4472_v3  ;;  %6885 = vmatprep.mubr.msk.f32.mxu1 %vm580_vm0, %v6294_v61  ;;  %v4487_v23 = vcvt.f32.s32 %v4486_v48 }
 0xa7c   : > { %v4504_v54 = vshll.u32 %v4503_v20, 16  ;;  %v4533_v35 = vcvt.f32.s32 %v10278_v58  ;;  %v6295_v52 = vsel %vm4813_vm4, 1.0, %v11880_v55  ;;  %v4501_v19 = vpop.xlane.xlu1 %4500  ;;  %vm4814_vm5 = vcmp.eq.s32.totalorder %v11879_v18, %v4460_v30 }
 0xa7d   : > { %5559 = vst.msk [vmem:[%s10501_s17 + $0x38] sm:$0xff] %vm5551_vm11, %v5526_v22  ;;  %v5527_v13 = vor.u32 %v5495_v63, %v10413_v31  ;;  %v5496_v32 = vshll.u32 %v4475_v11, 16  ;;  %v4490_v39 = vadd.s32 %v4489_v56, %v4487_v23  ;;  %6886 = vmatmul.mubr.msk.f32.gmra.mrb[102].mxu1 %vm580_vm0, %v6295_v52  ;;  %v4502_v8 = vcvt.f32.s32 %v4501_v19 }
 0xa7e   : > { %v4519_v25 = vshll.u32 %v4518_v50, 16  ;;  %v4548_v62 = vcvt.f32.s32 %v10283_v14  ;;  %v6296_v58 = vsel %vm4814_vm5, 1.0, %v11880_v55  ;;  %v4516_v33 = vpop.xlane.xlu0 %4515  ;;  %vm4815_vm6 = vcmp.eq.s32.totalorder %v11879_v18, %v4475_v11 }
 0xa7f   : > { %5560 = vst.msk [vmem:[%s10501_s17 + $0x40] sm:$0xff] %vm5551_vm11, %v5527_v13  ;;  %v5528_v2 = vor.u32 %v5496_v32, %v10416_v57  ;;  %v5497_v41 = vshll.u32 %v4490_v39, 16  ;;  %v4505_v31 = vadd.s32 %v4504_v54, %v4502_v8  ;;  %6888 = vmatprep.mubr.msk.f32.mxu1 %vm580_vm0, %v6296_v58  ;;  %v4517_v17 = vcvt.f32.s32 %v4516_v33 }
 0xa80   : > { %v4534_v43 = vshll.u32 %v4533_v35, 16  ;;  %v4563_v29 = vcvt.f32.s32 %v10288_v49  ;;  %v6297_v14 = vsel %vm4815_vm6, 1.0, %v11880_v55  ;;  %v4531_v40 = vpop.xlane.xlu1 %4530  ;;  %vm4816_vm7 = vcmp.eq.s32.totalorder %v11879_v18, %v4490_v39 }
 0xa81   : > { %5561 = vst.msk [vmem:[%s10501_s17 + $0x48] sm:$0xff] %vm5551_vm11, %v5528_v2  ;;  %v5529_v6 = vor.u32 %v5497_v41, %v10419_v51  ;;  %v5498_v20 = vshll.u32 %v4505_v31, 16  ;;  %v4520_v57 = vadd.s32 %v4519_v25, %v4517_v17  ;;  %6889 = vmatmul.mubr.msk.f32.gmra.mrb[104].mxu1 %vm580_vm0, %v6297_v14  ;;  %v4532_v59 = vcvt.f32.s32 %v4531_v40 }
 0xa82   : > { %v4549_v38 = vshll.u32 %v4548_v62, 16  ;;  %v4578_v0 = vcvt.f32.s32 %v10293_v12  ;;  %v6298_v49 = vsel %vm4816_vm7, 1.0, %v11880_v55  ;;  %v4546_v44 = vpop.xlane.xlu0 %4545  ;;  %vm4817_vm8 = vcmp.eq.s32.totalorder %v11879_v18, %v4505_v31 }
 0xa83   : > { %5562 = vst.msk [vmem:[%s10501_s17 + $0x50] sm:$0xff] %vm5551_vm11, %v5529_v6  ;;  %v5530_v30 = vor.u32 %v5498_v20, %v10422_v45  ;;  %v5499_v3 = vshll.u32 %v4520_v57, 16  ;;  %v4535_v51 = vadd.s32 %v4534_v43, %v4532_v59  ;;  %6891 = vmatprep.mubr.msk.f32.mxu1 %vm580_vm0, %v6298_v49  ;;  %v4547_v56 = vcvt.f32.s32 %v4546_v44  ;;  %v11886_v44 = vld [vmem:[#allocation176_spill] sm:$0xff] }
 0xa84   : > { %v4564_v50 = vshll.u32 %v4563_v29, 16  ;;  %v4593_v61 = vcvt.f32.s32 %v10298_v53  ;;  %v6299_v12 = vsel %vm4817_vm8, 1.0, %v11880_v55  ;;  %v4561_v48 = vpop.xlane.xlu1 %4560  ;;  %vm4818_vm9 = vcmp.eq.s32.totalorder %v11879_v18, %v4520_v57 }
 0xa85   : > { %5563 = vst.msk [vmem:[%s10501_s17 + $0x58] sm:$0xff] %vm5551_vm11, %v5530_v30  ;;  %v5531_v22 = vor.u32 %v5499_v3, %v10427_v60  ;;  %v5500_v63 = vshll.u32 %v4535_v51, 16  ;;  %v4550_v45 = vadd.s32 %v4549_v38, %v4547_v56  ;;  %6892 = vmatmul.mubr.msk.f32.gmra.mrb[106].mxu1 %vm580_vm0, %v6299_v12  ;;  %v4562_v11 = vcvt.f32.s32 %v4561_v48  ;;  %v11885_v38 = vld [vmem:[#allocation166_spill] sm:$0xff] }
 0xa86   : > { %v4579_v23 = vshll.u32 %v4578_v0, 16  ;;  %v4608_v54 = vcvt.f32.s32 %v10303_v26  ;;  %v6300_v53 = vsel %vm4818_vm9, 1.0, %v11880_v55  ;;  %v4576_v35 = vpop.xlane.xlu0 %4575  ;;  %vm4819_vm10 = vcmp.eq.s32.totalorder %v11879_v18, %v4535_v51 }
 0xa87   : > { %5564 = vst.msk [vmem:[%s10501_s17 + $0x60] sm:$0xff] %vm5551_vm11, %v5531_v22  ;;  %v5532_v52 = vor.u32 %v5500_v63, %v10430_v27  ;;  %v5501_v19 = vshll.u32 %v4550_v45, 16  ;;  %v4565_v60 = vadd.s32 %v4564_v50, %v4562_v11  ;;  %6894 = vmatprep.mubr.msk.f32.mxu1 %vm580_vm0, %v6300_v53  ;;  %v4577_v13 = vcvt.f32.s32 %v4576_v35  ;;  %v11887_v50 = vld [vmem:[#allocation167_spill] sm:$0xff]  ;;  %v11888_v22 = vld [vmem:[#allocation132_spill] sm:$0xff] }
 0xa88   : > { %v4594_v32 = vshll.u32 %v4593_v61, 16  ;;  %v4623_v39 = vcvt.f32.s32 %v10308_v34  ;;  %v6301_v26 = vsel %vm4819_vm10, 1.0, %v11880_v55  ;;  %v4591_v8 = vpop.xlane.xlu1 %4590  ;;  %vm4820_vm12 = vcmp.eq.s32.totalorder %v11879_v18, %v4550_v45  ;;  %v11889_v53 = vld [vmem:[#allocation168_spill] sm:$0xff] }
 0xa89   : > { %5565 = vst.msk [vmem:[%s10501_s17 + $0x68] sm:$0xff] %vm5551_vm11, %v5532_v52  ;;  %v5533_v25 = vor.u32 %v5501_v19, %v10433_v5  ;;  %v5502_v62 = vshll.u32 %v4565_v60, 16  ;;  %v4580_v27 = vadd.s32 %v4579_v23, %v4577_v13  ;;  %6895 = vmatmul.mubr.msk.f32.gmra.mrb[108].mxu1 %vm580_vm0, %v6301_v26  ;;  %v4592_v58 = vcvt.f32.s32 %v4591_v8  ;;  %v11890_v8 = vld [vmem:[#allocation169_spill] sm:$0xff] }
 0xa8a   : > { %v4609_v33 = vshll.u32 %v4608_v54, 16  ;;  %v4638_v2 = vcvt.f32.s32 %v10313_v24  ;;  %v6302_v34 = vsel %vm4820_vm12, 1.0, %v11880_v55  ;;  %v4606_v41 = vpop.xlane.xlu0 %4605  ;;  %vm4821_vm13 = vcmp.eq.s32.totalorder %v11879_v18, %v4565_v60 }
 0xa8b   : > { %5566 = vst.msk [vmem:[%s10501_s17 + $0x70] sm:$0xff] %vm5551_vm11, %v5533_v25  ;;  %v5534_v31 = vor.u32 %v5502_v62, %v10437_v7  ;;  %v5503_v17 = vshll.u32 %v4580_v27, 16  ;;  %v4595_v5 = vadd.s32 %v4594_v32, %v4592_v58  ;;  %6897 = vmatprep.mubr.msk.f32.mxu1 %vm580_vm0, %v6302_v34  ;;  %v4607_v43 = vcvt.f32.s32 %v4606_v41  ;;  %v11891_v41 = vld [vmem:[#allocation170_spill] sm:$0xff] }
 0xa8c   : > { %v4624_v29 = vshll.u32 %v4623_v39, 16  ;;  %v4653_v14 = vcvt.f32.s32 %v10318_v9  ;;  %v6303_v24 = vsel %vm4821_vm13, 1.0, %v11880_v55  ;;  %v4621_v40 = vpop.xlane.xlu1 %4620  ;;  %vm4822_vm14 = vcmp.eq.s32.totalorder %v11879_v18, %v4580_v27 }
 0xa8d   : > { %5567 = vst.msk [vmem:[%s10501_s17 + $0x78] sm:$0xff] %vm5551_vm11, %v5534_v31  ;;  %v5535_v6 = vor.u32 %v5503_v17, %v10447_v47  ;;  %v5504_v20 = vshll.u32 %v4595_v5, 16  ;;  %v4610_v7 = vadd.s32 %v4609_v33, %v4607_v43  ;;  %6898 = vmatmul.mubr.msk.f32.gmra.mrb[110].mxu1 %vm580_vm0, %v6303_v24  ;;  %v4622_v57 = vcvt.f32.s32 %v4621_v40  ;;  %v11892_v40 = vld [vmem:[#allocation171_spill] sm:$0xff] }
 0xa8e   : > { %v4639_v59 = vshll.u32 %v4638_v2, 16  ;;  %v4668_v0 = vcvt.f32.s32 %v11885_v38  ;;  %v6304_v9 = vsel %vm4822_vm14, 1.0, %v11880_v55  ;;  %v4636_v49 = vpop.xlane.xlu0 %4635  ;;  %vm4823_vm15 = vcmp.eq.s32.totalorder %v11879_v18, %v4595_v5 }
 0xa8f   : > { %5568 = vst.msk [vmem:[%s10501_s17 + $0x80] sm:$0xff] %vm5551_vm11, %v5535_v6  ;;  %v5536_v30 = vor.u32 %v5504_v20, %v11886_v44  ;;  %v5505_v3 = vshll.u32 %v4610_v7, 16  ;;  %v4625_v47 = vadd.s32 %v4624_v29, %v4622_v57  ;;  %6900 = vmatprep.mubr.msk.f32.mxu1 %vm580_vm0, %v6304_v9  ;;  %v4637_v51 = vcvt.f32.s32 %v4636_v49  ;;  %v11893_v9 = vld [vmem:[#allocation172_spill] sm:$0xff] }
 0xa90   : > { %v4654_v56 = vshll.u32 %v4653_v14, 16  ;;  %v4683_v61 = vcvt.f32.s32 %v11887_v50  ;;  %v6305_v12 = vsel %vm4823_vm15, 1.0, %v11880_v55  ;;  %v4651_v48 = vpop.xlane.xlu1 %4650  ;;  %vm4824_vm2 = vcmp.eq.s32.totalorder %v11879_v18, %v4610_v7  ;;  %v11894_v50 = vld [vmem:[#allocation174_spill] sm:$0xff] }
 0xa91   : > { %5569 = vst.msk [vmem:[%s10501_s17 + $0x88] sm:$0xff] %vm5551_vm11, %v5536_v30  ;;  %v5537_v63 = vor.u32 %v5505_v3, %v11888_v22  ;;  %v5506_v45 = vshll.u32 %v4625_v47, 16  ;;  %v4640_v11 = vadd.s32 %v4639_v59, %v4637_v51  ;;  %6901 = vmatmul.mubr.msk.f32.gmra.mrb[112].mxu1 %vm580_vm0, %v6305_v12  ;;  %v4652_v23 = vcvt.f32.s32 %v4651_v48 }
 0xa92   : > { %v4669_v54 = vshll.u32 %v4668_v0, 16  ;;  %v4698_v35 = vcvt.f32.s32 %v11889_v53  ;;  %v6306_v52 = vsel %vm4824_vm2, 1.0, %v11880_v55  ;;  %v4666_v19 = vpop.xlane.xlu0 %4665  ;;  %vm4825_vm3 = vcmp.eq.s32.totalorder %v11879_v18, %v4625_v47 }
 0xa93   : > { %5570 = vst.msk [vmem:[%s10501_s17 + $0x90] sm:$0xff] %vm5551_vm11, %v5537_v63  ;;  %v5538_v60 = vor.u32 %v5506_v45, %v10461_v46  ;;  %v5507_v13 = vshll.u32 %v4640_v11, 16  ;;  %v4655_v32 = vadd.s32 %v4654_v56, %v4652_v23  ;;  %6903 = vmatprep.mubr.msk.f32.mxu1 %vm580_vm0, %v6306_v52  ;;  %v4667_v39 = vcvt.f32.s32 %v4666_v19  ;;  %v11895_v23 = vld [vmem:[#allocation173_spill] sm:$0xff] }
 0xa94   : > { %v4684_v26 = vshll.u32 %v4683_v61, 16  ;;  %v4713_v25 = vcvt.f32.s32 %v11890_v8  ;;  %v6307_v62 = vsel %vm4825_vm3, 1.0, %v11880_v55  ;;  %v4681_v27 = vpop.xlane.xlu1 %4680  ;;  %vm4826_vm4 = vcmp.eq.s32.totalorder %v11879_v18, %v4640_v11 }
 0xa95   : > { %5571 = vst.msk [vmem:[%s10501_s17 + $0x98] sm:$0xff] %vm5551_vm11, %v5538_v60  ;;  %v5539_v58 = vor.u32 %v5507_v13, %v10464_v10  ;;  %v5508_v33 = vshll.u32 %v4655_v32, 16  ;;  %v4670_v46 = vadd.s32 %v4669_v54, %v4667_v39  ;;  %6904 = vmatmul.mubr.msk.f32.gmra.mrb[114].mxu1 %vm580_vm0, %v6307_v62  ;;  %v4682_v2 = vcvt.f32.s32 %v4681_v27 }
 0xa96   : > { %v4699_v34 = vshll.u32 %v4698_v35, 16  ;;  %v4728_v31 = vcvt.f32.s32 %v11891_v41  ;;  %v6308_v17 = vsel %vm4826_vm4, 1.0, %v11880_v55  ;;  %v4696_v5 = vpop.xlane.xlu0 %4695  ;;  %vm4827_vm5 = vcmp.eq.s32.totalorder %v11879_v18, %v4655_v32  ;;  %v11896_v32 = vld [vmem:[#allocation175_spill] sm:$0xff] }
 0xa97   : > { %5572 = vst.msk [vmem:[%s10501_s17 + $0xa0] sm:$0xff] %vm5551_vm11, %v5539_v58  ;;  %v5540_v43 = vor.u32 %v5508_v33, %v10467_v21  ;;  %v5509_v29 = vshll.u32 %v4670_v46, 16  ;;  %v4685_v10 = vadd.s32 %v4684_v26, %v4682_v2  ;;  %6906 = vmatprep.mubr.msk.f32.mxu1 %vm580_vm0, %v6308_v17  ;;  %v4697_v14 = vcvt.f32.s32 %v4696_v5  ;;  %v11897_v58 = vld [vmem:[#allocation163_spill] sm:$0xff]  ;;  %v11898_v5 = vld [vmem:[#allocation164_spill] sm:$0xff] }
 0xa98   : > { %v4714_v24 = vshll.u32 %v4713_v25, 16  ;;  %v4743_v6 = vcvt.f32.s32 %v11892_v40  ;;  %v6309_v20 = vsel %vm4827_vm5, 1.0, %v11880_v55  ;;  %v4711_v7 = vpop.xlane.xlu1 %4710  ;;  %vm4828_vm6 = vcmp.eq.s32.totalorder %v11879_v18, %v4670_v46 }
 0xa99   : > { %5573 = vst.msk [vmem:[%s10501_s17 + $0xa8] sm:$0xff] %vm5551_vm11, %v5540_v43  ;;  %v5541_v57 = vor.u32 %v5509_v29, %v10470_v1  ;;  %v5510_v59 = vshll.u32 %v4685_v10, 16  ;;  %v4700_v21 = vadd.s32 %v4699_v34, %v4697_v14  ;;  %6907 = vmatmul.mubr.msk.f32.gmra.mrb[116].mxu1 %vm580_vm0, %v6309_v20  ;;  %v4712_v38 = vcvt.f32.s32 %v4711_v7  ;;  %v11899_v20 = vld [vmem:[#allocation65_spill] sm:$0xff] }
 0xa9a   : > { %v4729_v0 = vshll.u32 %v4728_v31, 16  ;;  %v4758_v49 = vcvt.f32.s32 %v11893_v9  ;;  %v6310_v44 = vsel %vm4828_vm6, 1.0, %v11880_v55  ;;  %v4726_v30 = vpop.xlane.xlu0 %4725  ;;  %vm4829_vm7 = vcmp.eq.s32.totalorder %v11879_v18, %v4685_v10  ;;  %v11900_v9 = vld [vmem:[#allocation67_spill] sm:$0xff] }
 0xa9b   : > { %5574 = vst.msk [vmem:[%s10501_s17 + $0xb0] sm:$0xff] %vm5551_vm11, %v5541_v57  ;;  %v5542_v3 = vor.u32 %v5510_v59, %v10473_v15  ;;  %v5511_v47 = vshll.u32 %v4700_v21, 16  ;;  %v4715_v1 = vadd.s32 %v4714_v24, %v4712_v38  ;;  %6909 = vmatprep.mubr.msk.f32.mxu1 %vm580_vm0, %v6310_v44  ;;  %v4727_v51 = vcvt.f32.s32 %v4726_v30 }
 0xa9c   : > { %v4744_v56 = vshll.u32 %v4743_v6, 16  ;;  %v4773_v61 = vcvt.f32.s32 %v11894_v50  ;;  %v6311_v12 = vsel %vm4829_vm7, 1.0, %v11880_v55  ;;  %v4741_v48 = vpop.xlane.xlu1 %4740  ;;  %vm4830_vm8 = vcmp.eq.s32.totalorder %v11879_v18, %v4700_v21 }
 0xa9d   : > { %5575 = vst.msk [vmem:[%s10501_s17 + $0xb8] sm:$0xff] %vm5551_vm11, %v5542_v3  ;;  %v5543_v22 = vor.u32 %v5511_v47, %v10476_v4  ;;  %v5512_v63 = vshll.u32 %v4715_v1, 16  ;;  %v4730_v15 = vadd.s32 %v4729_v0, %v4727_v51  ;;  %6910 = vmatmul.mubr.msk.f32.gmra.mrb[118].mxu1 %vm580_vm0, %v6311_v12  ;;  %v4742_v45 = vcvt.f32.s32 %v4741_v48 }
 0xa9e   : > { %v4759_v11 = vshll.u32 %v4758_v49, 16  ;;  %v4788_v54 = vcvt.f32.s32 %v11895_v23  ;;  %v6312_v53 = vsel %vm4830_vm8, 1.0, %v11880_v55  ;;  %v4756_v35 = vpop.xlane.xlu0 %4755  ;;  %vm4831_vm9 = vcmp.eq.s32.totalorder %v11879_v18, %v4715_v1 }
 0xa9f   : > { %5576 = vst.msk [vmem:[%s10501_s17 + $0xc0] sm:$0xff] %vm5551_vm11, %v5543_v22  ;;  %v5544_v52 = vor.u32 %v5512_v63, %v10479_v42  ;;  %v5513_v19 = vshll.u32 %v4730_v15, 16  ;;  %v4745_v4 = vadd.s32 %v4744_v56, %v4742_v45  ;;  %6912 = vmatprep.mubr.msk.f32.mxu1 %vm580_vm0, %v6312_v53  ;;  %v4757_v60 = vcvt.f32.s32 %v4756_v35  ;;  %v11901_v53 = vld [vmem:[#allocation83_spill] sm:$0xff] }
 0xaa0   : > { %v4774_v13 = vshll.u32 %v4773_v61, 16  ;;  %v4803_v39 = vcvt.f32.s32 %v11896_v32  ;;  %v6313_v26 = vsel %vm4831_vm9, 1.0, %v11880_v55  ;;  %v4771_v8 = vpop.xlane.xlu1 %4770  ;;  %vm4832_vm10 = vcmp.eq.s32.totalorder %v11879_v18, %v4730_v15 }
 0xaa1   : > { %5577 = vst.msk [vmem:[%s10501_s17 + $0xc8] sm:$0xff] %vm5551_vm11, %v5544_v52  ;;  %v5545_v25 = vor.u32 %v5513_v19, %v10488_v28  ;;  %v5514_v62 = vshll.u32 %v4745_v4, 16  ;;  %v4760_v42 = vadd.s32 %v4759_v11, %v4757_v60  ;;  %6913 = vmatmul.mubr.msk.f32.gmra.mrb[120].mxu1 %vm580_vm0, %v6313_v26  ;;  %v4772_v27 = vcvt.f32.s32 %v4771_v8  ;;  %v11905_v8 = vld [vmem:[#allocation69_spill] sm:$0xff] }
 0xaa2   : > { %v5453_v33 = vshll.u32 %v11897_v58, 8  ;;  %v4789_v46 = vshll.u32 %v4788_v54, 16  ;;  %v6314_v2 = vsel %vm4832_vm10, 1.0, %v11880_v55  ;;  %v4786_v34 = vpop.xlane.xlu0 %4785  ;;  %vm4833_vm12 = vcmp.eq.s32.totalorder %v11879_v18, %v4745_v4 }
 0xaa3   : > { %5578 = vst.msk [vmem:[%s10501_s17 + $0xd0] sm:$0xff] %vm5551_vm11, %v5545_v25  ;;  %v5546_v41 = vor.u32 %v5514_v62, %v10491_v36  ;;  %v5515_v31 = vshll.u32 %v4760_v42, 16  ;;  %v4775_v28 = vadd.s32 %v4774_v13, %v4772_v27  ;;  %6915 = vmatprep.mubr.msk.f32.mxu1 %vm580_vm0, %v6314_v2  ;;  %v4787_v17 = vcvt.f32.s32 %v4786_v34  ;;  %v11903_v13 = vld [vmem:[#allocation68_spill] sm:$0xff]  ;;  %v11907_v2 = vld [vmem:[#allocation89_spill] sm:$0xff] }
 0xaa4   : > { %v5454_v43 = vshll.u32 %v11898_v5, 8  ;;  %v4804_v29 = vshll.u32 %v4803_v39, 16  ;;  %v6315_v10 = vsel %vm4833_vm12, 1.0, %v11880_v55  ;;  %v4801_v14 = vpop.xlane.xlu1 %4800  ;;  %vm4834_vm13 = vcmp.eq.s32.totalorder %v11879_v18, %v4760_v42  ;;  %v11904_v39 = vld [vmem:[#allocation5_spill] sm:$0xff]  ;;  %v11906_v62 = vld [vmem:[#allocation4_spill] sm:$0xff] }
 0xaa5   : > { %5579 = vst.msk [vmem:[%s10501_s17 + $0xd8] sm:$0xff] %vm5551_vm11, %v5546_v41  ;;  %v5547_v24 = vor.u32 %v5515_v31, %v10524_v16  ;;  %v5516_v40 = vshll.u32 %v4775_v28, 16  ;;  %v4790_v36 = vadd.s32 %v4789_v46, %v4787_v17  ;;  %6916 = vmatmul.mubr.msk.f32.gmra.mrb[122].mxu1 %vm580_vm0, %v6315_v10  ;;  %v4802_v6 = vcvt.f32.s32 %v4801_v14  ;;  %v11908_v17 = vld [vmem:[#allocation90_spill] sm:$0xff] }
 0xaa6   : > { %v5485_v7 = vor.u32 %v5453_v33, %v11899_v20  ;;  %v6316_v57 = vsel %vm4834_vm13, 1.0, %v11880_v55  ;;  %v2295_v59 = vpop.xlane.xlu0 %2294  ;;  %vm4835_vm14 = vcmp.eq.s32.totalorder %v11879_v18, %v4775_v28  ;;  %v5486_v49 = vor.u32 %v5454_v43, %v11900_v9  ;;  %v11909_v10 = vld [vmem:[#allocation70_spill] sm:$0xff] }
 0xaa7   : > { %5580 = vst.msk [vmem:[%s10501_s17 + $0xe0] sm:$0xff] %vm5551_vm11, %v5547_v24  ;;  %v5548_v21 = vor.u32 %v5516_v40, %v10533_v37  ;;  %v5517_v38 = vshll.u32 %v4790_v36, 16  ;;  %v4805_v16 = vadd.s32 %v4804_v29, %v4802_v6  ;;  %6918 = vmatprep.mubr.msk.f32.mxu1 %vm580_vm0, %v6316_v57  ;;  %v2296_v0 = vrot.slane %v2295_v59, 4  ;;  %v11910_v24 = vld [vmem:[#allocation3_spill] sm:$0xff] }
 0xaa8   : > { %v6317_v44 = vsel %vm4835_vm14, 1.0, %v11880_v55  ;;  %v3839_v30 = vpop.xlane.xlu1 %3838  ;;  %vm4836_vm15 = vcmp.eq.s32.totalorder %v11879_v18, %v4790_v36  ;;  %v11911_v6 = vld [vmem:[#allocation71_spill] sm:$0xff]  ;;  %vm5590_vm3 = vcmp.eq.s32.totalorder %v11879_v18, 2 }
 0xaa9   : > { %5581 = vst.msk [vmem:[%s10501_s17 + $0xe8] sm:$0xff] %vm5551_vm11, %v5548_v21  ;;  %v5549_v3 = vor.u32 %v5517_v38, %v5485_v7  ;;  %v5518_v47 = vshll.u32 %v4805_v16, 16  ;;  %v2297_v1 = vadd.f32 %v2296_v0, %v2295_v59  ;;  %6919 = vmatmul.mubr.msk.f32.gmra.mrb[124].mxu1 %vm580_vm0, %v6317_v44  ;;  %v3840_v37 = vrot.slane %v3839_v30, 4  ;;  %v11912_v7 = vld [vmem:[#allocation6_spill] sm:$0xff]  ;;  %v11913_v0 = vld [vmem:[#allocation91_spill] sm:$0xff] }
 0xaaa   : > { %v6318_v51 = vsel %vm4836_vm15, 1.0, %v11880_v55  ;;  %vm4837_vm2 = vcmp.eq.s32.totalorder %v11879_v18, %v4805_v16 }
 0xaab   : > { %5582 = vst.msk [vmem:[%s10501_s17 + $0xf0] sm:$0xff] %vm5551_vm11, %v5549_v3  ;;  %v5550_v56 = vor.u32 %v5518_v47, %v5486_v49  ;;  %v2298_v50 = vrot.slane %v2297_v1, 2  ;;  %v3841_v61 = vadd.f32 %v3840_v37, %v3839_v30  ;;  %6921 = vmatprep.mubr.msk.f32.mxu1 %vm580_vm0, %v6318_v51  ;;  %v6319_v12 = vsel %vm4837_vm2, 1.0, %v11880_v55  ;;  %v11902_v55 = vld [vmem:[#allocation84_spill] sm:$0xff] }
 0xaac   : > { %v11914_v3 = vld [vmem:[#allocation92_spill] sm:$0xff] }
 0xaad   : > { %5583 = vst.msk [vmem:[%s10501_s17 + $0xf8] sm:$0xff] %vm5551_vm11, %v5550_v56  ;;  %v3842_v48 = vrot.slane %v3841_v61, 2  ;;  %6922 = vmatmul.mubr.msk.f32.gmra.mrb[126].mxu1 %vm580_vm0, %v6319_v12  ;;  %v2299_v22 = vadd.f32 %v2298_v50, %v2297_v1  ;;  %v11915_v51 = vld [vmem:[#allocation72_spill] sm:$0xff]  ;;  %v11916_v50 = vld [vmem:[#allocation10_spill] sm:$0xff]  ;;  %vm5587_vm11 = vcmp.eq.s32.totalorder %v11879_v18, 1 }
 0xaaf   : > { %v3843_v63 = vadd.f32 %v3842_v48, %v3841_v61  ;;  %v2300_v15 = vrot.slane %v2299_v22, 1  ;;  %v11917_v48 = vld [vmem:[#allocation73_spill] sm:$0xff] }
 0xab1   : > { %v2301_v45 = vadd.f32 %v2300_v15, %v2299_v22  ;;  %v3844_v11 = vrot.slane %v3843_v63, 1 }
 0xab3   : > { %7008 = vpush %v2301_v45  ;;  %v3845_v23 = vadd.f32 %v3844_v11, %v3843_v63  ;;  %v11918_v63 = vld [vmem:[#allocation7_spill] sm:$0xff] }
 0xab5   : > { %7010 = vpush %v3845_v23 }
 0xae4   : > { %s7009_s14 = spop %7008 }
 0xae6   : > { %s7011_s23 = spop %7010 }
 0xb42   : > { %v6878_v54 = vpop.f32.mrb[96].mxu1 }
 0xb43   : > { %v5224_v35 = vsub.f32 %v6878_v54, %v11901_v53  ;;  %v5392_v52 = vsub.f32 %v11901_v53, %v6878_v54  ;;  %v5064_v19 = vpop.f32.mrb[97].mxu1  ;;  %v11919_v54 = vld [vmem:[#allocation96_spill] sm:$0xff] }
 0xb44   : > { %v5223_v4 = vsub.f32 %v5064_v19, %v11902_v55  ;;  %v5391_v60 = vsub.f32 %v11902_v55, %v5064_v19 }
 0xb45   : > { %v5256_v32 = vmul.f32 %v11903_v13, %v5224_v35  ;;  %v5595_v26 = vsub.f32 %v11904_v39, %v5392_v52 }
 0xb46   : > { %v5255_v25 = vmul.f32 %v11905_v8, %v5223_v4  ;;  %v5594_v42 = vsub.f32 %v11906_v62, %v5391_v60  ;;  %v11920_v4 = vld [vmem:[#allocation97_spill] sm:$0xff] }
 0xb47   : > { %v5288_v27 = vmul.f32 %v5256_v32, %v5256_v32  ;;  %v6881_v58 = vpop.f32.mrb[98].mxu1  ;;  %v11921_v32 = vld [vmem:[#allocation74_spill] sm:$0xff] }
 0xb48   : > { %v5287_v33 = vmul.f32 %v5255_v25, %v5255_v25  ;;  %v5626_v46 = vpack.c.bf16 %v5595_v26, %v5594_v42  ;;  %v5226_v34 = vsub.f32 %v6881_v58, %v11907_v2  ;;  %v5394_v41 = vsub.f32 %v11907_v2, %v6881_v58  ;;  %v5074_v31 = vpop.f32.mrb[99].mxu1  ;;  %v11922_v26 = vld [vmem:[#allocation9_spill] sm:$0xff]  ;;  %v11923_v42 = vld [vmem:[#allocation75_spill] sm:$0xff]  ;;  %v11924_v58 = vld [vmem:[#allocation8_spill] sm:$0xff] }
 0xb49   : > { %v5320_v28 = vsel %vm832_vm1, %v5288_v27, 0.0  ;;  %v5225_v5 = vsub.f32 %v5074_v31, %v11908_v17  ;;  %v5393_v43 = vsub.f32 %v11908_v17, %v5074_v31 }
 0xb4a   : > { %v5319_v29 = vsel %vm832_vm1, %v5287_v33, 0.0  ;;  %v5258_v14 = vmul.f32 %v11909_v10, %v5226_v34  ;;  %v5597_v40 = vsub.f32 %v11910_v24, %v5394_v41  ;;  %6928 = vmatprep.mubr.msk.bf16.mxu0 %vm832_vm1, %v5626_v46  ;;  %v11925_v41 = vld [vmem:[#allocation99_spill] sm:$0xff] }
 0xb4b   : > { %v5321_v36 = vadd.f32 %v5320_v28, %v5319_v29  ;;  %v5257_v20 = vmul.f32 %v11911_v6, %v5225_v5  ;;  %v5596_v57 = vsub.f32 %v11912_v7, %v5393_v43  ;;  %v11926_v29 = vld [vmem:[#allocation100_spill] sm:$0xff]  ;;  %v11928_v6 = vld [vmem:[#allocation14_spill] sm:$0xff] }
 0xb4c   : > { %v5290_v59 = vmul.f32 %v5258_v14, %v5258_v14  ;;  %v6884_v16 = vpop.f32.mrb[100].mxu1 }
 0xb4d   : > { %v5289_v21 = vmul.f32 %v5257_v20, %v5257_v20  ;;  %v5627_v38 = vpack.c.bf16 %v5597_v40, %v5596_v57  ;;  %v5228_v9 = vsub.f32 %v6884_v16, %v11913_v0  ;;  %v5396_v49 = vsub.f32 %v11913_v0, %v6884_v16  ;;  %v5084_v44 = vpop.f32.mrb[101].mxu1  ;;  %v11927_v40 = vld [vmem:[#allocation76_spill] sm:$0xff] }
 0xb4e   : > { %v5227_v47 = vsub.f32 %v5084_v44, %v11914_v3  ;;  %v5395_v1 = vsub.f32 %v11914_v3, %v5084_v44  ;;  %v5324_v12 = vsel %vm832_vm1, %v5290_v59, 0.0  ;;  %v11929_v59 = vld [vmem:[#allocation77_spill] sm:$0xff]  ;;  %v11931_v44 = vld [vmem:[#allocation102_spill] sm:$0xff] }
 0xb4f   : > { %v5322_v30 = vsel %vm832_vm1, %v5289_v21, 0.0  ;;  %6929 = vmatmul.mubr.msk.bf16.vlgmr.msra.gmra.mrb[96].mxu0 %vm832_vm1, %v5627_v38  ;;  %v5260_v56 = vmul.f32 %v11915_v51, %v5228_v9  ;;  %v5599_v61 = vsub.f32 %v11916_v50, %v5396_v49  ;;  %v11930_v38 = vld [vmem:[#allocation11_spill] sm:$0xff] }
 0xb50   : > { %v5323_v37 = vadd.f32 %v5322_v30, %v5321_v36  ;;  %v5259_v22 = vmul.f32 %v11917_v48, %v5227_v47  ;;  %v5598_v15 = vsub.f32 %v11918_v63, %v5395_v1  ;;  %v6887_v45 = vpop.f32.mrb[102].mxu1  ;;  %v11932_v51 = vld [vmem:[#allocation103_spill] sm:$0xff] }
 0xb51   : > { %v5292_v11 = vmul.f32 %v5260_v56, %v5260_v56  ;;  %v5230_v53 = vsub.f32 %v6887_v45, %v11919_v54  ;;  %v5398_v35 = vsub.f32 %v11919_v54, %v6887_v45  ;;  %v5094_v52 = vpop.f32.mrb[103].mxu1  ;;  %v11936_v54 = vld [vmem:[#allocation12_spill] sm:$0xff] }
 0xb52   : > { %v5325_v23 = vadd.f32 %v5324_v12, %v5323_v37  ;;  %v5291_v19 = vmul.f32 %v5259_v22, %v5259_v22  ;;  %v5628_v55 = vpack.c.bf16 %v5599_v61, %v5598_v15  ;;  %v5229_v60 = vsub.f32 %v5094_v52, %v11920_v4  ;;  %v11933_v12 = vld [vmem:[#allocation78_spill] sm:$0xff]  ;;  %v11934_v22 = vld [vmem:[#allocation13_spill] sm:$0xff] }
 0xb53   : > { %v5397_v13 = vsub.f32 %v11920_v4, %v5094_v52  ;;  %v5262_v39 = vmul.f32 %v11921_v32, %v5230_v53  ;;  %v5601_v8 = vsub.f32 %v11922_v26, %v5398_v35  ;;  %v5328_v25 = vsel %vm832_vm1, %v5292_v11, 0.0  ;;  %v11935_v11 = vld [vmem:[#allocation79_spill] sm:$0xff]  ;;  %v11938_v26 = vld [vmem:[#allocation105_spill] sm:$0xff] }
 0xb54   : > { %v5326_v62 = vsel %vm832_vm1, %v5291_v19, 0.0  ;;  %v5261_v27 = vmul.f32 %v11923_v42, %v5229_v60  ;;  %v6890_v46 = vpop.f32.mrb[104].mxu1  ;;  %6932 = vmatprep.mubr.msk.bf16.mxu0 %vm832_vm1, %v5628_v55  ;;  %v11937_v55 = vld [vmem:[#allocation104_spill] sm:$0xff] }
 0xb55   : > { %v5600_v33 = vsub.f32 %v11924_v58, %v5397_v13  ;;  %v5327_v2 = vadd.f32 %v5326_v62, %v5325_v23  ;;  %v5294_v34 = vmul.f32 %v5262_v39, %v5262_v39  ;;  %v5232_v31 = vsub.f32 %v6890_v46, %v11925_v41  ;;  %v5104_v17 = vpop.f32.mrb[105].mxu1  ;;  %v11939_v42 = vld [vmem:[#allocation80_spill] sm:$0xff]  ;;  %v11940_v58 = vld [vmem:[#allocation18_spill] sm:$0xff] }
 0xb56   : > { %v5400_v28 = vsub.f32 %v11925_v41, %v6890_v46  ;;  %v5293_v5 = vmul.f32 %v5261_v27, %v5261_v27  ;;  %v5231_v10 = vsub.f32 %v5104_v17, %v11926_v29  ;;  %v5399_v14 = vsub.f32 %v11926_v29, %v5104_v17  ;;  %v11943_v29 = vld [vmem:[#allocation107_spill] sm:$0xff] }
 0xb57   : > { %v5629_v43 = vpack.c.bf16 %v5601_v8, %v5600_v33  ;;  %v5329_v24 = vadd.f32 %v5328_v25, %v5327_v2  ;;  %v5264_v36 = vmul.f32 %v11927_v40, %v5232_v31  ;;  %v5332_v7 = vsel %vm832_vm1, %v5294_v34, 0.0  ;;  %v11941_v34 = vld [vmem:[#allocation81_spill] sm:$0xff]  ;;  %v11942_v31 = vld [vmem:[#allocation15_spill] sm:$0xff] }
 0xb58   : > { %v5603_v20 = vsub.f32 %v11928_v6, %v5400_v28  ;;  %v5330_v57 = vsel %vm832_vm1, %v5293_v5, 0.0  ;;  %v5263_v21 = vmul.f32 %v11929_v59, %v5231_v10  ;;  %v5602_v16 = vsub.f32 %v11930_v38, %v5399_v14  ;;  %v6893_v0 = vpop.f32.mrb[106].mxu1  ;;  %v11944_v6 = vld [vmem:[#allocation108_spill] sm:$0xff]  ;;  %v11945_v59 = vld [vmem:[#allocation82_spill] sm:$0xff]  ;;  %v11946_v38 = vld [vmem:[#allocation17_spill] sm:$0xff] }
 0xb59   : > { %6933 = vmatmul.mubr.msk.bf16.gmra.mrb[100].mxu0 %vm832_vm1, %v5629_v43  ;;  %v5331_v9 = vadd.f32 %v5330_v57, %v5329_v24  ;;  %v5296_v49 = vmul.f32 %v5264_v36, %v5264_v36  ;;  %v5234_v30 = vsub.f32 %v6893_v0, %v11931_v44  ;;  %v5402_v3 = vsub.f32 %v11931_v44, %v6893_v0  ;;  %v5114_v47 = vpop.f32.mrb[107].mxu1 }
 0xb5a   : > { %v5295_v1 = vmul.f32 %v5263_v21, %v5263_v21  ;;  %v5630_v37 = vpack.c.bf16 %v5603_v20, %v5602_v16  ;;  %v5233_v56 = vsub.f32 %v5114_v47, %v11932_v51  ;;  %v5401_v50 = vsub.f32 %v11932_v51, %v5114_v47  ;;  %v11949_v51 = vld [vmem:[#allocation110_spill] sm:$0xff] }
 0xb5b   : > { %v5333_v61 = vadd.f32 %v5332_v7, %v5331_v9  ;;  %v5266_v48 = vmul.f32 %v11933_v12, %v5234_v30  ;;  %v5605_v63 = vsub.f32 %v11934_v22, %v5402_v3  ;;  %v5336_v15 = vsel %vm832_vm1, %v5296_v49, 0.0  ;;  %v11947_v49 = vld [vmem:[#allocation85_spill] sm:$0xff]  ;;  %v11948_v30 = vld [vmem:[#allocation16_spill] sm:$0xff]  ;;  %v11950_v22 = vld [vmem:[#allocation111_spill] sm:$0xff] }
 0xb5c   : > { %v5334_v45 = vsel %vm832_vm1, %v5295_v1, 0.0  ;;  %v5265_v23 = vmul.f32 %v11935_v11, %v5233_v56  ;;  %v5604_v53 = vsub.f32 %v11936_v54, %v5401_v50  ;;  %v6896_v35 = vpop.f32.mrb[108].mxu1  ;;  %6936 = vmatprep.mubr.msk.bf16.mxu0 %vm832_vm1, %v5630_v37  ;;  %v11951_v11 = vld [vmem:[#allocation86_spill] sm:$0xff] }
 0xb5d   : > { %v5335_v52 = vadd.f32 %v5334_v45, %v5333_v61  ;;  %v5298_v19 = vmul.f32 %v5266_v48, %v5266_v48  ;;  %v5236_v4 = vsub.f32 %v6896_v35, %v11937_v55  ;;  %v5404_v60 = vsub.f32 %v11937_v55, %v6896_v35  ;;  %v5124_v13 = vpop.f32.mrb[109].mxu1  ;;  %v11952_v54 = vld [vmem:[#allocation22_spill] sm:$0xff] }
 0xb5e   : > { %v5297_v32 = vmul.f32 %v5265_v23, %v5265_v23  ;;  %v5631_v39 = vpack.c.bf16 %v5605_v63, %v5604_v53  ;;  %v5235_v8 = vsub.f32 %v5124_v13, %v11938_v26  ;;  %v5403_v25 = vsub.f32 %v11938_v26, %v5124_v13  ;;  %v11955_v26 = vld [vmem:[#allocation113_spill] sm:$0xff] }
 0xb5f   : > { %v5337_v62 = vadd.f32 %v5336_v15, %v5335_v52  ;;  %v5268_v27 = vmul.f32 %v11939_v42, %v5236_v4  ;;  %v5607_v33 = vsub.f32 %v11940_v58, %v5404_v60  ;;  %v5340_v46 = vsel %vm832_vm1, %v5298_v19, 0.0  ;;  %v11953_v19 = vld [vmem:[#allocation87_spill] sm:$0xff]  ;;  %v11956_v58 = vld [vmem:[#allocation114_spill] sm:$0xff] }
 0xb60   : > { %v5338_v2 = vsel %vm832_vm1, %v5297_v32, 0.0  ;;  %v5267_v41 = vmul.f32 %v11941_v34, %v5235_v8  ;;  %v5606_v28 = vsub.f32 %v11942_v31, %v5403_v25  ;;  %v6899_v17 = vpop.f32.mrb[110].mxu1  ;;  %v11954_v4 = vld [vmem:[#allocation19_spill] sm:$0xff]  ;;  %v11957_v34 = vld [vmem:[#allocation88_spill] sm:$0xff]  ;;  %v11958_v31 = vld [vmem:[#allocation21_spill] sm:$0xff] }
 0xb61   : > { %6937 = vmatmul.mubr.msk.bf16.gmra.mrb[104].mxu0 %vm832_vm1, %v5631_v39  ;;  %v5339_v5 = vadd.f32 %v5338_v2, %v5337_v62  ;;  %v5300_v43 = vmul.f32 %v5268_v27, %v5268_v27  ;;  %v5238_v10 = vsub.f32 %v6899_v17, %v11943_v29  ;;  %v5406_v14 = vsub.f32 %v11943_v29, %v6899_v17  ;;  %v5134_v24 = vpop.f32.mrb[111].mxu1 }
 0xb62   : > { %v5299_v40 = vmul.f32 %v5267_v41, %v5267_v41  ;;  %v5632_v36 = vpack.c.bf16 %v5607_v33, %v5606_v28  ;;  %v5237_v20 = vsub.f32 %v5134_v24, %v11944_v6  ;;  %v5405_v7 = vsub.f32 %v11944_v6, %v5134_v24  ;;  %v11961_v6 = vld [vmem:[#allocation115_spill] sm:$0xff] }
 0xb63   : > { %v5341_v57 = vadd.f32 %v5340_v46, %v5339_v5  ;;  %v5270_v21 = vmul.f32 %v11945_v59, %v5238_v10  ;;  %v5609_v16 = vsub.f32 %v11946_v38, %v5406_v14  ;;  %v5344_v0 = vsel %vm832_vm1, %v5300_v43, 0.0  ;;  %v11959_v43 = vld [vmem:[#allocation93_spill] sm:$0xff]  ;;  %v11960_v10 = vld [vmem:[#allocation20_spill] sm:$0xff] }
 0xb64   : > { %v5342_v9 = vsel %vm832_vm1, %v5299_v40, 0.0  ;;  %v5269_v44 = vmul.f32 %v11947_v49, %v5237_v20  ;;  %v5608_v3 = vsub.f32 %v11948_v30, %v5405_v7  ;;  %v6902_v47 = vpop.f32.mrb[112].mxu1  ;;  %6940 = vmatprep.mubr.msk.bf16.mxu0 %vm832_vm1, %v5632_v36  ;;  %v11962_v38 = vld [vmem:[#allocation116_spill] sm:$0xff]  ;;  %v11963_v49 = vld [vmem:[#allocation94_spill] sm:$0xff] }
 0xb65   : > { %v5343_v1 = vadd.f32 %v5342_v9, %v5341_v57  ;;  %v5302_v37 = vmul.f32 %v5270_v21, %v5270_v21  ;;  %v5240_v56 = vsub.f32 %v6902_v47, %v11949_v51  ;;  %v5408_v50 = vsub.f32 %v11949_v51, %v6902_v47  ;;  %v5144_v61 = vpop.f32.mrb[113].mxu1  ;;  %v11964_v30 = vld [vmem:[#allocation26_spill] sm:$0xff] }
 0xb66   : > { %v5301_v12 = vmul.f32 %v5269_v44, %v5269_v44  ;;  %v5633_v48 = vpack.c.bf16 %v5609_v16, %v5608_v3  ;;  %v5239_v63 = vsub.f32 %v5144_v61, %v11950_v22  ;;  %v5407_v15 = vsub.f32 %v11950_v22, %v5144_v61  ;;  %v11967_v22 = vld [vmem:[#allocation118_spill] sm:$0xff] }
 0xb67   : > { %v5345_v45 = vadd.f32 %v5344_v0, %v5343_v1  ;;  %v5272_v23 = vmul.f32 %v11951_v11, %v5240_v56  ;;  %v5611_v53 = vsub.f32 %v11952_v54, %v5408_v50  ;;  %v5348_v35 = vsel %vm832_vm1, %v5302_v37, 0.0  ;;  %v11965_v37 = vld [vmem:[#allocation95_spill] sm:$0xff] }
 0xb68   : > { %v5346_v52 = vsel %vm832_vm1, %v5301_v12, 0.0  ;;  %v5271_v55 = vmul.f32 %v11953_v19, %v5239_v63  ;;  %v5610_v60 = vsub.f32 %v11954_v4, %v5407_v15  ;;  %v6905_v13 = vpop.f32.mrb[114].mxu1  ;;  %v11966_v56 = vld [vmem:[#allocation23_spill] sm:$0xff]  ;;  %v11969_v19 = vld [vmem:[#allocation98_spill] sm:$0xff]  ;;  %v11970_v4 = vld [vmem:[#allocation25_spill] sm:$0xff] }
 0xb69   : > { %6941 = vmatmul.mubr.msk.bf16.gmra.mrb[108].mxu0 %vm832_vm1, %v5633_v48  ;;  %v5347_v32 = vadd.f32 %v5346_v52, %v5345_v45  ;;  %v5304_v39 = vmul.f32 %v5272_v23, %v5272_v23  ;;  %v5242_v8 = vsub.f32 %v6905_v13, %v11955_v26  ;;  %v5410_v25 = vsub.f32 %v11955_v26, %v6905_v13  ;;  %v5154_v62 = vpop.f32.mrb[115].mxu1  ;;  %v11968_v54 = vld [vmem:[#allocation119_spill] sm:$0xff] }
 0xb6a   : > { %v5303_v42 = vmul.f32 %v5271_v55, %v5271_v55  ;;  %v5634_v27 = vpack.c.bf16 %v5611_v53, %v5610_v60  ;;  %v5241_v33 = vsub.f32 %v5154_v62, %v11956_v58  ;;  %v5409_v46 = vsub.f32 %v11956_v58, %v5154_v62  ;;  %v11973_v58 = vld [vmem:[#allocation121_spill] sm:$0xff] }
 0xb6b   : > { %v5349_v2 = vadd.f32 %v5348_v35, %v5347_v32  ;;  %v5274_v41 = vmul.f32 %v11957_v34, %v5242_v8  ;;  %v5613_v28 = vsub.f32 %v11958_v31, %v5410_v25  ;;  %v5352_v17 = vsel %vm832_vm1, %v5304_v39, 0.0  ;;  %v11971_v39 = vld [vmem:[#allocation101_spill] sm:$0xff]  ;;  %v11972_v8 = vld [vmem:[#allocation24_spill] sm:$0xff]  ;;  %v11974_v31 = vld [vmem:[#allocation122_spill] sm:$0xff] }
 0xb6c   : > { %v5350_v5 = vsel %vm832_vm1, %v5303_v42, 0.0  ;;  %v5273_v29 = vmul.f32 %v11959_v43, %v5241_v33  ;;  %v5612_v14 = vsub.f32 %v11960_v10, %v5409_v46  ;;  %v6908_v24 = vpop.f32.mrb[116].mxu1  ;;  %6944 = vmatprep.mubr.msk.bf16.mxu0 %vm832_vm1, %v5634_v27  ;;  %v11975_v43 = vld [vmem:[#allocation106_spill] sm:$0xff] }
 0xb6d   : > { %v5351_v40 = vadd.f32 %v5350_v5, %v5349_v2  ;;  %v5306_v36 = vmul.f32 %v5274_v41, %v5274_v41  ;;  %v5244_v20 = vsub.f32 %v6908_v24, %v11961_v6  ;;  %v5412_v7 = vsub.f32 %v11961_v6, %v6908_v24  ;;  %v5164_v57 = vpop.f32.mrb[117].mxu1  ;;  %v11976_v10 = vld [vmem:[#allocation30_spill] sm:$0xff] }
 0xb6e   : > { %v5305_v59 = vmul.f32 %v5273_v29, %v5273_v29  ;;  %v5635_v21 = vpack.c.bf16 %v5613_v28, %v5612_v14  ;;  %v5243_v16 = vsub.f32 %v5164_v57, %v11962_v38  ;;  %v5411_v0 = vsub.f32 %v11962_v38, %v5164_v57  ;;  %v11979_v38 = vld [vmem:[#allocation123_spill] sm:$0xff] }
 0xb6f   : > { %v5353_v9 = vadd.f32 %v5352_v17, %v5351_v40  ;;  %v5276_v44 = vmul.f32 %v11963_v49, %v5244_v20  ;;  %v5615_v3 = vsub.f32 %v11964_v30, %v5412_v7  ;;  %v5356_v47 = vsel %vm832_vm1, %v5306_v36, 0.0  ;;  %v11977_v36 = vld [vmem:[#allocation109_spill] sm:$0xff]  ;;  %v11978_v20 = vld [vmem:[#allocation27_spill] sm:$0xff]  ;;  %v11980_v30 = vld [vmem:[#allocation124_spill] sm:$0xff] }
 0xb70   : > { %v5354_v1 = vsel %vm832_vm1, %v5305_v59, 0.0  ;;  %v5275_v51 = vmul.f32 %v11965_v37, %v5243_v16  ;;  %v5614_v50 = vsub.f32 %v11966_v56, %v5411_v0  ;;  %v6911_v61 = vpop.f32.mrb[118].mxu1  ;;  %v11981_v37 = vld [vmem:[#allocation112_spill] sm:$0xff]  ;;  %v11982_v56 = vld [vmem:[#allocation29_spill] sm:$0xff] }
 0xb71   : > { %6945 = vmatmul.mubr.msk.bf16.gmra.mrb[112].mxu0 %vm832_vm1, %v5635_v21  ;;  %v5355_v12 = vadd.f32 %v5354_v1, %v5353_v9  ;;  %v5308_v48 = vmul.f32 %v5276_v44, %v5276_v44  ;;  %v5246_v63 = vsub.f32 %v6911_v61, %v11967_v22  ;;  %v5414_v15 = vsub.f32 %v11967_v22, %v6911_v61  ;;  %v5174_v45 = vpop.f32.mrb[119].mxu1 }
 0xb72   : > { %v5307_v11 = vmul.f32 %v5275_v51, %v5275_v51  ;;  %v5636_v23 = vpack.c.bf16 %v5615_v3, %v5614_v50  ;;  %v5245_v53 = vsub.f32 %v5174_v45, %v11968_v54  ;;  %v5413_v35 = vsub.f32 %v11968_v54, %v5174_v45  ;;  %v11985_v54 = vld [vmem:[#allocation126_spill] sm:$0xff] }
 0xb73   : > { %v5357_v52 = vadd.f32 %v5356_v47, %v5355_v12  ;;  %v5278_v55 = vmul.f32 %v11969_v19, %v5246_v63  ;;  %v5617_v60 = vsub.f32 %v11970_v4, %v5414_v15  ;;  %v5360_v13 = vsel %vm832_vm1, %v5308_v48, 0.0  ;;  %v11983_v48 = vld [vmem:[#allocation117_spill] sm:$0xff]  ;;  %v11984_v63 = vld [vmem:[#allocation28_spill] sm:$0xff]  ;;  %v11986_v4 = vld [vmem:[#allocation127_spill] sm:$0xff] }
 0xb74   : > { %v5358_v32 = vsel %vm832_vm1, %v5307_v11, 0.0  ;;  %v5277_v26 = vmul.f32 %v11971_v39, %v5245_v53  ;;  %v5616_v25 = vsub.f32 %v11972_v8, %v5413_v35  ;;  %v6914_v62 = vpop.f32.mrb[120].mxu1  ;;  %6948 = vmatprep.mubr.msk.bf16.mxu0 %vm832_vm1, %v5636_v23  ;;  %v11987_v39 = vld [vmem:[#allocation120_spill] sm:$0xff]  ;;  %v11988_v8 = vld [vmem:[#allocation34_spill] sm:$0xff] }
 0xb75   : > { %v5359_v42 = vadd.f32 %v5358_v32, %v5357_v52  ;;  %v5310_v27 = vmul.f32 %v5278_v55, %v5278_v55  ;;  %v5248_v33 = vsub.f32 %v6914_v62, %v11973_v58  ;;  %v5416_v46 = vsub.f32 %v11973_v58, %v6914_v62  ;;  %v5184_v2 = vpop.f32.mrb[121].mxu1 }
 0xb76   : > { %v5309_v34 = vmul.f32 %v5277_v26, %v5277_v26  ;;  %v5637_v41 = vpack.c.bf16 %v5617_v60, %v5616_v25  ;;  %v5247_v28 = vsub.f32 %v5184_v2, %v11974_v31  ;;  %v5415_v17 = vsub.f32 %v11974_v31, %v5184_v2  ;;  %v11991_v31 = vld [vmem:[#allocation130_spill] sm:$0xff] }
 0xb77   : > { %v5361_v5 = vadd.f32 %v5360_v13, %v5359_v42  ;;  %v5280_v29 = vmul.f32 %v11975_v43, %v5248_v33  ;;  %v5619_v14 = vsub.f32 %v11976_v10, %v5416_v46  ;;  %v5364_v24 = vsel %vm832_vm1, %v5310_v27, 0.0  ;;  %v11989_v27 = vld [vmem:[#allocation125_spill] sm:$0xff]  ;;  %v11990_v33 = vld [vmem:[#allocation31_spill] sm:$0xff] }
 0xb78   : > { %v5362_v40 = vsel %vm832_vm1, %v5309_v34, 0.0  ;;  %v5279_v6 = vmul.f32 %v11977_v36, %v5247_v28  ;;  %v5618_v7 = vsub.f32 %v11978_v20, %v5415_v17  ;;  %v6917_v57 = vpop.f32.mrb[122].mxu1  ;;  %v11992_v10 = vld [vmem:[#allocation131_spill] sm:$0xff]  ;;  %v11993_v36 = vld [vmem:[#allocation128_spill] sm:$0xff]  ;;  %v11994_v20 = vld [vmem:[#allocation33_spill] sm:$0xff] }
 0xb79   : > { %6949 = vmatmul.mubr.msk.bf16.gmra.mrb[116].mxu0 %vm832_vm1, %v5637_v41  ;;  %v5363_v59 = vadd.f32 %v5362_v40, %v5361_v5  ;;  %v5312_v21 = vmul.f32 %v5280_v29, %v5280_v29  ;;  %v5250_v16 = vsub.f32 %v6917_v57, %v11979_v38  ;;  %v5418_v0 = vsub.f32 %v11979_v38, %v6917_v57  ;;  %v5194_v9 = vpop.f32.mrb[123].mxu1  ;;  %v11996_v38 = vld [vmem:[#allocation32_spill] sm:$0xff] }
 0xb7a   : > { %v5311_v49 = vmul.f32 %v5279_v6, %v5279_v6  ;;  %v5638_v44 = vpack.c.bf16 %v5619_v14, %v5618_v7  ;;  %v5249_v3 = vsub.f32 %v5194_v9, %v11980_v30  ;;  %v5417_v47 = vsub.f32 %v11980_v30, %v5194_v9 }
 0xb7b   : > { %v5365_v1 = vadd.f32 %v5364_v24, %v5363_v59  ;;  %v5282_v51 = vmul.f32 %v11981_v37, %v5250_v16  ;;  %v5621_v50 = vsub.f32 %v11982_v56, %v5418_v0  ;;  %v5368_v61 = vsel %vm832_vm1, %v5312_v21, 0.0  ;;  %v11995_v59 = vld [vmem:[#allocation129_spill] sm:$0xff] }
 0xb7c   : > { %v5366_v12 = vsel %vm832_vm1, %v5311_v49, 0.0  ;;  %v5281_v22 = vmul.f32 %v11983_v48, %v5249_v3  ;;  %v5620_v15 = vsub.f32 %v11984_v63, %v5417_v47  ;;  %v6920_v45 = vpop.f32.mrb[124].mxu1  ;;  %6952 = vmatprep.mubr.msk.bf16.mxu0 %vm832_vm1, %v5638_v44 }
 0xb7d   : > { %v5367_v11 = vadd.f32 %v5366_v12, %v5365_v1  ;;  %v5314_v23 = vmul.f32 %v5282_v51, %v5282_v51  ;;  %v5252_v53 = vsub.f32 %v6920_v45, %v11985_v54  ;;  %v5420_v35 = vsub.f32 %v11985_v54, %v6920_v45  ;;  %v5204_v52 = vpop.f32.mrb[125].mxu1 }
 0xb7e   : > { %v5313_v19 = vmul.f32 %v5281_v22, %v5281_v22  ;;  %v5639_v55 = vpack.c.bf16 %v5621_v50, %v5620_v15  ;;  %v5251_v60 = vsub.f32 %v5204_v52, %v11986_v4  ;;  %v5419_v13 = vsub.f32 %v11986_v4, %v5204_v52  ;;  %v11997_v50 = vld [vmem:[#allocation2_spill] sm:$0xff] }
 0xb7f   : > { %v5369_v32 = vadd.f32 %v5368_v61, %v5367_v11  ;;  %v5284_v26 = vmul.f32 %v11987_v39, %v5252_v53  ;;  %v5623_v25 = vsub.f32 %v11988_v8, %v5420_v35  ;;  %v5372_v62 = vsel %vm832_vm1, %v5314_v23, 0.0  ;;  %v7037_v22 = vld [vmem:[%s11030_s5] sm:$0xff] }
 0xb80   : > { %v5370_v42 = vsel %vm832_vm1, %v5313_v19, 0.0  ;;  %v5283_v58 = vmul.f32 %v11989_v27, %v5251_v60  ;;  %v5622_v46 = vsub.f32 %v11990_v33, %v5419_v13  ;;  %v6923_v2 = vpop.f32.mrb[126].mxu1  ;;  %v5648_v61 = vsub.s32 1, %v11997_v50 }
 0xb81   : > { %6953 = vmatmul.mubr.msk.bf16.gmra.mrb[120].mxu0 %vm832_vm1, %v5639_v55  ;;  %v5371_v34 = vadd.f32 %v5370_v42, %v5369_v32  ;;  %v5316_v41 = vmul.f32 %v5284_v26, %v5284_v26  ;;  %v5254_v28 = vsub.f32 %v6923_v2, %v11991_v31  ;;  %v5422_v17 = vsub.f32 %v11991_v31, %v6923_v2  ;;  %v5214_v5 = vpop.f32.mrb[127].mxu1 }
 0xb82   : > { %v5315_v43 = vmul.f32 %v5283_v58, %v5283_v58  ;;  %v5640_v29 = vpack.c.bf16 %v5623_v25, %v5622_v46  ;;  %v5253_v14 = vsub.f32 %v5214_v5, %v11992_v10  ;;  %v5421_v24 = vsub.f32 %v11992_v10, %v5214_v5 }
 0xb83   : > { %v5373_v40 = vadd.f32 %v5372_v62, %v5371_v34  ;;  %v5286_v6 = vmul.f32 %v11993_v36, %v5254_v28  ;;  %v5625_v7 = vsub.f32 %v11994_v20, %v5422_v17  ;;  %v5376_v9 = vsel %vm832_vm1, %v5316_v41, 0.0 }
 0xb84   : > { %v5374_v57 = vsel %vm832_vm1, %v5315_v43, 0.0  ;;  %v5285_v21 = vmul.f32 %v11995_v59, %v5253_v14  ;;  %v5624_v16 = vsub.f32 %v11996_v38, %v5421_v24  ;;  %6956 = vmatprep.mubr.msk.bf16.mxu0 %vm832_vm1, %v5640_v29  ;;  %v10910_v63 = vrot.slane %v7037_v22, %v5648_v61 }
 0xb85   : > { %v5375_v0 = vadd.f32 %v5374_v57, %v5373_v40  ;;  %v5318_v49 = vmul.f32 %v5286_v6, %v5286_v6 }
 0xb86   : > { %v5317_v44 = vmul.f32 %v5285_v21, %v5285_v21  ;;  %v5641_v30 = vpack.c.bf16 %v5625_v7, %v5624_v16 }
 0xb87   : > { %v5377_v3 = vadd.f32 %v5376_v9, %v5375_v0  ;;  %v5380_v37 = vsel %vm832_vm1, %v5318_v49, 0.0 }
 0xb88   : > { %v5378_v47 = vsel %vm832_vm1, %v5317_v44, 0.0 }
 0xb89   : > { %6957 = vmatmul.mubr.msk.bf16.gmra.mrb[124].mxu0 %vm832_vm1, %v5641_v30  ;;  %v5379_v1 = vadd.f32 %v5378_v47, %v5377_v3  ;;  %vm5584_vm1 = vcmp.eq.s32.totalorder %v11879_v18, 0  ;;  %v5585_v47 = vstv %s7009_s14 }
 0xb8a   : > { %v5586_v61 = vsel %vm5584_vm1, %v5585_v47, 0.0 }
 0xb8b   : > { %v5381_v51 = vadd.f32 %v5380_v37, %v5379_v1 }
 0xb8d   : > { %5382 = vadd.xlane.f32.xlu0 %v5381_v51 }
 0xc1a   : > { %v5383_v56 = vpop.xlane.xlu0 %5382 }
 0xc1b   : > { %v5384_v12 = vrot.slane %v5383_v56, 4 }
 0xc1d   : > { %v5385_v48 = vadd.f32 %v5384_v12, %v5383_v56  ;;  %v5588_v12 = vstv %s7011_s23 }
 0xc1f   : > { %v5386_v15 = vrot.slane %v5385_v48, 2 }
 0xc21   : > { %v5387_v45 = vadd.f32 %v5386_v15, %v5385_v48 }
 0xc22   : > { %v6930_v11 = vpop.f32.mrb[96].mxu0 }
 0xc23   : > { %v5753_v23 = vadd.f32 %v6930_v11, %v10910_v63  ;;  %v5744_v54 = vpop.f32.mrb[97].mxu0  ;;  %v5388_v52 = vrot.slane %v5387_v45, 1 }
 0xc24   : > { %v5745_v53 = vadd.f32 %v5744_v54, %v10910_v63  ;;  %v6931_v35 = vpop.f32.mrb[98].mxu0 }
 0xc25   : > { %5873 = vst.msk [vmem:[%s10916_s22 + $0x10] sm:$0xff] %vm580_vm0, %v5753_v23  ;;  %v5756_v19 = vadd.f32 %v6931_v35, %v10910_v63  ;;  %v5747_v55 = vpop.f32.mrb[99].mxu0  ;;  %v5389_v60 = vadd.f32 %v5388_v52, %v5387_v45  ;;  %v5589_v45 = vsel %vm5587_vm11, %v5588_v12, %v5586_v61 }
 0xc26   : > { %5871 = vst.msk [vmem:[%s10916_s22] sm:$0xff] %vm580_vm0, %v5745_v53  ;;  %v5748_v4 = vadd.f32 %v5747_v55, %v10910_v63 }
 0xc27   : > { %5874 = vst.msk [vmem:[%s10916_s22 + $0x18] sm:$0xff] %vm580_vm0, %v5756_v19 }
 0xc28   : > { %5872 = vst.msk [vmem:[%s10916_s22 + $0x8] sm:$0xff] %vm580_vm0, %v5748_v4 }
 0xc29   : > { %7012 = vpush %v5389_v60 }
 0xc2c   : > { %v6934_v13 = vpop.f32.mrb[100].mxu0 }
 0xc2d   : > { %v5769_v32 = vadd.f32 %v6934_v13, %v10910_v63  ;;  %v5760_v39 = vpop.f32.mrb[101].mxu0 }
 0xc2e   : > { %v5761_v26 = vadd.f32 %v5760_v39, %v10910_v63  ;;  %v6935_v8 = vpop.f32.mrb[102].mxu0 }
 0xc2f   : > { %5877 = vst.msk [vmem:[%s10916_s22 + $0x30] sm:$0xff] %vm580_vm0, %v5769_v32  ;;  %v5772_v25 = vadd.f32 %v6935_v8, %v10910_v63  ;;  %v5763_v62 = vpop.f32.mrb[103].mxu0 }
 0xc30   : > { %5875 = vst.msk [vmem:[%s10916_s22 + $0x20] sm:$0xff] %vm580_vm0, %v5761_v26  ;;  %v5764_v42 = vadd.f32 %v5763_v62, %v10910_v63 }
 0xc31   : > { %5878 = vst.msk [vmem:[%s10916_s22 + $0x38] sm:$0xff] %vm580_vm0, %v5772_v25 }
 0xc32   : > { %5876 = vst.msk [vmem:[%s10916_s22 + $0x28] sm:$0xff] %vm580_vm0, %v5764_v42 }
 0xc34   : > { %v6938_v27 = vpop.f32.mrb[104].mxu0 }
 0xc35   : > { %v5785_v58 = vadd.f32 %v6938_v27, %v10910_v63  ;;  %v5776_v33 = vpop.f32.mrb[105].mxu0 }
 0xc36   : > { %v5777_v46 = vadd.f32 %v5776_v33, %v10910_v63  ;;  %v6939_v2 = vpop.f32.mrb[106].mxu0 }
 0xc37   : > { %5881 = vst.msk [vmem:[%s10916_s22 + $0x50] sm:$0xff] %vm580_vm0, %v5785_v58  ;;  %v5788_v34 = vadd.f32 %v6939_v2, %v10910_v63  ;;  %v5779_v41 = vpop.f32.mrb[107].mxu0 }
 0xc38   : > { %5879 = vst.msk [vmem:[%s10916_s22 + $0x40] sm:$0xff] %vm580_vm0, %v5777_v46  ;;  %v5780_v31 = vadd.f32 %v5779_v41, %v10910_v63 }
 0xc39   : > { %5882 = vst.msk [vmem:[%s10916_s22 + $0x58] sm:$0xff] %vm580_vm0, %v5788_v34 }
 0xc3a   : > { %5880 = vst.msk [vmem:[%s10916_s22 + $0x48] sm:$0xff] %vm580_vm0, %v5780_v31 }
 0xc3c   : > { %v6942_v28 = vpop.f32.mrb[108].mxu0 }
 0xc3d   : > { %v5801_v17 = vadd.f32 %v6942_v28, %v10910_v63  ;;  %v5792_v5 = vpop.f32.mrb[109].mxu0 }
 0xc3e   : > { %v5793_v43 = vadd.f32 %v5792_v5, %v10910_v63  ;;  %v6943_v29 = vpop.f32.mrb[110].mxu0 }
 0xc3f   : > { %5885 = vst.msk [vmem:[%s10916_s22 + $0x70] sm:$0xff] %vm580_vm0, %v5801_v17  ;;  %v5804_v10 = vadd.f32 %v6943_v29, %v10910_v63  ;;  %v5795_v14 = vpop.f32.mrb[111].mxu0 }
 0xc40   : > { %5883 = vst.msk [vmem:[%s10916_s22 + $0x60] sm:$0xff] %vm580_vm0, %v5793_v43  ;;  %v5796_v24 = vadd.f32 %v5795_v14, %v10910_v63 }
 0xc41   : > { %5886 = vst.msk [vmem:[%s10916_s22 + $0x78] sm:$0xff] %vm580_vm0, %v5804_v10 }
 0xc42   : > { %5884 = vst.msk [vmem:[%s10916_s22 + $0x68] sm:$0xff] %vm580_vm0, %v5796_v24 }
 0xc44   : > { %v6946_v40 = vpop.f32.mrb[112].mxu0 }
 0xc45   : > { %v5817_v36 = vadd.f32 %v6946_v40, %v10910_v63  ;;  %v5808_v6 = vpop.f32.mrb[113].mxu0 }
 0xc46   : > { %v5809_v20 = vadd.f32 %v5808_v6, %v10910_v63  ;;  %v6947_v7 = vpop.f32.mrb[114].mxu0 }
 0xc47   : > { %5889 = vst.msk [vmem:[%s10916_s22 + $0x90] sm:$0xff] %vm580_vm0, %v5817_v36  ;;  %v5820_v57 = vadd.f32 %v6947_v7, %v10910_v63  ;;  %v5811_v59 = vpop.f32.mrb[115].mxu0 }
 0xc48   : > { %5887 = vst.msk [vmem:[%s10916_s22 + $0x80] sm:$0xff] %vm580_vm0, %v5809_v20  ;;  %v5812_v21 = vadd.f32 %v5811_v59, %v10910_v63 }
 0xc49   : > { %5890 = vst.msk [vmem:[%s10916_s22 + $0x98] sm:$0xff] %vm580_vm0, %v5820_v57 }
 0xc4a   : > { %5888 = vst.msk [vmem:[%s10916_s22 + $0x88] sm:$0xff] %vm580_vm0, %v5812_v21 }
 0xc4c   : > { %v6950_v38 = vpop.f32.mrb[116].mxu0 }
 0xc4d   : > { %v5833_v16 = vadd.f32 %v6950_v38, %v10910_v63  ;;  %v5824_v0 = vpop.f32.mrb[117].mxu0 }
 0xc4e   : > { %v5825_v9 = vadd.f32 %v5824_v0, %v10910_v63  ;;  %v6951_v49 = vpop.f32.mrb[118].mxu0 }
 0xc4f   : > { %5893 = vst.msk [vmem:[%s10916_s22 + $0xb0] sm:$0xff] %vm580_vm0, %v5833_v16  ;;  %v5836_v44 = vadd.f32 %v6951_v49, %v10910_v63  ;;  %v5827_v30 = vpop.f32.mrb[119].mxu0 }
 0xc50   : > { %5891 = vst.msk [vmem:[%s10916_s22 + $0xa0] sm:$0xff] %vm580_vm0, %v5825_v9  ;;  %v5828_v3 = vadd.f32 %v5827_v30, %v10910_v63 }
 0xc51   : > { %5894 = vst.msk [vmem:[%s10916_s22 + $0xb8] sm:$0xff] %vm580_vm0, %v5836_v44 }
 0xc52   : > { %5892 = vst.msk [vmem:[%s10916_s22 + $0xa8] sm:$0xff] %vm580_vm0, %v5828_v3 }
 0xc54   : > { %v6954_v1 = vpop.f32.mrb[120].mxu0 }
 0xc55   : > { %v5849_v37 = vadd.f32 %v6954_v1, %v10910_v63  ;;  %v5840_v51 = vpop.f32.mrb[121].mxu0 }
 0xc56   : > { %v5841_v56 = vadd.f32 %v5840_v51, %v10910_v63  ;;  %v6955_v50 = vpop.f32.mrb[122].mxu0 }
 0xc57   : > { %5897 = vst.msk [vmem:[%s10916_s22 + $0xd0] sm:$0xff] %vm580_vm0, %v5849_v37  ;;  %v5852_v48 = vadd.f32 %v6955_v50, %v10910_v63  ;;  %v5843_v22 = vpop.f32.mrb[123].mxu0 }
 0xc58   : > { %5895 = vst.msk [vmem:[%s10916_s22 + $0xc0] sm:$0xff] %vm580_vm0, %v5841_v56  ;;  %v5844_v15 = vadd.f32 %v5843_v22, %v10910_v63 }
 0xc59   : > { %5898 = vst.msk [vmem:[%s10916_s22 + $0xd8] sm:$0xff] %vm580_vm0, %v5852_v48 }
 0xc5a   : > { %s7013_s29 = spop %7012  ;;  %5896 = vst.msk [vmem:[%s10916_s22 + $0xc8] sm:$0xff] %vm580_vm0, %v5844_v15 }
 0xc5b   : > { %v5591_v11 = vstv %s7013_s29 }
 0xc5c   : > { %v5592_v23 = vsel %vm5590_vm3, %v5591_v11, %v5589_v45  ;;  %v6958_v54 = vpop.f32.mrb[124].mxu0 }
 0xc5d   : > { %5593 = vst [vmem:[%s330_s26] sm:$0x1] %v5592_v23  ;;  %v5865_v53 = vadd.f32 %v6958_v54, %v10910_v63  ;;  %v5856_v18 = vpop.f32.mrb[125].mxu0 }
 0xc5e   : > { %v5857_v35 = vadd.f32 %v5856_v18, %v10910_v63  ;;  %v6959_v52 = vpop.f32.mrb[126].mxu0 }
 0xc5f   : > { %5901 = vst.msk [vmem:[%s10916_s22 + $0xf0] sm:$0xff] %vm580_vm0, %v5865_v53  ;;  %v5868_v19 = vadd.f32 %v6959_v52, %v10910_v63  ;;  %v5859_v55 = vpop.f32.mrb[127].mxu0 }
 0xc60   : > { %5899 = vst.msk [vmem:[%s10916_s22 + $0xe0] sm:$0xff] %vm580_vm0, %v5857_v35  ;;  %v5860_v4 = vadd.f32 %v5859_v55, %v10910_v63 }
 0xc61   : > { %5902 = vst.msk [vmem:[%s10916_s22 + $0xf8] sm:$0xff] %vm580_vm0, %v5868_v19 }
 0xc62   : > { %5900 = vst.msk [vmem:[%s10916_s22 + $0xe8] sm:$0xff] %vm580_vm0, %v5860_v4 }
 0xc63 PF: > { %s19_s27 = sadd.s32 1, %s7044_s27  }
 0xc64   : > { %p16_p5 = scmp.ge.s32.totalorder %s19_s27, 5  }
 0xc66   :  { %18 = sbr.rel (!%p16_p5) target bundleno = 1 (0x1), region = 102 }

</bundles_post_ra>
